<compile_context>
chip_gen: v5e
topology: v5e:2x2
jax: 0.10.0
libtpu: 0.0.40
codegen_flags: <defaults>
</compile_context>

<pallas_src>
import functools

import numpy as np
import jax
import jax.numpy as jnp
from jax.experimental import pallas as pl
from jax.experimental.pallas import tpu as pltpu

IN_DIM = 3
ENC_DIMS = (64, 64, 128, 1024)   # encoder layer output widths
HEAD_DIMS = (512, 256)           # hidden widths of the regression/classifier head
BN_EPS = 1e-5

_VMEM_SPEC = pl.BlockSpec(memory_space=pltpu.MemorySpace.VMEM)


# ---------------------------------------------------------------------------
# Host-side helpers (tile selection, VMEM sizing, BN affine fold)
# ---------------------------------------------------------------------------
def _divisors(n):
    out = set()
    d = 1
    while d * d <= n:
        if n % d == 0:
            out.add(d)
            out.add(n // d)
        d += 1
    return sorted(out)


def _choose_row_tile(total_rows, target=8192):
    """Largest row tile dividing total_rows, (8,128)-legal, preferring >=2 grid steps."""
    cands = [d for d in _divisors(total_rows) if d % 8 == 0 or d == total_rows]
    pref = [d for d in cands if d <= target and total_rows // d >= 2]
    if pref:
        return max(pref)
    small = [d for d in cands if d <= target]
    if small:
        return max(small)
    return min(cands)


def _choose_cloud_tile(B, N, target_rows=2048):
    """Clouds per layer-4 row tile (rows = TB*N); small so VMEM stays bounded."""
    cands = [tb for tb in range(1, B + 1)
             if B % tb == 0 and ((tb * N) % 8 == 0 or tb == B)]
    pref = [tb for tb in cands if tb * N <= target_rows and B // tb >= 2]
    if pref:
        return max(pref)
    small = [tb for tb in cands if tb * N <= target_rows]
    if small:
        return max(small)
    return min(cands)


def _vmem_cap():
    try:
        cap = int(pltpu.get_tpu_info().vmem_capacity_bytes)
    except Exception:
        cap = 64 << 20          # conservative fallback (v7x physical VMEM)
    return max(16 << 20, (cap * 3) // 4)


def _nbytes(shape, dtype):
    n = 1
    for d in shape:
        n *= int(d)
    return n * np.dtype(dtype).itemsize


def _vmem_limit(blocks, temps=()):
    """blocks: double-buffered pipeline blocks; temps: in-kernel f32 temporaries."""
    need = 2 * sum(_nbytes(s, d) for s, d in blocks)
    need += sum(_nbytes(s, d) for s, d in temps)
    need += 4 << 20
    return int(max(16 << 20, min(need, _vmem_cap())))


def _bn_affine(ssum, ssq, gamma, beta, count):
    """Fold batch-stat BN into a per-channel affine: y = h*scale + shift."""
    s = jnp.sum(ssum[:, 0, :], axis=0)
    sq = jnp.sum(ssq[:, 0, :], axis=0)
    mean = s / count
    var = jnp.maximum(sq / count - mean * mean, 0.0)     # biased variance
    scale = gamma.reshape(-1) * jax.lax.rsqrt(var + BN_EPS)
    shift = beta.reshape(-1) - mean * scale
    return scale.reshape(1, -1), shift.reshape(1, -1)


# ---------------------------------------------------------------------------
# Kernels
# ---------------------------------------------------------------------------
def _first_kernel(x_ref, w_ref, b_ref, h_ref, ssum_ref, ssq_ref):
    """Linear(K=8 padded -> 64) via one MXU dot; emits BN column sum / sumsq."""
    acc = jnp.dot(x_ref[...], w_ref[...],
                  preferred_element_type=jnp.float32) + b_ref[...]
    ssum_ref[0] = jnp.sum(acc, axis=0, keepdims=True)
    ssq_ref[0] = jnp.sum(acc * acc, axis=0, keepdims=True)
    h_ref[...] = acc.astype(h_ref.dtype)


def _mid_kernel(h_ref, scale_ref, shift_ref, w_ref, b_ref,
                out_ref, ssum_ref, ssq_ref):
    """relu(BN_prev(h)) @ W + b, plus column sum/sumsq for this layer's BN."""
    h = h_ref[...].astype(jnp.float32)
    a = jnp.maximum(h * scale_ref[...] + shift_ref[...], 0.0)
    acc = jnp.dot(a.astype(jnp.bfloat16), w_ref[...],
                  preferred_element_type=jnp.float32) + b_ref[...]
    ssum_ref[0] = jnp.sum(acc, axis=0, keepdims=True)
    ssq_ref[0] = jnp.sum(acc * acc, axis=0, keepdims=True)
    out_ref[...] = acc.astype(out_ref.dtype)


def _make_final_kernel(TB, N, with_enc):
    """relu(BN_prev(h)) @ W4_strip + b4_strip, per-cloud max pool over the strip."""
    def kernel(h_ref, scale_ref, shift_ref, w_ref, b_ref, *out_refs):
        h = h_ref[...].astype(jnp.float32)
        a = jnp.maximum(h * scale_ref[...] + shift_ref[...], 0.0)
        acc = jnp.dot(a.astype(jnp.bfloat16), w_ref[...],
                      preferred_element_type=jnp.float32) + b_ref[...]
        if with_enc:
            enc_ref, gmax_ref = out_refs
            enc_ref[...] = acc.astype(enc_ref.dtype)        # bf16 store
        else:
            (gmax_ref,) = out_refs
        gmax_ref[0] = jnp.max(acc.reshape(TB, N, acc.shape[-1]), axis=1)
    return kernel


def _head_kernel(g_ref, w1, b1, w2, b2, w3, b3, out_ref):
    """Linear+ReLU, Linear+ReLU, Linear (final layer padded to 128 lanes)."""
    r = jnp.dot(g_ref[...].astype(jnp.bfloat16), w1[...],
                preferred_element_type=jnp.float32) + b1[...]
    r = jnp.maximum(r, 0.0)
    r = jnp.dot(r.astype(jnp.bfloat16), w2[...],
                preferred_element_type=jnp.float32) + b2[...]
    r = jnp.maximum(r, 0.0)
    out_ref[...] = jnp.dot(r.astype(jnp.bfloat16), w3[...],
                           preferred_element_type=jnp.float32) + b3[...]


# ---------------------------------------------------------------------------
# Pallas-call wrappers
# ---------------------------------------------------------------------------
def _first_stage(xp, w1p, b1, R, cout):
    total, kp = xp.shape
    G = total // R
    limit = _vmem_limit(
        blocks=[((R, kp), jnp.float32), ((kp, cout), jnp.float32),
                ((1, cout), jnp.float32), ((R, cout), jnp.bfloat16),
                ((1, 1, cout), jnp.float32), ((1, 1, cout), jnp.float32)],
        temps=[((R, cout), jnp.float32)])
    return pl.pallas_call(
        _first_kernel,
        grid=(G,),
        out_shape=(jax.ShapeDtypeStruct((total, cout), jnp.bfloat16),
                   jax.ShapeDtypeStruct((G, 1, cout), jnp.float32),
                   jax.ShapeDtypeStruct((G, 1, cout), jnp.float32)),
        in_specs=[
            pl.BlockSpec((R, kp), lambda i: (i, 0)),
            pl.BlockSpec((kp, cout), lambda i: (0, 0)),
            pl.BlockSpec((1, cout), lambda i: (0, 0)),
        ],
        out_specs=(
            pl.BlockSpec((R, cout), lambda i: (i, 0)),
            pl.BlockSpec((1, 1, cout), lambda i: (i, 0, 0)),
            pl.BlockSpec((1, 1, cout), lambda i: (i, 0, 0)),
        ),
        compiler_params=pltpu.CompilerParams(
            dimension_semantics=("parallel",), vmem_limit_bytes=limit),
    )(xp, w1p, b1)


def _linear_bn_stage(h, scale, shift, w, b, R, cin, cout):
    total = h.shape[0]
    G = total // R
    limit = _vmem_limit(
        blocks=[((R, cin), jnp.bfloat16), ((1, cin), jnp.float32),
                ((1, cin), jnp.float32), ((cin, cout), jnp.bfloat16),
                ((1, cout), jnp.float32), ((R, cout), jnp.bfloat16),
                ((1, 1, cout), jnp.float32), ((1, 1, cout), jnp.float32)],
        temps=[((R, cin), jnp.float32), ((R, cout), jnp.float32)])
    return pl.pallas_call(
        _mid_kernel,
        grid=(G,),
        out_shape=(jax.ShapeDtypeStruct((total, cout), jnp.bfloat16),
                   jax.ShapeDtypeStruct((G, 1, cout), jnp.float32),
                   jax.ShapeDtypeStruct((G, 1, cout), jnp.float32)),
        in_specs=[
            pl.BlockSpec((R, cin), lambda i: (i, 0)),
            pl.BlockSpec((1, cin), lambda i: (0, 0)),
            pl.BlockSpec((1, cin), lambda i: (0, 0)),
            pl.BlockSpec((cin, cout), lambda i: (0, 0)),
            pl.BlockSpec((1, cout), lambda i: (0, 0)),
        ],
        out_specs=(
            pl.BlockSpec((R, cout), lambda i: (i, 0)),
            pl.BlockSpec((1, 1, cout), lambda i: (i, 0, 0)),
            pl.BlockSpec((1, 1, cout), lambda i: (i, 0, 0)),
        ),
        compiler_params=pltpu.CompilerParams(
            dimension_semantics=("parallel",), vmem_limit_bytes=limit),
    )(h, scale, shift, w, b)


def _final_stage(h, scale, shift, w, b, B, N, TB, with_enc):
    total = B * N
    G = B // TB
    R = TB * N
    cin, cout = w.shape
    TC = min(256, cout)
    GC = cout // TC
    kernel = _make_final_kernel(TB, N, with_enc)

    out_shape = [jax.ShapeDtypeStruct((G, TB, cout), jnp.float32)]
    out_specs = [pl.BlockSpec((1, TB, TC), lambda i, j: (i, 0, j))]
    blocks = [((R, cin), jnp.bfloat16), ((1, cin), jnp.float32),
              ((1, cin), jnp.float32), ((cin, TC), jnp.bfloat16),
              ((1, TC), jnp.float32), ((1, TB, TC), jnp.float32)]
    temps = [((R, cin), jnp.float32), ((R, TC), jnp.float32)]
    if with_enc:
        out_shape = [jax.ShapeDtypeStruct((total, cout), jnp.bfloat16)] + out_shape
        out_specs = [pl.BlockSpec((R, TC), lambda i, j: (i, j))] + out_specs
        blocks.append(((R, TC), jnp.bfloat16))

    outs = pl.pallas_call(
        kernel,
        grid=(G, GC),
        out_shape=tuple(out_shape),
        in_specs=[
            pl.BlockSpec((R, cin), lambda i, j: (i, 0)),   # resident across cout strips
            pl.BlockSpec((1, cin), lambda i, j: (0, 0)),
            pl.BlockSpec((1, cin), lambda i, j: (0, 0)),
            pl.BlockSpec((cin, TC), lambda i, j: (0, j)),
            pl.BlockSpec((1, TC), lambda i, j: (0, j)),
        ],
        out_specs=tuple(out_specs),
        compiler_params=pltpu.CompilerParams(
            dimension_semantics=("parallel", "parallel"),
            vmem_limit_bytes=_vmem_limit(blocks, temps)),
    )(h, scale, shift, w, b)

    if with_enc:
        enc, gmax = outs
    else:
        (gmax,) = outs
        enc = None
    return enc, gmax.reshape(B, cout)


def _head(gmax, head_w, head_b, out_dim):
    B = gmax.shape[0]
    out_pad = ((out_dim + 127) // 128) * 128          # lane-dense output store
    w3 = jnp.pad(head_w[2], ((0, 0), (0, out_pad - out_dim)))
    b3 = jnp.pad(head_b[2], ((0, 0), (0, out_pad - out_dim)))
    limit = _vmem_limit(
        blocks=[((B, ENC_DIMS[-1]), jnp.float32),
                ((ENC_DIMS[-1], HEAD_DIMS[0]), jnp.bfloat16),
                ((1, HEAD_DIMS[0]), jnp.float32),
                ((HEAD_DIMS[0], HEAD_DIMS[1]), jnp.bfloat16),
                ((1, HEAD_DIMS[1]), jnp.float32),
                ((HEAD_DIMS[1], out_pad), jnp.bfloat16),
                ((1, out_pad), jnp.float32),
                ((B, out_pad), jnp.float32)],
        temps=[((B, HEAD_DIMS[0]), jnp.float32),
               ((B, HEAD_DIMS[1]), jnp.float32)])
    out = pl.pallas_call(
        _head_kernel,
        out_shape=jax.ShapeDtypeStruct((B, out_pad), jnp.float32),
        in_specs=[_VMEM_SPEC] * 7,
        out_specs=_VMEM_SPEC,
        compiler_params=pltpu.CompilerParams(vmem_limit_bytes=limit),
    )(gmax, head_w[0], head_b[0], head_w[1], head_b[1], w3, b3)
    return out[:, :out_dim]


def _branch_forward(x2d, params, B, N, R, TB, out_dim, with_enc):
    """Shared encoder + head, used for both the T-Net and PointNet branches."""
    C1, C2, C3, _ = ENC_DIMS
    total = B * N
    count = float(total)
    in_dim = x2d.shape[-1]
    kp = max(8, ((in_dim + 7) // 8) * 8)
    xp = jnp.pad(x2d, ((0, 0), (0, kp - in_dim)))                 # tiny, XLA
    w1p = jnp.pad(params["enc_w"][0], ((0, kp - in_dim), (0, 0)))

    # layer 1: Linear(in_dim -> 64)                               (+ BN stats)
    h, ssum, ssq = _first_stage(xp, w1p, params["enc_b"][0], R, C1)
    scale, shift = _bn_affine(ssum, ssq, params["bn_g"][0], params["bn_b"][0], count)

    # layer 2: fused BN1+ReLU -> Linear(64 -> 64)                 (+ BN stats)
    h, ssum, ssq = _linear_bn_stage(h, scale, shift,
                                    params["enc_w"][1], params["enc_b"][1], R, C1, C2)
    scale, shift = _bn_affine(ssum, ssq, params["bn_g"][1], params["bn_b"][1], count)

    # layer 3: fused BN2+ReLU -> Linear(64 -> 128)                (+ BN stats)
    h, ssum, ssq = _linear_bn_stage(h, scale, shift,
                                    params["enc_w"][2], params["enc_b"][2], R, C2, C3)
    scale, shift = _bn_affine(ssum, ssq, params["bn_g"][2], params["bn_b"][2], count)

    # layer 4: fused BN3+ReLU -> Linear(128 -> 1024), per-cloud max pool
    enc, gmax = _final_stage(h, scale, shift,
                             params["enc_w"][3], params["enc_b"][3], B, N, TB, with_enc)

    head_out = _head(gmax, params["head_w"], params["head_b"], out_dim)
    return head_out, enc


# ---------------------------------------------------------------------------
# Parameter construction (deterministic, in-script)
# ---------------------------------------------------------------------------
def _init_branch_params(key, in_dim, out_dim):
    enc_sizes = [(in_dim, ENC_DIMS[0]), (ENC_DIMS[0], ENC_DIMS[1]),
                 (ENC_DIMS[1], ENC_DIMS[2]), (ENC_DIMS[2], ENC_DIMS[3])]
    head_sizes = [(ENC_DIMS[3], HEAD_DIMS[0]), (HEAD_DIMS[0], HEAD_DIMS[1]),
                  (HEAD_DIMS[1], out_dim)]

    def lin(k, fin, fout):
        kw, kb = jax.random.split(k)
        w = (jax.random.normal(kw, (fin, fout), jnp.float32)
             / jnp.sqrt(jnp.float32(fin)))
        b = 0.01 * jax.random.normal(kb, (1, fout), jnp.float32)
        return w, b

    keys = jax.random.split(key, len(enc_sizes) + len(head_sizes))
    enc_w, enc_b, bn_g, bn_b, head_w, head_b = [], [], [], [], [], []
    for i, (fin, fout) in enumerate(enc_sizes):
        w, b = lin(keys[i], fin, fout)
        # layer-1 weight stays f32 (tiny K); MXU-layer weights pre-cast to bf16 once.
        enc_w.append(w if i == 0 else w.astype(jnp.bfloat16))
        enc_b.append(b)
        if i < 3:  # BN after every encoder Linear except the last
            bn_g.append(jnp.ones((1, fout), jnp.float32))
            bn_b.append(jnp.zeros((1, fout), jnp.float32))
    for j, (fin, fout) in enumerate(head_sizes):
        w, b = lin(keys[len(enc_sizes) + j], fin, fout)
        head_w.append(w.astype(jnp.bfloat16))
        head_b.append(b)
    return {"enc_w": enc_w, "enc_b": enc_b, "bn_g": bn_g, "bn_b": bn_b,
            "head_w": head_w, "head_b": head_b}


def init_pointnet_tnet_params(key, in_dim=IN_DIM, classes=4):
    k_tnet, k_pnet = jax.random.split(key)
    return {
        "tnet": _init_branch_params(k_tnet, in_dim, in_dim * in_dim),
        "pointnet": _init_branch_params(k_pnet, in_dim, classes),
        "classes": classes,
        "in_dim": in_dim,
    }


# ---------------------------------------------------------------------------
# Full PointNetTNet forward
# ---------------------------------------------------------------------------
@functools.partial(jax.jit, static_argnames=("classes",))
def pointnet_tnet_forward(x, tnet_params, pnet_params, classes):
    B, N, in_dim = x.shape
    x = x.astype(jnp.float32)
    total = B * N
    R = _choose_row_tile(total)          # large row tile for layers 1-3
    TB = _choose_cloud_tile(B, N)        # small cloud tile for layer 4

    # --- T-Net branch: regress per-cloud transforms; no encodings materialized.
    reg, _ = _branch_forward(x.reshape(total, in_dim), tnet_params, B, N, R, TB,
                             out_dim=in_dim * in_dim, with_enc=False)
    T = reg.reshape(B, in_dim, in_dim) + jnp.eye(in_dim, dtype=jnp.float32)[None]

    # --- apply_tnet: tiny (B,N,3)x(B,3,3) bmm kept in plain XLA (negligible).
    x_t = jnp.einsum("bnd,bde->bne", x, T)

    # --- PointNet branch on the transformed points.
    class_out, enc = _branch_forward(x_t.reshape(total, in_dim), pnet_params,
                                     B, N, R, TB, out_dim=classes, with_enc=True)
    # encodings returned in bf16 (halves the dominant HBM writeback).
    encodings = enc.reshape(B, N, ENC_DIMS[-1])
    return class_out, encodings


if __name__ == "__main__":
    B, N, in_dim, classes = 2, 8, 3, 4
    key = jax.random.PRNGKey(0)
    k_x, k_p = jax.random.split(key)
    x = jax.random.normal(k_x, (B, N, in_dim), jnp.float32)

    params = init_pointnet_tnet_params(k_p, in_dim=in_dim, classes=classes)
    class_outputs, encodings = pointnet_tnet_forward(
        x, params["tnet"], params["pointnet"], classes=classes)
    jax.block_until_ready((class_outputs, encodings))

    assert class_outputs.shape == (B, classes)
    assert encodings.shape == (B, N, ENC_DIMS[-1])
    print("KERNEL_OK")
</pallas_src>

<mosaic_0001>
module attributes {stable_mosaic.version = 11 : i64} {
  func.func @_mid_kernel(%arg0: i32, %arg1: memref<8x64xbf16, #tpu.memory_space<vmem>>, %arg2: memref<1x64xf32, #tpu.memory_space<vmem>>, %arg3: memref<1x64xf32, #tpu.memory_space<vmem>>, %arg4: memref<64x128xbf16, #tpu.memory_space<vmem>>, %arg5: memref<1x128xf32, #tpu.memory_space<vmem>>, %arg6: memref<8x128xbf16, #tpu.memory_space<vmem>>, %arg7: memref<1x1x128xf32, #tpu.memory_space<vmem>>, %arg8: memref<1x1x128xf32, #tpu.memory_space<vmem>>) attributes {dimension_semantics = [#tpu.dimension_semantics<parallel>], iteration_bounds = array<i64: 2>, scalar_prefetch = 0 : i64, scratch_operands = 0 : i64, tpu.core_type = #tpu.core_type<tc>, window_params = [{transform_indices = @transform_0, window_bounds = array<i64: 8, 64>}, {pipeline_mode = #tpu.pipeline_mode<synchronous>, transform_indices = @transform_1, window_bounds = array<i64: 1, 64>}, {pipeline_mode = #tpu.pipeline_mode<synchronous>, transform_indices = @transform_2, window_bounds = array<i64: 1, 64>}, {pipeline_mode = #tpu.pipeline_mode<synchronous>, transform_indices = @transform_3, window_bounds = array<i64: 64, 128>}, {pipeline_mode = #tpu.pipeline_mode<synchronous>, transform_indices = @transform_4, window_bounds = array<i64: 1, 128>}, {transform_indices = @transform_5, window_bounds = array<i64: 8, 128>}, {transform_indices = @transform_6, window_bounds = array<i64: 1, 1, 128>}, {transform_indices = @transform_7, window_bounds = array<i64: 1, 1, 128>}]} {
    %c0 = arith.constant 0 : index
    %c0_0 = arith.constant 0 : index
    %0 = vector.load %arg1[%c0, %c0_0] : memref<8x64xbf16, #tpu.memory_space<vmem>>, vector<8x64xbf16>
    %1 = arith.extf %0 : vector<8x64xbf16> to vector<8x64xf32>
    %c0_1 = arith.constant 0 : index
    %c0_2 = arith.constant 0 : index
    %2 = vector.load %arg2[%c0_1, %c0_2] : memref<1x64xf32, #tpu.memory_space<vmem>>, vector<1x64xf32>
    %3 = vector.broadcast %2 : vector<1x64xf32> to vector<8x64xf32>
    %4 = arith.mulf %1, %3 : vector<8x64xf32>
    %c0_3 = arith.constant 0 : index
    %c0_4 = arith.constant 0 : index
    %5 = vector.load %arg3[%c0_3, %c0_4] : memref<1x64xf32, #tpu.memory_space<vmem>>, vector<1x64xf32>
    %6 = vector.broadcast %5 : vector<1x64xf32> to vector<8x64xf32>
    %7 = arith.addf %4, %6 : vector<8x64xf32>
    %cst = arith.constant 0.000000e+00 : f32
    %8 = vector.broadcast %cst : f32 to vector<8x64xf32>
    %9 = arith.maximumf %7, %8 : vector<8x64xf32>
    %10 = arith.truncf %9 : vector<8x64xf32> to vector<8x64xbf16>
    %c0_5 = arith.constant 0 : index
    %c0_6 = arith.constant 0 : index
    %11 = vector.load %arg4[%c0_5, %c0_6] : memref<64x128xbf16, #tpu.memory_space<vmem>>, vector<64x128xbf16>
    %cst_7 = arith.constant dense<0.000000e+00> : vector<8x128xf32>
    %12 = tpu.matmul %10, %11, %cst_7 {dimension_numbers = #tpu.dot_dimension_numbers<[1], [0], [0], [1], [0, 0, 1, 1], [], []>} : vector<8x64xbf16>, vector<64x128xbf16>, vector<8x128xf32> -> vector<8x128xf32>
    %c0_8 = arith.constant 0 : index
    %c0_9 = arith.constant 0 : index
    %13 = vector.load %arg5[%c0_8, %c0_9] : memref<1x128xf32, #tpu.memory_space<vmem>>, vector<1x128xf32>
    %14 = vector.broadcast %13 : vector<1x128xf32> to vector<8x128xf32>
    %15 = arith.addf %12, %14 : vector<8x128xf32>
    %cst_10 = arith.constant dense<0.000000e+00> : vector<128xf32>
    %16 = vector.multi_reduction <add>, %15, %cst_10 [0] : vector<8x128xf32> to vector<128xf32>
    %17 = vector.shape_cast %16 : vector<128xf32> to vector<1x128xf32>
    %c0_11 = arith.constant 0 : index
    %c0_12 = arith.constant 0 : index
    %c0_13 = arith.constant 0 : index
    %18 = vector.load %arg7[%c0_11, %c0_12, %c0_13] : memref<1x1x128xf32, #tpu.memory_space<vmem>>, vector<1x1x128xf32>
    %19 = vector.shape_cast %18 : vector<1x1x128xf32> to vector<1x128xf32>
    %20 = vector.shape_cast %17 : vector<1x128xf32> to vector<1x1x128xf32>
    tpu.vector_store %arg7[%c0_11, %c0_12, %c0_13], %20 {strides = array<i32>} : memref<1x1x128xf32, #tpu.memory_space<vmem>>, vector<1x1x128xf32>,
    %21 = arith.mulf %15, %15 : vector<8x128xf32>
    %cst_14 = arith.constant dense<0.000000e+00> : vector<128xf32>
    %22 = vector.multi_reduction <add>, %21, %cst_14 [0] : vector<8x128xf32> to vector<128xf32>
    %23 = vector.shape_cast %22 : vector<128xf32> to vector<1x128xf32>
    %c0_15 = arith.constant 0 : index
    %c0_16 = arith.constant 0 : index
    %c0_17 = arith.constant 0 : index
    %24 = vector.load %arg8[%c0_15, %c0_16, %c0_17] : memref<1x1x128xf32, #tpu.memory_space<vmem>>, vector<1x1x128xf32>
    %25 = vector.shape_cast %24 : vector<1x1x128xf32> to vector<1x128xf32>
    %26 = vector.shape_cast %23 : vector<1x128xf32> to vector<1x1x128xf32>
    tpu.vector_store %arg8[%c0_15, %c0_16, %c0_17], %26 {strides = array<i32>} : memref<1x1x128xf32, #tpu.memory_space<vmem>>, vector<1x1x128xf32>,
    %27 = arith.truncf %15 : vector<8x128xf32> to vector<8x128xbf16>
    %c0_18 = arith.constant 0 : index
    %c0_19 = arith.constant 0 : index
    %28 = vector.load %arg6[%c0_18, %c0_19] : memref<8x128xbf16, #tpu.memory_space<vmem>>, vector<8x128xbf16>
    tpu.vector_store %arg6[%c0_18, %c0_19], %27 {strides = array<i32>} : memref<8x128xbf16, #tpu.memory_space<vmem>>, vector<8x128xbf16>,
    return
  }
  func.func @transform_0(%arg0: i32) -> (i32, i32) {
    %c0_i32 = arith.constant 0 : i32
    %c0_i32_0 = arith.constant 0 : i32
    return %arg0, %c0_i32 : i32, i32
  }
  func.func @transform_1(%arg0: i32) -> (i32, i32) {
    %c0_i32 = arith.constant 0 : i32
    %c0_i32_0 = arith.constant 0 : i32
    %c0_i32_1 = arith.constant 0 : i32
    return %c0_i32, %c0_i32_0 : i32, i32
  }
  func.func @transform_2(%arg0: i32) -> (i32, i32) {
    %c0_i32 = arith.constant 0 : i32
    %c0_i32_0 = arith.constant 0 : i32
    %c0_i32_1 = arith.constant 0 : i32
    return %c0_i32, %c0_i32_0 : i32, i32
  }
  func.func @transform_3(%arg0: i32) -> (i32, i32) {
    %c0_i32 = arith.constant 0 : i32
    %c0_i32_0 = arith.constant 0 : i32
    %c0_i32_1 = arith.constant 0 : i32
    return %c0_i32, %c0_i32_0 : i32, i32
  }
  func.func @transform_4(%arg0: i32) -> (i32, i32) {
    %c0_i32 = arith.constant 0 : i32
    %c0_i32_0 = arith.constant 0 : i32
    %c0_i32_1 = arith.constant 0 : i32
    return %c0_i32, %c0_i32_0 : i32, i32
  }
  func.func @transform_5(%arg0: i32) -> (i32, i32) {
    %c0_i32 = arith.constant 0 : i32
    %c0_i32_0 = arith.constant 0 : i32
    return %arg0, %c0_i32 : i32, i32
  }
  func.func @transform_6(%arg0: i32) -> (i32, i32, i32) {
    %c0_i32 = arith.constant 0 : i32
    %c0_i32_0 = arith.constant 0 : i32
    %c0_i32_1 = arith.constant 0 : i32
    return %arg0, %c0_i32, %c0_i32_0 : i32, i32, i32
  }
  func.func @transform_7(%arg0: i32) -> (i32, i32, i32) {
    %c0_i32 = arith.constant 0 : i32
    %c0_i32_0 = arith.constant 0 : i32
    %c0_i32_1 = arith.constant 0 : i32
    return %arg0, %c0_i32, %c0_i32_0 : i32, i32, i32
  }
}

module attributes {stable_mosaic.version = 11 : i64} {
  func.func @_first_kernel(%arg0: i32, %arg1: memref<8x8xf32, #tpu.memory_space<vmem>>, %arg2: memref<8x64xf32, #tpu.memory_space<vmem>>, %arg3: memref<1x64xf32, #tpu.memory_space<vmem>>, %arg4: memref<8x64xbf16, #tpu.memory_space<vmem>>, %arg5: memref<1x1x64xf32, #tpu.memory_space<vmem>>, %arg6: memref<1x1x64xf32, #tpu.memory_space<vmem>>) attributes {dimension_semantics = [#tpu.dimension_semantics<parallel>], iteration_bounds = array<i64: 2>, scalar_prefetch = 0 : i64, scratch_operands = 0 : i64, tpu.core_type = #tpu.core_type<tc>, window_params = [{transform_indices = @transform_0, window_bounds = array<i64: 8, 8>}, {pipeline_mode = #tpu.pipeline_mode<synchronous>, transform_indices = @transform_1, window_bounds = array<i64: 8, 64>}, {pipeline_mode = #tpu.pipeline_mode<synchronous>, transform_indices = @transform_2, window_bounds = array<i64: 1, 64>}, {transform_indices = @transform_3, window_bounds = array<i64: 8, 64>}, {transform_indices = @transform_4, window_bounds = array<i64: 1, 1, 64>}, {transform_indices = @transform_5, window_bounds = array<i64: 1, 1, 64>}]} {
    %c0 = arith.constant 0 : index
    %c0_0 = arith.constant 0 : index
    %0 = vector.load %arg1[%c0, %c0_0] : memref<8x8xf32, #tpu.memory_space<vmem>>, vector<8x8xf32>
    %c0_1 = arith.constant 0 : index
    %c0_2 = arith.constant 0 : index
    %1 = vector.load %arg2[%c0_1, %c0_2] : memref<8x64xf32, #tpu.memory_space<vmem>>, vector<8x64xf32>
    %cst = arith.constant dense<0.000000e+00> : vector<8x64xf32>
    %2 = tpu.matmul %0, %1, %cst {dimension_numbers = #tpu.dot_dimension_numbers<[1], [0], [0], [1], [0, 0, 1, 1], [], []>} : vector<8x8xf32>, vector<8x64xf32>, vector<8x64xf32> -> vector<8x64xf32>
    %c0_3 = arith.constant 0 : index
    %c0_4 = arith.constant 0 : index
    %3 = vector.load %arg3[%c0_3, %c0_4] : memref<1x64xf32, #tpu.memory_space<vmem>>, vector<1x64xf32>
    %4 = vector.broadcast %3 : vector<1x64xf32> to vector<8x64xf32>
    %5 = arith.addf %2, %4 : vector<8x64xf32>
    %cst_5 = arith.constant dense<0.000000e+00> : vector<64xf32>
    %6 = vector.multi_reduction <add>, %5, %cst_5 [0] : vector<8x64xf32> to vector<64xf32>
    %7 = vector.shape_cast %6 : vector<64xf32> to vector<1x64xf32>
    %c0_6 = arith.constant 0 : index
    %c0_7 = arith.constant 0 : index
    %c0_8 = arith.constant 0 : index
    %8 = vector.load %arg5[%c0_6, %c0_7, %c0_8] : memref<1x1x64xf32, #tpu.memory_space<vmem>>, vector<1x1x64xf32>
    %9 = vector.shape_cast %8 : vector<1x1x64xf32> to vector<1x64xf32>
    %10 = vector.shape_cast %7 : vector<1x64xf32> to vector<1x1x64xf32>
    tpu.vector_store %arg5[%c0_6, %c0_7, %c0_8], %10 {strides = array<i32>} : memref<1x1x64xf32, #tpu.memory_space<vmem>>, vector<1x1x64xf32>,
    %11 = arith.mulf %5, %5 : vector<8x64xf32>
    %cst_9 = arith.constant dense<0.000000e+00> : vector<64xf32>
    %12 = vector.multi_reduction <add>, %11, %cst_9 [0] : vector<8x64xf32> to vector<64xf32>
    %13 = vector.shape_cast %12 : vector<64xf32> to vector<1x64xf32>
    %c0_10 = arith.constant 0 : index
    %c0_11 = arith.constant 0 : index
    %c0_12 = arith.constant 0 : index
    %14 = vector.load %arg6[%c0_10, %c0_11, %c0_12] : memref<1x1x64xf32, #tpu.memory_space<vmem>>, vector<1x1x64xf32>
    %15 = vector.shape_cast %14 : vector<1x1x64xf32> to vector<1x64xf32>
    %16 = vector.shape_cast %13 : vector<1x64xf32> to vector<1x1x64xf32>
    tpu.vector_store %arg6[%c0_10, %c0_11, %c0_12], %16 {strides = array<i32>} : memref<1x1x64xf32, #tpu.memory_space<vmem>>, vector<1x1x64xf32>,
    %17 = arith.truncf %5 : vector<8x64xf32> to vector<8x64xbf16>
    %c0_13 = arith.constant 0 : index
    %c0_14 = arith.constant 0 : index
    %18 = vector.load %arg4[%c0_13, %c0_14] : memref<8x64xbf16, #tpu.memory_space<vmem>>, vector<8x64xbf16>
    tpu.vector_store %arg4[%c0_13, %c0_14], %17 {strides = array<i32>} : memref<8x64xbf16, #tpu.memory_space<vmem>>, vector<8x64xbf16>,
    return
  }
  func.func @transform_0(%arg0: i32) -> (i32, i32) {
    %c0_i32 = arith.constant 0 : i32
    %c0_i32_0 = arith.constant 0 : i32
    return %arg0, %c0_i32 : i32, i32
  }
  func.func @transform_1(%arg0: i32) -> (i32, i32) {
    %c0_i32 = arith.constant 0 : i32
    %c0_i32_0 = arith.constant 0 : i32
    %c0_i32_1 = arith.constant 0 : i32
    return %c0_i32, %c0_i32_0 : i32, i32
  }
  func.func @transform_2(%arg0: i32) -> (i32, i32) {
    %c0_i32 = arith.constant 0 : i32
    %c0_i32_0 = arith.constant 0 : i32
    %c0_i32_1 = arith.constant 0 : i32
    return %c0_i32, %c0_i32_0 : i32, i32
  }
  func.func @transform_3(%arg0: i32) -> (i32, i32) {
    %c0_i32 = arith.constant 0 : i32
    %c0_i32_0 = arith.constant 0 : i32
    return %arg0, %c0_i32 : i32, i32
  }
  func.func @transform_4(%arg0: i32) -> (i32, i32, i32) {
    %c0_i32 = arith.constant 0 : i32
    %c0_i32_0 = arith.constant 0 : i32
    %c0_i32_1 = arith.constant 0 : i32
    return %arg0, %c0_i32, %c0_i32_0 : i32, i32, i32
  }
  func.func @transform_5(%arg0: i32) -> (i32, i32, i32) {
    %c0_i32 = arith.constant 0 : i32
    %c0_i32_0 = arith.constant 0 : i32
    %c0_i32_1 = arith.constant 0 : i32
    return %arg0, %c0_i32, %c0_i32_0 : i32, i32, i32
  }
}

module attributes {stable_mosaic.version = 11 : i64} {
  func.func @_mid_kernel(%arg0: i32, %arg1: memref<8x64xbf16, #tpu.memory_space<vmem>>, %arg2: memref<1x64xf32, #tpu.memory_space<vmem>>, %arg3: memref<1x64xf32, #tpu.memory_space<vmem>>, %arg4: memref<64x64xbf16, #tpu.memory_space<vmem>>, %arg5: memref<1x64xf32, #tpu.memory_space<vmem>>, %arg6: memref<8x64xbf16, #tpu.memory_space<vmem>>, %arg7: memref<1x1x64xf32, #tpu.memory_space<vmem>>, %arg8: memref<1x1x64xf32, #tpu.memory_space<vmem>>) attributes {dimension_semantics = [#tpu.dimension_semantics<parallel>], iteration_bounds = array<i64: 2>, scalar_prefetch = 0 : i64, scratch_operands = 0 : i64, tpu.core_type = #tpu.core_type<tc>, window_params = [{transform_indices = @transform_0, window_bounds = array<i64: 8, 64>}, {pipeline_mode = #tpu.pipeline_mode<synchronous>, transform_indices = @transform_1, window_bounds = array<i64: 1, 64>}, {pipeline_mode = #tpu.pipeline_mode<synchronous>, transform_indices = @transform_2, window_bounds = array<i64: 1, 64>}, {pipeline_mode = #tpu.pipeline_mode<synchronous>, transform_indices = @transform_3, window_bounds = array<i64: 64, 64>}, {pipeline_mode = #tpu.pipeline_mode<synchronous>, transform_indices = @transform_4, window_bounds = array<i64: 1, 64>}, {transform_indices = @transform_5, window_bounds = array<i64: 8, 64>}, {transform_indices = @transform_6, window_bounds = array<i64: 1, 1, 64>}, {transform_indices = @transform_7, window_bounds = array<i64: 1, 1, 64>}]} {
    %c0 = arith.constant 0 : index
    %c0_0 = arith.constant 0 : index
    %0 = vector.load %arg1[%c0, %c0_0] : memref<8x64xbf16, #tpu.memory_space<vmem>>, vector<8x64xbf16>
    %1 = arith.extf %0 : vector<8x64xbf16> to vector<8x64xf32>
    %c0_1 = arith.constant 0 : index
    %c0_2 = arith.constant 0 : index
    %2 = vector.load %arg2[%c0_1, %c0_2] : memref<1x64xf32, #tpu.memory_space<vmem>>, vector<1x64xf32>
    %3 = vector.broadcast %2 : vector<1x64xf32> to vector<8x64xf32>
    %4 = arith.mulf %1, %3 : vector<8x64xf32>
    %c0_3 = arith.constant 0 : index
    %c0_4 = arith.constant 0 : index
    %5 = vector.load %arg3[%c0_3, %c0_4] : memref<1x64xf32, #tpu.memory_space<vmem>>, vector<1x64xf32>
    %6 = vector.broadcast %5 : vector<1x64xf32> to vector<8x64xf32>
    %7 = arith.addf %4, %6 : vector<8x64xf32>
    %cst = arith.constant 0.000000e+00 : f32
    %8 = vector.broadcast %cst : f32 to vector<8x64xf32>
    %9 = arith.maximumf %7, %8 : vector<8x64xf32>
    %10 = arith.truncf %9 : vector<8x64xf32> to vector<8x64xbf16>
    %c0_5 = arith.constant 0 : index
    %c0_6 = arith.constant 0 : index
    %11 = vector.load %arg4[%c0_5, %c0_6] : memref<64x64xbf16, #tpu.memory_space<vmem>>, vector<64x64xbf16>
    %cst_7 = arith.constant dense<0.000000e+00> : vector<8x64xf32>
    %12 = tpu.matmul %10, %11, %cst_7 {dimension_numbers = #tpu.dot_dimension_numbers<[1], [0], [0], [1], [0, 0, 1, 1], [], []>} : vector<8x64xbf16>, vector<64x64xbf16>, vector<8x64xf32> -> vector<8x64xf32>
    %c0_8 = arith.constant 0 : index
    %c0_9 = arith.constant 0 : index
    %13 = vector.load %arg5[%c0_8, %c0_9] : memref<1x64xf32, #tpu.memory_space<vmem>>, vector<1x64xf32>
    %14 = vector.broadcast %13 : vector<1x64xf32> to vector<8x64xf32>
    %15 = arith.addf %12, %14 : vector<8x64xf32>
    %cst_10 = arith.constant dense<0.000000e+00> : vector<64xf32>
    %16 = vector.multi_reduction <add>, %15, %cst_10 [0] : vector<8x64xf32> to vector<64xf32>
    %17 = vector.shape_cast %16 : vector<64xf32> to vector<1x64xf32>
    %c0_11 = arith.constant 0 : index
    %c0_12 = arith.constant 0 : index
    %c0_13 = arith.constant 0 : index
    %18 = vector.load %arg7[%c0_11, %c0_12, %c0_13] : memref<1x1x64xf32, #tpu.memory_space<vmem>>, vector<1x1x64xf32>
    %19 = vector.shape_cast %18 : vector<1x1x64xf32> to vector<1x64xf32>
    %20 = vector.shape_cast %17 : vector<1x64xf32> to vector<1x1x64xf32>
    tpu.vector_store %arg7[%c0_11, %c0_12, %c0_13], %20 {strides = array<i32>} : memref<1x1x64xf32, #tpu.memory_space<vmem>>, vector<1x1x64xf32>,
    %21 = arith.mulf %15, %15 : vector<8x64xf32>
    %cst_14 = arith.constant dense<0.000000e+00> : vector<64xf32>
    %22 = vector.multi_reduction <add>, %21, %cst_14 [0] : vector<8x64xf32> to vector<64xf32>
    %23 = vector.shape_cast %22 : vector<64xf32> to vector<1x64xf32>
    %c0_15 = arith.constant 0 : index
    %c0_16 = arith.constant 0 : index
    %c0_17 = arith.constant 0 : index
    %24 = vector.load %arg8[%c0_15, %c0_16, %c0_17] : memref<1x1x64xf32, #tpu.memory_space<vmem>>, vector<1x1x64xf32>
    %25 = vector.shape_cast %24 : vector<1x1x64xf32> to vector<1x64xf32>
    %26 = vector.shape_cast %23 : vector<1x64xf32> to vector<1x1x64xf32>
    tpu.vector_store %arg8[%c0_15, %c0_16, %c0_17], %26 {strides = array<i32>} : memref<1x1x64xf32, #tpu.memory_space<vmem>>, vector<1x1x64xf32>,
    %27 = arith.truncf %15 : vector<8x64xf32> to vector<8x64xbf16>
    %c0_18 = arith.constant 0 : index
    %c0_19 = arith.constant 0 : index
    %28 = vector.load %arg6[%c0_18, %c0_19] : memref<8x64xbf16, #tpu.memory_space<vmem>>, vector<8x64xbf16>
    tpu.vector_store %arg6[%c0_18, %c0_19], %27 {strides = array<i32>} : memref<8x64xbf16, #tpu.memory_space<vmem>>, vector<8x64xbf16>,
    return
  }
  func.func @transform_0(%arg0: i32) -> (i32, i32) {
    %c0_i32 = arith.constant 0 : i32
    %c0_i32_0 = arith.constant 0 : i32
    return %arg0, %c0_i32 : i32, i32
  }
  func.func @transform_1(%arg0: i32) -> (i32, i32) {
    %c0_i32 = arith.constant 0 : i32
    %c0_i32_0 = arith.constant 0 : i32
    %c0_i32_1 = arith.constant 0 : i32
    return %c0_i32, %c0_i32_0 : i32, i32
  }
  func.func @transform_2(%arg0: i32) -> (i32, i32) {
    %c0_i32 = arith.constant 0 : i32
    %c0_i32_0 = arith.constant 0 : i32
    %c0_i32_1 = arith.constant 0 : i32
    return %c0_i32, %c0_i32_0 : i32, i32
  }
  func.func @transform_3(%arg0: i32) -> (i32, i32) {
    %c0_i32 = arith.constant 0 : i32
    %c0_i32_0 = arith.constant 0 : i32
    %c0_i32_1 = arith.constant 0 : i32
    return %c0_i32, %c0_i32_0 : i32, i32
  }
  func.func @transform_4(%arg0: i32) -> (i32, i32) {
    %c0_i32 = arith.constant 0 : i32
    %c0_i32_0 = arith.constant 0 : i32
    %c0_i32_1 = arith.constant 0 : i32
    return %c0_i32, %c0_i32_0 : i32, i32
  }
  func.func @transform_5(%arg0: i32) -> (i32, i32) {
    %c0_i32 = arith.constant 0 : i32
    %c0_i32_0 = arith.constant 0 : i32
    return %arg0, %c0_i32 : i32, i32
  }
  func.func @transform_6(%arg0: i32) -> (i32, i32, i32) {
    %c0_i32 = arith.constant 0 : i32
    %c0_i32_0 = arith.constant 0 : i32
    %c0_i32_1 = arith.constant 0 : i32
    return %arg0, %c0_i32, %c0_i32_0 : i32, i32, i32
  }
  func.func @transform_7(%arg0: i32) -> (i32, i32, i32) {
    %c0_i32 = arith.constant 0 : i32
    %c0_i32_0 = arith.constant 0 : i32
    %c0_i32_1 = arith.constant 0 : i32
    return %arg0, %c0_i32, %c0_i32_0 : i32, i32, i32
  }
}

module attributes {stable_mosaic.version = 11 : i64} {
  func.func @kernel(%arg0: i32, %arg1: i32, %arg2: memref<8x128xbf16, #tpu.memory_space<vmem>>, %arg3: memref<1x128xf32, #tpu.memory_space<vmem>>, %arg4: memref<1x128xf32, #tpu.memory_space<vmem>>, %arg5: memref<128x256xbf16, #tpu.memory_space<vmem>>, %arg6: memref<1x256xf32, #tpu.memory_space<vmem>>, %arg7: memref<1x1x256xf32, #tpu.memory_space<vmem>>) attributes {dimension_semantics = [#tpu.dimension_semantics<parallel>, #tpu.dimension_semantics<parallel>], iteration_bounds = array<i64: 2, 4>, scalar_prefetch = 0 : i64, scratch_operands = 0 : i64, tpu.core_type = #tpu.core_type<tc>, window_params = [{transform_indices = @transform_0, window_bounds = array<i64: 8, 128>}, {pipeline_mode = #tpu.pipeline_mode<synchronous>, transform_indices = @transform_1, window_bounds = array<i64: 1, 128>}, {pipeline_mode = #tpu.pipeline_mode<synchronous>, transform_indices = @transform_2, window_bounds = array<i64: 1, 128>}, {transform_indices = @transform_3, window_bounds = array<i64: 128, 256>}, {transform_indices = @transform_4, window_bounds = array<i64: 1, 256>}, {transform_indices = @transform_5, window_bounds = array<i64: 1, 1, 256>}]} {
    %c0 = arith.constant 0 : index
    %c0_0 = arith.constant 0 : index
    %0 = vector.load %arg2[%c0, %c0_0] : memref<8x128xbf16, #tpu.memory_space<vmem>>, vector<8x128xbf16>
    %1 = arith.extf %0 : vector<8x128xbf16> to vector<8x128xf32>
    %c0_1 = arith.constant 0 : index
    %c0_2 = arith.constant 0 : index
    %2 = vector.load %arg3[%c0_1, %c0_2] : memref<1x128xf32, #tpu.memory_space<vmem>>, vector<1x128xf32>
    %3 = vector.broadcast %2 : vector<1x128xf32> to vector<8x128xf32>
    %4 = arith.mulf %1, %3 : vector<8x128xf32>
    %c0_3 = arith.constant 0 : index
    %c0_4 = arith.constant 0 : index
    %5 = vector.load %arg4[%c0_3, %c0_4] : memref<1x128xf32, #tpu.memory_space<vmem>>, vector<1x128xf32>
    %6 = vector.broadcast %5 : vector<1x128xf32> to vector<8x128xf32>
    %7 = arith.addf %4, %6 : vector<8x128xf32>
    %cst = arith.constant 0.000000e+00 : f32
    %8 = vector.broadcast %cst : f32 to vector<8x128xf32>
    %9 = arith.maximumf %7, %8 : vector<8x128xf32>
    %10 = arith.truncf %9 : vector<8x128xf32> to vector<8x128xbf16>
    %c0_5 = arith.constant 0 : index
    %c0_6 = arith.constant 0 : index
    %11 = vector.load %arg5[%c0_5, %c0_6] : memref<128x256xbf16, #tpu.memory_space<vmem>>, vector<128x256xbf16>
    %cst_7 = arith.constant dense<0.000000e+00> : vector<8x256xf32>
    %12 = tpu.matmul %10, %11, %cst_7 {dimension_numbers = #tpu.dot_dimension_numbers<[1], [0], [0], [1], [0, 0, 1, 1], [], []>} : vector<8x128xbf16>, vector<128x256xbf16>, vector<8x256xf32> -> vector<8x256xf32>
    %c0_8 = arith.constant 0 : index
    %c0_9 = arith.constant 0 : index
    %13 = vector.load %arg6[%c0_8, %c0_9] : memref<1x256xf32, #tpu.memory_space<vmem>>, vector<1x256xf32>
    %14 = vector.broadcast %13 : vector<1x256xf32> to vector<8x256xf32>
    %15 = arith.addf %12, %14 : vector<8x256xf32>
    %16 = vector.shape_cast %15 : vector<8x256xf32> to vector<1x8x256xf32>
    %cst_10 = arith.constant dense<0xFF800000> : vector<1x256xf32>
    %17 = vector.multi_reduction <maximumf>, %16, %cst_10 [1] : vector<1x8x256xf32> to vector<1x256xf32>
    %c0_11 = arith.constant 0 : index
    %c0_12 = arith.constant 0 : index
    %c0_13 = arith.constant 0 : index
    %18 = vector.load %arg7[%c0_11, %c0_12, %c0_13] : memref<1x1x256xf32, #tpu.memory_space<vmem>>, vector<1x1x256xf32>
    %19 = vector.shape_cast %18 : vector<1x1x256xf32> to vector<1x256xf32>
    %20 = vector.shape_cast %17 : vector<1x256xf32> to vector<1x1x256xf32>
    tpu.vector_store %arg7[%c0_11, %c0_12, %c0_13], %20 {strides = array<i32>} : memref<1x1x256xf32, #tpu.memory_space<vmem>>, vector<1x1x256xf32>,
    return
  }
  func.func @transform_0(%arg0: i32, %arg1: i32) -> (i32, i32) {
    %c0_i32 = arith.constant 0 : i32
    %c0_i32_0 = arith.constant 0 : i32
    return %arg0, %c0_i32 : i32, i32
  }
  func.func @transform_1(%arg0: i32, %arg1: i32) -> (i32, i32) {
    %c0_i32 = arith.constant 0 : i32
    %c0_i32_0 = arith.constant 0 : i32
    %c0_i32_1 = arith.constant 0 : i32
    return %c0_i32, %c0_i32_0 : i32, i32
  }
  func.func @transform_2(%arg0: i32, %arg1: i32) -> (i32, i32) {
    %c0_i32 = arith.constant 0 : i32
    %c0_i32_0 = arith.constant 0 : i32
    %c0_i32_1 = arith.constant 0 : i32
    return %c0_i32, %c0_i32_0 : i32, i32
  }
  func.func @transform_3(%arg0: i32, %arg1: i32) -> (i32, i32) {
    %c0_i32 = arith.constant 0 : i32
    %c0_i32_0 = arith.constant 0 : i32
    return %c0_i32, %arg1 : i32, i32
  }
  func.func @transform_4(%arg0: i32, %arg1: i32) -> (i32, i32) {
    %c0_i32 = arith.constant 0 : i32
    %c0_i32_0 = arith.constant 0 : i32
    return %c0_i32, %arg1 : i32, i32
  }
  func.func @transform_5(%arg0: i32, %arg1: i32) -> (i32, i32, i32) {
    %c0_i32 = arith.constant 0 : i32
    %c0_i32_0 = arith.constant 0 : i32
    return %arg0, %c0_i32, %arg1 : i32, i32, i32
  }
}

module attributes {stable_mosaic.version = 11 : i64} {
  func.func @_head_kernel(%arg0: memref<2x1024xf32, #tpu.memory_space<vmem>>, %arg1: memref<1024x512xbf16, #tpu.memory_space<vmem>>, %arg2: memref<1x512xf32, #tpu.memory_space<vmem>>, %arg3: memref<512x256xbf16, #tpu.memory_space<vmem>>, %arg4: memref<1x256xf32, #tpu.memory_space<vmem>>, %arg5: memref<256x128xbf16, #tpu.memory_space<vmem>>, %arg6: memref<1x128xf32, #tpu.memory_space<vmem>>, %arg7: memref<2x128xf32, #tpu.memory_space<vmem>>) attributes {dimension_semantics = [], scalar_prefetch = 0 : i64, scratch_operands = 0 : i64, tpu.core_type = #tpu.core_type<tc>} {
    %c0 = arith.constant 0 : index
    %c0_0 = arith.constant 0 : index
    %0 = vector.load %arg0[%c0, %c0_0] : memref<2x1024xf32, #tpu.memory_space<vmem>>, vector<2x1024xf32>
    %1 = arith.truncf %0 : vector<2x1024xf32> to vector<2x1024xbf16>
    %c0_1 = arith.constant 0 : index
    %c0_2 = arith.constant 0 : index
    %2 = vector.load %arg1[%c0_1, %c0_2] : memref<1024x512xbf16, #tpu.memory_space<vmem>>, vector<1024x512xbf16>
    %cst = arith.constant dense<0.000000e+00> : vector<2x512xf32>
    %3 = tpu.matmul %1, %2, %cst {dimension_numbers = #tpu.dot_dimension_numbers<[1], [0], [0], [1], [0, 0, 1, 1], [], []>} : vector<2x1024xbf16>, vector<1024x512xbf16>, vector<2x512xf32> -> vector<2x512xf32>
    %c0_3 = arith.constant 0 : index
    %c0_4 = arith.constant 0 : index
    %4 = vector.load %arg2[%c0_3, %c0_4] : memref<1x512xf32, #tpu.memory_space<vmem>>, vector<1x512xf32>
    %5 = vector.broadcast %4 : vector<1x512xf32> to vector<2x512xf32>
    %6 = arith.addf %3, %5 : vector<2x512xf32>
    %cst_5 = arith.constant 0.000000e+00 : f32
    %7 = vector.broadcast %cst_5 : f32 to vector<2x512xf32>
    %8 = arith.maximumf %6, %7 : vector<2x512xf32>
    %9 = arith.truncf %8 : vector<2x512xf32> to vector<2x512xbf16>
    %c0_6 = arith.constant 0 : index
    %c0_7 = arith.constant 0 : index
    %10 = vector.load %arg3[%c0_6, %c0_7] : memref<512x256xbf16, #tpu.memory_space<vmem>>, vector<512x256xbf16>
    %cst_8 = arith.constant dense<0.000000e+00> : vector<2x256xf32>
    %11 = tpu.matmul %9, %10, %cst_8 {dimension_numbers = #tpu.dot_dimension_numbers<[1], [0], [0], [1], [0, 0, 1, 1], [], []>} : vector<2x512xbf16>, vector<512x256xbf16>, vector<2x256xf32> -> vector<2x256xf32>
    %c0_9 = arith.constant 0 : index
    %c0_10 = arith.constant 0 : index
    %12 = vector.load %arg4[%c0_9, %c0_10] : memref<1x256xf32, #tpu.memory_space<vmem>>, vector<1x256xf32>
    %13 = vector.broadcast %12 : vector<1x256xf32> to vector<2x256xf32>
    %14 = arith.addf %11, %13 : vector<2x256xf32>
    %cst_11 = arith.constant 0.000000e+00 : f32
    %15 = vector.broadcast %cst_11 : f32 to vector<2x256xf32>
    %16 = arith.maximumf %14, %15 : vector<2x256xf32>
    %17 = arith.truncf %16 : vector<2x256xf32> to vector<2x256xbf16>
    %c0_12 = arith.constant 0 : index
    %c0_13 = arith.constant 0 : index
    %18 = vector.load %arg5[%c0_12, %c0_13] : memref<256x128xbf16, #tpu.memory_space<vmem>>, vector<256x128xbf16>
    %cst_14 = arith.constant dense<0.000000e+00> : vector<2x128xf32>
    %19 = tpu.matmul %17, %18, %cst_14 {dimension_numbers = #tpu.dot_dimension_numbers<[1], [0], [0], [1], [0, 0, 1, 1], [], []>} : vector<2x256xbf16>, vector<256x128xbf16>, vector<2x128xf32> -> vector<2x128xf32>
    %c0_15 = arith.constant 0 : index
    %c0_16 = arith.constant 0 : index
    %20 = vector.load %arg6[%c0_15, %c0_16] : memref<1x128xf32, #tpu.memory_space<vmem>>, vector<1x128xf32>
    %21 = vector.broadcast %20 : vector<1x128xf32> to vector<2x128xf32>
    %22 = arith.addf %19, %21 : vector<2x128xf32>
    %c0_17 = arith.constant 0 : index
    %c0_18 = arith.constant 0 : index
    %23 = vector.load %arg7[%c0_17, %c0_18] : memref<2x128xf32, #tpu.memory_space<vmem>>, vector<2x128xf32>
    tpu.vector_store %arg7[%c0_17, %c0_18], %22 {strides = array<i32>} : memref<2x128xf32, #tpu.memory_space<vmem>>, vector<2x128xf32>,
    return
  }
}

module attributes {stable_mosaic.version = 11 : i64} {
  func.func @_mid_kernel(%arg0: i32, %arg1: memref<8x64xbf16, #tpu.memory_space<vmem>>, %arg2: memref<1x64xf32, #tpu.memory_space<vmem>>, %arg3: memref<1x64xf32, #tpu.memory_space<vmem>>, %arg4: memref<64x64xbf16, #tpu.memory_space<vmem>>, %arg5: memref<1x64xf32, #tpu.memory_space<vmem>>, %arg6: memref<8x64xbf16, #tpu.memory_space<vmem>>, %arg7: memref<1x1x64xf32, #tpu.memory_space<vmem>>, %arg8: memref<1x1x64xf32, #tpu.memory_space<vmem>>) attributes {dimension_semantics = [#tpu.dimension_semantics<parallel>], iteration_bounds = array<i64: 2>, scalar_prefetch = 0 : i64, scratch_operands = 0 : i64, tpu.core_type = #tpu.core_type<tc>, window_params = [{transform_indices = @transform_0, window_bounds = array<i64: 8, 64>}, {pipeline_mode = #tpu.pipeline_mode<synchronous>, transform_indices = @transform_1, window_bounds = array<i64: 1, 64>}, {pipeline_mode = #tpu.pipeline_mode<synchronous>, transform_indices = @transform_2, window_bounds = array<i64: 1, 64>}, {pipeline_mode = #tpu.pipeline_mode<synchronous>, transform_indices = @transform_3, window_bounds = array<i64: 64, 64>}, {pipeline_mode = #tpu.pipeline_mode<synchronous>, transform_indices = @transform_4, window_bounds = array<i64: 1, 64>}, {transform_indices = @transform_5, window_bounds = array<i64: 8, 64>}, {transform_indices = @transform_6, window_bounds = array<i64: 1, 1, 64>}, {transform_indices = @transform_7, window_bounds = array<i64: 1, 1, 64>}]} {
    %c0 = arith.constant 0 : index
    %c0_0 = arith.constant 0 : index
    %0 = vector.load %arg1[%c0, %c0_0] : memref<8x64xbf16, #tpu.memory_space<vmem>>, vector<8x64xbf16>
    %1 = arith.extf %0 : vector<8x64xbf16> to vector<8x64xf32>
    %c0_1 = arith.constant 0 : index
    %c0_2 = arith.constant 0 : index
    %2 = vector.load %arg2[%c0_1, %c0_2] : memref<1x64xf32, #tpu.memory_space<vmem>>, vector<1x64xf32>
    %3 = vector.broadcast %2 : vector<1x64xf32> to vector<8x64xf32>
    %4 = arith.mulf %1, %3 : vector<8x64xf32>
    %c0_3 = arith.constant 0 : index
    %c0_4 = arith.constant 0 : index
    %5 = vector.load %arg3[%c0_3, %c0_4] : memref<1x64xf32, #tpu.memory_space<vmem>>, vector<1x64xf32>
    %6 = vector.broadcast %5 : vector<1x64xf32> to vector<8x64xf32>
    %7 = arith.addf %4, %6 : vector<8x64xf32>
    %cst = arith.constant 0.000000e+00 : f32
    %8 = vector.broadcast %cst : f32 to vector<8x64xf32>
    %9 = arith.maximumf %7, %8 : vector<8x64xf32>
    %10 = arith.truncf %9 : vector<8x64xf32> to vector<8x64xbf16>
    %c0_5 = arith.constant 0 : index
    %c0_6 = arith.constant 0 : index
    %11 = vector.load %arg4[%c0_5, %c0_6] : memref<64x64xbf16, #tpu.memory_space<vmem>>, vector<64x64xbf16>
    %cst_7 = arith.constant dense<0.000000e+00> : vector<8x64xf32>
    %12 = tpu.matmul %10, %11, %cst_7 {dimension_numbers = #tpu.dot_dimension_numbers<[1], [0], [0], [1], [0, 0, 1, 1], [], []>} : vector<8x64xbf16>, vector<64x64xbf16>, vector<8x64xf32> -> vector<8x64xf32>
    %c0_8 = arith.constant 0 : index
    %c0_9 = arith.constant 0 : index
    %13 = vector.load %arg5[%c0_8, %c0_9] : memref<1x64xf32, #tpu.memory_space<vmem>>, vector<1x64xf32>
    %14 = vector.broadcast %13 : vector<1x64xf32> to vector<8x64xf32>
    %15 = arith.addf %12, %14 : vector<8x64xf32>
    %cst_10 = arith.constant dense<0.000000e+00> : vector<64xf32>
    %16 = vector.multi_reduction <add>, %15, %cst_10 [0] : vector<8x64xf32> to vector<64xf32>
    %17 = vector.shape_cast %16 : vector<64xf32> to vector<1x64xf32>
    %c0_11 = arith.constant 0 : index
    %c0_12 = arith.constant 0 : index
    %c0_13 = arith.constant 0 : index
    %18 = vector.load %arg7[%c0_11, %c0_12, %c0_13] : memref<1x1x64xf32, #tpu.memory_space<vmem>>, vector<1x1x64xf32>
    %19 = vector.shape_cast %18 : vector<1x1x64xf32> to vector<1x64xf32>
    %20 = vector.shape_cast %17 : vector<1x64xf32> to vector<1x1x64xf32>
    tpu.vector_store %arg7[%c0_11, %c0_12, %c0_13], %20 {strides = array<i32>} : memref<1x1x64xf32, #tpu.memory_space<vmem>>, vector<1x1x64xf32>,
    %21 = arith.mulf %15, %15 : vector<8x64xf32>
    %cst_14 = arith.constant dense<0.000000e+00> : vector<64xf32>
    %22 = vector.multi_reduction <add>, %21, %cst_14 [0] : vector<8x64xf32> to vector<64xf32>
    %23 = vector.shape_cast %22 : vector<64xf32> to vector<1x64xf32>
    %c0_15 = arith.constant 0 : index
    %c0_16 = arith.constant 0 : index
    %c0_17 = arith.constant 0 : index
    %24 = vector.load %arg8[%c0_15, %c0_16, %c0_17] : memref<1x1x64xf32, #tpu.memory_space<vmem>>, vector<1x1x64xf32>
    %25 = vector.shape_cast %24 : vector<1x1x64xf32> to vector<1x64xf32>
    %26 = vector.shape_cast %23 : vector<1x64xf32> to vector<1x1x64xf32>
    tpu.vector_store %arg8[%c0_15, %c0_16, %c0_17], %26 {strides = array<i32>} : memref<1x1x64xf32, #tpu.memory_space<vmem>>, vector<1x1x64xf32>,
    %27 = arith.truncf %15 : vector<8x64xf32> to vector<8x64xbf16>
    %c0_18 = arith.constant 0 : index
    %c0_19 = arith.constant 0 : index
    %28 = vector.load %arg6[%c0_18, %c0_19] : memref<8x64xbf16, #tpu.memory_space<vmem>>, vector<8x64xbf16>
    tpu.vector_store %arg6[%c0_18, %c0_19], %27 {strides = array<i32>} : memref<8x64xbf16, #tpu.memory_space<vmem>>, vector<8x64xbf16>,
    return
  }
  func.func @transform_0(%arg0: i32) -> (i32, i32) {
    %c0_i32 = arith.constant 0 : i32
    %c0_i32_0 = arith.constant 0 : i32
    return %arg0, %c0_i32 : i32, i32
  }
  func.func @transform_1(%arg0: i32) -> (i32, i32) {
    %c0_i32 = arith.constant 0 : i32
    %c0_i32_0 = arith.constant 0 : i32
    %c0_i32_1 = arith.constant 0 : i32
    return %c0_i32, %c0_i32_0 : i32, i32
  }
  func.func @transform_2(%arg0: i32) -> (i32, i32) {
    %c0_i32 = arith.constant 0 : i32
    %c0_i32_0 = arith.constant 0 : i32
    %c0_i32_1 = arith.constant 0 : i32
    return %c0_i32, %c0_i32_0 : i32, i32
  }
  func.func @transform_3(%arg0: i32) -> (i32, i32) {
    %c0_i32 = arith.constant 0 : i32
    %c0_i32_0 = arith.constant 0 : i32
    %c0_i32_1 = arith.constant 0 : i32
    return %c0_i32, %c0_i32_0 : i32, i32
  }
  func.func @transform_4(%arg0: i32) -> (i32, i32) {
    %c0_i32 = arith.constant 0 : i32
    %c0_i32_0 = arith.constant 0 : i32
    %c0_i32_1 = arith.constant 0 : i32
    return %c0_i32, %c0_i32_0 : i32, i32
  }
  func.func @transform_5(%arg0: i32) -> (i32, i32) {
    %c0_i32 = arith.constant 0 : i32
    %c0_i32_0 = arith.constant 0 : i32
    return %arg0, %c0_i32 : i32, i32
  }
  func.func @transform_6(%arg0: i32) -> (i32, i32, i32) {
    %c0_i32 = arith.constant 0 : i32
    %c0_i32_0 = arith.constant 0 : i32
    %c0_i32_1 = arith.constant 0 : i32
    return %arg0, %c0_i32, %c0_i32_0 : i32, i32, i32
  }
  func.func @transform_7(%arg0: i32) -> (i32, i32, i32) {
    %c0_i32 = arith.constant 0 : i32
    %c0_i32_0 = arith.constant 0 : i32
    %c0_i32_1 = arith.constant 0 : i32
    return %arg0, %c0_i32, %c0_i32_0 : i32, i32, i32
  }
}

module attributes {stable_mosaic.version = 11 : i64} {
  func.func @_mid_kernel(%arg0: i32, %arg1: memref<8x64xbf16, #tpu.memory_space<vmem>>, %arg2: memref<1x64xf32, #tpu.memory_space<vmem>>, %arg3: memref<1x64xf32, #tpu.memory_space<vmem>>, %arg4: memref<64x128xbf16, #tpu.memory_space<vmem>>, %arg5: memref<1x128xf32, #tpu.memory_space<vmem>>, %arg6: memref<8x128xbf16, #tpu.memory_space<vmem>>, %arg7: memref<1x1x128xf32, #tpu.memory_space<vmem>>, %arg8: memref<1x1x128xf32, #tpu.memory_space<vmem>>) attributes {dimension_semantics = [#tpu.dimension_semantics<parallel>], iteration_bounds = array<i64: 2>, scalar_prefetch = 0 : i64, scratch_operands = 0 : i64, tpu.core_type = #tpu.core_type<tc>, window_params = [{transform_indices = @transform_0, window_bounds = array<i64: 8, 64>}, {pipeline_mode = #tpu.pipeline_mode<synchronous>, transform_indices = @transform_1, window_bounds = array<i64: 1, 64>}, {pipeline_mode = #tpu.pipeline_mode<synchronous>, transform_indices = @transform_2, window_bounds = array<i64: 1, 64>}, {pipeline_mode = #tpu.pipeline_mode<synchronous>, transform_indices = @transform_3, window_bounds = array<i64: 64, 128>}, {pipeline_mode = #tpu.pipeline_mode<synchronous>, transform_indices = @transform_4, window_bounds = array<i64: 1, 128>}, {transform_indices = @transform_5, window_bounds = array<i64: 8, 128>}, {transform_indices = @transform_6, window_bounds = array<i64: 1, 1, 128>}, {transform_indices = @transform_7, window_bounds = array<i64: 1, 1, 128>}]} {
    %c0 = arith.constant 0 : index
    %c0_0 = arith.constant 0 : index
    %0 = vector.load %arg1[%c0, %c0_0] : memref<8x64xbf16, #tpu.memory_space<vmem>>, vector<8x64xbf16>
    %1 = arith.extf %0 : vector<8x64xbf16> to vector<8x64xf32>
    %c0_1 = arith.constant 0 : index
    %c0_2 = arith.constant 0 : index
    %2 = vector.load %arg2[%c0_1, %c0_2] : memref<1x64xf32, #tpu.memory_space<vmem>>, vector<1x64xf32>
    %3 = vector.broadcast %2 : vector<1x64xf32> to vector<8x64xf32>
    %4 = arith.mulf %1, %3 : vector<8x64xf32>
    %c0_3 = arith.constant 0 : index
    %c0_4 = arith.constant 0 : index
    %5 = vector.load %arg3[%c0_3, %c0_4] : memref<1x64xf32, #tpu.memory_space<vmem>>, vector<1x64xf32>
    %6 = vector.broadcast %5 : vector<1x64xf32> to vector<8x64xf32>
    %7 = arith.addf %4, %6 : vector<8x64xf32>
    %cst = arith.constant 0.000000e+00 : f32
    %8 = vector.broadcast %cst : f32 to vector<8x64xf32>
    %9 = arith.maximumf %7, %8 : vector<8x64xf32>
    %10 = arith.truncf %9 : vector<8x64xf32> to vector<8x64xbf16>
    %c0_5 = arith.constant 0 : index
    %c0_6 = arith.constant 0 : index
    %11 = vector.load %arg4[%c0_5, %c0_6] : memref<64x128xbf16, #tpu.memory_space<vmem>>, vector<64x128xbf16>
    %cst_7 = arith.constant dense<0.000000e+00> : vector<8x128xf32>
    %12 = tpu.matmul %10, %11, %cst_7 {dimension_numbers = #tpu.dot_dimension_numbers<[1], [0], [0], [1], [0, 0, 1, 1], [], []>} : vector<8x64xbf16>, vector<64x128xbf16>, vector<8x128xf32> -> vector<8x128xf32>
    %c0_8 = arith.constant 0 : index
    %c0_9 = arith.constant 0 : index
    %13 = vector.load %arg5[%c0_8, %c0_9] : memref<1x128xf32, #tpu.memory_space<vmem>>, vector<1x128xf32>
    %14 = vector.broadcast %13 : vector<1x128xf32> to vector<8x128xf32>
    %15 = arith.addf %12, %14 : vector<8x128xf32>
    %cst_10 = arith.constant dense<0.000000e+00> : vector<128xf32>
    %16 = vector.multi_reduction <add>, %15, %cst_10 [0] : vector<8x128xf32> to vector<128xf32>
    %17 = vector.shape_cast %16 : vector<128xf32> to vector<1x128xf32>
    %c0_11 = arith.constant 0 : index
    %c0_12 = arith.constant 0 : index
    %c0_13 = arith.constant 0 : index
    %18 = vector.load %arg7[%c0_11, %c0_12, %c0_13] : memref<1x1x128xf32, #tpu.memory_space<vmem>>, vector<1x1x128xf32>
    %19 = vector.shape_cast %18 : vector<1x1x128xf32> to vector<1x128xf32>
    %20 = vector.shape_cast %17 : vector<1x128xf32> to vector<1x1x128xf32>
    tpu.vector_store %arg7[%c0_11, %c0_12, %c0_13], %20 {strides = array<i32>} : memref<1x1x128xf32, #tpu.memory_space<vmem>>, vector<1x1x128xf32>,
    %21 = arith.mulf %15, %15 : vector<8x128xf32>
    %cst_14 = arith.constant dense<0.000000e+00> : vector<128xf32>
    %22 = vector.multi_reduction <add>, %21, %cst_14 [0] : vector<8x128xf32> to vector<128xf32>
    %23 = vector.shape_cast %22 : vector<128xf32> to vector<1x128xf32>
    %c0_15 = arith.constant 0 : index
    %c0_16 = arith.constant 0 : index
    %c0_17 = arith.constant 0 : index
    %24 = vector.load %arg8[%c0_15, %c0_16, %c0_17] : memref<1x1x128xf32, #tpu.memory_space<vmem>>, vector<1x1x128xf32>
    %25 = vector.shape_cast %24 : vector<1x1x128xf32> to vector<1x128xf32>
    %26 = vector.shape_cast %23 : vector<1x128xf32> to vector<1x1x128xf32>
    tpu.vector_store %arg8[%c0_15, %c0_16, %c0_17], %26 {strides = array<i32>} : memref<1x1x128xf32, #tpu.memory_space<vmem>>, vector<1x1x128xf32>,
    %27 = arith.truncf %15 : vector<8x128xf32> to vector<8x128xbf16>
    %c0_18 = arith.constant 0 : index
    %c0_19 = arith.constant 0 : index
    %28 = vector.load %arg6[%c0_18, %c0_19] : memref<8x128xbf16, #tpu.memory_space<vmem>>, vector<8x128xbf16>
    tpu.vector_store %arg6[%c0_18, %c0_19], %27 {strides = array<i32>} : memref<8x128xbf16, #tpu.memory_space<vmem>>, vector<8x128xbf16>,
    return
  }
  func.func @transform_0(%arg0: i32) -> (i32, i32) {
    %c0_i32 = arith.constant 0 : i32
    %c0_i32_0 = arith.constant 0 : i32
    return %arg0, %c0_i32 : i32, i32
  }
  func.func @transform_1(%arg0: i32) -> (i32, i32) {
    %c0_i32 = arith.constant 0 : i32
    %c0_i32_0 = arith.constant 0 : i32
    %c0_i32_1 = arith.constant 0 : i32
    return %c0_i32, %c0_i32_0 : i32, i32
  }
  func.func @transform_2(%arg0: i32) -> (i32, i32) {
    %c0_i32 = arith.constant 0 : i32
    %c0_i32_0 = arith.constant 0 : i32
    %c0_i32_1 = arith.constant 0 : i32
    return %c0_i32, %c0_i32_0 : i32, i32
  }
  func.func @transform_3(%arg0: i32) -> (i32, i32) {
    %c0_i32 = arith.constant 0 : i32
    %c0_i32_0 = arith.constant 0 : i32
    %c0_i32_1 = arith.constant 0 : i32
    return %c0_i32, %c0_i32_0 : i32, i32
  }
  func.func @transform_4(%arg0: i32) -> (i32, i32) {
    %c0_i32 = arith.constant 0 : i32
    %c0_i32_0 = arith.constant 0 : i32
    %c0_i32_1 = arith.constant 0 : i32
    return %c0_i32, %c0_i32_0 : i32, i32
  }
  func.func @transform_5(%arg0: i32) -> (i32, i32) {
    %c0_i32 = arith.constant 0 : i32
    %c0_i32_0 = arith.constant 0 : i32
    return %arg0, %c0_i32 : i32, i32
  }
  func.func @transform_6(%arg0: i32) -> (i32, i32, i32) {
    %c0_i32 = arith.constant 0 : i32
    %c0_i32_0 = arith.constant 0 : i32
    %c0_i32_1 = arith.constant 0 : i32
    return %arg0, %c0_i32, %c0_i32_0 : i32, i32, i32
  }
  func.func @transform_7(%arg0: i32) -> (i32, i32, i32) {
    %c0_i32 = arith.constant 0 : i32
    %c0_i32_0 = arith.constant 0 : i32
    %c0_i32_1 = arith.constant 0 : i32
    return %arg0, %c0_i32, %c0_i32_0 : i32, i32, i32
  }
}

module attributes {stable_mosaic.version = 11 : i64} {
  func.func @kernel(%arg0: i32, %arg1: i32, %arg2: memref<8x128xbf16, #tpu.memory_space<vmem>>, %arg3: memref<1x128xf32, #tpu.memory_space<vmem>>, %arg4: memref<1x128xf32, #tpu.memory_space<vmem>>, %arg5: memref<128x256xbf16, #tpu.memory_space<vmem>>, %arg6: memref<1x256xf32, #tpu.memory_space<vmem>>, %arg7: memref<8x256xbf16, #tpu.memory_space<vmem>>, %arg8: memref<1x1x256xf32, #tpu.memory_space<vmem>>) attributes {dimension_semantics = [#tpu.dimension_semantics<parallel>, #tpu.dimension_semantics<parallel>], iteration_bounds = array<i64: 2, 4>, scalar_prefetch = 0 : i64, scratch_operands = 0 : i64, tpu.core_type = #tpu.core_type<tc>, window_params = [{transform_indices = @transform_0, window_bounds = array<i64: 8, 128>}, {pipeline_mode = #tpu.pipeline_mode<synchronous>, transform_indices = @transform_1, window_bounds = array<i64: 1, 128>}, {pipeline_mode = #tpu.pipeline_mode<synchronous>, transform_indices = @transform_2, window_bounds = array<i64: 1, 128>}, {transform_indices = @transform_3, window_bounds = array<i64: 128, 256>}, {transform_indices = @transform_4, window_bounds = array<i64: 1, 256>}, {transform_indices = @transform_5, window_bounds = array<i64: 8, 256>}, {transform_indices = @transform_6, window_bounds = array<i64: 1, 1, 256>}]} {
    %c0 = arith.constant 0 : index
    %c0_0 = arith.constant 0 : index
    %0 = vector.load %arg2[%c0, %c0_0] : memref<8x128xbf16, #tpu.memory_space<vmem>>, vector<8x128xbf16>
    %1 = arith.extf %0 : vector<8x128xbf16> to vector<8x128xf32>
    %c0_1 = arith.constant 0 : index
    %c0_2 = arith.constant 0 : index
    %2 = vector.load %arg3[%c0_1, %c0_2] : memref<1x128xf32, #tpu.memory_space<vmem>>, vector<1x128xf32>
    %3 = vector.broadcast %2 : vector<1x128xf32> to vector<8x128xf32>
    %4 = arith.mulf %1, %3 : vector<8x128xf32>
    %c0_3 = arith.constant 0 : index
    %c0_4 = arith.constant 0 : index
    %5 = vector.load %arg4[%c0_3, %c0_4] : memref<1x128xf32, #tpu.memory_space<vmem>>, vector<1x128xf32>
    %6 = vector.broadcast %5 : vector<1x128xf32> to vector<8x128xf32>
    %7 = arith.addf %4, %6 : vector<8x128xf32>
    %cst = arith.constant 0.000000e+00 : f32
    %8 = vector.broadcast %cst : f32 to vector<8x128xf32>
    %9 = arith.maximumf %7, %8 : vector<8x128xf32>
    %10 = arith.truncf %9 : vector<8x128xf32> to vector<8x128xbf16>
    %c0_5 = arith.constant 0 : index
    %c0_6 = arith.constant 0 : index
    %11 = vector.load %arg5[%c0_5, %c0_6] : memref<128x256xbf16, #tpu.memory_space<vmem>>, vector<128x256xbf16>
    %cst_7 = arith.constant dense<0.000000e+00> : vector<8x256xf32>
    %12 = tpu.matmul %10, %11, %cst_7 {dimension_numbers = #tpu.dot_dimension_numbers<[1], [0], [0], [1], [0, 0, 1, 1], [], []>} : vector<8x128xbf16>, vector<128x256xbf16>, vector<8x256xf32> -> vector<8x256xf32>
    %c0_8 = arith.constant 0 : index
    %c0_9 = arith.constant 0 : index
    %13 = vector.load %arg6[%c0_8, %c0_9] : memref<1x256xf32, #tpu.memory_space<vmem>>, vector<1x256xf32>
    %14 = vector.broadcast %13 : vector<1x256xf32> to vector<8x256xf32>
    %15 = arith.addf %12, %14 : vector<8x256xf32>
    %16 = arith.truncf %15 : vector<8x256xf32> to vector<8x256xbf16>
    %c0_10 = arith.constant 0 : index
    %c0_11 = arith.constant 0 : index
    %17 = vector.load %arg7[%c0_10, %c0_11] : memref<8x256xbf16, #tpu.memory_space<vmem>>, vector<8x256xbf16>
    tpu.vector_store %arg7[%c0_10, %c0_11], %16 {strides = array<i32>} : memref<8x256xbf16, #tpu.memory_space<vmem>>, vector<8x256xbf16>,
    %18 = vector.shape_cast %15 : vector<8x256xf32> to vector<1x8x256xf32>
    %cst_12 = arith.constant dense<0xFF800000> : vector<1x256xf32>
    %19 = vector.multi_reduction <maximumf>, %18, %cst_12 [1] : vector<1x8x256xf32> to vector<1x256xf32>
    %c0_13 = arith.constant 0 : index
    %c0_14 = arith.constant 0 : index
    %c0_15 = arith.constant 0 : index
    %20 = vector.load %arg8[%c0_13, %c0_14, %c0_15] : memref<1x1x256xf32, #tpu.memory_space<vmem>>, vector<1x1x256xf32>
    %21 = vector.shape_cast %20 : vector<1x1x256xf32> to vector<1x256xf32>
    %22 = vector.shape_cast %19 : vector<1x256xf32> to vector<1x1x256xf32>
    tpu.vector_store %arg8[%c0_13, %c0_14, %c0_15], %22 {strides = array<i32>} : memref<1x1x256xf32, #tpu.memory_space<vmem>>, vector<1x1x256xf32>,
    return
  }
  func.func @transform_0(%arg0: i32, %arg1: i32) -> (i32, i32) {
    %c0_i32 = arith.constant 0 : i32
    %c0_i32_0 = arith.constant 0 : i32
    return %arg0, %c0_i32 : i32, i32
  }
  func.func @transform_1(%arg0: i32, %arg1: i32) -> (i32, i32) {
    %c0_i32 = arith.constant 0 : i32
    %c0_i32_0 = arith.constant 0 : i32
    %c0_i32_1 = arith.constant 0 : i32
    return %c0_i32, %c0_i32_0 : i32, i32
  }
  func.func @transform_2(%arg0: i32, %arg1: i32) -> (i32, i32) {
    %c0_i32 = arith.constant 0 : i32
    %c0_i32_0 = arith.constant 0 : i32
    %c0_i32_1 = arith.constant 0 : i32
    return %c0_i32, %c0_i32_0 : i32, i32
  }
  func.func @transform_3(%arg0: i32, %arg1: i32) -> (i32, i32) {
    %c0_i32 = arith.constant 0 : i32
    %c0_i32_0 = arith.constant 0 : i32
    return %c0_i32, %arg1 : i32, i32
  }
  func.func @transform_4(%arg0: i32, %arg1: i32) -> (i32, i32) {
    %c0_i32 = arith.constant 0 : i32
    %c0_i32_0 = arith.constant 0 : i32
    return %c0_i32, %arg1 : i32, i32
  }
  func.func @transform_5(%arg0: i32, %arg1: i32) -> (i32, i32) {
    %c0_i32 = arith.constant 0 : i32
    return %arg0, %arg1 : i32, i32
  }
  func.func @transform_6(%arg0: i32, %arg1: i32) -> (i32, i32, i32) {
    %c0_i32 = arith.constant 0 : i32
    %c0_i32_0 = arith.constant 0 : i32
    return %arg0, %c0_i32, %arg1 : i32, i32, i32
  }
}

module attributes {stable_mosaic.version = 11 : i64} {
  func.func @_head_kernel(%arg0: memref<2x1024xf32, #tpu.memory_space<vmem>>, %arg1: memref<1024x512xbf16, #tpu.memory_space<vmem>>, %arg2: memref<1x512xf32, #tpu.memory_space<vmem>>, %arg3: memref<512x256xbf16, #tpu.memory_space<vmem>>, %arg4: memref<1x256xf32, #tpu.memory_space<vmem>>, %arg5: memref<256x128xbf16, #tpu.memory_space<vmem>>, %arg6: memref<1x128xf32, #tpu.memory_space<vmem>>, %arg7: memref<2x128xf32, #tpu.memory_space<vmem>>) attributes {dimension_semantics = [], scalar_prefetch = 0 : i64, scratch_operands = 0 : i64, tpu.core_type = #tpu.core_type<tc>} {
    %c0 = arith.constant 0 : index
    %c0_0 = arith.constant 0 : index
    %0 = vector.load %arg0[%c0, %c0_0] : memref<2x1024xf32, #tpu.memory_space<vmem>>, vector<2x1024xf32>
    %1 = arith.truncf %0 : vector<2x1024xf32> to vector<2x1024xbf16>
    %c0_1 = arith.constant 0 : index
    %c0_2 = arith.constant 0 : index
    %2 = vector.load %arg1[%c0_1, %c0_2] : memref<1024x512xbf16, #tpu.memory_space<vmem>>, vector<1024x512xbf16>
    %cst = arith.constant dense<0.000000e+00> : vector<2x512xf32>
    %3 = tpu.matmul %1, %2, %cst {dimension_numbers = #tpu.dot_dimension_numbers<[1], [0], [0], [1], [0, 0, 1, 1], [], []>} : vector<2x1024xbf16>, vector<1024x512xbf16>, vector<2x512xf32> -> vector<2x512xf32>
    %c0_3 = arith.constant 0 : index
    %c0_4 = arith.constant 0 : index
    %4 = vector.load %arg2[%c0_3, %c0_4] : memref<1x512xf32, #tpu.memory_space<vmem>>, vector<1x512xf32>
    %5 = vector.broadcast %4 : vector<1x512xf32> to vector<2x512xf32>
    %6 = arith.addf %3, %5 : vector<2x512xf32>
    %cst_5 = arith.constant 0.000000e+00 : f32
    %7 = vector.broadcast %cst_5 : f32 to vector<2x512xf32>
    %8 = arith.maximumf %6, %7 : vector<2x512xf32>
    %9 = arith.truncf %8 : vector<2x512xf32> to vector<2x512xbf16>
    %c0_6 = arith.constant 0 : index
    %c0_7 = arith.constant 0 : index
    %10 = vector.load %arg3[%c0_6, %c0_7] : memref<512x256xbf16, #tpu.memory_space<vmem>>, vector<512x256xbf16>
    %cst_8 = arith.constant dense<0.000000e+00> : vector<2x256xf32>
    %11 = tpu.matmul %9, %10, %cst_8 {dimension_numbers = #tpu.dot_dimension_numbers<[1], [0], [0], [1], [0, 0, 1, 1], [], []>} : vector<2x512xbf16>, vector<512x256xbf16>, vector<2x256xf32> -> vector<2x256xf32>
    %c0_9 = arith.constant 0 : index
    %c0_10 = arith.constant 0 : index
    %12 = vector.load %arg4[%c0_9, %c0_10] : memref<1x256xf32, #tpu.memory_space<vmem>>, vector<1x256xf32>
    %13 = vector.broadcast %12 : vector<1x256xf32> to vector<2x256xf32>
    %14 = arith.addf %11, %13 : vector<2x256xf32>
    %cst_11 = arith.constant 0.000000e+00 : f32
    %15 = vector.broadcast %cst_11 : f32 to vector<2x256xf32>
    %16 = arith.maximumf %14, %15 : vector<2x256xf32>
    %17 = arith.truncf %16 : vector<2x256xf32> to vector<2x256xbf16>
    %c0_12 = arith.constant 0 : index
    %c0_13 = arith.constant 0 : index
    %18 = vector.load %arg5[%c0_12, %c0_13] : memref<256x128xbf16, #tpu.memory_space<vmem>>, vector<256x128xbf16>
    %cst_14 = arith.constant dense<0.000000e+00> : vector<2x128xf32>
    %19 = tpu.matmul %17, %18, %cst_14 {dimension_numbers = #tpu.dot_dimension_numbers<[1], [0], [0], [1], [0, 0, 1, 1], [], []>} : vector<2x256xbf16>, vector<256x128xbf16>, vector<2x128xf32> -> vector<2x128xf32>
    %c0_15 = arith.constant 0 : index
    %c0_16 = arith.constant 0 : index
    %20 = vector.load %arg6[%c0_15, %c0_16] : memref<1x128xf32, #tpu.memory_space<vmem>>, vector<1x128xf32>
    %21 = vector.broadcast %20 : vector<1x128xf32> to vector<2x128xf32>
    %22 = arith.addf %19, %21 : vector<2x128xf32>
    %c0_17 = arith.constant 0 : index
    %c0_18 = arith.constant 0 : index
    %23 = vector.load %arg7[%c0_17, %c0_18] : memref<2x128xf32, #tpu.memory_space<vmem>>, vector<2x128xf32>
    tpu.vector_store %arg7[%c0_17, %c0_18], %22 {strides = array<i32>} : memref<2x128xf32, #tpu.memory_space<vmem>>, vector<2x128xf32>,
    return
  }
}

</mosaic_0001>

<bundles_post_ra>
// kernel: pointnet_tnet_forward.12
= control target key start
LH: loop header
LB: loop body
LE: loop exit
PB: predicated region body
PF: predicated region fallthrough
CT: control target
= control target key end

     0   :  { %s568_s24 = smov 0   ;;  %s617_s0 = inlined_call_operand.vmem [shape: bf16[16,64], index: 0, kind: input, shape index: {}]   ;;  %s618_s1 = inlined_call_operand.vmem [shape: f32[1,64], index: 1, kind: input, shape index: {}]   ;;  %s619_s2 = inlined_call_operand.vmem [shape: f32[1,64], index: 2, kind: input, shape index: {}]   ;;  %s620_s3 = inlined_call_operand.vmem [shape: bf16[64,128], index: 3, kind: input, shape index: {}]   ;;  %s621_s4 = inlined_call_operand.vmem [shape: f32[1,128], index: 4, kind: input, shape index: {}]   ;;  %s622_s5 = inlined_call_operand.vmem [shape: bf16[16,128], index: 5, kind: output, shape index: {0}]   ;;  %s623_s6 = inlined_call_operand.vmem [shape: f32[2,1,128], index: 6, kind: output, shape index: {1}]   ;;  %s624_s7 = inlined_call_operand.vmem [shape: f32[2,1,128], index: 7, kind: output, shape index: {2}]  }
   0x1 LB: > { %s479_s25 = sadd.s32 4294967295, %s526_s24   ;;  %p483_p0 = scmp.ge.s32.totalorder %s526_s24, 1  ;;  %s526_s24 = sphi %s568_s24, %s18_s24  }
   0x2   : > { %p241_p1 = scmp.lt.s32.totalorder %s526_s24, 3 }
   0x4   : > { %p242_p2 = pnand %p483_p0, %p241_p1 }
   0x5   : > { %p277_p3 = scmp.lt.s32.totalorder (!%p242_p2), %s479_s25, 1 }
   0x6   : > { %245 = sbr.rel (%p242_p2) target bundleno = 170 (0xaa), region = 40 }
   0xb   : > { %v508_v0 = vld [vmem:[%s620_s3 + $0x18] sm:$0xff]  ;;  %v507_v1 = vld [vmem:[%s620_s3 + $0x10] sm:$0xff]  ;;  %s626_s25 = smov (!%p277_p3, %s479_s25), 1  ;;  %v517_v2 = vld [vmem:[%s618_s1] ss:$0 sm:$0xff]  ;;  %vm342_vm0 = vcmask 523264  }
   0xc   : > { %350 = vmatpush.bf16.msra.mxu0 %v508_v0  ;;  %s484_s30 = sshll.u32 %s626_s25, 2  ;;  %v506_v3 = vld [vmem:[%s620_s3 + $0x8] sm:$0xff]  ;;  %v518_v6 = vld [vmem:[%s619_s2] ss:$0 sm:$0xff]  ;;  %s287_s28 = scalar_lea.vmem %s623_s6, %s626_s25 }
   0xd   : > { %s280_s10 = scalar_lea.vmem %s617_s0, %s484_s30  ;;  %v505_v8 = vld [vmem:[%s620_s3] sm:$0xff]  ;;  %s284_s23 = scalar_lea.vmem %s622_s5, %s484_s30 }
   0xe   : > { %v292_v4 = vld [vmem:[%s280_s10] sm:$0xf]  ;;  %s290_s8 = scalar_lea.vmem %s624_s7, %s626_s25 }
   0xf   : > { %v293_v5 = vunpack.c.l.bf16 %v292_v4  ;;  %v519_v12 = vld [vmem:[%s621_s4] ss:$0 sm:$0xff] }
  0x10   : > { %351 = vmatpush.bf16.msra.mxu0 %v507_v1 }
  0x11   : > { %v298_v7 = vmul.f32 %v517_v2, %v293_v5 }
  0x13   : > { %v303_v9 = vadd.f32 %v518_v6, %v298_v7 }
  0x14   : > { %352 = vmatpush.bf16.msra.mxu0 %v506_v3 }
  0x15   : > { %v304_v10 = vmax.f32 %v303_v9, 0.0 }
  0x17   : > { %v305_v11 = vpack.c.bf16 %v304_v10, %v304_v10 }
  0x18   : > { %353 = vmatpush.bf16.msra.mxu0 %v505_v8 }
  0x1b   : > { %502 = vmatmul.msk.bf16.vlgmr.msra.gmra.mxu0 %vm342_vm0, %v305_v11 }
  0x98   : > { %v355_v13 = vpop.f32.mrf.mxu0 }
  0x99   : > { %v356_v14 = vadd.f32 %v519_v12, %v355_v13 }
  0x9b   : > { %v359_v15 = vrot.slane %v356_v14, 4  ;;  %v366_v16 = vmul.f32 %v356_v14, %v356_v14  ;;  %v374_v17 = vpack.c.bf16 %v356_v14, %v356_v14 }
  0x9d   : > { %v360_v18 = vadd.f32 %v359_v15, %v356_v14  ;;  %v367_v19 = vrot.slane %v366_v16, 4  ;;  %375 = vst [vmem:[%s284_s23] sm:$0xf] %v374_v17 }
  0x9f   : > { %v361_v20 = vrot.slane %v360_v18, 2  ;;  %v368_v21 = vadd.f32 %v367_v19, %v366_v16 }
  0xa0   : > { %v357_v22 = vpop.f32.mrf.mxu0 }
  0xa1   : > { %v362_v23 = vadd.f32 %v361_v20, %v360_v18  ;;  %v369_v24 = vrot.slane %v368_v21, 2 }
  0xa3   : > { %v363_v25 = vrot.slane %v362_v23, 1  ;;  %v370_v26 = vadd.f32 %v369_v24, %v368_v21 }
  0xa5   : > { %v364_v27 = vadd.f32 %v363_v25, %v362_v23  ;;  %v371_v28 = vrot.slane %v370_v26, 1 }
  0xa7   : > { %365 = vst [vmem:[%s287_s28] sm:$0x1] %v364_v27  ;;  %v372_v29 = vadd.f32 %v371_v28, %v370_v26 }
  0xa9   : > { %373 = vst [vmem:[%s290_s8] sm:$0x1] %v372_v29 }
  0xaa PF: > { %s18_s24 = sadd.s32 1, %s526_s24  }
  0xab   : > { %p15_p4 = scmp.ge.s32.totalorder %s18_s24, 4  }
  0xad   :  { %17 = sbr.rel (!%p15_p4) target bundleno = 1 (0x1), region = 94 }

// kernel: pointnet_tnet_forward.10
= control target key start
LH: loop header
LB: loop body
LE: loop exit
PB: predicated region body
PF: predicated region fallthrough
CT: control target
= control target key end

     0   :  { %s449_s18 = smov 0   ;;  %s484_s0 = inlined_call_operand.vmem [shape: f32[16,8], index: 0, kind: input, shape index: {}]   ;;  %s485_s1 = inlined_call_operand.vmem [shape: f32[8,64], index: 1, kind: input, shape index: {}]   ;;  %s486_s2 = inlined_call_operand.vmem [shape: f32[1,64], index: 2, kind: input, shape index: {}]   ;;  %s487_s3 = inlined_call_operand.vmem [shape: bf16[16,64], index: 3, kind: output, shape index: {0}]   ;;  %s488_s4 = inlined_call_operand.vmem [shape: f32[2,1,64], index: 4, kind: output, shape index: {1}]   ;;  %s489_s5 = inlined_call_operand.vmem [shape: f32[2,1,64], index: 5, kind: output, shape index: {2}]  }
   0x1 LB: > { %s392_s19 = sadd.s32 4294967295, %s417_s18   ;;  %p396_p0 = scmp.ge.s32.totalorder %s417_s18, 1  ;;  %s417_s18 = sphi %s449_s18, %s16_s18  }
   0x2   : > { %p191_p1 = scmp.lt.s32.totalorder %s417_s18, 3 }
   0x4   : > { %p192_p2 = pnand %p396_p0, %p191_p1 }
   0x5   : > { %p223_p3 = scmp.lt.s32.totalorder (!%p192_p2), %s392_s19, 1 }
   0x6   : > { %195 = sbr.rel (%p192_p2) target bundleno = 159 (0x9f), region = 32 }
   0xb   : > { %v238_v0 = vld [vmem:[%s485_s1] sm:$0xff]  ;;  %s491_s19 = smov (!%p223_p3, %s392_s19), 1  ;;  %vm243_vm0 = vcmask 64512   ;;  %vm267_vm1 = vcmask 523264   ;;  %vm287_vm2 = vcmask 519168   ;;  %vm275_vm3 = vcmask 516096  }
   0xc   : > { %262 = vmatpush.msra.mxu0 %v238_v0  ;;  %s397_s22 = sshll.u32 %s491_s19, 3  ;;  %v410_v2 = vld [vmem:[%s486_s2] ss:$0 sm:$0xff]  ;;  %s398_s28 = sshll.u32 %s491_s19, 2 }
   0xd   : > { %s226_s25 = scalar_lea.vmem %s484_s0, %s397_s22  ;;  %s230_s6 = scalar_lea.vmem %s487_s3, %s398_s28 }
   0xe   : > { %v237_v1 = vld [vmem:[%s226_s25] sm:$0xff]  ;;  %s233_s9 = scalar_lea.vmem %s488_s4, %s491_s19  ;;  %s236_s12 = scalar_lea.vmem %s489_s5, %s491_s19 }
   0xf   : > { %399 = vmatmul.msk.f32.vlgmr.msra.gmra.mxu0 %vm243_vm0, %v237_v1 }
  0x8c   : > { %v264_v3 = vpop.f32.mrf.mxu0 }
  0x8d   : > { %v265_v4 = vadd.f32 %v410_v2, %v264_v3 }
  0x8f   : > { %v268_v5 = vsel %vm267_vm1, %v265_v4, 0.0  ;;  %v277_v6 = vmul.f32 %v265_v4, %v265_v4  ;;  %v286_v7 = vpack.c.bf16 %v265_v4, %v265_v4 }
  0x90   : > { %v269_v8 = vrot.slane %v268_v5, 4 }
  0x91   : > { %v278_v9 = vsel %vm267_vm1, %v277_v6, 0.0  ;;  %288 = vst.msk [vmem:[%s230_s6] sm:$0xf] %vm287_vm2, %v286_v7 }
  0x92   : > { %v270_v10 = vadd.f32 %v269_v8, %v268_v5  ;;  %v279_v11 = vrot.slane %v278_v9, 4 }
  0x94   : > { %v271_v12 = vrot.slane %v270_v10, 2  ;;  %v280_v13 = vadd.f32 %v279_v11, %v278_v9 }
  0x96   : > { %v272_v14 = vadd.f32 %v271_v12, %v270_v10  ;;  %v281_v15 = vrot.slane %v280_v13, 2 }
  0x98   : > { %v273_v16 = vrot.slane %v272_v14, 1  ;;  %v282_v17 = vadd.f32 %v281_v15, %v280_v13 }
  0x9a   : > { %v274_v18 = vadd.f32 %v273_v16, %v272_v14  ;;  %v283_v19 = vrot.slane %v282_v17, 1 }
  0x9c   : > { %276 = vst.msk [vmem:[%s233_s9] sm:$0x1] %vm275_vm3, %v274_v18  ;;  %v284_v20 = vadd.f32 %v283_v19, %v282_v17 }
  0x9e   : > { %285 = vst.msk [vmem:[%s236_s12] sm:$0x1] %vm275_vm3, %v284_v20 }
  0x9f PF: > { %s16_s18 = sadd.s32 1, %s417_s18  }
  0xa0   : > { %p13_p4 = scmp.ge.s32.totalorder %s16_s18, 4  }
  0xa2   :  { %15 = sbr.rel (!%p13_p4) target bundleno = 1 (0x1), region = 86 }

// kernel: pointnet_tnet_forward.11
= control target key start
LH: loop header
LB: loop body
LE: loop exit
PB: predicated region body
PF: predicated region fallthrough
CT: control target
= control target key end

     0   :  { %s572_s24 = smov 0   ;;  %s621_s0 = inlined_call_operand.vmem [shape: bf16[16,64], index: 0, kind: input, shape index: {}]   ;;  %s622_s1 = inlined_call_operand.vmem [shape: f32[1,64], index: 1, kind: input, shape index: {}]   ;;  %s623_s2 = inlined_call_operand.vmem [shape: f32[1,64], index: 2, kind: input, shape index: {}]   ;;  %s624_s3 = inlined_call_operand.vmem [shape: bf16[64,64], index: 3, kind: input, shape index: {}]   ;;  %s625_s4 = inlined_call_operand.vmem [shape: f32[1,64], index: 4, kind: input, shape index: {}]   ;;  %s626_s5 = inlined_call_operand.vmem [shape: bf16[16,64], index: 5, kind: output, shape index: {0}]   ;;  %s627_s6 = inlined_call_operand.vmem [shape: f32[2,1,64], index: 6, kind: output, shape index: {1}]   ;;  %s628_s7 = inlined_call_operand.vmem [shape: f32[2,1,64], index: 7, kind: output, shape index: {2}]  }
   0x1 LB: > { %s483_s25 = sadd.s32 4294967295, %s530_s24   ;;  %p487_p0 = scmp.ge.s32.totalorder %s530_s24, 1  ;;  %s530_s24 = sphi %s572_s24, %s18_s24  }
   0x2   : > { %p241_p1 = scmp.lt.s32.totalorder %s530_s24, 3 }
   0x4   : > { %p242_p2 = pnand %p487_p0, %p241_p1 }
   0x5   : > { %p277_p3 = scmp.lt.s32.totalorder (!%p242_p2), %s483_s25, 1 }
   0x6   : > { %245 = sbr.rel (%p242_p2) target bundleno = 171 (0xab), region = 40 }
   0xb   : > { %v512_v0 = vld [vmem:[%s624_s3 + $0x18] sm:$0xff]  ;;  %v511_v1 = vld [vmem:[%s624_s3 + $0x10] sm:$0xff]  ;;  %s630_s25 = smov (!%p277_p3, %s483_s25), 1  ;;  %v521_v2 = vld [vmem:[%s622_s1] ss:$0 sm:$0xff]  ;;  %vm342_vm0 = vcmask 523264  }
   0xc   : > { %350 = vmatpush.bf16.msra.mxu0 %v512_v0  ;;  %s488_s30 = sshll.u32 %s630_s25, 2  ;;  %v510_v3 = vld [vmem:[%s624_s3 + $0x8] sm:$0xff]  ;;  %v522_v6 = vld [vmem:[%s623_s2] ss:$0 sm:$0xff]  ;;  %vm378_vm1 = vcmask 519168   ;;  %s287_s28 = scalar_lea.vmem %s627_s6, %s630_s25  ;;  %vm366_vm2 = vcmask 516096  }
   0xd   : > { %s280_s10 = scalar_lea.vmem %s621_s0, %s488_s30  ;;  %v509_v8 = vld [vmem:[%s624_s3] sm:$0xff]  ;;  %s284_s23 = scalar_lea.vmem %s626_s5, %s488_s30 }
   0xe   : > { %v292_v4 = vld [vmem:[%s280_s10] sm:$0xf]  ;;  %s290_s8 = scalar_lea.vmem %s628_s7, %s630_s25 }
   0xf   : > { %v293_v5 = vunpack.c.l.bf16 %v292_v4  ;;  %v523_v12 = vld [vmem:[%s625_s4] ss:$0 sm:$0xff] }
  0x10   : > { %351 = vmatpush.bf16.msra.mxu0 %v511_v1 }
  0x11   : > { %v298_v7 = vmul.f32 %v521_v2, %v293_v5 }
  0x13   : > { %v303_v9 = vadd.f32 %v522_v6, %v298_v7 }
  0x14   : > { %352 = vmatpush.bf16.msra.mxu0 %v510_v3 }
  0x15   : > { %v304_v10 = vmax.f32 %v303_v9, 0.0 }
  0x17   : > { %v305_v11 = vpack.c.bf16 %v304_v10, %v304_v10 }
  0x18   : > { %353 = vmatpush.bf16.msra.mxu0 %v509_v8 }
  0x1b   : > { %506 = vmatmul.msk.bf16.vlgmr.msra.gmra.mxu0 %vm342_vm0, %v305_v11 }
  0x98   : > { %v355_v13 = vpop.f32.mrf.mxu0 }
  0x99   : > { %v356_v14 = vadd.f32 %v523_v12, %v355_v13 }
  0x9b   : > { %v359_v15 = vsel %vm342_vm0, %v356_v14, 0.0  ;;  %v368_v16 = vmul.f32 %v356_v14, %v356_v14  ;;  %v377_v17 = vpack.c.bf16 %v356_v14, %v356_v14 }
  0x9c   : > { %v360_v18 = vrot.slane %v359_v15, 4 }
  0x9d   : > { %v369_v19 = vsel %vm342_vm0, %v368_v16, 0.0  ;;  %379 = vst.msk [vmem:[%s284_s23] sm:$0xf] %vm378_vm1, %v377_v17 }
  0x9e   : > { %v361_v20 = vadd.f32 %v360_v18, %v359_v15  ;;  %v370_v21 = vrot.slane %v369_v19, 4 }
  0xa0   : > { %v362_v22 = vrot.slane %v361_v20, 2  ;;  %v371_v23 = vadd.f32 %v370_v21, %v369_v19  ;;  %v357_v24 = vpop.f32.mrf.mxu0 }
  0xa2   : > { %v363_v25 = vadd.f32 %v362_v22, %v361_v20  ;;  %v372_v26 = vrot.slane %v371_v23, 2 }
  0xa4   : > { %v364_v27 = vrot.slane %v363_v25, 1  ;;  %v373_v28 = vadd.f32 %v372_v26, %v371_v23 }
  0xa6   : > { %v365_v29 = vadd.f32 %v364_v27, %v363_v25  ;;  %v374_v30 = vrot.slane %v373_v28, 1 }
  0xa8   : > { %367 = vst.msk [vmem:[%s287_s28] sm:$0x1] %vm366_vm2, %v365_v29  ;;  %v375_v31 = vadd.f32 %v374_v30, %v373_v28 }
  0xaa   : > { %376 = vst.msk [vmem:[%s290_s8] sm:$0x1] %vm366_vm2, %v375_v31 }
  0xab PF: > { %s18_s24 = sadd.s32 1, %s530_s24  }
  0xac   : > { %p15_p4 = scmp.ge.s32.totalorder %s18_s24, 4  }
  0xae   :  { %17 = sbr.rel (!%p15_p4) target bundleno = 1 (0x1), region = 94 }

// kernel: pointnet_tnet_forward.13
= control target key start
LH: loop header
LB: loop body
LE: loop exit
PB: predicated region body
PF: predicated region fallthrough
CT: control target
= control target key end

     0   :  { %10 = vsyncpa [#allocation3], 0  ;;  %s1042_s0 = inlined_call_operand.vmem [shape: bf16[16,128], index: 0, kind: input, shape index: {}]   ;;  %s1043_s1 = inlined_call_operand.vmem [shape: f32[1,128], index: 1, kind: input, shape index: {}]   ;;  %s1044_s2 = inlined_call_operand.vmem [shape: f32[1,128], index: 2, kind: input, shape index: {}]   ;;  %s1045_s3 = inlined_call_operand.hbm [shape: bf16[128,1024], index: 3, kind: input, shape index: {}]   ;;  %s1046_s4 = inlined_call_operand.vmem [shape: f32[1,1024], index: 4, kind: input, shape index: {}]   ;;  %s1047_s5 = inlined_call_operand.vmem [shape: f32[2,1,1024], index: 5, kind: output, shape index: {}]  }
   0x1   :  { %12 = vsyncpa [#allocation3 + $0x1], 0  ;;  %s883_s18 = smov 0   ;;  %s885_s19 = smov 0  }
   0x2   :  { %s887_s20 = smov 0   ;;  %s889_s21 = smov 0  }
   0x3   :  { %s891_s22 = smov 0   ;;  %s893_s23 = smov 0  }
   0x4   :  { %s895_s24 = smov 0   ;;  %s897_s25 = smov 0  }
   0x5 LB: > { %s580_s26 = sadd.s32 4294967295, %s848_s25   ;;  %s27_s27 = sadd.s32 1, %s840_s23  ;;  %s848_s25 = sphi %s897_s25, %s18_s25   ;;  %s844_s24 = sphi %s895_s24, %s1056_s24   ;;  %s840_s23 = sphi %s893_s23, %s1055_s23   ;;  %s836_s22 = sphi %s891_s22, %s1054_s22   ;;  %s832_s21 = sphi %s889_s21, %s1053_s21   ;;  %s828_s20 = sphi %s887_s20, %s1052_s20   ;;  %s824_s19 = sphi %s885_s19, %s1051_s19   ;;  %s820_s18 = sphi %s883_s18, %s1050_s18  }
   0x6   : > { %p28_p0 = scmp.ge.s32.totalorder %s27_s27, 4  ;;  %s30_s28 = sadd.s32 1, %s844_s24 }
   0x7   : > { %s105_s29 = sadd.s32 1, %s828_s20  ;;  %p112_p1 = scmp.ne.s32.totalorder %s828_s20, %s824_s19 }
   0x8   : > { %s1058_s27 = smov (%p28_p0, %s27_s27), 0  ;;  %s1060_s28 = smov (!%p28_p0, %s30_s28), %s844_s24 }
   0x9   : > { %s102_s30 = ssub.s32 %s840_s23, %s1058_s27  ;;  %p113_p2 = scmp.eq.s32.totalorder %s848_s25, 0 }
   0xa   : > { %p32_p3 = scmp.ge.s32.totalorder %s1060_s28, 2  ;;  %p103_p4 = scmp.eq.s32.totalorder %s102_s30, 0 }
   0xb   : > { %p933_p5 = por %p113_p2, %p112_p1  ;;  %p118_p6 = scmp.ne.s32.totalorder %s824_s19, %s820_s18 }
   0xc   : > { %s1062_s28 = smov (%p32_p3, %s1060_s28), 0  ;;  %p119_p7 = scmp.eq.s32.totalorder %s580_s26, 0 }
   0xd   : > { %s941_s7 = scalar_select %p103_p4, %s828_s20, %s105_s29  }
   0xe   : > { %p682_p8 = scmp.lt.s32.totalorder %s848_s25, 8  ;;  %s209_s8 = sand.u32 1, %s828_s20  }
   0xf   : > { %p945_p9 = por %p119_p7, %p118_p6  ;;  %s584_s10 = sshll.u32 %s209_s8, 7 }
  0x10   : > { %s659_s11 = sshll.u32 %s840_s23, 3  ;;  %s213_s16 = scalar_lea.vmem [#allocation2], %s584_s10 }
  0x11   : > { %s218_s14 = scalar_lea.hbm %s1045_s3, %s659_s11  ;;  %s221_s17 = sshll.u32 %s213_s16, 4  ;;  %s222_s17 = int_to_ptr.vmem [resolvable:$true] %s221_s17 }
  0x12   : > { %s219_s15 = sshll.u32 %s218_s14, 4  ;;  %p679_p10 = pnand %p682_p8, %p933_p5  ;;  %s220_s15 = int_to_ptr.hbm [resolvable:$true] %s219_s15 }
  0x13   : > { %p587_p11 = scmp.ge.s32.totalorder %s848_s25, 1  ;;  %s210_s18 = scalar_lea.sflag [#allocation3], %s209_s8 }
  0x14   : > { %s850_s26 = smov 512   ;;  %s851_s29 = smov 128  }
  0x15   : > { %s852_s30 = smov 8   ;;  %p237_p12 = scmp.lt.s32.totalorder %s848_s25, 9 }
  0x16   : > { %681 = dma.hbm_to_vmem [thread:$0]  (!%p679_p10), %s220_s15, 2048, %s222_s17, %s210_s18, %s850_s26, %s851_s29, %s852_s30  }
  0x17   : > { %p238_p13 = pnand %p587_p11, %p237_p12 }
  0x18   : > { %s243_s12 = sand.u32 (!%p238_p13), 1, %s824_s19  }
  0x19   : > { %241 = sbr.rel (%p238_p13) target bundleno = 210 (0xd2), region = 40  ;;  %s588_s11 = sshll.u32 (!%p238_p13), %s243_s12, 7 }
  0x1a   : > { %s244_s13 = scalar_lea.sflag (!%p238_p13), [#allocation3], %s243_s12  ;;  %s958_s10 = scalar_lea.vmem (!%p238_p13), [#allocation2], %s588_s11 }
  0x1e   : > { %815 = dma.done.wait (%p945_p9), %s244_s13, 2048  }
  0x1f   : > { %817 = vsyncadd (%p945_p9), %s244_s13, 4294965248  ;;  %p286_p0 = scmp.lt.s32.totalorder %s836_s22, 1  ;;  %v651_v0 = vld [vmem:[%s958_s10 + $0x70] sm:$0xf]  ;;  %v675_v1 = vld [vmem:[%s958_s10 + $0x74] sm:$0xf0] }
  0x20   : > { %v674_v2 = vld [vmem:[%s958_s10 + $0x74] sm:$0xf]  ;;  %v652_v3 = vor.u32 %v675_v1, %v651_v0  ;;  %v653_v4 = vld [vmem:[%s958_s10 + $0x78] sm:$0xf0]  ;;  %v643_v5 = vld [vmem:[%s958_s10 + $0x60] sm:$0xf] }
  0x21   : > { %s1064_s22 = smov (!%p286_p0, %s836_s22), 1  ;;  %v673_v6 = vld [vmem:[%s958_s10 + $0x64] sm:$0xf0]  ;;  %v656_v7 = vor.u32 %v674_v2, %v653_v4  ;;  %v672_v8 = vld [vmem:[%s958_s10 + $0x64] sm:$0xf]  ;;  %s590_s26 = sshll.u32 %s832_s21, 1 }
  0x22   : > { %v645_v9 = vld [vmem:[%s958_s10 + $0x68] sm:$0xf0]  ;;  %421 = vmatpush.bf16.msra.mxu0 %v652_v3  ;;  %v644_v10 = vor.u32 %v673_v6, %v643_v5  ;;  %v635_v12 = vld [vmem:[%s958_s10 + $0x50] sm:$0xf]  ;;  %v671_v13 = vld [vmem:[%s958_s10 + $0x54] sm:$0xf0] }
  0x23   : > { %434 = vmatpush.bf16.msra.mxu1 %v656_v7  ;;  %v648_v11 = vor.u32 %v672_v8, %v645_v9  ;;  %v670_v14 = vld [vmem:[%s958_s10 + $0x54] sm:$0xf]  ;;  %v637_v15 = vld [vmem:[%s958_s10 + $0x58] sm:$0xf0]  ;;  %s589_s6 = sshll.u32 %s1064_s22, 2  ;;  %v636_v16 = vor.u32 %v671_v13, %v635_v12  ;;  %p292_p1 = scmp.lt.s32.totalorder %s590_s26, 7 }
  0x24   : > { %v640_v17 = vor.u32 %v670_v14, %v637_v15  ;;  %v627_v18 = vld [vmem:[%s958_s10 + $0x40] sm:$0xf]  ;;  %v669_v19 = vld [vmem:[%s958_s10 + $0x44] sm:$0xf0]  ;;  %s289_s14 = scalar_lea.vmem %s1042_s0, %s589_s6  ;;  %v668_v20 = vld [vmem:[%s958_s10 + $0x44] sm:$0xf] }
  0x25   : > { %v629_v21 = vld [vmem:[%s958_s10 + $0x48] sm:$0xf0]  ;;  %v628_v22 = vor.u32 %v669_v19, %v627_v18  ;;  %v305_v23 = vld [vmem:[%s289_s14] sm:$0xf]  ;;  %v619_v25 = vld [vmem:[%s958_s10 + $0x30] sm:$0xf] }
  0x26   : > { %422 = vmatpush.bf16.msra.mxu0 %v644_v10  ;;  %v632_v24 = vor.u32 %v668_v20, %v629_v21  ;;  %v667_v26 = vld [vmem:[%s958_s10 + $0x34] sm:$0xf0]  ;;  %v666_v27 = vld [vmem:[%s958_s10 + $0x34] sm:$0xf]  ;;  %v621_v28 = vld [vmem:[%s958_s10 + $0x38] sm:$0xf0]  ;;  %v306_v29 = vunpack.c.l.bf16 %v305_v23 }
  0x27   : > { %435 = vmatpush.bf16.msra.mxu1 %v648_v11  ;;  %v750_v30 = vld [vmem:[%s1043_s1] ss:$0 sm:$0xff]  ;;  %v620_v31 = vor.u32 %v667_v26, %v619_v25  ;;  %v624_v32 = vor.u32 %v666_v27, %v621_v28  ;;  %v665_v34 = vld [vmem:[%s958_s10 + $0x24] sm:$0xf0]  ;;  %v664_v35 = vld [vmem:[%s958_s10 + $0x24] sm:$0xf]  ;;  %v465_v11 = vlaneseq }
  0x28   : > { %v611_v33 = vld [vmem:[%s958_s10 + $0x20] sm:$0xf]  ;;  %v613_v36 = vld [vmem:[%s958_s10 + $0x28] sm:$0xf0]  ;;  %v311_v37 = vmul.f32 %v750_v30, %v306_v29  ;;  %v603_v41 = vld [vmem:[%s958_s10 + $0x10] sm:$0xf] }
  0x29   : > { %v751_v38 = vld [vmem:[%s1044_s2] ss:$0 sm:$0xff]  ;;  %v612_v39 = vor.u32 %v665_v34, %v611_v33  ;;  %v616_v40 = vor.u32 %v664_v35, %v613_v36  ;;  %v663_v42 = vld [vmem:[%s958_s10 + $0x14] sm:$0xf0]  ;;  %v662_v43 = vld [vmem:[%s958_s10 + $0x14] sm:$0xf] }
  0x2a   : > { %423 = vmatpush.bf16.msra.mxu0 %v636_v16  ;;  %v605_v44 = vld [vmem:[%s958_s10 + $0x18] sm:$0xf0]  ;;  %v316_v45 = vadd.f32 %v751_v38, %v311_v37  ;;  %v604_v46 = vor.u32 %v663_v42, %v603_v41  ;;  %v595_v48 = vld [vmem:[%s958_s10] sm:$0xf]  ;;  %v661_v49 = vld [vmem:[%s958_s10 + $0x4] sm:$0xf0] }
  0x2b   : > { %436 = vmatpush.bf16.msra.mxu1 %v640_v17  ;;  %v608_v47 = vor.u32 %v662_v43, %v605_v44  ;;  %v660_v50 = vld [vmem:[%s958_s10 + $0x4] sm:$0xf]  ;;  %v597_v51 = vld [vmem:[%s958_s10 + $0x8] sm:$0xf0]  ;;  %v596_v53 = vor.u32 %v661_v49, %v595_v48  ;;  %s1066_s26 = smov (!%p292_p1, %s590_s26), 7  ;;  %s592_s21 = sshll.u32 %s1064_s22, 3 }
  0x2c   : > { %v317_v52 = vmax.f32 %v316_v45, 0.0  ;;  %v600_v54 = vor.u32 %v660_v50, %v597_v51  ;;  %s294_s12 = scalar_lea.vmem %s1046_s4, %s1066_s26  ;;  %s302_s11 = sadd.s32 %s592_s21, %s1066_s26  ;;  %vm462_vm0 = vcmask 1040384   ;;  %vm467_vm1 = vcmp.lt.s32.totalorder %v465_v11, 256 }
  0x2d   : > { %v335_v56 = vld [vmem:[%s294_s12] sm:$0x3]  ;;  %s303_s6 = scalar_lea.vmem %s1047_s5, %s302_s11 }
  0x2e   : > { %424 = vmatpush.bf16.msra.mxu0 %v628_v22  ;;  %v318_v55 = vpack.c.bf16 %v317_v52, %v317_v52  ;;  %v337_v57 = vperm.slane %v335_v56, 0  ;;  %v338_v58 = vperm.slane %v335_v56, 1 }
  0x2f   : > { %437 = vmatpush.bf16.msra.mxu1 %v632_v24 }
  0x32   : > { %425 = vmatpush.bf16.msra.mxu0 %v620_v31 }
  0x33   : > { %438 = vmatpush.bf16.msra.mxu1 %v624_v32 }
  0x36   : > { %426 = vmatpush.bf16.msra.mxu0 %v612_v39 }
  0x37   : > { %439 = vmatpush.bf16.msra.mxu1 %v616_v40 }
  0x3a   : > { %427 = vmatpush.bf16.msra.mxu0 %v604_v46 }
  0x3b   : > { %440 = vmatpush.bf16.msra.mxu1 %v608_v47 }
  0x3e   : > { %428 = vmatpush.bf16.msra.mxu0 %v596_v53 }
  0x3f   : > { %441 = vmatpush.bf16.msra.mxu1 %v600_v54 }
  0x41   : > { %429 = vmatmul.bf16.vlgmr.msra.gmra.mxu0 %v318_v55 }
  0x42   : > { %442 = vmatmul.bf16.vlgmr.msra.gmra.mxu1 %v318_v55 }
  0xbe   : > { %v430_v59 = vpop.f32.mrf.mxu0 }
  0xbf   : > { %v431_v60 = vadd.f32 %v430_v59, %v337_v57  ;;  %v443_v61 = vpop.f32.mrf.mxu1 }
  0xc0   : > { %v444_v62 = vadd.f32 %v443_v61, %v338_v58 }
  0xc1   : > { %v447_v63 = vrot.slane %v431_v60, 4 }
  0xc2   : > { %v453_v0 = vrot.slane %v444_v62, 4 }
  0xc3   : > { %v448_v1 = vmax.f32 %v431_v60, %v447_v63 }
  0xc4   : > { %v454_v2 = vmax.f32 %v444_v62, %v453_v0 }
  0xc5   : > { %v449_v3 = vrot.slane %v448_v1, 2 }
  0xc6   : > { %v455_v4 = vrot.slane %v454_v2, 2  ;;  %v432_v5 = vpop.f32.mrf.mxu0 }
  0xc7   : > { %v450_v6 = vmax.f32 %v448_v1, %v449_v3  ;;  %v445_v7 = vpop.f32.mrf.mxu1 }
  0xc8   : > { %v456_v8 = vmax.f32 %v454_v2, %v455_v4 }
  0xc9   : > { %v451_v9 = vrot.slane %v450_v6, 1 }
  0xca   : > { %v457_v10 = vrot.slane %v456_v8, 1 }
  0xcb   : > { %v452_v13 = vmax.f32 %v450_v6, %v451_v9 }
  0xcc   : > { %v458_v12 = vmax.f32 %v456_v8, %v457_v10 }
  0xce   : > { %v461_v14 = vrot.slane %v458_v12, 7 }
  0xd0   : > { %v463_v15 = vsel %vm462_vm0, %v452_v13, %v461_v14 }
  0xd1   : > { %469 = vst.msk [vmem:[%s303_s6] sm:$0x3] %vm467_vm1, %v463_v15 }
  0xd2 PF: > { %s18_s25 = sadd.s32 1, %s848_s25   ;;  %s1050_s18 = smov %s824_s19 }
  0xd3   : > { %p15_p2 = scmp.ge.s32.totalorder %s18_s25, 10   ;;  %s1051_s19 = smov %s828_s20 }
  0xd4   : > { %s1052_s20 = smov %s941_s7  ;;  %s1053_s21 = smov %s840_s23 }
  0xd5   : > { %s1054_s22 = smov %s844_s24  ;;  %s1055_s23 = smov %s1058_s27 }
  0xd6   : > { %s1056_s24 = smov %s1062_s28  ;;  %17 = sbr.rel (!%p15_p2) target bundleno = 5 (0x5), region = 86 }
  0xdb   :  { %498 = vsyncpa [#allocation3], 1 }
  0xdc   :  { %500 = vsyncpa [#allocation3 + $0x1], 1 }

// kernel: pointnet_tnet_forward.17
= control target key start
LH: loop header
LB: loop body
LE: loop exit
PB: predicated region body
PF: predicated region fallthrough
CT: control target
= control target key end

     0   :  { %13 = vsyncpa [#allocation3], 0  ;;  %s649_s24 = smov 0   ;;  %s689_s0 = inlined_call_operand.vmem [shape: bf16[16,64], index: 0, kind: input, shape index: {}]   ;;  %s690_s1 = inlined_call_operand.vmem [shape: f32[1,64], index: 1, kind: input, shape index: {}]   ;;  %s691_s2 = inlined_call_operand.vmem [shape: f32[1,64], index: 2, kind: input, shape index: {}]   ;;  %s692_s3 = inlined_call_operand.hbm [shape: bf16[64,128], index: 3, kind: input, shape index: {}]   ;;  %s693_s4 = inlined_call_operand.vmem [shape: f32[1,128], index: 4, kind: input, shape index: {}]   ;;  %s694_s5 = inlined_call_operand.vmem [shape: bf16[16,128], index: 5, kind: output, shape index: {0}]   ;;  %s695_s6 = inlined_call_operand.vmem [shape: f32[2,1,128], index: 6, kind: output, shape index: {1}]   ;;  %s696_s7 = inlined_call_operand.vmem [shape: f32[2,1,128], index: 7, kind: output, shape index: {2}]  }
   0x1 LB: > { %s229_s27 = sshll.u32 %s692_s3, 4  ;;  %s508_s28 = sadd.s32 4294967295, %s604_s24   ;;  %s604_s24 = sphi %s649_s24, %s19_s24   ;;  %s230_s27 = int_to_ptr.hbm [resolvable:$true] %s229_s27 }
   0x2   : > { %p510_p0 = scmp.ge.s32.totalorder %s604_s24, 1  ;;  %p212_p1 = scmp.lt.s32.totalorder %s604_s24, 3 }
   0x3   : > { %p548_p2 = scmp.eq.s32.totalorder %s508_s28, 0  ;;  %s606_s29 = smov [#allocation2]  }
   0x4   : > { %p213_p3 = pnand %p510_p0, %p212_p1  ;;  %s231_s30 = sshll.u32 %s606_s29, 4  ;;  %s232_s30 = int_to_ptr.vmem [resolvable:$true] %s231_s30 }
   0x5   : > { %s607_s8 = smov 64   ;;  %s608_s9 = smov 4  }
   0x6   : > { %p544_p4 = pneg %p213_p3  ;;  %257 = sbr.rel (%p213_p3) target bundleno = 171 (0xab), region = 40 }
   0x8   : > { %p545_p5 = pnand %p548_p2, %p544_p4 }
   0xa   : > { %547 = dma.hbm_to_vmem [thread:$0]  (!%p545_p5), %s230_s27, 512, %s232_s30, [#allocation3], %s607_s8, %s607_s8, %s608_s9  }
   0xb   : > { %599 = dma.done.wait (%p548_p2), [#allocation3], 512  }
   0xc   : > { %601 = vsyncadd (%p548_p2), [#allocation3], 4294966784  ;;  %p294_p6 = scmp.lt.s32.totalorder %s508_s28, 1  ;;  %v539_v0 = vld [vmem:[#allocation2 + $0x18] sm:$0xff]  ;;  %v538_v1 = vld [vmem:[#allocation2 + $0x10] sm:$0xff]  ;;  %vm359_vm0 = vcmask 523264  }
   0xd   : > { %367 = vmatpush.bf16.msra.mxu0 %v539_v0  ;;  %v561_v4 = vld [vmem:[%s690_s1] ss:$0 sm:$0xff]  ;;  %v537_v7 = vld [vmem:[#allocation2 + $0x8] sm:$0xff] }
   0xe   : > { %s698_s28 = smov (!%p294_p6, %s508_s28), 1  ;;  %v562_v5 = vld [vmem:[%s691_s2] ss:$0 sm:$0xff] }
   0xf   : > { %s515_s10 = sshll.u32 %s698_s28, 2  ;;  %v536_v10 = vld [vmem:[#allocation2] sm:$0xff]  ;;  %s304_s26 = scalar_lea.vmem %s695_s6, %s698_s28 }
  0x10   : > { %s297_s13 = scalar_lea.vmem %s689_s0, %s515_s10  ;;  %v563_v12 = vld [vmem:[%s693_s4] ss:$0 sm:$0xff]  ;;  %s301_s22 = scalar_lea.vmem %s694_s5, %s515_s10 }
  0x11   : > { %v309_v2 = vld [vmem:[%s297_s13] sm:$0xf]  ;;  %368 = vmatpush.bf16.msra.mxu0 %v538_v1  ;;  %s307_s30 = scalar_lea.vmem %s696_s7, %s698_s28 }
  0x12   : > { %v310_v3 = vunpack.c.l.bf16 %v309_v2 }
  0x14   : > { %v315_v6 = vmul.f32 %v561_v4, %v310_v3 }
  0x15   : > { %369 = vmatpush.bf16.msra.mxu0 %v537_v7 }
  0x16   : > { %v320_v8 = vadd.f32 %v562_v5, %v315_v6 }
  0x18   : > { %v321_v9 = vmax.f32 %v320_v8, 0.0 }
  0x19   : > { %370 = vmatpush.bf16.msra.mxu0 %v536_v10 }
  0x1a   : > { %v322_v11 = vpack.c.bf16 %v321_v9, %v321_v9 }
  0x1c   : > { %533 = vmatmul.msk.bf16.vlgmr.msra.gmra.mxu0 %vm359_vm0, %v322_v11 }
  0x99   : > { %v372_v13 = vpop.f32.mrf.mxu0 }
  0x9a   : > { %v373_v14 = vadd.f32 %v563_v12, %v372_v13 }
  0x9c   : > { %v376_v15 = vrot.slane %v373_v14, 4  ;;  %v383_v16 = vmul.f32 %v373_v14, %v373_v14  ;;  %v391_v17 = vpack.c.bf16 %v373_v14, %v373_v14 }
  0x9e   : > { %v377_v18 = vadd.f32 %v376_v15, %v373_v14  ;;  %v384_v19 = vrot.slane %v383_v16, 4  ;;  %392 = vst [vmem:[%s301_s22] sm:$0xf] %v391_v17 }
  0xa0   : > { %v378_v20 = vrot.slane %v377_v18, 2  ;;  %v385_v21 = vadd.f32 %v384_v19, %v383_v16 }
  0xa1   : > { %v374_v22 = vpop.f32.mrf.mxu0 }
  0xa2   : > { %v379_v23 = vadd.f32 %v378_v20, %v377_v18  ;;  %v386_v24 = vrot.slane %v385_v21, 2 }
  0xa4   : > { %v380_v25 = vrot.slane %v379_v23, 1  ;;  %v387_v26 = vadd.f32 %v386_v24, %v385_v21 }
  0xa6   : > { %v381_v27 = vadd.f32 %v380_v25, %v379_v23  ;;  %v388_v28 = vrot.slane %v387_v26, 1 }
  0xa8   : > { %382 = vst [vmem:[%s304_s26] sm:$0x1] %v381_v27  ;;  %v389_v29 = vadd.f32 %v388_v28, %v387_v26 }
  0xaa   : > { %390 = vst [vmem:[%s307_s30] sm:$0x1] %v389_v29 }
  0xab PF: > { %s19_s24 = sadd.s32 1, %s604_s24  }
  0xac   : > { %p16_p7 = scmp.ge.s32.totalorder %s19_s24, 4  }
  0xae   :  { %18 = sbr.rel (!%p16_p7) target bundleno = 1 (0x1), region = 99 }
  0xb3   :  { %436 = vsyncpa [#allocation3], 1 }
  0xb4   :  { %438 = vsyncpa [#allocation3 + $0x1], 1 }

// kernel: pointnet_tnet_forward.16
= control target key start
LH: loop header
LB: loop body
LE: loop exit
PB: predicated region body
PF: predicated region fallthrough
CT: control target
= control target key end

     0   :  { %13 = vsyncpa [#allocation3], 0  ;;  %s653_s24 = smov 0   ;;  %s693_s0 = inlined_call_operand.vmem [shape: bf16[16,64], index: 0, kind: input, shape index: {}]   ;;  %s694_s1 = inlined_call_operand.vmem [shape: f32[1,64], index: 1, kind: input, shape index: {}]   ;;  %s695_s2 = inlined_call_operand.vmem [shape: f32[1,64], index: 2, kind: input, shape index: {}]   ;;  %s696_s3 = inlined_call_operand.hbm [shape: bf16[64,64], index: 3, kind: input, shape index: {}]   ;;  %s697_s4 = inlined_call_operand.vmem [shape: f32[1,64], index: 4, kind: input, shape index: {}]   ;;  %s698_s5 = inlined_call_operand.vmem [shape: bf16[16,64], index: 5, kind: output, shape index: {0}]   ;;  %s699_s6 = inlined_call_operand.vmem [shape: f32[2,1,64], index: 6, kind: output, shape index: {1}]   ;;  %s700_s7 = inlined_call_operand.vmem [shape: f32[2,1,64], index: 7, kind: output, shape index: {2}]  }
   0x1 LB: > { %s229_s27 = sshll.u32 %s696_s3, 4  ;;  %s512_s28 = sadd.s32 4294967295, %s608_s24   ;;  %s608_s24 = sphi %s653_s24, %s19_s24   ;;  %s230_s27 = int_to_ptr.hbm [resolvable:$true] %s229_s27 }
   0x2   : > { %p514_p0 = scmp.ge.s32.totalorder %s608_s24, 1  ;;  %p212_p1 = scmp.lt.s32.totalorder %s608_s24, 3 }
   0x3   : > { %p552_p2 = scmp.eq.s32.totalorder %s512_s28, 0  ;;  %s610_s29 = smov [#allocation2]  }
   0x4   : > { %p213_p3 = pnand %p514_p0, %p212_p1  ;;  %s231_s30 = sshll.u32 %s610_s29, 4  ;;  %s232_s30 = int_to_ptr.vmem [resolvable:$true] %s231_s30 }
   0x5   : > { %s611_s8 = smov 64   ;;  %s612_s9 = smov 4  }
   0x6   : > { %p548_p4 = pneg %p213_p3  ;;  %257 = sbr.rel (%p213_p3) target bundleno = 172 (0xac), region = 40 }
   0x8   : > { %p549_p5 = pnand %p552_p2, %p548_p4 }
   0xa   : > { %551 = dma.hbm_to_vmem [thread:$0]  (!%p549_p5), %s230_s27, 512, %s232_s30, [#allocation3], %s611_s8, %s611_s8, %s612_s9  }
   0xb   : > { %603 = dma.done.wait (%p552_p2), [#allocation3], 512  }
   0xc   : > { %605 = vsyncadd (%p552_p2), [#allocation3], 4294966784  ;;  %p294_p6 = scmp.lt.s32.totalorder %s512_s28, 1  ;;  %v543_v0 = vld [vmem:[#allocation2 + $0x18] sm:$0xff]  ;;  %v542_v1 = vld [vmem:[#allocation2 + $0x10] sm:$0xff]  ;;  %vm359_vm0 = vcmask 523264  }
   0xd   : > { %367 = vmatpush.bf16.msra.mxu0 %v543_v0  ;;  %v565_v4 = vld [vmem:[%s694_s1] ss:$0 sm:$0xff]  ;;  %v541_v7 = vld [vmem:[#allocation2 + $0x8] sm:$0xff]  ;;  %vm395_vm1 = vcmask 519168   ;;  %vm383_vm2 = vcmask 516096  }
   0xe   : > { %s702_s28 = smov (!%p294_p6, %s512_s28), 1  ;;  %v566_v5 = vld [vmem:[%s695_s2] ss:$0 sm:$0xff] }
   0xf   : > { %s519_s10 = sshll.u32 %s702_s28, 2  ;;  %v540_v10 = vld [vmem:[#allocation2] sm:$0xff]  ;;  %s304_s26 = scalar_lea.vmem %s699_s6, %s702_s28 }
  0x10   : > { %s297_s13 = scalar_lea.vmem %s693_s0, %s519_s10  ;;  %v567_v12 = vld [vmem:[%s697_s4] ss:$0 sm:$0xff]  ;;  %s301_s22 = scalar_lea.vmem %s698_s5, %s519_s10 }
  0x11   : > { %v309_v2 = vld [vmem:[%s297_s13] sm:$0xf]  ;;  %368 = vmatpush.bf16.msra.mxu0 %v542_v1  ;;  %s307_s30 = scalar_lea.vmem %s700_s7, %s702_s28 }
  0x12   : > { %v310_v3 = vunpack.c.l.bf16 %v309_v2 }
  0x14   : > { %v315_v6 = vmul.f32 %v565_v4, %v310_v3 }
  0x15   : > { %369 = vmatpush.bf16.msra.mxu0 %v541_v7 }
  0x16   : > { %v320_v8 = vadd.f32 %v566_v5, %v315_v6 }
  0x18   : > { %v321_v9 = vmax.f32 %v320_v8, 0.0 }
  0x19   : > { %370 = vmatpush.bf16.msra.mxu0 %v540_v10 }
  0x1a   : > { %v322_v11 = vpack.c.bf16 %v321_v9, %v321_v9 }
  0x1c   : > { %537 = vmatmul.msk.bf16.vlgmr.msra.gmra.mxu0 %vm359_vm0, %v322_v11 }
  0x99   : > { %v372_v13 = vpop.f32.mrf.mxu0 }
  0x9a   : > { %v373_v14 = vadd.f32 %v567_v12, %v372_v13 }
  0x9c   : > { %v376_v15 = vsel %vm359_vm0, %v373_v14, 0.0  ;;  %v385_v16 = vmul.f32 %v373_v14, %v373_v14  ;;  %v394_v17 = vpack.c.bf16 %v373_v14, %v373_v14 }
  0x9d   : > { %v377_v18 = vrot.slane %v376_v15, 4 }
  0x9e   : > { %v386_v19 = vsel %vm359_vm0, %v385_v16, 0.0  ;;  %396 = vst.msk [vmem:[%s301_s22] sm:$0xf] %vm395_vm1, %v394_v17 }
  0x9f   : > { %v378_v20 = vadd.f32 %v377_v18, %v376_v15  ;;  %v387_v21 = vrot.slane %v386_v19, 4 }
  0xa1   : > { %v379_v22 = vrot.slane %v378_v20, 2  ;;  %v388_v23 = vadd.f32 %v387_v21, %v386_v19  ;;  %v374_v24 = vpop.f32.mrf.mxu0 }
  0xa3   : > { %v380_v25 = vadd.f32 %v379_v22, %v378_v20  ;;  %v389_v26 = vrot.slane %v388_v23, 2 }
  0xa5   : > { %v381_v27 = vrot.slane %v380_v25, 1  ;;  %v390_v28 = vadd.f32 %v389_v26, %v388_v23 }
  0xa7   : > { %v382_v29 = vadd.f32 %v381_v27, %v380_v25  ;;  %v391_v30 = vrot.slane %v390_v28, 1 }
  0xa9   : > { %384 = vst.msk [vmem:[%s304_s26] sm:$0x1] %vm383_vm2, %v382_v29  ;;  %v392_v31 = vadd.f32 %v391_v30, %v390_v28 }
  0xab   : > { %393 = vst.msk [vmem:[%s307_s30] sm:$0x1] %vm383_vm2, %v392_v31 }
  0xac PF: > { %s19_s24 = sadd.s32 1, %s608_s24  }
  0xad   : > { %p16_p7 = scmp.ge.s32.totalorder %s19_s24, 4  }
  0xaf   :  { %18 = sbr.rel (!%p16_p7) target bundleno = 1 (0x1), region = 99 }
  0xb4   :  { %440 = vsyncpa [#allocation3], 1 }
  0xb5   :  { %442 = vsyncpa [#allocation3 + $0x1], 1 }

// kernel: pointnet_tnet_forward.18
= control target key start
LH: loop header
LB: loop body
LE: loop exit
PB: predicated region body
PF: predicated region fallthrough
CT: control target
= control target key end

     0   :  { %s1315_s0 = inlined_call_operand.vmem [shape: bf16[16,128], index: 0, kind: input, shape index: {}]   ;;  %s1316_s1 = inlined_call_operand.vmem [shape: f32[1,128], index: 1, kind: input, shape index: {}]   ;;  %s1317_s2 = inlined_call_operand.vmem [shape: f32[1,128], index: 2, kind: input, shape index: {}]   ;;  %s1318_s3 = inlined_call_operand.vmem [shape: bf16[128,1024], index: 3, kind: input, shape index: {}]   ;;  %s1319_s4 = inlined_call_operand.vmem [shape: f32[1,1024], index: 4, kind: input, shape index: {}]   ;;  %s1320_s5 = inlined_call_operand.hbm [shape: bf16[16,1024], index: 5, kind: output, shape index: {0}]   ;;  %s1321_s6 = inlined_call_operand.vmem [shape: f32[2,1,1024], index: 6, kind: output, shape index: {1}]  }
   0x1   :  { %1324 = sst [smem:[#allocation8_spill]] %s1315_s0 }
   0x2   :  { %1325 = sst [smem:[#allocation9_spill]] %s1316_s1 }
   0x3   :  { %1326 = sst [smem:[#allocation10_spill]] %s1317_s2 }
   0x4   :  { %1327 = sst [smem:[#allocation11_spill]] %s1318_s3 }
   0x5   :  { %12 = vsyncpa [#allocation4], 0 }
   0x6   :  { %14 = vsyncpa [#allocation4 + $0x1], 0  ;;  %s1087_s21 = smov 0   ;;  %s1089_s22 = smov 0  }
   0x7   :  { %s1091_s23 = smov 0   ;;  %s1093_s24 = smov 0  }
   0x8   :  { %s1095_s25 = smov 0   ;;  %s1097_s26 = smov 0  }
   0x9   :  { %s1099_s27 = smov 0   ;;  %s1101_s28 = smov 0  }
   0xa   :  { %s1103_s29 = smov 0   ;;  %s1105_s30 = smov 0  }
   0xb LB: > { %s750_s7 = sadd.s32 4294967295, %s1050_s30   ;;  %s751_s8 = sadd.s32 4294967294, %s1050_s30   ;;  %s1050_s30 = sphi %s1105_s30, %s20_s30   ;;  %s1046_s29 = sphi %s1103_s29, %s1347_s29   ;;  %s1042_s28 = sphi %s1101_s28, %s1346_s28   ;;  %s1038_s27 = sphi %s1099_s27, %s1345_s27   ;;  %s1034_s26 = sphi %s1097_s26, %s1344_s26   ;;  %s1030_s25 = sphi %s1095_s25, %s1343_s25   ;;  %s1026_s24 = sphi %s1093_s24, %s1342_s24   ;;  %s1022_s23 = sphi %s1091_s23, %s1341_s23   ;;  %s1018_s22 = sphi %s1089_s22, %s1340_s22   ;;  %s1014_s21 = sphi %s1087_s21, %s1339_s21  }
   0xc   : > { %s29_s9 = sadd.s32 1, %s1042_s28  ;;  %s32_s10 = sadd.s32 1, %s1046_s29 }
   0xd   : > { %p30_p0 = scmp.ge.s32.totalorder %s29_s9, 4  ;;  %s107_s11 = sadd.s32 1, %s1030_s25 }
   0xe   : > { %p114_p1 = scmp.ne.s32.totalorder %s1030_s25, %s1026_s24  ;;  %p115_p2 = scmp.eq.s32.totalorder %s1050_s30, 0 }
   0xf   : > { %s1349_s9 = smov (%p30_p0, %s29_s9), 0  ;;  %s1351_s10 = smov (!%p30_p0, %s32_s10), %s1046_s29 }
  0x10   : > { %1328 = sst [smem:[#allocation6_spill]] %s1349_s9  ;;  %s104_s12 = ssub.s32 %s1042_s28, %s1349_s9 }
  0x11   : > { %p1150_p3 = por %p115_p2, %p114_p1  ;;  %p34_p4 = scmp.ge.s32.totalorder %s1351_s10, 2 }
  0x12   : > { %p105_p5 = scmp.eq.s32.totalorder %s104_s12, 0  ;;  %s161_s14 = sadd.s32 1, %s1022_s23 }
  0x13   : > { %p171_p6 = scmp.ne.s32.totalorder %s1022_s23, %s1018_s22  ;;  %s1353_s10 = smov (%p34_p4, %s1351_s10), 0 }
  0x14   : > { %1330 = sst [smem:[#allocation7_spill]] %s1353_s10  ;;  %s156_s16 = ssub.s32 %s1046_s29, %s1353_s10 }
  0x15   : > { %s1160_s15 = scalar_select %p105_p5, %s1030_s25, %s107_s11  }
  0x16   : > { %p172_p7 = scmp.eq.s32.totalorder %s750_s7, 7  ;;  %s158_s17 = sor.u32 %s156_s16, %s104_s12 }
  0x17   : > { %p177_p8 = scmp.ne.s32.totalorder %s1018_s22, %s1014_s21  ;;  %p159_p9 = scmp.eq.s32.totalorder %s158_s17, 0 }
  0x18   : > { %p1166_p10 = por %p172_p7, %p171_p6  ;;  %p178_p11 = scmp.eq.s32.totalorder %s751_s8, 7 }
  0x19   : > { %s1171_s19 = scalar_select %p159_p9, %s1022_s23, %s161_s14  }
  0x1a   : > { %p1173_p12 = por %p178_p11, %p177_p8  ;;  %p753_p13 = scmp.ge.s32.totalorder %s1050_s30, 8 }
  0x1c   : > { %228 = sbr.rel (%p753_p13) target bundleno = 59 (0x3b), region = 24 }
  0x21   : > { %238 = sbr.rel (!%p1150_p3) target bundleno = 59 (0x3b), region = 32  ;;  %s240_s7 = sand.u32 (%p1150_p3), 1, %s1030_s25  }
  0x22   : > { %s834_s11 = sshll.u32 (%p1150_p3), %s1042_s28, 3  ;;  %s754_s12 = sshll.u32 (%p1150_p3), %s240_s7, 7 }
  0x23   : > { %s1333_s3 = sld [smem:[#allocation11_spill]] (%p1150_p3)  ;;  %s242_s13 = scalar_lea.vmem (%p1150_p3), [#allocation2], %s754_s12 }
  0x29   : > { %s1185_s8 = scalar_lea.vmem %s1333_s3, %s834_s11 }
  0x2a   : > { %v304_v0 = vld [vmem:[%s1185_s8] sm:$0xff] }
  0x2b   : > { %v306_v1 = vld [vmem:[%s1185_s8 + $0x20] sm:$0xff]  ;;  %305 = vst [vmem:[%s242_s13] sm:$0xff] %v304_v0 }
  0x2c   : > { %v308_v2 = vld [vmem:[%s1185_s8 + $0x40] sm:$0xff]  ;;  %307 = vst [vmem:[%s242_s13 + $0x8] sm:$0xff] %v306_v1 }
  0x2d   : > { %v310_v3 = vld [vmem:[%s1185_s8 + $0x60] sm:$0xff]  ;;  %309 = vst [vmem:[%s242_s13 + $0x10] sm:$0xff] %v308_v2 }
  0x2e   : > { %v312_v4 = vld [vmem:[%s1185_s8 + $0x80] sm:$0xff]  ;;  %311 = vst [vmem:[%s242_s13 + $0x18] sm:$0xff] %v310_v3 }
  0x2f   : > { %v314_v5 = vld [vmem:[%s1185_s8 + $0xa0] sm:$0xff]  ;;  %313 = vst [vmem:[%s242_s13 + $0x20] sm:$0xff] %v312_v4 }
  0x30   : > { %v316_v6 = vld [vmem:[%s1185_s8 + $0xc0] sm:$0xff]  ;;  %315 = vst [vmem:[%s242_s13 + $0x28] sm:$0xff] %v314_v5 }
  0x31   : > { %v318_v7 = vld [vmem:[%s1185_s8 + $0xe0] sm:$0xff]  ;;  %317 = vst [vmem:[%s242_s13 + $0x30] sm:$0xff] %v316_v6 }
  0x32   : > { %v320_v8 = vld [vmem:[%s1185_s8 + $0x100] sm:$0xff]  ;;  %319 = vst [vmem:[%s242_s13 + $0x38] sm:$0xff] %v318_v7 }
  0x33   : > { %v322_v9 = vld [vmem:[%s1185_s8 + $0x120] sm:$0xff]  ;;  %321 = vst [vmem:[%s242_s13 + $0x40] sm:$0xff] %v320_v8 }
  0x34   : > { %v324_v10 = vld [vmem:[%s1185_s8 + $0x140] sm:$0xff]  ;;  %323 = vst [vmem:[%s242_s13 + $0x48] sm:$0xff] %v322_v9 }
  0x35   : > { %v326_v11 = vld [vmem:[%s1185_s8 + $0x160] sm:$0xff]  ;;  %325 = vst [vmem:[%s242_s13 + $0x50] sm:$0xff] %v324_v10 }
  0x36   : > { %v328_v12 = vld [vmem:[%s1185_s8 + $0x180] sm:$0xff]  ;;  %327 = vst [vmem:[%s242_s13 + $0x58] sm:$0xff] %v326_v11 }
  0x37   : > { %v330_v13 = vld [vmem:[%s1185_s8 + $0x1a0] sm:$0xff]  ;;  %329 = vst [vmem:[%s242_s13 + $0x60] sm:$0xff] %v328_v12 }
  0x38   : > { %v332_v14 = vld [vmem:[%s1185_s8 + $0x1c0] sm:$0xff]  ;;  %331 = vst [vmem:[%s242_s13 + $0x68] sm:$0xff] %v330_v13 }
  0x39   : > { %v334_v15 = vld [vmem:[%s1185_s8 + $0x1e0] sm:$0xff]  ;;  %333 = vst [vmem:[%s242_s13 + $0x70] sm:$0xff] %v332_v14 }
  0x3a   : > { %335 = vst [vmem:[%s242_s13 + $0x78] sm:$0xff] %v334_v15 }
  0x3b PF: > { %p757_p0 = scmp.ge.s32.totalorder %s1050_s30, 1  ;;  %p348_p1 = scmp.lt.s32.totalorder %s1050_s30, 9 }
  0x3d   : > { %p349_p2 = pnand %p757_p0, %p348_p1 }
  0x3e   : > { %s355_s14 = sand.u32 (!%p349_p2), 1, %s1026_s24   ;;  %p400_p3 = scmp.lt.s32.totalorder (!%p349_p2), %s1038_s27, 1 }
  0x3f   : > { %352 = sbr.rel (%p349_p2) target bundleno = 248 (0xf8), region = 74  ;;  %s758_s7 = sshll.u32 (!%p349_p2), %s355_s14, 7 }
  0x40   : > { %s1206_s11 = scalar_lea.vmem (!%p349_p2), [#allocation2], %s758_s7  ;;  %s1334_s0 = sld [smem:[#allocation8_spill]] (!%p349_p2) }
  0x41   : > { %s1335_s1 = sld [smem:[#allocation9_spill]] (!%p349_p2)  ;;  %s761_s16 = sshll.u32 (!%p349_p2), %s1034_s26, 1 }
  0x42   : > { %s1336_s2 = sld [smem:[#allocation10_spill]] (!%p349_p2)  ;;  %p406_p4 = scmp.lt.s32.totalorder (!%p349_p2), %s761_s16, 7 }
  0x44   : > { %v822_v16 = vld [vmem:[%s1206_s11 + $0x70] sm:$0xf]  ;;  %v850_v17 = vld [vmem:[%s1206_s11 + $0x74] sm:$0xf0]  ;;  %v849_v18 = vld [vmem:[%s1206_s11 + $0x74] sm:$0xf] }
  0x45   : > { %v823_v19 = vor.u32 %v850_v17, %v822_v16  ;;  %v824_v20 = vld [vmem:[%s1206_s11 + $0x78] sm:$0xf0]  ;;  %v814_v21 = vld [vmem:[%s1206_s11 + $0x60] sm:$0xf]  ;;  %v848_v22 = vld [vmem:[%s1206_s11 + $0x64] sm:$0xf0] }
  0x46   : > { %v827_v23 = vor.u32 %v849_v18, %v824_v20  ;;  %v847_v24 = vld [vmem:[%s1206_s11 + $0x64] sm:$0xf]  ;;  %v816_v25 = vld [vmem:[%s1206_s11 + $0x68] sm:$0xf0]  ;;  %v815_v26 = vor.u32 %v848_v22, %v814_v21  ;;  %v806_v28 = vld [vmem:[%s1206_s11 + $0x50] sm:$0xf] }
  0x47   : > { %536 = vmatpush.bf16.msra.mxu0 %v823_v19  ;;  %v819_v27 = vor.u32 %v847_v24, %v816_v25  ;;  %v846_v29 = vld [vmem:[%s1206_s11 + $0x54] sm:$0xf0]  ;;  %v845_v30 = vld [vmem:[%s1206_s11 + $0x54] sm:$0xf]  ;;  %v808_v31 = vld [vmem:[%s1206_s11 + $0x58] sm:$0xf0] }
  0x48   : > { %549 = vmatpush.bf16.msra.mxu1 %v827_v23  ;;  %v807_v32 = vor.u32 %v846_v29, %v806_v28  ;;  %v811_v33 = vor.u32 %v845_v30, %v808_v31  ;;  %v798_v34 = vld [vmem:[%s1206_s11 + $0x40] sm:$0xf]  ;;  %v844_v35 = vld [vmem:[%s1206_s11 + $0x44] sm:$0xf0]  ;;  %v843_v36 = vld [vmem:[%s1206_s11 + $0x44] sm:$0xf] }
  0x49   : > { %v800_v37 = vld [vmem:[%s1206_s11 + $0x48] sm:$0xf0]  ;;  %s1226_s24 = scalar_select %p400_p3, %s1038_s27, 1  ;;  %v799_v38 = vor.u32 %v844_v35, %v798_v34  ;;  %v790_v40 = vld [vmem:[%s1206_s11 + $0x30] sm:$0xf] }
  0x4a   : > { %v803_v39 = vor.u32 %v843_v36, %v800_v37  ;;  %v842_v41 = vld [vmem:[%s1206_s11 + $0x34] sm:$0xf0]  ;;  %v841_v42 = vld [vmem:[%s1206_s11 + $0x34] sm:$0xf]  ;;  %v792_v43 = vld [vmem:[%s1206_s11 + $0x38] sm:$0xf0] }
  0x4b   : > { %537 = vmatpush.bf16.msra.mxu0 %v815_v26  ;;  %s760_s12 = sshll.u32 %s1226_s24, 2  ;;  %v938_v45 = vld [vmem:[%s1335_s1] ss:$0 sm:$0xff]  ;;  %v791_v46 = vor.u32 %v842_v41, %v790_v40  ;;  %v795_v48 = vor.u32 %v841_v42, %v792_v43  ;;  %v840_v50 = vld [vmem:[%s1206_s11 + $0x24] sm:$0xf0] }
  0x4c   : > { %550 = vmatpush.bf16.msra.mxu1 %v819_v27  ;;  %s403_s8 = scalar_lea.vmem %s1334_s0, %s760_s12  ;;  %v782_v49 = vld [vmem:[%s1206_s11 + $0x20] sm:$0xf]  ;;  %v839_v51 = vld [vmem:[%s1206_s11 + $0x24] sm:$0xf]  ;;  %v784_v52 = vld [vmem:[%s1206_s11 + $0x28] sm:$0xf0] }
  0x4d   : > { %v420_v44 = vld [vmem:[%s403_s8] sm:$0xf]  ;;  %v783_v55 = vor.u32 %v840_v50, %v782_v49  ;;  %v787_v56 = vor.u32 %v839_v51, %v784_v52  ;;  %v774_v57 = vld [vmem:[%s1206_s11 + $0x10] sm:$0xf]  ;;  %v838_v58 = vld [vmem:[%s1206_s11 + $0x14] sm:$0xf0] }
  0x4e   : > { %v421_v47 = vunpack.c.l.bf16 %v420_v44  ;;  %v939_v54 = vld [vmem:[%s1336_s2] ss:$0 sm:$0xff]  ;;  %v837_v59 = vld [vmem:[%s1206_s11 + $0x14] sm:$0xf]  ;;  %v776_v60 = vld [vmem:[%s1206_s11 + $0x18] sm:$0xf0]  ;;  %v775_v62 = vor.u32 %v838_v58, %v774_v57 }
  0x4f   : > { %538 = vmatpush.bf16.msra.mxu0 %v807_v32  ;;  %v779_v63 = vor.u32 %v837_v59, %v776_v60  ;;  %v766_v0 = vld [vmem:[%s1206_s11] sm:$0xf]  ;;  %v836_v1 = vld [vmem:[%s1206_s11 + $0x4] sm:$0xf0]  ;;  %v835_v2 = vld [vmem:[%s1206_s11 + $0x4] sm:$0xf] }
  0x50   : > { %551 = vmatpush.bf16.msra.mxu1 %v811_v33  ;;  %v426_v53 = vmul.f32 %v938_v45, %v421_v47  ;;  %v768_v3 = vld [vmem:[%s1206_s11 + $0x8] sm:$0xf0]  ;;  %v767_v5 = vor.u32 %v836_v1, %v766_v0  ;;  %s1255_s17 = scalar_select %p406_p4, %s761_s16, 7 }
  0x51   : > { %v771_v6 = vor.u32 %v835_v2, %v768_v3  ;;  %s830_s8 = sshll.u32 %s1038_s27, 3  ;;  %s387_s12 = sand.u32 1, %s1018_s22  }
  0x52   : > { %v431_v61 = vadd.f32 %v939_v54, %v426_v53  ;;  %s408_s11 = scalar_lea.vmem %s1319_s4, %s1255_s17  ;;  %s607_s7 = sadd.s32 %s830_s8, %s761_s16 }
  0x53   : > { %539 = vmatpush.bf16.msra.mxu0 %v799_v38  ;;  %v450_v8 = vld [vmem:[%s408_s11] sm:$0x3]  ;;  %s831_s0 = sshll.u32 %s607_s7, 2  ;;  %s759_s1 = sshll.u32 %s387_s12, 3 }
  0x54   : > { %552 = vmatpush.bf16.msra.mxu1 %v803_v39  ;;  %v432_v4 = vmax.f32 %v431_v61, 0.0  ;;  %v452_v9 = vperm.slane %v450_v8, 0  ;;  %v453_v10 = vperm.slane %v450_v8, 1  ;;  %s609_s26 = scalar_lea.hbm %s1320_s5, %s831_s0  ;;  %s389_s10 = scalar_lea.vmem [#allocation3], %s759_s1 }
  0x55   : > { %s611_s27 = sshll.u32 %s389_s10, 4  ;;  %s613_s9 = sshll.u32 %s609_s26, 4  ;;  %s612_s27 = int_to_ptr.vmem [resolvable:$true] %s611_s27  ;;  %s614_s9 = int_to_ptr.hbm [resolvable:$true] %s613_s9 }
  0x56   : > { %v433_v7 = vpack.c.bf16 %v432_v4, %v432_v4  ;;  %s588_s16 = scalar_lea.sflag [#allocation4], %s387_s12  ;;  %s954_s2 = sshra.s32 %s614_s9, 4  ;;  %s955_s2 = int_to_ptr.hbm [resolvable:$true] %s954_s2 }
  0x57   : > { %540 = vmatpush.bf16.msra.mxu0 %v791_v46  ;;  %s956_s0 = scalar_lea.hbm %s955_s2, 8  ;;  %s960_s8 = scalar_lea.hbm %s1320_s5, 64 }
  0x58   : > { %553 = vmatpush.bf16.msra.mxu1 %v795_v48  ;;  %p957_p5 = scmp.ne.s32.totalorder %s955_s2, %s956_s0  ;;  %p961_p8 = scmp.lt.s32.totalorder %s955_s2, %s1320_s5 }
  0x59   : > { %p962_p9 = scmp.lt.s32.totalorder %s960_s8, %s956_s0 }
  0x5a   : > { %p958_p6 = pnand %p957_p5, %p1166_p10 }
  0x5b   : > { %541 = vmatpush.bf16.msra.mxu0 %v783_v55  ;;  %p963_p11 = por %p962_p9, %p961_p8 }
  0x5c   : > { %554 = vmatpush.bf16.msra.mxu1 %v787_v56  ;;  %p959_p7 = pneg %p958_p6 }
  0x5e   : > { %p964_p13 = pnand %p963_p11, %p959_p7 }
  0x5f   : > { %542 = vmatpush.bf16.msra.mxu0 %v775_v62 }
  0x60   : > { %555 = vmatpush.bf16.msra.mxu1 %v779_v63 }
  0x63   : > { %543 = vmatpush.bf16.msra.mxu0 %v767_v5 }
  0x64   : > { %556 = vmatpush.bf16.msra.mxu1 %v771_v6 }
  0x66   : > { %544 = vmatmul.bf16.vlgmr.msra.gmra.mxu0 %v433_v7 }
  0x67   : > { %557 = vmatmul.bf16.vlgmr.msra.gmra.mxu1 %v433_v7 }
  0xe3   : > { %v545_v11 = vpop.f32.mrf.mxu0 }
  0xe4   : > { %v546_v12 = vadd.f32 %v545_v11, %v452_v9  ;;  %v558_v13 = vpop.f32.mrf.mxu1 }
  0xe5   : > { %v559_v14 = vadd.f32 %v558_v13, %v453_v10 }
  0xe6   : > { %v564_v15 = vrot.slane %v546_v12, 4 }
  0xe7   : > { %v562_v16 = vpack.c.bf16 %v559_v14, %v546_v12  ;;  %v570_v17 = vrot.slane %v559_v14, 4 }
  0xe8   : > { %v565_v18 = vmax.f32 %v546_v12, %v564_v15 }
  0xe9   : > { %v571_v19 = vmax.f32 %v559_v14, %v570_v17  ;;  %563 = vst [vmem:[%s389_s10] sm:$0xff] %v562_v16 }
  0xea   : > { %v566_v20 = vrot.slane %v565_v18, 2 }
  0xeb   : > { %967 = shalt.err (!%p964_p13)
}
  0xec   : > { %851 = dma.vmem_to_hbm [thread:$0]  (%p1166_p10), %s612_s27, 128, %s614_s9, %s588_s16   ;;  %v572_v21 = vrot.slane %v571_v19, 2  ;;  %v547_v22 = vpop.f32.mrf.mxu0  ;;  %v567_v23 = vmax.f32 %v565_v18, %v566_v20  ;;  %v560_v24 = vpop.f32.mrf.mxu1  ;;  %v582_v28 = vlaneseq  ;;  %vm579_vm0 = vcmask 1040384  }
  0xed   : > { %s763_s10 = sshll.u32 %s1226_s24, 3 }
  0xee   : > { %v573_v25 = vmax.f32 %v571_v19, %v572_v21  ;;  %v568_v26 = vrot.slane %v567_v23, 1  ;;  %s417_s11 = sadd.s32 %s763_s10, %s1255_s17  ;;  %vm584_vm1 = vcmp.lt.s32.totalorder %v582_v28, 256 }
  0xef   : > { %s418_s26 = scalar_lea.vmem %s1321_s6, %s417_s11 }
  0xf0   : > { %v574_v27 = vrot.slane %v573_v25, 1  ;;  %v569_v30 = vmax.f32 %v567_v23, %v568_v26 }
  0xf2   : > { %v575_v29 = vmax.f32 %v573_v25, %v574_v27 }
  0xf4   : > { %v578_v31 = vrot.slane %v575_v29, 7 }
  0xf6   : > { %v580_v32 = vsel %vm579_vm0, %v569_v30, %v578_v31 }
  0xf7   : > { %586 = vst.msk [vmem:[%s418_s26] sm:$0x3] %vm584_vm1, %v580_v32 }
  0xf8 PF: > { %p857_p10 = scmp.ge.s32.totalorder %s1050_s30, 2  ;;  %s629_s9 = sand.u32 1, %s1014_s21  }
  0xf9   : > { %s630_s18 = scalar_lea.sflag [#allocation4], %s629_s9 }
  0xfa   : > { %p854_p0 = pnand %p857_p10, %p1173_p12 }
  0xfc   : > { %p855_p1 = pneg %p854_p0 }
  0xfe   : > { %1009 = dma.done.wait (%p855_p1), %s630_s18, 128  }
  0xff   : > { %1011 = vsyncadd (%p855_p1), %s630_s18, 4294967168  ;;  %s20_s30 = sadd.s32 1, %s1050_s30   ;;  %s1337_s17 = sld [smem:[#allocation6_spill]] }
 0x100   : > { %p17_p2 = scmp.ge.s32.totalorder %s20_s30, 10   ;;  %s1338_s16 = sld [smem:[#allocation7_spill]] }
 0x101   : > { %s1339_s21 = smov %s1018_s22  ;;  %s1340_s22 = smov %s1022_s23 }
 0x102   : > { %s1341_s23 = smov %s1171_s19  ;;  %s1342_s24 = smov %s1030_s25 }
 0x103   : > { %s1343_s25 = smov %s1160_s15  ;;  %s1344_s26 = smov %s1042_s28 }
 0x104   : > { %s1345_s27 = smov %s1046_s29  ;;  %19 = sbr.rel (!%p17_p2) target bundleno = 11 (0xb), region = 136 }
 0x105   : > { %s1346_s28 = smov %s1337_s17 }
 0x106   : > { %s1347_s29 = smov %s1338_s16 }
 0x109   :  { %647 = vsyncpa [#allocation4], 1 }
 0x10a   :  { %649 = vsyncpa [#allocation4 + $0x1], 1 }

// kernel: pointnet_tnet_forward.14
= control target key start
LH: loop header
LB: loop body
LE: loop exit
PB: predicated region body
PF: predicated region fallthrough
CT: control target
= control target key end

     0   :  { %12 = vsyncpa [#allocation3], 0  ;;  %s4665_s0 = inlined_call_operand.vmem [shape: f32[2,1024], index: 0, kind: input, shape index: {}]   ;;  %s4666_s1 = inlined_call_operand.hbm [shape: bf16[1024,512], index: 1, kind: input, shape index: {}]   ;;  %s4667_s2 = inlined_call_operand.vmem [shape: f32[1,512], index: 2, kind: input, shape index: {}]   ;;  %s4668_s3 = inlined_call_operand.hbm [shape: bf16[512,256], index: 3, kind: input, shape index: {}]   ;;  %s4669_s4 = inlined_call_operand.vmem [shape: f32[1,256], index: 4, kind: input, shape index: {}]   ;;  %s4670_s5 = inlined_call_operand.vmem [shape: bf16[256,128], index: 5, kind: input, shape index: {}]   ;;  %s4671_s6 = inlined_call_operand.vmem [shape: f32[1,128], index: 6, kind: input, shape index: {}]   ;;  %s4672_s7 = inlined_call_operand.vmem [shape: f32[2,128], index: 7, kind: output, shape index: {}]  }
   0x1   :  { %s20_s26 = sshll.u32 %s4666_s1, 4  ;;  %s21_s26 = int_to_ptr.hbm [resolvable:$true] %s20_s26 }
   0x2   :  { %13 = vsyncpa [#allocation5], 0  ;;  %s4462_s27 = smov [#allocation2]   ;;  %s35_s8 = sshll.u32 %s4668_s3, 4  ;;  %s36_s8 = int_to_ptr.hbm [resolvable:$true] %s35_s8 }
   0x3   :  { %s22_s28 = sshll.u32 %s4462_s27, 4  ;;  %s4463_s9 = smov 256   ;;  %s23_s28 = int_to_ptr.vmem [resolvable:$true] %s22_s28 }
   0x4   :  { %s4464_s10 = smov 16   ;;  %s4465_s11 = smov [#allocation4]  }
   0x5   :  { %28 = dma.hbm_to_vmem [thread:$0]  %s21_s26, 32768, %s23_s28, [#allocation3], %s4463_s9, %s4463_s9, %s4464_s10  }
   0x6   :  { %s37_s12 = sshll.u32 %s4465_s11, 4  ;;  %s4466_s13 = smov 128   ;;  %s38_s12 = int_to_ptr.vmem [resolvable:$true] %s37_s12 }
   0x7   :  { %s4467_s14 = smov 8  }
   0x8   :  { %43 = dma.hbm_to_vmem [thread:$0]  %s36_s8, 8192, %s38_s12, [#allocation5], %s4466_s13, %s4466_s13, %s4467_s14  }
   0x9   :  { %4458 = dma.done.wait [#allocation3], 32768  }
   0xa   :  { %4459 = vsyncadd [#allocation3], 4294934528 }
   0xb   :  { %4460 = dma.done.wait [#allocation5], 8192  }
   0xc   :  { %4461 = vsyncadd [#allocation5], 4294959104  ;;  %v2836_v0 = vld [vmem:[#allocation2 + $0xe0] sm:$0xf]  ;;  %v4096_v1 = vld [vmem:[#allocation2 + $0xec] sm:$0xf0] }
   0xd   :  { %v2964_v2 = vld [vmem:[#allocation2 + $0x1e0] sm:$0xf]  ;;  %v2837_v3 = vor.u32 %v4096_v1, %v2836_v0  ;;  %v4128_v4 = vld [vmem:[#allocation2 + $0x1ec] sm:$0xf0] }
   0xe   :  { %v3092_v5 = vld [vmem:[#allocation2 + $0x2e0] sm:$0xf]  ;;  %v4160_v6 = vld [vmem:[#allocation2 + $0x2ec] sm:$0xf0]  ;;  %v2965_v7 = vor.u32 %v4128_v4, %v2964_v2 }
   0xf   :  { %v3093_v8 = vor.u32 %v4160_v6, %v3092_v5  ;;  %v3220_v9 = vld [vmem:[#allocation2 + $0x3e0] sm:$0xf]  ;;  %v4192_v10 = vld [vmem:[#allocation2 + $0x3ec] sm:$0xf0]  ;;  %1635 = vmatpush.bf16.msra.mxu0 %v2837_v3 }
  0x10   :  { %v2820_v11 = vld [vmem:[#allocation2 + $0xc0] sm:$0xf]  ;;  %v3221_v12 = vor.u32 %v4192_v10, %v3220_v9  ;;  %v4092_v13 = vld [vmem:[#allocation2 + $0xcc] sm:$0xf0]  ;;  %1648 = vmatpush.bf16.msra.mxu1 %v2965_v7 }
  0x11   :  { %v2948_v14 = vld [vmem:[#allocation2 + $0x1c0] sm:$0xf]  ;;  %v4124_v15 = vld [vmem:[#allocation2 + $0x1cc] sm:$0xf0]  ;;  %1661 = vmatpush.bf16.msra.mxu2 %v3093_v8  ;;  %v2821_v16 = vor.u32 %v4092_v13, %v2820_v11 }
  0x12   :  { %v2949_v17 = vor.u32 %v4124_v15, %v2948_v14  ;;  %v3076_v18 = vld [vmem:[#allocation2 + $0x2c0] sm:$0xf]  ;;  %v4156_v19 = vld [vmem:[#allocation2 + $0x2cc] sm:$0xf0]  ;;  %1674 = vmatpush.bf16.msra.mxu3 %v3221_v12 }
  0x13   :  { %v3204_v20 = vld [vmem:[#allocation2 + $0x3c0] sm:$0xf]  ;;  %v3077_v21 = vor.u32 %v4156_v19, %v3076_v18  ;;  %v4188_v22 = vld [vmem:[#allocation2 + $0x3cc] sm:$0xf0]  ;;  %1636 = vmatpush.bf16.msra.mxu0 %v2821_v16 }
  0x14   :  { %v2804_v23 = vld [vmem:[#allocation2 + $0xa0] sm:$0xf]  ;;  %v4088_v24 = vld [vmem:[#allocation2 + $0xac] sm:$0xf0]  ;;  %v3205_v25 = vor.u32 %v4188_v22, %v3204_v20  ;;  %1649 = vmatpush.bf16.msra.mxu1 %v2949_v17 }
  0x15   :  { %v2932_v26 = vld [vmem:[#allocation2 + $0x1a0] sm:$0xf]  ;;  %v4120_v27 = vld [vmem:[#allocation2 + $0x1ac] sm:$0xf0]  ;;  %v2805_v29 = vor.u32 %v4088_v24, %v2804_v23  ;;  %1662 = vmatpush.bf16.msra.mxu2 %v3077_v21 }
  0x16   :  { %v3060_v28 = vld [vmem:[#allocation2 + $0x2a0] sm:$0xf]  ;;  %v4152_v30 = vld [vmem:[#allocation2 + $0x2ac] sm:$0xf0]  ;;  %v2933_v33 = vor.u32 %v4120_v27, %v2932_v26  ;;  %1675 = vmatpush.bf16.msra.mxu3 %v3205_v25 }
  0x17   :  { %v3188_v31 = vld [vmem:[#allocation2 + $0x3a0] sm:$0xf]  ;;  %v4184_v32 = vld [vmem:[#allocation2 + $0x3ac] sm:$0xf0]  ;;  %v3061_v34 = vor.u32 %v4152_v30, %v3060_v28  ;;  %1637 = vmatpush.bf16.msra.mxu0 %v2805_v29 }
  0x18   :  { %v2788_v35 = vld [vmem:[#allocation2 + $0x80] sm:$0xf]  ;;  %v4084_v36 = vld [vmem:[#allocation2 + $0x8c] sm:$0xf0]  ;;  %v3189_v38 = vor.u32 %v4184_v32, %v3188_v31  ;;  %1650 = vmatpush.bf16.msra.mxu1 %v2933_v33 }
  0x19   :  { %v2916_v37 = vld [vmem:[#allocation2 + $0x180] sm:$0xf]  ;;  %v4116_v39 = vld [vmem:[#allocation2 + $0x18c] sm:$0xf0]  ;;  %v2789_v44 = vor.u32 %v4084_v36, %v2788_v35  ;;  %1663 = vmatpush.bf16.msra.mxu2 %v3061_v34 }
  0x1a   :  { %v3044_v40 = vld [vmem:[#allocation2 + $0x280] sm:$0xf]  ;;  %v4148_v41 = vld [vmem:[#allocation2 + $0x28c] sm:$0xf0]  ;;  %v2917_v45 = vor.u32 %v4116_v39, %v2916_v37  ;;  %1676 = vmatpush.bf16.msra.mxu3 %v3189_v38 }
  0x1b   :  { %v3172_v42 = vld [vmem:[#allocation2 + $0x380] sm:$0xf]  ;;  %v4180_v43 = vld [vmem:[#allocation2 + $0x38c] sm:$0xf0]  ;;  %v3045_v46 = vor.u32 %v4148_v41, %v3044_v40  ;;  %1638 = vmatpush.bf16.msra.mxu0 %v2789_v44 }
  0x1c   :  { %v2772_v47 = vld [vmem:[#allocation2 + $0x60] sm:$0xf]  ;;  %v4080_v48 = vld [vmem:[#allocation2 + $0x6c] sm:$0xf0]  ;;  %v3173_v50 = vor.u32 %v4180_v43, %v3172_v42  ;;  %1651 = vmatpush.bf16.msra.mxu1 %v2917_v45 }
  0x1d   :  { %v2900_v49 = vld [vmem:[#allocation2 + $0x160] sm:$0xf]  ;;  %v4112_v51 = vld [vmem:[#allocation2 + $0x16c] sm:$0xf0]  ;;  %v2773_v56 = vor.u32 %v4080_v48, %v2772_v47  ;;  %1664 = vmatpush.bf16.msra.mxu2 %v3045_v46 }
  0x1e   :  { %v3028_v52 = vld [vmem:[#allocation2 + $0x260] sm:$0xf]  ;;  %v4144_v53 = vld [vmem:[#allocation2 + $0x26c] sm:$0xf0]  ;;  %v2901_v57 = vor.u32 %v4112_v51, %v2900_v49  ;;  %1677 = vmatpush.bf16.msra.mxu3 %v3173_v50 }
  0x1f   :  { %v3156_v54 = vld [vmem:[#allocation2 + $0x360] sm:$0xf]  ;;  %v4176_v55 = vld [vmem:[#allocation2 + $0x36c] sm:$0xf0]  ;;  %v3029_v58 = vor.u32 %v4144_v53, %v3028_v52  ;;  %1639 = vmatpush.bf16.msra.mxu0 %v2773_v56 }
  0x20   :  { %v2756_v59 = vld [vmem:[#allocation2 + $0x40] sm:$0xf]  ;;  %v4076_v60 = vld [vmem:[#allocation2 + $0x4c] sm:$0xf0]  ;;  %v3157_v62 = vor.u32 %v4176_v55, %v3156_v54  ;;  %1652 = vmatpush.bf16.msra.mxu1 %v2901_v57 }
  0x21   :  { %v2884_v61 = vld [vmem:[#allocation2 + $0x140] sm:$0xf]  ;;  %v4108_v63 = vld [vmem:[#allocation2 + $0x14c] sm:$0xf0]  ;;  %v2757_v4 = vor.u32 %v4076_v60, %v2756_v59  ;;  %1665 = vmatpush.bf16.msra.mxu2 %v3029_v58 }
  0x22   :  { %v3012_v0 = vld [vmem:[#allocation2 + $0x240] sm:$0xf]  ;;  %v4140_v1 = vld [vmem:[#allocation2 + $0x24c] sm:$0xf0]  ;;  %v2885_v5 = vor.u32 %v4108_v63, %v2884_v61  ;;  %1678 = vmatpush.bf16.msra.mxu3 %v3157_v62 }
  0x23   :  { %v3140_v2 = vld [vmem:[#allocation2 + $0x340] sm:$0xf]  ;;  %v4172_v3 = vld [vmem:[#allocation2 + $0x34c] sm:$0xf0]  ;;  %v3013_v6 = vor.u32 %v4140_v1, %v3012_v0  ;;  %1640 = vmatpush.bf16.msra.mxu0 %v2757_v4 }
  0x24   :  { %v2740_v7 = vld [vmem:[#allocation2 + $0x20] sm:$0xf]  ;;  %v4072_v8 = vld [vmem:[#allocation2 + $0x2c] sm:$0xf0]  ;;  %v3141_v10 = vor.u32 %v4172_v3, %v3140_v2  ;;  %1653 = vmatpush.bf16.msra.mxu1 %v2885_v5  ;;  %v58_v2 = vld [vmem:[%s4665_s0] sm:$0xff] }
  0x25   :  { %v2868_v9 = vld [vmem:[#allocation2 + $0x120] sm:$0xf]  ;;  %v4104_v11 = vld [vmem:[#allocation2 + $0x12c] sm:$0xf0]  ;;  %v2741_v16 = vor.u32 %v4072_v8, %v2740_v7  ;;  %1666 = vmatpush.bf16.msra.mxu2 %v3013_v6  ;;  %62 = vst [vmem:[#allocation1] ss:$4 sm:$0xff] %v58_v2 }
  0x26   :  { %v2996_v12 = vld [vmem:[#allocation2 + $0x220] sm:$0xf]  ;;  %v4136_v13 = vld [vmem:[#allocation2 + $0x22c] sm:$0xf0]  ;;  %v2869_v19 = vor.u32 %v4104_v11, %v2868_v9  ;;  %1679 = vmatpush.bf16.msra.mxu3 %v3141_v10 }
  0x27   :  { %v3124_v14 = vld [vmem:[#allocation2 + $0x320] sm:$0xf]  ;;  %v4168_v15 = vld [vmem:[#allocation2 + $0x32c] sm:$0xf0]  ;;  %v2997_v20 = vor.u32 %v4136_v13, %v2996_v12  ;;  %1641 = vmatpush.bf16.msra.mxu0 %v2741_v16 }
  0x28   :  { %v2724_v17 = vld [vmem:[#allocation2] sm:$0xf]  ;;  %v4068_v18 = vld [vmem:[#allocation2 + $0xc] sm:$0xf0]  ;;  %v3125_v24 = vor.u32 %v4168_v15, %v3124_v14  ;;  %1654 = vmatpush.bf16.msra.mxu1 %v2869_v19 }
  0x29   :  { %v2852_v21 = vld [vmem:[#allocation2 + $0x100] sm:$0xf]  ;;  %v4100_v22 = vld [vmem:[#allocation2 + $0x10c] sm:$0xf0]  ;;  %v2725_v31 = vor.u32 %v4068_v18, %v2724_v17  ;;  %1667 = vmatpush.bf16.msra.mxu2 %v2997_v20 }
  0x2a   :  { %v2980_v23 = vld [vmem:[#allocation2 + $0x200] sm:$0xf]  ;;  %v4132_v25 = vld [vmem:[#allocation2 + $0x20c] sm:$0xf0]  ;;  %v2853_v35 = vor.u32 %v4100_v22, %v2852_v21  ;;  %1680 = vmatpush.bf16.msra.mxu3 %v3125_v24 }
  0x2b   :  { %v3108_v26 = vld [vmem:[#allocation2 + $0x300] sm:$0xf]  ;;  %v4164_v27 = vld [vmem:[#allocation2 + $0x30c] sm:$0xf0]  ;;  %v2981_v36 = vor.u32 %v4132_v25, %v2980_v23  ;;  %1642 = vmatpush.bf16.msra.mxu0 %v2725_v31 }
  0x2c   :  { %v3348_v28 = vld [vmem:[#allocation2 + $0x4e0] sm:$0xf]  ;;  %v4224_v29 = vld [vmem:[#allocation2 + $0x4ec] sm:$0xf0]  ;;  %v3109_v39 = vor.u32 %v4164_v27, %v3108_v26  ;;  %1655 = vmatpush.bf16.msra.mxu1 %v2853_v35 }
  0x2d   :  { %v3476_v30 = vld [vmem:[#allocation2 + $0x5e0] sm:$0xf]  ;;  %v4256_v32 = vld [vmem:[#allocation2 + $0x5ec] sm:$0xf0]  ;;  %v3349_v40 = vor.u32 %v4224_v29, %v3348_v28  ;;  %1668 = vmatpush.bf16.msra.mxu2 %v2981_v36 }
  0x2e   :  { %v3604_v33 = vld [vmem:[#allocation2 + $0x6e0] sm:$0xf]  ;;  %v4288_v34 = vld [vmem:[#allocation2 + $0x6ec] sm:$0xf0]  ;;  %v3477_v41 = vor.u32 %v4256_v32, %v3476_v30  ;;  %1681 = vmatpush.bf16.msra.mxu3 %v3109_v39 }
  0x2f   :  { %v3732_v37 = vld [vmem:[#allocation2 + $0x7e0] sm:$0xf]  ;;  %v4320_v38 = vld [vmem:[#allocation2 + $0x7ec] sm:$0xf0]  ;;  %v3605_v42 = vor.u32 %v4288_v34, %v3604_v33  ;;  %1687 = vmatpush.bf16.msrb.mxu0 %v3349_v40 }
  0x30   :  { %v3332_v43 = vld [vmem:[#allocation2 + $0x4c0] sm:$0xf]  ;;  %v4220_v44 = vld [vmem:[#allocation2 + $0x4cc] sm:$0xf0]  ;;  %v3733_v46 = vor.u32 %v4320_v38, %v3732_v37  ;;  %1700 = vmatpush.bf16.msrb.mxu1 %v3477_v41 }
  0x31   :  { %v3460_v45 = vld [vmem:[#allocation2 + $0x5c0] sm:$0xf]  ;;  %v4252_v47 = vld [vmem:[#allocation2 + $0x5cc] sm:$0xf0]  ;;  %v3333_v52 = vor.u32 %v4220_v44, %v3332_v43  ;;  %1713 = vmatpush.bf16.msrb.mxu2 %v3605_v42 }
  0x32   :  { %v3588_v48 = vld [vmem:[#allocation2 + $0x6c0] sm:$0xf]  ;;  %v4284_v49 = vld [vmem:[#allocation2 + $0x6cc] sm:$0xf0]  ;;  %v3461_v53 = vor.u32 %v4252_v47, %v3460_v45  ;;  %1726 = vmatpush.bf16.msrb.mxu3 %v3733_v46 }
  0x33   :  { %v3716_v50 = vld [vmem:[#allocation2 + $0x7c0] sm:$0xf]  ;;  %v4316_v51 = vld [vmem:[#allocation2 + $0x7cc] sm:$0xf0]  ;;  %v3589_v54 = vor.u32 %v4284_v49, %v3588_v48  ;;  %1688 = vmatpush.bf16.msrb.mxu0 %v3333_v52 }
  0x34   :  { %v3316_v55 = vld [vmem:[#allocation2 + $0x4a0] sm:$0xf]  ;;  %v4216_v56 = vld [vmem:[#allocation2 + $0x4ac] sm:$0xf0]  ;;  %v3717_v58 = vor.u32 %v4316_v51, %v3716_v50  ;;  %1701 = vmatpush.bf16.msrb.mxu1 %v3461_v53 }
  0x35   :  { %v3444_v57 = vld [vmem:[#allocation2 + $0x5a0] sm:$0xf]  ;;  %v4248_v59 = vld [vmem:[#allocation2 + $0x5ac] sm:$0xf0]  ;;  %v3317_v0 = vor.u32 %v4216_v56, %v3316_v55  ;;  %1714 = vmatpush.bf16.msrb.mxu2 %v3589_v54 }
  0x36   :  { %v3572_v60 = vld [vmem:[#allocation2 + $0x6a0] sm:$0xf]  ;;  %v4280_v61 = vld [vmem:[#allocation2 + $0x6ac] sm:$0xf0]  ;;  %v3445_v3 = vor.u32 %v4248_v59, %v3444_v57  ;;  %1727 = vmatpush.bf16.msrb.mxu3 %v3717_v58 }
  0x37   :  { %v3700_v62 = vld [vmem:[#allocation2 + $0x7a0] sm:$0xf]  ;;  %v4312_v63 = vld [vmem:[#allocation2 + $0x7ac] sm:$0xf0]  ;;  %v3573_v4 = vor.u32 %v4280_v61, %v3572_v60  ;;  %1689 = vmatpush.bf16.msrb.mxu0 %v3317_v0 }
  0x38   :  { %v3300_v1 = vld [vmem:[#allocation2 + $0x480] sm:$0xf]  ;;  %v4212_v5 = vld [vmem:[#allocation2 + $0x48c] sm:$0xf0]  ;;  %v3701_v7 = vor.u32 %v4312_v63, %v3700_v62  ;;  %1702 = vmatpush.bf16.msrb.mxu1 %v3445_v3 }
  0x39   :  { %v3428_v6 = vld [vmem:[#allocation2 + $0x580] sm:$0xf]  ;;  %v4244_v8 = vld [vmem:[#allocation2 + $0x58c] sm:$0xf0]  ;;  %v3301_v13 = vor.u32 %v4212_v5, %v3300_v1  ;;  %1715 = vmatpush.bf16.msrb.mxu2 %v3573_v4 }
  0x3a   :  { %v3556_v9 = vld [vmem:[#allocation2 + $0x680] sm:$0xf]  ;;  %v4276_v10 = vld [vmem:[#allocation2 + $0x68c] sm:$0xf0]  ;;  %v3429_v15 = vor.u32 %v4244_v8, %v3428_v6  ;;  %1728 = vmatpush.bf16.msrb.mxu3 %v3701_v7  ;;  %v4094_v6 = vld [vmem:[#allocation2 + $0xe4] sm:$0xf] }
  0x3b   :  { %v3684_v11 = vld [vmem:[#allocation2 + $0x780] sm:$0xf]  ;;  %v4308_v12 = vld [vmem:[#allocation2 + $0x78c] sm:$0xf0]  ;;  %v3557_v16 = vor.u32 %v4276_v10, %v3556_v9  ;;  %1690 = vmatpush.bf16.msrb.mxu0 %v3301_v13  ;;  %v2838_v7 = vld [vmem:[#allocation2 + $0xf0] sm:$0xf0] }
  0x3c   :  { %v3284_v14 = vld [vmem:[#allocation2 + $0x460] sm:$0xf]  ;;  %v4208_v17 = vld [vmem:[#allocation2 + $0x46c] sm:$0xf0]  ;;  %v3685_v20 = vor.u32 %v4308_v12, %v3684_v11  ;;  %1703 = vmatpush.bf16.msrb.mxu1 %v3429_v15  ;;  %v4126_v8 = vld [vmem:[#allocation2 + $0x1e4] sm:$0xf] }
  0x3d   :  { %v3412_v18 = vld [vmem:[#allocation2 + $0x560] sm:$0xf]  ;;  %v4240_v19 = vld [vmem:[#allocation2 + $0x56c] sm:$0xf0]  ;;  %v3285_v27 = vor.u32 %v4208_v17, %v3284_v14  ;;  %1716 = vmatpush.bf16.msrb.mxu2 %v3557_v16  ;;  %v2966_v9 = vld [vmem:[#allocation2 + $0x1f0] sm:$0xf0] }
  0x3e   :  { %v3540_v21 = vld [vmem:[#allocation2 + $0x660] sm:$0xf]  ;;  %v4272_v22 = vld [vmem:[#allocation2 + $0x66c] sm:$0xf0]  ;;  %v3413_v28 = vor.u32 %v4240_v19, %v3412_v18  ;;  %1729 = vmatpush.bf16.msrb.mxu3 %v3685_v20  ;;  %v4158_v10 = vld [vmem:[#allocation2 + $0x2e4] sm:$0xf] }
  0x3f   :  { %v3668_v23 = vld [vmem:[#allocation2 + $0x760] sm:$0xf]  ;;  %v4304_v24 = vld [vmem:[#allocation2 + $0x76c] sm:$0xf0]  ;;  %v3541_v32 = vor.u32 %v4272_v22, %v3540_v21  ;;  %1691 = vmatpush.bf16.msrb.mxu0 %v3285_v27  ;;  %v3094_v12 = vld [vmem:[#allocation2 + $0x2f0] sm:$0xf0]  ;;  %v2841_v21 = vor.u32 %v4094_v6, %v2838_v7 }
  0x40   :  { %v3268_v25 = vld [vmem:[#allocation2 + $0x440] sm:$0xf]  ;;  %v4204_v26 = vld [vmem:[#allocation2 + $0x44c] sm:$0xf0]  ;;  %v3669_v37 = vor.u32 %v4304_v24, %v3668_v23  ;;  %1704 = vmatpush.bf16.msrb.mxu1 %v3413_v28  ;;  %v4190_v13 = vld [vmem:[#allocation2 + $0x3e4] sm:$0xf]  ;;  %v2969_v24 = vor.u32 %v4126_v8, %v2966_v9 }
  0x41   :  { %v3396_v29 = vld [vmem:[#allocation2 + $0x540] sm:$0xf]  ;;  %v67_v30 = vld.sshfl [vmem:[#allocation1 + $0x10] sm:$0xff pattern:$0x73625140]  ;;  %v3269_v45 = vor.u32 %v4204_v26, %v3268_v25  ;;  %1717 = vmatpush.bf16.msrb.mxu2 %v3541_v32  ;;  %v3097_v25 = vor.u32 %v4158_v10, %v3094_v12 }
  0x42   :  { %v65_v31 = vld.sshfl [vmem:[#allocation1] sm:$0xff pattern:$0x73625140]  ;;  %v4517_v33 = vpack.c.bf16 %v67_v30, %v67_v30  ;;  %v68_v35 = vld.sshfl [vmem:[#allocation1 + $0x18] sm:$0xff pattern:$0x73625140]  ;;  %1730 = vmatpush.bf16.msrb.mxu3 %v3669_v37 }
  0x43   :  { %v4519_v34 = vpack.c.bf16 %v65_v31, %v65_v31  ;;  %v66_v36 = vld.sshfl [vmem:[#allocation1 + $0x8] sm:$0xff pattern:$0x73625140]  ;;  %v4236_v38 = vld [vmem:[#allocation2 + $0x54c] sm:$0xf0]  ;;  %v4521_v41 = vpack.c.bf16 %v68_v35, %v68_v35  ;;  %1692 = vmatpush.bf16.msrb.mxu0 %v3269_v45 }
  0x44   :  { %v3524_v39 = vld [vmem:[#allocation2 + $0x640] sm:$0xf]  ;;  %v4268_v40 = vld [vmem:[#allocation2 + $0x64c] sm:$0xf0]  ;;  %v4523_v42 = vpack.c.bf16 %v66_v36, %v66_v36  ;;  %1669 = vmatmul.bf16.vlgmr.msra.gmra.mxu2 %v4517_v33  ;;  %v3397_v48 = vor.u32 %v4236_v38, %v3396_v29  ;;  %v3222_v14 = vld [vmem:[#allocation2 + $0x3f0] sm:$0xf0] }
  0x45   :  { %v3652_v43 = vld [vmem:[#allocation2 + $0x740] sm:$0xf]  ;;  %v4300_v44 = vld [vmem:[#allocation2 + $0x74c] sm:$0xf0]  ;;  %1643 = vmatmul.bf16.vlgmr.msra.gmra.mxu0 %v4519_v34  ;;  %1682 = vmatmul.bf16.vlgmr.msra.gmra.mxu3 %v4521_v41  ;;  %v3525_v49 = vor.u32 %v4268_v40, %v3524_v39  ;;  %v4090_v17 = vld [vmem:[#allocation2 + $0xc4] sm:$0xf]  ;;  %v3225_v28 = vor.u32 %v4190_v13, %v3222_v14 }
  0x46   :  { %v3252_v46 = vld [vmem:[#allocation2 + $0x420] sm:$0xf]  ;;  %v4200_v47 = vld [vmem:[#allocation2 + $0x42c] sm:$0xf0]  ;;  %v3653_v53 = vor.u32 %v4300_v44, %v3652_v43  ;;  %1656 = vmatmul.bf16.vlgmr.msra.gmra.mxu1 %v4523_v42  ;;  %v2822_v18 = vld [vmem:[#allocation2 + $0xd0] sm:$0xf0] }
  0x47   :  { %v3380_v50 = vld [vmem:[#allocation2 + $0x520] sm:$0xf]  ;;  %v4232_v51 = vld [vmem:[#allocation2 + $0x52c] sm:$0xf0]  ;;  %v3253_v59 = vor.u32 %v4200_v47, %v3252_v46  ;;  %1705 = vmatpush.bf16.msrb.mxu1 %v3397_v48  ;;  %1718 = vmatpush.bf16.msrb.mxu2 %v3525_v49  ;;  %v4122_v26 = vld [vmem:[#allocation2 + $0x1c4] sm:$0xf]  ;;  %v2825_v39 = vor.u32 %v4090_v17, %v2822_v18 }
  0x48   :  { %v59_v52 = vld [vmem:[%s4665_s0 + $0x8] sm:$0xff]  ;;  %v4264_v55 = vld [vmem:[#allocation2 + $0x62c] sm:$0xf0]  ;;  %v3381_v63 = vor.u32 %v4232_v51, %v3380_v50  ;;  %1731 = vmatpush.bf16.msrb.mxu3 %v3653_v53  ;;  %v2950_v29 = vld [vmem:[#allocation2 + $0x1d0] sm:$0xf0] }
  0x49   :  { %v3508_v54 = vld [vmem:[#allocation2 + $0x620] sm:$0xf]  ;;  %64 = vst [vmem:[#allocation1 + $0x20] ss:$4 sm:$0xff] %v59_v52  ;;  %v4296_v57 = vld [vmem:[#allocation2 + $0x72c] sm:$0xf0]  ;;  %1693 = vmatpush.bf16.msrb.mxu0 %v3253_v59  ;;  %v2953_v43 = vor.u32 %v4122_v26, %v2950_v29 }
  0x4a   :  { %v3636_v56 = vld [vmem:[#allocation2 + $0x720] sm:$0xf]  ;;  %v4196_v60 = vld [vmem:[#allocation2 + $0x40c] sm:$0xf0]  ;;  %v3509_v0 = vor.u32 %v4264_v55, %v3508_v54  ;;  %v4154_v30 = vld [vmem:[#allocation2 + $0x2c4] sm:$0xf] }
  0x4b   :  { %v3236_v58 = vld [vmem:[#allocation2 + $0x400] sm:$0xf]  ;;  %v4228_v62 = vld [vmem:[#allocation2 + $0x50c] sm:$0xf0]  ;;  %v3637_v4 = vor.u32 %v4296_v57, %v3636_v56  ;;  %1706 = vmatpush.bf16.msrb.mxu1 %v3381_v63  ;;  %v3078_v31 = vld [vmem:[#allocation2 + $0x2d0] sm:$0xf0] }
  0x4c   :  { %v3364_v61 = vld [vmem:[#allocation2 + $0x500] sm:$0xf]  ;;  %v4260_v2 = vld [vmem:[#allocation2 + $0x60c] sm:$0xf0]  ;;  %v3237_v11 = vor.u32 %v4196_v60, %v3236_v58  ;;  %1719 = vmatpush.bf16.msrb.mxu2 %v3509_v0  ;;  %v4186_v35 = vld [vmem:[#allocation2 + $0x3c4] sm:$0xf]  ;;  %v3081_v44 = vor.u32 %v4154_v30, %v3078_v31 }
  0x4d   :  { %v3492_v1 = vld [vmem:[#allocation2 + $0x600] sm:$0xf]  ;;  %v4292_v5 = vld [vmem:[#allocation2 + $0x70c] sm:$0xf0]  ;;  %v3365_v15 = vor.u32 %v4228_v62, %v3364_v61  ;;  %1732 = vmatpush.bf16.msrb.mxu3 %v3637_v4  ;;  %v3206_v36 = vld [vmem:[#allocation2 + $0x3d0] sm:$0xf0] }
  0x4e   :  { %v3620_v3 = vld [vmem:[#allocation2 + $0x700] sm:$0xf]  ;;  %v3493_v16 = vor.u32 %v4260_v2, %v3492_v1  ;;  %1694 = vmatpush.bf16.msrb.mxu0 %v3237_v11  ;;  %v4086_v45 = vld [vmem:[#allocation2 + $0xa4] sm:$0xf]  ;;  %v2806_v46 = vld [vmem:[#allocation2 + $0xb0] sm:$0xf0]  ;;  %v3209_v48 = vor.u32 %v4186_v35, %v3206_v36 }
  0x4f   :  { %v3621_v20 = vor.u32 %v4292_v5, %v3620_v3  ;;  %1707 = vmatpush.bf16.msrb.mxu1 %v3365_v15  ;;  %v4118_v47 = vld [vmem:[#allocation2 + $0x1a4] sm:$0xf]  ;;  %v2934_v49 = vld [vmem:[#allocation2 + $0x1b0] sm:$0xf0]  ;;  %v2809_v54 = vor.u32 %v4086_v45, %v2806_v46 }
  0x50   :  { %v71_v19 = vld.sshfl [vmem:[#allocation1 + $0x30] sm:$0xff pattern:$0x73625140]  ;;  %v69_v22 = vld.sshfl [vmem:[#allocation1 + $0x20] sm:$0xff pattern:$0x73625140]  ;;  %1720 = vmatpush.bf16.msrb.mxu2 %v3493_v16  ;;  %v2937_v55 = vor.u32 %v4118_v47, %v2934_v49 }
  0x51   :  { %v72_v23 = vld.sshfl [vmem:[#allocation1 + $0x38] sm:$0xff pattern:$0x73625140]  ;;  %v70_v27 = vld.sshfl [vmem:[#allocation1 + $0x28] sm:$0xff pattern:$0x73625140]  ;;  %v4532_v32 = vpack.c.bf16 %v71_v19, %v71_v19  ;;  %v4534_v37 = vpack.c.bf16 %v69_v22, %v69_v22  ;;  %1733 = vmatpush.bf16.msrb.mxu3 %v3621_v20 }
  0x52   :  { %v4536_v38 = vpack.c.bf16 %v72_v23, %v72_v23  ;;  %1739 = vmatpush.bf16.msra.mxu0 %v2841_v21  ;;  %v4538_v40 = vpack.c.bf16 %v70_v27, %v70_v27  ;;  %v4150_v50 = vld [vmem:[#allocation2 + $0x2a4] sm:$0xf]  ;;  %v3062_v51 = vld [vmem:[#allocation2 + $0x2b0] sm:$0xf0] }
  0x53   :  { %1752 = vmatpush.bf16.msra.mxu1 %v2969_v24  ;;  %v4182_v52 = vld [vmem:[#allocation2 + $0x3a4] sm:$0xf]  ;;  %v3190_v53 = vld [vmem:[#allocation2 + $0x3b0] sm:$0xf0]  ;;  %v3065_v56 = vor.u32 %v4150_v50, %v3062_v51 }
  0x54   :  { %1765 = vmatpush.bf16.msra.mxu2 %v3097_v25  ;;  %v4082_v57 = vld [vmem:[#allocation2 + $0x84] sm:$0xf]  ;;  %v2790_v58 = vld [vmem:[#allocation2 + $0x90] sm:$0xf0]  ;;  %v3193_v60 = vor.u32 %v4182_v52, %v3190_v53 }
  0x55   :  { %1778 = vmatpush.bf16.msra.mxu3 %v3225_v28  ;;  %1721 = vmatmul.bf16.vlgmr.msrb.gmra.mxu2 %v4532_v32  ;;  %v4114_v59 = vld [vmem:[#allocation2 + $0x184] sm:$0xf]  ;;  %v2918_v61 = vld [vmem:[#allocation2 + $0x190] sm:$0xf0]  ;;  %v2793_v2 = vor.u32 %v4082_v57, %v2790_v58 }
  0x56   :  { %1695 = vmatmul.bf16.vlgmr.msrb.gmra.mxu0 %v4534_v37  ;;  %1734 = vmatmul.bf16.vlgmr.msrb.gmra.mxu3 %v4536_v38  ;;  %v4146_v62 = vld [vmem:[#allocation2 + $0x284] sm:$0xf]  ;;  %v3046_v63 = vld [vmem:[#allocation2 + $0x290] sm:$0xf0]  ;;  %v2921_v3 = vor.u32 %v4114_v59, %v2918_v61 }
  0x57   :  { %1740 = vmatpush.bf16.msra.mxu0 %v2825_v39  ;;  %1708 = vmatmul.bf16.vlgmr.msrb.gmra.mxu1 %v4538_v40  ;;  %v4178_v0 = vld [vmem:[#allocation2 + $0x384] sm:$0xf]  ;;  %v3174_v1 = vld [vmem:[#allocation2 + $0x390] sm:$0xf0]  ;;  %v3049_v4 = vor.u32 %v4146_v62, %v3046_v63 }
  0x58   :  { %1753 = vmatpush.bf16.msra.mxu1 %v2953_v43  ;;  %1766 = vmatpush.bf16.msra.mxu2 %v3081_v44  ;;  %v4078_v5 = vld [vmem:[#allocation2 + $0x64] sm:$0xf]  ;;  %v2774_v6 = vld [vmem:[#allocation2 + $0x70] sm:$0xf0]  ;;  %v3177_v8 = vor.u32 %v4178_v0, %v3174_v1 }
  0x59   :  { %1779 = vmatpush.bf16.msra.mxu3 %v3209_v48  ;;  %v4110_v7 = vld [vmem:[#allocation2 + $0x164] sm:$0xf]  ;;  %v2902_v9 = vld [vmem:[#allocation2 + $0x170] sm:$0xf0]  ;;  %v2777_v14 = vor.u32 %v4078_v5, %v2774_v6 }
  0x5a   :  { %v4142_v10 = vld [vmem:[#allocation2 + $0x264] sm:$0xf]  ;;  %v3030_v11 = vld [vmem:[#allocation2 + $0x270] sm:$0xf0]  ;;  %v2905_v15 = vor.u32 %v4110_v7, %v2902_v9 }
  0x5b   :  { %1741 = vmatpush.bf16.msra.mxu0 %v2809_v54  ;;  %v4174_v12 = vld [vmem:[#allocation2 + $0x364] sm:$0xf]  ;;  %v3158_v13 = vld [vmem:[#allocation2 + $0x370] sm:$0xf0]  ;;  %v3033_v16 = vor.u32 %v4142_v10, %v3030_v11 }
  0x5c   :  { %1754 = vmatpush.bf16.msra.mxu1 %v2937_v55  ;;  %1767 = vmatpush.bf16.msra.mxu2 %v3065_v56  ;;  %v4074_v17 = vld [vmem:[#allocation2 + $0x44] sm:$0xf]  ;;  %v2758_v18 = vld [vmem:[#allocation2 + $0x50] sm:$0xf0]  ;;  %v3161_v20 = vor.u32 %v4174_v12, %v3158_v13 }
  0x5d   :  { %1780 = vmatpush.bf16.msra.mxu3 %v3193_v60  ;;  %v4106_v19 = vld [vmem:[#allocation2 + $0x144] sm:$0xf]  ;;  %v2886_v21 = vld [vmem:[#allocation2 + $0x150] sm:$0xf0]  ;;  %v2761_v26 = vor.u32 %v4074_v17, %v2758_v18 }
  0x5e   :  { %v4138_v22 = vld [vmem:[#allocation2 + $0x244] sm:$0xf]  ;;  %v3014_v23 = vld [vmem:[#allocation2 + $0x250] sm:$0xf0]  ;;  %v2889_v27 = vor.u32 %v4106_v19, %v2886_v21 }
  0x5f   :  { %1742 = vmatpush.bf16.msra.mxu0 %v2793_v2  ;;  %v4170_v24 = vld [vmem:[#allocation2 + $0x344] sm:$0xf]  ;;  %v3142_v25 = vld [vmem:[#allocation2 + $0x350] sm:$0xf0]  ;;  %v3017_v28 = vor.u32 %v4138_v22, %v3014_v23 }
  0x60   :  { %1755 = vmatpush.bf16.msra.mxu1 %v2921_v3  ;;  %1768 = vmatpush.bf16.msra.mxu2 %v3049_v4  ;;  %v4070_v29 = vld [vmem:[#allocation2 + $0x24] sm:$0xf]  ;;  %v2742_v30 = vld [vmem:[#allocation2 + $0x30] sm:$0xf0]  ;;  %v3145_v35 = vor.u32 %v4170_v24, %v3142_v25 }
  0x61   :  { %1781 = vmatpush.bf16.msra.mxu3 %v3177_v8  ;;  %v4102_v31 = vld [vmem:[#allocation2 + $0x124] sm:$0xf]  ;;  %v2870_v36 = vld [vmem:[#allocation2 + $0x130] sm:$0xf0]  ;;  %v2745_v46 = vor.u32 %v4070_v29, %v2742_v30 }
  0x62   :  { %v4134_v39 = vld [vmem:[#allocation2 + $0x224] sm:$0xf]  ;;  %v2998_v43 = vld [vmem:[#allocation2 + $0x230] sm:$0xf0]  ;;  %v2873_v49 = vor.u32 %v4102_v31, %v2870_v36 }
  0x63   :  { %1743 = vmatpush.bf16.msra.mxu0 %v2777_v14  ;;  %v4166_v44 = vld [vmem:[#allocation2 + $0x324] sm:$0xf]  ;;  %v3126_v45 = vld [vmem:[#allocation2 + $0x330] sm:$0xf0]  ;;  %v3001_v50 = vor.u32 %v4134_v39, %v2998_v43 }
  0x64   :  { %1756 = vmatpush.bf16.msra.mxu1 %v2905_v15  ;;  %1769 = vmatpush.bf16.msra.mxu2 %v3033_v16  ;;  %v4066_v47 = vld [vmem:[#allocation2 + $0x4] sm:$0xf]  ;;  %v2726_v48 = vld [vmem:[#allocation2 + $0x10] sm:$0xf0]  ;;  %v3129_v54 = vor.u32 %v4166_v44, %v3126_v45 }
  0x65   :  { %1782 = vmatpush.bf16.msra.mxu3 %v3161_v20  ;;  %v4098_v51 = vld [vmem:[#allocation2 + $0x104] sm:$0xf]  ;;  %v2854_v52 = vld [vmem:[#allocation2 + $0x110] sm:$0xf0]  ;;  %v2729_v61 = vor.u32 %v4066_v47, %v2726_v48 }
  0x66   :  { %v4130_v53 = vld [vmem:[#allocation2 + $0x204] sm:$0xf]  ;;  %v2982_v55 = vld [vmem:[#allocation2 + $0x210] sm:$0xf0]  ;;  %v2857_v1 = vor.u32 %v4098_v51, %v2854_v52 }
  0x67   :  { %1744 = vmatpush.bf16.msra.mxu0 %v2761_v26  ;;  %v4162_v56 = vld [vmem:[#allocation2 + $0x304] sm:$0xf]  ;;  %v3110_v57 = vld [vmem:[#allocation2 + $0x310] sm:$0xf0]  ;;  %v2985_v2 = vor.u32 %v4130_v53, %v2982_v55 }
  0x68   :  { %1757 = vmatpush.bf16.msra.mxu1 %v2889_v27  ;;  %1770 = vmatpush.bf16.msra.mxu2 %v3017_v28  ;;  %v4222_v58 = vld [vmem:[#allocation2 + $0x4e4] sm:$0xf]  ;;  %v3350_v59 = vld [vmem:[#allocation2 + $0x4f0] sm:$0xf0]  ;;  %v3113_v5 = vor.u32 %v4162_v56, %v3110_v57 }
  0x69   :  { %1783 = vmatpush.bf16.msra.mxu3 %v3145_v35  ;;  %v4254_v60 = vld [vmem:[#allocation2 + $0x5e4] sm:$0xf]  ;;  %v3478_v62 = vld [vmem:[#allocation2 + $0x5f0] sm:$0xf0]  ;;  %v3353_v6 = vor.u32 %v4222_v58, %v3350_v59 }
  0x6a   :  { %v4286_v63 = vld [vmem:[#allocation2 + $0x6e4] sm:$0xf]  ;;  %v3606_v0 = vld [vmem:[#allocation2 + $0x6f0] sm:$0xf0]  ;;  %v3481_v7 = vor.u32 %v4254_v60, %v3478_v62 }
  0x6b   :  { %1745 = vmatpush.bf16.msra.mxu0 %v2745_v46  ;;  %v4318_v3 = vld [vmem:[#allocation2 + $0x7e4] sm:$0xf]  ;;  %v3734_v4 = vld [vmem:[#allocation2 + $0x7f0] sm:$0xf0]  ;;  %v3609_v8 = vor.u32 %v4286_v63, %v3606_v0 }
  0x6c   :  { %1758 = vmatpush.bf16.msra.mxu1 %v2873_v49  ;;  %1771 = vmatpush.bf16.msra.mxu2 %v3001_v50  ;;  %v4218_v9 = vld [vmem:[#allocation2 + $0x4c4] sm:$0xf]  ;;  %v3334_v10 = vld [vmem:[#allocation2 + $0x4d0] sm:$0xf0]  ;;  %v3737_v12 = vor.u32 %v4318_v3, %v3734_v4 }
  0x6d   :  { %1784 = vmatpush.bf16.msra.mxu3 %v3129_v54  ;;  %v4250_v11 = vld [vmem:[#allocation2 + $0x5c4] sm:$0xf]  ;;  %v3462_v13 = vld [vmem:[#allocation2 + $0x5d0] sm:$0xf0]  ;;  %v3337_v18 = vor.u32 %v4218_v9, %v3334_v10 }
  0x6e   :  { %v4282_v14 = vld [vmem:[#allocation2 + $0x6c4] sm:$0xf]  ;;  %v3590_v15 = vld [vmem:[#allocation2 + $0x6d0] sm:$0xf0]  ;;  %v3465_v19 = vor.u32 %v4250_v11, %v3462_v13 }
  0x6f   :  { %1746 = vmatpush.bf16.msra.mxu0 %v2729_v61  ;;  %v4314_v16 = vld [vmem:[#allocation2 + $0x7c4] sm:$0xf]  ;;  %v3718_v17 = vld [vmem:[#allocation2 + $0x7d0] sm:$0xf0]  ;;  %v3593_v20 = vor.u32 %v4282_v14, %v3590_v15 }
  0x70   :  { %1759 = vmatpush.bf16.msra.mxu1 %v2857_v1  ;;  %1772 = vmatpush.bf16.msra.mxu2 %v2985_v2  ;;  %v4214_v21 = vld [vmem:[#allocation2 + $0x4a4] sm:$0xf]  ;;  %v3318_v22 = vld [vmem:[#allocation2 + $0x4b0] sm:$0xf0]  ;;  %v3721_v24 = vor.u32 %v4314_v16, %v3718_v17 }
  0x71   :  { %1785 = vmatpush.bf16.msra.mxu3 %v3113_v5  ;;  %v4246_v23 = vld [vmem:[#allocation2 + $0x5a4] sm:$0xf]  ;;  %v3446_v25 = vld [vmem:[#allocation2 + $0x5b0] sm:$0xf0]  ;;  %v3321_v30 = vor.u32 %v4214_v21, %v3318_v22 }
  0x72   :  { %v4278_v26 = vld [vmem:[#allocation2 + $0x6a4] sm:$0xf]  ;;  %v3574_v27 = vld [vmem:[#allocation2 + $0x6b0] sm:$0xf0]  ;;  %1747 = vmatmul.bf16.vlgmr.msra.gmra.mxu0 %v4519_v34  ;;  %v3449_v31 = vor.u32 %v4246_v23, %v3446_v25 }
  0x73   :  { %1791 = vmatpush.bf16.msrb.mxu0 %v3353_v6  ;;  %1773 = vmatmul.bf16.vlgmr.msra.gmra.mxu2 %v4517_v33  ;;  %v4310_v28 = vld [vmem:[#allocation2 + $0x7a4] sm:$0xf]  ;;  %v3702_v29 = vld [vmem:[#allocation2 + $0x7b0] sm:$0xf0]  ;;  %v3577_v35 = vor.u32 %v4278_v26, %v3574_v27 }
  0x74   :  { %1804 = vmatpush.bf16.msrb.mxu1 %v3481_v7  ;;  %1817 = vmatpush.bf16.msrb.mxu2 %v3609_v8  ;;  %v4210_v36 = vld [vmem:[#allocation2 + $0x484] sm:$0xf]  ;;  %v3302_v39 = vld [vmem:[#allocation2 + $0x490] sm:$0xf0]  ;;  %v3705_v44 = vor.u32 %v4310_v28, %v3702_v29 }
  0x75   :  { %1830 = vmatpush.bf16.msrb.mxu3 %v3737_v12  ;;  %1760 = vmatmul.bf16.vlgmr.msra.gmra.mxu1 %v4523_v42  ;;  %v4242_v43 = vld [vmem:[#allocation2 + $0x584] sm:$0xf]  ;;  %v3430_v45 = vld [vmem:[#allocation2 + $0x590] sm:$0xf0]  ;;  %v3305_v50 = vor.u32 %v4210_v36, %v3302_v39  ;;  %v2844_v39 = vld [vmem:[#allocation2 + $0xe8] sm:$0xf] }
  0x76   :  { %1786 = vmatmul.bf16.vlgmr.msra.gmra.mxu3 %v4521_v41  ;;  %v4274_v46 = vld [vmem:[#allocation2 + $0x684] sm:$0xf]  ;;  %v3558_v47 = vld [vmem:[#allocation2 + $0x690] sm:$0xf0]  ;;  %v3433_v51 = vor.u32 %v4242_v43, %v3430_v45  ;;  %v4097_v43 = vld [vmem:[#allocation2 + $0xf4] sm:$0xf0] }
  0x77   :  { %1792 = vmatpush.bf16.msrb.mxu0 %v3337_v18  ;;  %v4306_v48 = vld [vmem:[#allocation2 + $0x784] sm:$0xf]  ;;  %v3686_v49 = vld [vmem:[#allocation2 + $0x790] sm:$0xf0]  ;;  %v3561_v52 = vor.u32 %v4274_v46, %v3558_v47  ;;  %v4129_v46 = vld [vmem:[#allocation2 + $0x1f4] sm:$0xf0] }
  0x78   :  { %1805 = vmatpush.bf16.msrb.mxu1 %v3465_v19  ;;  %1818 = vmatpush.bf16.msrb.mxu2 %v3593_v20  ;;  %v4206_v53 = vld [vmem:[#allocation2 + $0x464] sm:$0xf]  ;;  %v3286_v54 = vld [vmem:[#allocation2 + $0x470] sm:$0xf0]  ;;  %v3689_v56 = vor.u32 %v4306_v48, %v3686_v49  ;;  %v3100_v47 = vld [vmem:[#allocation2 + $0x2e8] sm:$0xf] }
  0x79   :  { %1831 = vmatpush.bf16.msrb.mxu3 %v3721_v24  ;;  %v4238_v55 = vld [vmem:[#allocation2 + $0x564] sm:$0xf]  ;;  %v3414_v57 = vld [vmem:[#allocation2 + $0x570] sm:$0xf0]  ;;  %v3289_v62 = vor.u32 %v4206_v53, %v3286_v54  ;;  %v4161_v48 = vld [vmem:[#allocation2 + $0x2f4] sm:$0xf0]  ;;  %v2845_v54 = vor.u32 %v4097_v43, %v2844_v39 }
  0x7a   :  { %v4270_v58 = vld [vmem:[#allocation2 + $0x664] sm:$0xf]  ;;  %v3542_v59 = vld [vmem:[#allocation2 + $0x670] sm:$0xf0]  ;;  %v3417_v63 = vor.u32 %v4238_v55, %v3414_v57  ;;  %v2828_v57 = vld [vmem:[#allocation2 + $0xc8] sm:$0xf] }
  0x7b   :  { %1793 = vmatpush.bf16.msrb.mxu0 %v3321_v30  ;;  %v4302_v60 = vld [vmem:[#allocation2 + $0x764] sm:$0xf]  ;;  %v3670_v61 = vld [vmem:[#allocation2 + $0x770] sm:$0xf0]  ;;  %v3545_v0 = vor.u32 %v4270_v58, %v3542_v59  ;;  %v4093_v58 = vld [vmem:[#allocation2 + $0xd4] sm:$0xf0] }
  0x7c   :  { %1806 = vmatpush.bf16.msrb.mxu1 %v3449_v31  ;;  %1819 = vmatpush.bf16.msrb.mxu2 %v3577_v35  ;;  %v4202_v1 = vld [vmem:[#allocation2 + $0x444] sm:$0xf]  ;;  %v3270_v2 = vld [vmem:[#allocation2 + $0x450] sm:$0xf0]  ;;  %v3673_v4 = vor.u32 %v4302_v60, %v3670_v61  ;;  %v2956_v59 = vld [vmem:[#allocation2 + $0x1c8] sm:$0xf] }
  0x7d   :  { %1832 = vmatpush.bf16.msrb.mxu3 %v3705_v44  ;;  %v4234_v3 = vld [vmem:[#allocation2 + $0x544] sm:$0xf]  ;;  %v3398_v5 = vld [vmem:[#allocation2 + $0x550] sm:$0xf0]  ;;  %v3273_v10 = vor.u32 %v4202_v1, %v3270_v2  ;;  %v2972_v44 = vld [vmem:[#allocation2 + $0x1e8] sm:$0xf]  ;;  %v2829_v2 = vor.u32 %v4093_v58, %v2828_v57 }
  0x7e   :  { %v4266_v6 = vld [vmem:[#allocation2 + $0x644] sm:$0xf]  ;;  %v3526_v7 = vld [vmem:[#allocation2 + $0x650] sm:$0xf0]  ;;  %v3401_v11 = vor.u32 %v4234_v3, %v3398_v5  ;;  %v2973_v55 = vor.u32 %v4129_v46, %v2972_v44  ;;  %v4125_v61 = vld [vmem:[#allocation2 + $0x1d4] sm:$0xf0] }
  0x7f   :  { %1794 = vmatpush.bf16.msrb.mxu0 %v3305_v50  ;;  %v4298_v8 = vld [vmem:[#allocation2 + $0x744] sm:$0xf]  ;;  %v3654_v9 = vld [vmem:[#allocation2 + $0x750] sm:$0xf0]  ;;  %v3529_v12 = vor.u32 %v4266_v6, %v3526_v7  ;;  %v4189_v1 = vld [vmem:[#allocation2 + $0x3d4] sm:$0xf0]  ;;  %v2957_v3 = vor.u32 %v4125_v61, %v2956_v59 }
  0x80   :  { %1807 = vmatpush.bf16.msrb.mxu1 %v3433_v51  ;;  %1820 = vmatpush.bf16.msrb.mxu2 %v3561_v52  ;;  %v4198_v13 = vld [vmem:[#allocation2 + $0x424] sm:$0xf]  ;;  %v3254_v14 = vld [vmem:[#allocation2 + $0x430] sm:$0xf0]  ;;  %v3657_v16 = vor.u32 %v4298_v8, %v3654_v9  ;;  %v3228_v51 = vld [vmem:[#allocation2 + $0x3e8] sm:$0xf] }
  0x81   :  { %1833 = vmatpush.bf16.msrb.mxu3 %v3689_v56  ;;  %v4230_v15 = vld [vmem:[#allocation2 + $0x524] sm:$0xf]  ;;  %v3382_v17 = vld [vmem:[#allocation2 + $0x530] sm:$0xf0]  ;;  %v3257_v22 = vor.u32 %v4198_v13, %v3254_v14  ;;  %v4193_v52 = vld [vmem:[#allocation2 + $0x3f4] sm:$0xf0]  ;;  %v3101_v56 = vor.u32 %v4161_v48, %v3100_v47 }
  0x82   :  { %v4262_v18 = vld [vmem:[#allocation2 + $0x624] sm:$0xf]  ;;  %v3510_v19 = vld [vmem:[#allocation2 + $0x630] sm:$0xf0]  ;;  %v3385_v25 = vor.u32 %v4230_v15, %v3382_v17  ;;  %v3229_v60 = vor.u32 %v4193_v52, %v3228_v51  ;;  %v2812_v5 = vld [vmem:[#allocation2 + $0xa8] sm:$0xf] }
  0x83   :  { %1795 = vmatpush.bf16.msrb.mxu0 %v3289_v62  ;;  %v4294_v20 = vld [vmem:[#allocation2 + $0x724] sm:$0xf]  ;;  %v3638_v21 = vld [vmem:[#allocation2 + $0x730] sm:$0xf0]  ;;  %v3513_v26 = vor.u32 %v4262_v18, %v3510_v19  ;;  %v3084_v62 = vld [vmem:[#allocation2 + $0x2c8] sm:$0xf] }
  0x84   :  { %1808 = vmatpush.bf16.msrb.mxu1 %v3417_v63  ;;  %1821 = vmatpush.bf16.msrb.mxu2 %v3545_v0  ;;  %v4194_v23 = vld [vmem:[#allocation2 + $0x404] sm:$0xf]  ;;  %v3238_v24 = vld [vmem:[#allocation2 + $0x410] sm:$0xf0]  ;;  %v3641_v30 = vor.u32 %v4294_v20, %v3638_v21  ;;  %v4157_v63 = vld [vmem:[#allocation2 + $0x2d4] sm:$0xf0] }
  0x85   :  { %1834 = vmatpush.bf16.msrb.mxu3 %v3673_v4  ;;  %v4226_v27 = vld [vmem:[#allocation2 + $0x504] sm:$0xf]  ;;  %v3366_v28 = vld [vmem:[#allocation2 + $0x510] sm:$0xf0]  ;;  %v3241_v45 = vor.u32 %v4194_v23, %v3238_v24  ;;  %v3212_v0 = vld [vmem:[#allocation2 + $0x3c8] sm:$0xf]  ;;  %v3085_v4 = vor.u32 %v4157_v63, %v3084_v62 }
  0x86   :  { %v4258_v29 = vld [vmem:[#allocation2 + $0x604] sm:$0xf]  ;;  %v3494_v31 = vld [vmem:[#allocation2 + $0x610] sm:$0xf0]  ;;  %v3369_v49 = vor.u32 %v4226_v27, %v3366_v28  ;;  %v4089_v6 = vld [vmem:[#allocation2 + $0xb4] sm:$0xf0]  ;;  %v3213_v8 = vor.u32 %v4189_v1, %v3212_v0 }
  0x87   :  { %1796 = vmatpush.bf16.msrb.mxu0 %v3273_v10  ;;  %v4290_v35 = vld [vmem:[#allocation2 + $0x704] sm:$0xf]  ;;  %v3622_v36 = vld [vmem:[#allocation2 + $0x710] sm:$0xf0]  ;;  %v3497_v50 = vor.u32 %v4258_v29, %v3494_v31  ;;  %v2940_v7 = vld [vmem:[#allocation2 + $0x1a8] sm:$0xf]  ;;  %v2813_v14 = vor.u32 %v4089_v6, %v2812_v5 }
  0x88   :  { %1809 = vmatpush.bf16.msrb.mxu1 %v3401_v11  ;;  %1822 = vmatpush.bf16.msrb.mxu2 %v3529_v12  ;;  %v3625_v53 = vor.u32 %v4290_v35, %v3622_v36  ;;  %v4121_v9 = vld [vmem:[#allocation2 + $0x1b4] sm:$0xf0]  ;;  %v3068_v10 = vld [vmem:[#allocation2 + $0x2a8] sm:$0xf] }
  0x89   :  { %1835 = vmatpush.bf16.msrb.mxu3 %v3657_v16  ;;  %v4153_v11 = vld [vmem:[#allocation2 + $0x2b4] sm:$0xf0]  ;;  %v3196_v12 = vld [vmem:[#allocation2 + $0x3a8] sm:$0xf]  ;;  %v2941_v15 = vor.u32 %v4121_v9, %v2940_v7 }
  0x8a   :  { %v4185_v13 = vld [vmem:[#allocation2 + $0x3b4] sm:$0xf0]  ;;  %v3069_v16 = vor.u32 %v4153_v11, %v3068_v10  ;;  %v2796_v17 = vld [vmem:[#allocation2 + $0x88] sm:$0xf] }
  0x8b   :  { %1797 = vmatpush.bf16.msrb.mxu0 %v3257_v22  ;;  %v4085_v18 = vld [vmem:[#allocation2 + $0x94] sm:$0xf0]  ;;  %v2924_v19 = vld [vmem:[#allocation2 + $0x188] sm:$0xf]  ;;  %v3197_v20 = vor.u32 %v4185_v13, %v3196_v12 }
  0x8c   :  { %1810 = vmatpush.bf16.msrb.mxu1 %v3385_v25  ;;  %1823 = vmatpush.bf16.msrb.mxu2 %v3513_v26  ;;  %v4117_v21 = vld [vmem:[#allocation2 + $0x194] sm:$0xf0]  ;;  %v3052_v22 = vld [vmem:[#allocation2 + $0x288] sm:$0xf]  ;;  %v2797_v26 = vor.u32 %v4085_v18, %v2796_v17 }
  0x8d   :  { %1836 = vmatpush.bf16.msrb.mxu3 %v3641_v30  ;;  %v4149_v23 = vld [vmem:[#allocation2 + $0x294] sm:$0xf0]  ;;  %v3180_v24 = vld [vmem:[#allocation2 + $0x388] sm:$0xf]  ;;  %v2925_v27 = vor.u32 %v4117_v21, %v2924_v19 }
  0x8e   :  { %v4181_v25 = vld [vmem:[#allocation2 + $0x394] sm:$0xf0]  ;;  %v3053_v28 = vor.u32 %v4149_v23, %v3052_v22  ;;  %v2780_v29 = vld [vmem:[#allocation2 + $0x68] sm:$0xf] }
  0x8f   :  { %1798 = vmatpush.bf16.msrb.mxu0 %v3241_v45  ;;  %v4081_v30 = vld [vmem:[#allocation2 + $0x74] sm:$0xf0]  ;;  %v2908_v31 = vld [vmem:[#allocation2 + $0x168] sm:$0xf]  ;;  %v3181_v35 = vor.u32 %v4181_v25, %v3180_v24 }
  0x90   :  { %1811 = vmatpush.bf16.msrb.mxu1 %v3369_v49  ;;  %1824 = vmatpush.bf16.msrb.mxu2 %v3497_v50  ;;  %v4113_v36 = vld [vmem:[#allocation2 + $0x174] sm:$0xf0]  ;;  %v3036_v39 = vld [vmem:[#allocation2 + $0x268] sm:$0xf]  ;;  %v2781_v46 = vor.u32 %v4081_v30, %v2780_v29 }
  0x91   :  { %1837 = vmatpush.bf16.msrb.mxu3 %v3625_v53  ;;  %v4145_v43 = vld [vmem:[#allocation2 + $0x274] sm:$0xf0]  ;;  %v3164_v44 = vld [vmem:[#allocation2 + $0x368] sm:$0xf]  ;;  %v2909_v47 = vor.u32 %v4113_v36, %v2908_v31 }
  0x92   :  { %1799 = vmatmul.bf16.vlgmr.msrb.gmra.mxu0 %v4534_v37  ;;  %v4177_v45 = vld [vmem:[#allocation2 + $0x374] sm:$0xf0]  ;;  %v3037_v48 = vor.u32 %v4145_v43, %v3036_v39  ;;  %v2764_v49 = vld [vmem:[#allocation2 + $0x48] sm:$0xf] }
  0x93   :  { %1843 = vmatpush.bf16.msra.mxu0 %v2845_v54  ;;  %1825 = vmatmul.bf16.vlgmr.msrb.gmra.mxu2 %v4532_v32  ;;  %v4077_v50 = vld [vmem:[#allocation2 + $0x54] sm:$0xf0]  ;;  %v2892_v51 = vld [vmem:[#allocation2 + $0x148] sm:$0xf]  ;;  %v3165_v52 = vor.u32 %v4177_v45, %v3164_v44 }
  0x94   :  { %1856 = vmatpush.bf16.msra.mxu1 %v2973_v55  ;;  %1869 = vmatpush.bf16.msra.mxu2 %v3101_v56  ;;  %v4109_v53 = vld [vmem:[#allocation2 + $0x154] sm:$0xf0]  ;;  %v3020_v54 = vld [vmem:[#allocation2 + $0x248] sm:$0xf]  ;;  %v2765_v58 = vor.u32 %v4077_v50, %v2764_v49 }
  0x95   :  { %1882 = vmatpush.bf16.msra.mxu3 %v3229_v60  ;;  %1812 = vmatmul.bf16.vlgmr.msrb.gmra.mxu1 %v4538_v40  ;;  %v4141_v55 = vld [vmem:[#allocation2 + $0x254] sm:$0xf0]  ;;  %v3148_v56 = vld [vmem:[#allocation2 + $0x348] sm:$0xf]  ;;  %v2893_v59 = vor.u32 %v4109_v53, %v2892_v51 }
  0x96   :  { %1838 = vmatmul.bf16.vlgmr.msrb.gmra.mxu3 %v4536_v38  ;;  %v4173_v57 = vld [vmem:[#allocation2 + $0x354] sm:$0xf0]  ;;  %v3021_v60 = vor.u32 %v4141_v55, %v3020_v54  ;;  %v2748_v61 = vld [vmem:[#allocation2 + $0x28] sm:$0xf] }
  0x97   :  { %1844 = vmatpush.bf16.msra.mxu0 %v2829_v2  ;;  %v4073_v62 = vld [vmem:[#allocation2 + $0x34] sm:$0xf0]  ;;  %v2876_v63 = vld [vmem:[#allocation2 + $0x128] sm:$0xf]  ;;  %v3149_v0 = vor.u32 %v4173_v57, %v3148_v56 }
  0x98   :  { %1857 = vmatpush.bf16.msra.mxu1 %v2957_v3  ;;  %1870 = vmatpush.bf16.msra.mxu2 %v3085_v4  ;;  %v4105_v1 = vld [vmem:[#allocation2 + $0x134] sm:$0xf0]  ;;  %v3004_v2 = vld [vmem:[#allocation2 + $0x228] sm:$0xf]  ;;  %v2749_v6 = vor.u32 %v4073_v62, %v2748_v61 }
  0x99   :  { %1883 = vmatpush.bf16.msra.mxu3 %v3213_v8  ;;  %v4137_v3 = vld [vmem:[#allocation2 + $0x234] sm:$0xf0]  ;;  %v3132_v4 = vld [vmem:[#allocation2 + $0x328] sm:$0xf]  ;;  %v2877_v9 = vor.u32 %v4105_v1, %v2876_v63 }
  0x9a   :  { %v4169_v5 = vld [vmem:[#allocation2 + $0x334] sm:$0xf0]  ;;  %v2732_v7 = vld [vmem:[#allocation2 + $0x8] sm:$0xf]  ;;  %v3005_v10 = vor.u32 %v4137_v3, %v3004_v2 }
  0x9b   :  { %1845 = vmatpush.bf16.msra.mxu0 %v2813_v14  ;;  %v4069_v8 = vld [vmem:[#allocation2 + $0x14] sm:$0xf0]  ;;  %v2860_v11 = vld [vmem:[#allocation2 + $0x108] sm:$0xf]  ;;  %v3133_v14 = vor.u32 %v4169_v5, %v3132_v4 }
  0x9c   :  { %1858 = vmatpush.bf16.msra.mxu1 %v2941_v15  ;;  %1871 = vmatpush.bf16.msra.mxu2 %v3069_v16  ;;  %v4101_v12 = vld [vmem:[#allocation2 + $0x114] sm:$0xf0]  ;;  %v2988_v13 = vld [vmem:[#allocation2 + $0x208] sm:$0xf]  ;;  %v2733_v21 = vor.u32 %v4069_v8, %v2732_v7 }
  0x9d   :  { %1884 = vmatpush.bf16.msra.mxu3 %v3197_v20  ;;  %v4133_v15 = vld [vmem:[#allocation2 + $0x214] sm:$0xf0]  ;;  %v3116_v16 = vld [vmem:[#allocation2 + $0x308] sm:$0xf]  ;;  %v2861_v25 = vor.u32 %v4101_v12, %v2860_v11 }
  0x9e   :  { %v4165_v17 = vld [vmem:[#allocation2 + $0x314] sm:$0xf0]  ;;  %v3356_v18 = vld [vmem:[#allocation2 + $0x4e8] sm:$0xf] }
  0x9f   :  { %1846 = vmatpush.bf16.msra.mxu0 %v2797_v26  ;;  %v4225_v19 = vld [vmem:[#allocation2 + $0x4f4] sm:$0xf0]  ;;  %v3484_v20 = vld [vmem:[#allocation2 + $0x5e8] sm:$0xf]  ;;  %v2989_v26 = vor.u32 %v4133_v15, %v2988_v13  ;;  %v3117_v29 = vor.u32 %v4165_v17, %v3116_v16 }
  0xa0   :  { %1859 = vmatpush.bf16.msra.mxu1 %v2925_v27  ;;  %1872 = vmatpush.bf16.msra.mxu2 %v3053_v28  ;;  %v4257_v22 = vld [vmem:[#allocation2 + $0x5f4] sm:$0xf0]  ;;  %v3612_v23 = vld [vmem:[#allocation2 + $0x6e8] sm:$0xf]  ;;  %v3357_v30 = vor.u32 %v4225_v19, %v3356_v18 }
  0xa1   :  { %1885 = vmatpush.bf16.msra.mxu3 %v3181_v35  ;;  %v4289_v24 = vld [vmem:[#allocation2 + $0x6f4] sm:$0xf0]  ;;  %v3740_v27 = vld [vmem:[#allocation2 + $0x7e8] sm:$0xf]  ;;  %v3485_v31 = vor.u32 %v4257_v22, %v3484_v20 }
  0xa2   :  { %v4321_v28 = vld [vmem:[#allocation2 + $0x7f4] sm:$0xf0]  ;;  %v3613_v35 = vor.u32 %v4289_v24, %v3612_v23  ;;  %v3340_v36 = vld [vmem:[#allocation2 + $0x4c8] sm:$0xf] }
  0xa3   :  { %1847 = vmatpush.bf16.msra.mxu0 %v2781_v46  ;;  %v4221_v39 = vld [vmem:[#allocation2 + $0x4d4] sm:$0xf0]  ;;  %v3468_v43 = vld [vmem:[#allocation2 + $0x5c8] sm:$0xf]  ;;  %v3741_v44 = vor.u32 %v4321_v28, %v3740_v27 }
  0xa4   :  { %1860 = vmatpush.bf16.msra.mxu1 %v2909_v47  ;;  %1873 = vmatpush.bf16.msra.mxu2 %v3037_v48  ;;  %v4253_v45 = vld [vmem:[#allocation2 + $0x5d4] sm:$0xf0]  ;;  %v3596_v46 = vld [vmem:[#allocation2 + $0x6c8] sm:$0xf]  ;;  %v3341_v50 = vor.u32 %v4221_v39, %v3340_v36 }
  0xa5   :  { %1886 = vmatpush.bf16.msra.mxu3 %v3165_v52  ;;  %v4285_v47 = vld [vmem:[#allocation2 + $0x6d4] sm:$0xf0]  ;;  %v3724_v48 = vld [vmem:[#allocation2 + $0x7c8] sm:$0xf]  ;;  %v3469_v51 = vor.u32 %v4253_v45, %v3468_v43 }
  0xa6   :  { %v4317_v49 = vld [vmem:[#allocation2 + $0x7d4] sm:$0xf0]  ;;  %v3597_v52 = vor.u32 %v4285_v47, %v3596_v46  ;;  %v3324_v53 = vld [vmem:[#allocation2 + $0x4a8] sm:$0xf] }
  0xa7   :  { %1848 = vmatpush.bf16.msra.mxu0 %v2765_v58  ;;  %v4217_v54 = vld [vmem:[#allocation2 + $0x4b4] sm:$0xf0]  ;;  %v3452_v55 = vld [vmem:[#allocation2 + $0x5a8] sm:$0xf]  ;;  %v3725_v56 = vor.u32 %v4317_v49, %v3724_v48 }
  0xa8   :  { %1861 = vmatpush.bf16.msra.mxu1 %v2893_v59  ;;  %1874 = vmatpush.bf16.msra.mxu2 %v3021_v60  ;;  %v4249_v57 = vld [vmem:[#allocation2 + $0x5b4] sm:$0xf0]  ;;  %v3580_v58 = vld [vmem:[#allocation2 + $0x6a8] sm:$0xf]  ;;  %v3325_v62 = vor.u32 %v4217_v54, %v3324_v53 }
  0xa9   :  { %1887 = vmatpush.bf16.msra.mxu3 %v3149_v0  ;;  %v4281_v59 = vld [vmem:[#allocation2 + $0x6b4] sm:$0xf0]  ;;  %v3708_v60 = vld [vmem:[#allocation2 + $0x7a8] sm:$0xf]  ;;  %v3453_v63 = vor.u32 %v4249_v57, %v3452_v55 }
  0xaa   :  { %v4313_v61 = vld [vmem:[#allocation2 + $0x7b4] sm:$0xf0]  ;;  %v3581_v0 = vor.u32 %v4281_v59, %v3580_v58  ;;  %v3308_v1 = vld [vmem:[#allocation2 + $0x488] sm:$0xf] }
  0xab   :  { %1849 = vmatpush.bf16.msra.mxu0 %v2749_v6  ;;  %v4213_v2 = vld [vmem:[#allocation2 + $0x494] sm:$0xf0]  ;;  %v3436_v3 = vld [vmem:[#allocation2 + $0x588] sm:$0xf]  ;;  %v3709_v4 = vor.u32 %v4313_v61, %v3708_v60 }
  0xac   :  { %1862 = vmatpush.bf16.msra.mxu1 %v2877_v9  ;;  %1875 = vmatpush.bf16.msra.mxu2 %v3005_v10  ;;  %v4245_v5 = vld [vmem:[#allocation2 + $0x594] sm:$0xf0]  ;;  %v3564_v6 = vld [vmem:[#allocation2 + $0x688] sm:$0xf]  ;;  %v3309_v10 = vor.u32 %v4213_v2, %v3308_v1 }
  0xad   :  { %1888 = vmatpush.bf16.msra.mxu3 %v3133_v14  ;;  %v4277_v7 = vld [vmem:[#allocation2 + $0x694] sm:$0xf0]  ;;  %v3692_v8 = vld [vmem:[#allocation2 + $0x788] sm:$0xf]  ;;  %v3437_v11 = vor.u32 %v4245_v5, %v3436_v3 }
  0xae   :  { %v4309_v9 = vld [vmem:[#allocation2 + $0x794] sm:$0xf0]  ;;  %v3565_v12 = vor.u32 %v4277_v7, %v3564_v6  ;;  %v3292_v13 = vld [vmem:[#allocation2 + $0x468] sm:$0xf]  ;;  %v4095_v6 = vld [vmem:[#allocation2 + $0xec] sm:$0xf] }
  0xaf   :  { %1850 = vmatpush.bf16.msra.mxu0 %v2733_v21  ;;  %v4209_v14 = vld [vmem:[#allocation2 + $0x474] sm:$0xf0]  ;;  %v3420_v15 = vld [vmem:[#allocation2 + $0x568] sm:$0xf]  ;;  %v3693_v16 = vor.u32 %v4309_v9, %v3692_v8  ;;  %v2846_v7 = vld [vmem:[#allocation2 + $0xf8] sm:$0xf0] }
  0xb0   :  { %1863 = vmatpush.bf16.msra.mxu1 %v2861_v25  ;;  %1876 = vmatpush.bf16.msra.mxu2 %v2989_v26  ;;  %v4241_v17 = vld [vmem:[#allocation2 + $0x574] sm:$0xf0]  ;;  %v3548_v18 = vld [vmem:[#allocation2 + $0x668] sm:$0xf]  ;;  %v3293_v22 = vor.u32 %v4209_v14, %v3292_v13  ;;  %v4127_v8 = vld [vmem:[#allocation2 + $0x1ec] sm:$0xf] }
  0xb1   :  { %1889 = vmatpush.bf16.msra.mxu3 %v3117_v29  ;;  %v4273_v19 = vld [vmem:[#allocation2 + $0x674] sm:$0xf0]  ;;  %v3676_v20 = vld [vmem:[#allocation2 + $0x768] sm:$0xf]  ;;  %v3421_v24 = vor.u32 %v4241_v17, %v3420_v15  ;;  %v3102_v13 = vld [vmem:[#allocation2 + $0x2f8] sm:$0xf0] }
  0xb2   :  { %1851 = vmatmul.bf16.vlgmr.msra.gmra.mxu0 %v4519_v34  ;;  %v4305_v21 = vld [vmem:[#allocation2 + $0x774] sm:$0xf0]  ;;  %v3276_v23 = vld [vmem:[#allocation2 + $0x448] sm:$0xf]  ;;  %v3549_v25 = vor.u32 %v4273_v19, %v3548_v18  ;;  %v4191_v17 = vld [vmem:[#allocation2 + $0x3ec] sm:$0xf] }
  0xb3   :  { %1895 = vmatpush.bf16.msrb.mxu0 %v3357_v30  ;;  %1877 = vmatmul.bf16.vlgmr.msra.gmra.mxu2 %v4517_v33  ;;  %v4205_v26 = vld [vmem:[#allocation2 + $0x454] sm:$0xf0]  ;;  %v3404_v27 = vld [vmem:[#allocation2 + $0x548] sm:$0xf]  ;;  %v3677_v29 = vor.u32 %v4305_v21, %v3676_v20  ;;  %v3230_v18 = vld [vmem:[#allocation2 + $0x3f8] sm:$0xf0]  ;;  %v2849_v20 = vor.u32 %v4095_v6, %v2846_v7 }
  0xb4   :  { %1908 = vmatpush.bf16.msrb.mxu1 %v3485_v31  ;;  %1921 = vmatpush.bf16.msrb.mxu2 %v3613_v35  ;;  %v4237_v28 = vld [vmem:[#allocation2 + $0x554] sm:$0xf0]  ;;  %v3532_v30 = vld [vmem:[#allocation2 + $0x648] sm:$0xf]  ;;  %v3277_v43 = vor.u32 %v4205_v26, %v3276_v23  ;;  %v4123_v26 = vld [vmem:[#allocation2 + $0x1cc] sm:$0xf] }
  0xb5   :  { %1934 = vmatpush.bf16.msrb.mxu3 %v3741_v44  ;;  %1864 = vmatmul.bf16.vlgmr.msra.gmra.mxu1 %v4523_v42  ;;  %v4269_v31 = vld [vmem:[#allocation2 + $0x654] sm:$0xf0]  ;;  %v3660_v36 = vld [vmem:[#allocation2 + $0x748] sm:$0xf]  ;;  %v3405_v45 = vor.u32 %v4237_v28, %v3404_v27  ;;  %v3054_v6 = vld [vmem:[#allocation2 + $0x298] sm:$0xf0] }
  0xb6   :  { %1890 = vmatmul.bf16.vlgmr.msra.gmra.mxu3 %v4521_v41  ;;  %v4559_v35 = vld [vmem:[%s4667_s2] sm:$0xf]  ;;  %v3260_v44 = vld [vmem:[#allocation2 + $0x428] sm:$0xf]  ;;  %v3533_v46 = vor.u32 %v4269_v31, %v3532_v30  ;;  %v2958_v30 = vld [vmem:[#allocation2 + $0x1d8] sm:$0xf0] }
  0xb7   :  { %1896 = vmatpush.bf16.msrb.mxu0 %v3341_v50  ;;  %v4301_v39 = vld [vmem:[#allocation2 + $0x754] sm:$0xf0]  ;;  %v3388_v48 = vld [vmem:[#allocation2 + $0x528] sm:$0xf]  ;;  %v347_v49 = vperm.slane %v4559_v35, 0 }
  0xb8   :  { %1909 = vmatpush.bf16.msrb.mxu1 %v3469_v51  ;;  %1922 = vmatpush.bf16.msrb.mxu2 %v3597_v52  ;;  %v4201_v47 = vld [vmem:[#allocation2 + $0x434] sm:$0xf0]  ;;  %v3661_v50 = vor.u32 %v4301_v39, %v3660_v36  ;;  %v3516_v52 = vld [vmem:[#allocation2 + $0x628] sm:$0xf]  ;;  %v4155_v31 = vld [vmem:[#allocation2 + $0x2cc] sm:$0xf] }
  0xb9   :  { %1935 = vmatpush.bf16.msrb.mxu3 %v3725_v56  ;;  %v4233_v51 = vld [vmem:[#allocation2 + $0x534] sm:$0xf0]  ;;  %v3644_v54 = vld [vmem:[#allocation2 + $0x728] sm:$0xf]  ;;  %v3261_v56 = vor.u32 %v4201_v47, %v3260_v44  ;;  %v3086_v36 = vld [vmem:[#allocation2 + $0x2d8] sm:$0xf0]  ;;  %v2961_v47 = vor.u32 %v4123_v26, %v2958_v30 }
  0xba   :  { %v4265_v53 = vld [vmem:[#allocation2 + $0x634] sm:$0xf0]  ;;  %v3244_v57 = vld [vmem:[#allocation2 + $0x408] sm:$0xf]  ;;  %v3389_v60 = vor.u32 %v4233_v51, %v3388_v48  ;;  %v3214_v44 = vld [vmem:[#allocation2 + $0x3d8] sm:$0xf0]  ;;  %v3089_v48 = vor.u32 %v4155_v31, %v3086_v36 }
  0xbb   :  { %1897 = vmatpush.bf16.msrb.mxu0 %v3325_v62  ;;  %v4297_v55 = vld [vmem:[#allocation2 + $0x734] sm:$0xf0]  ;;  %v3517_v61 = vor.u32 %v4265_v53, %v3516_v52  ;;  %v3372_v62 = vld [vmem:[#allocation2 + $0x508] sm:$0xf]  ;;  %v4119_v51 = vld [vmem:[#allocation2 + $0x1ac] sm:$0xf] }
  0xbc   :  { %1910 = vmatpush.bf16.msrb.mxu1 %v3453_v63  ;;  %1923 = vmatpush.bf16.msrb.mxu2 %v3581_v0  ;;  %v4197_v58 = vld [vmem:[#allocation2 + $0x414] sm:$0xf0]  ;;  %v3500_v0 = vld [vmem:[#allocation2 + $0x608] sm:$0xf]  ;;  %v3645_v2 = vor.u32 %v4297_v55, %v3644_v54  ;;  %v2942_v54 = vld [vmem:[#allocation2 + $0x1b8] sm:$0xf0] }
  0xbd   :  { %1936 = vmatpush.bf16.msrb.mxu3 %v3709_v4  ;;  %v4229_v63 = vld [vmem:[#allocation2 + $0x514] sm:$0xf0]  ;;  %v3628_v4 = vld [vmem:[#allocation2 + $0x708] sm:$0xf]  ;;  %v4151_v55 = vld [vmem:[#allocation2 + $0x2ac] sm:$0xf] }
  0xbe   :  { %v4261_v3 = vld [vmem:[#allocation2 + $0x614] sm:$0xf0]  ;;  %v3373_v15 = vor.u32 %v4229_v63, %v3372_v62  ;;  %v4083_v63 = vld [vmem:[#allocation2 + $0x8c] sm:$0xf] }
  0xbf   :  { %1898 = vmatpush.bf16.msrb.mxu0 %v3309_v10  ;;  %v4293_v5 = vld [vmem:[#allocation2 + $0x714] sm:$0xf0]  ;;  %v3245_v10 = vor.u32 %v4197_v58, %v3244_v57  ;;  %v4183_v57 = vld [vmem:[#allocation2 + $0x3ac] sm:$0xf]  ;;  %v3198_v58 = vld [vmem:[#allocation2 + $0x3b8] sm:$0xf0] }
  0xc0   :  { %1911 = vmatpush.bf16.msrb.mxu1 %v3437_v11  ;;  %1924 = vmatpush.bf16.msrb.mxu2 %v3565_v12  ;;  %v2974_v11 = vld [vmem:[#allocation2 + $0x1f8] sm:$0xf0]  ;;  %v4159_v12 = vld [vmem:[#allocation2 + $0x2ec] sm:$0xf]  ;;  %v3629_v19 = vor.u32 %v4293_v5, %v3628_v4 }
  0xc1   :  { %1937 = vmatpush.bf16.msrb.mxu3 %v3693_v16  ;;  %v3501_v16 = vor.u32 %v4261_v3, %v3500_v0  ;;  %v3105_v23 = vor.u32 %v4159_v12, %v3102_v13  ;;  %v2798_v0 = vld [vmem:[#allocation2 + $0x98] sm:$0xf0]  ;;  %v3201_v3 = vor.u32 %v4183_v57, %v3198_v58  ;;  %v4147_v5 = vld [vmem:[#allocation2 + $0x28c] sm:$0xf] }
  0xc2   :  { %v1644_v59 = vpop.f32.mrf.mxu0  ;;  %v2926_v4 = vld [vmem:[#allocation2 + $0x198] sm:$0xf0]  ;;  %v4179_v7 = vld [vmem:[#allocation2 + $0x38c] sm:$0xf]  ;;  %v3057_v12 = vor.u32 %v4147_v5, %v3054_v6 }
  0xc3   :  { %1899 = vmatpush.bf16.msrb.mxu0 %v3293_v22  ;;  %v1645_v1 = vadd.f32 %v1644_v59, %v347_v49  ;;  %v1657_v9 = vpop.f32.mrf.mxu1  ;;  %v2977_v22 = vor.u32 %v4127_v8, %v2974_v11  ;;  %v4087_v49 = vld [vmem:[#allocation2 + $0xac] sm:$0xf]  ;;  %v3182_v8 = vld [vmem:[#allocation2 + $0x398] sm:$0xf0] }
  0xc4   :  { %1912 = vmatpush.bf16.msrb.mxu1 %v3421_v24  ;;  %1925 = vmatpush.bf16.msrb.mxu2 %v3549_v25  ;;  %v4091_v24 = vld [vmem:[#allocation2 + $0xcc] sm:$0xf]  ;;  %v2830_v25 = vld [vmem:[#allocation2 + $0xd8] sm:$0xf0] }
  0xc5   :  { %1938 = vmatpush.bf16.msrb.mxu3 %v3677_v29  ;;  %v1658_v14 = vadd.f32 %v1657_v9, %v1645_v1  ;;  %v3233_v29 = vor.u32 %v4191_v17, %v3230_v18  ;;  %v4115_v1 = vld [vmem:[#allocation2 + $0x18c] sm:$0xf]  ;;  %v2801_v9 = vor.u32 %v4083_v63, %v2798_v0  ;;  %v3185_v18 = vor.u32 %v4179_v7, %v3182_v8  ;;  %v3134_v63 = vld [vmem:[#allocation2 + $0x338] sm:$0xf0] }
  0xc6   :  { %v2929_v11 = vor.u32 %v4115_v1, %v2926_v4  ;;  %v4079_v13 = vld [vmem:[#allocation2 + $0x6c] sm:$0xf]  ;;  %v2862_v6 = vld [vmem:[#allocation2 + $0x118] sm:$0xf0] }
  0xc7   :  { %1900 = vmatpush.bf16.msrb.mxu0 %v3277_v43  ;;  %v1670_v21 = vpop.f32.mrf.mxu2  ;;  %v4187_v43 = vld [vmem:[#allocation2 + $0x3cc] sm:$0xf] }
  0xc8   :  { %1913 = vmatpush.bf16.msrb.mxu1 %v3405_v45  ;;  %1926 = vmatpush.bf16.msrb.mxu2 %v3533_v46  ;;  %v1671_v27 = vadd.f32 %v1670_v21, %v1658_v14  ;;  %v1683_v28 = vpop.f32.mrf.mxu3  ;;  %v2833_v46 = vor.u32 %v4091_v24, %v2830_v25  ;;  %v3217_v53 = vor.u32 %v4187_v43, %v3214_v44  ;;  %v2782_v14 = vld [vmem:[#allocation2 + $0x78] sm:$0xf0]  ;;  %v4107_v30 = vld [vmem:[#allocation2 + $0x14c] sm:$0xf] }
  0xc9   :  { %1939 = vmatpush.bf16.msrb.mxu3 %v3661_v50  ;;  %v2814_v50 = vld [vmem:[#allocation2 + $0xb8] sm:$0xf0]  ;;  %v2785_v25 = vor.u32 %v4079_v13, %v2782_v14  ;;  %v4139_v43 = vld [vmem:[#allocation2 + $0x24c] sm:$0xf] }
  0xca   :  { %v1646_v39 = vpop.f32.mrf.mxu0  ;;  %v1684_v45 = vadd.f32 %v1683_v28, %v1671_v27  ;;  %v2817_v59 = vor.u32 %v4087_v49, %v2814_v50  ;;  %v3038_v21 = vld [vmem:[#allocation2 + $0x278] sm:$0xf0]  ;;  %v4075_v28 = vld [vmem:[#allocation2 + $0x4c] sm:$0xf] }
  0xcb   :  { %1901 = vmatpush.bf16.msrb.mxu0 %v3261_v56  ;;  %v1659_v52 = vpop.f32.mrf.mxu1  ;;  %v3070_v56 = vld [vmem:[#allocation2 + $0x2b8] sm:$0xf0]  ;;  %v4067_v1 = vld [vmem:[#allocation2 + $0xc] sm:$0xf] }
  0xcc   :  { %1914 = vmatpush.bf16.msrb.mxu1 %v3389_v60  ;;  %1927 = vmatpush.bf16.msrb.mxu2 %v3517_v61  ;;  %v2945_v61 = vor.u32 %v4119_v51, %v2942_v54  ;;  %v3073_v62 = vor.u32 %v4151_v55, %v3070_v56  ;;  %v2894_v39 = vld [vmem:[#allocation2 + $0x158] sm:$0xf0]  ;;  %v4071_v54 = vld [vmem:[#allocation2 + $0x2c] sm:$0xf] }
  0xcd   :  { %1940 = vmatpush.bf16.msrb.mxu3 %v3645_v2  ;;  %v3022_v44 = vld [vmem:[#allocation2 + $0x258] sm:$0xf0]  ;;  %v2897_v52 = vor.u32 %v4107_v30, %v2894_v39  ;;  %v4103_v56 = vld [vmem:[#allocation2 + $0x12c] sm:$0xf] }
  0xce   :  { %v2750_v55 = vld [vmem:[#allocation2 + $0x38] sm:$0xf0]  ;;  %v4099_v5 = vld [vmem:[#allocation2 + $0x10c] sm:$0xf] }
  0xcf   :  { %1902 = vmatpush.bf16.msrb.mxu0 %v3245_v10  ;;  %v1672_v60 = vpop.f32.mrf.mxu2  ;;  %v2753_v0 = vor.u32 %v4071_v54, %v2750_v55  ;;  %v4131_v7 = vld [vmem:[#allocation2 + $0x20c] sm:$0xf]  ;;  %v3342_v30 = vld [vmem:[#allocation2 + $0x4d8] sm:$0xf0] }
  0xd0   :  { %1915 = vmatpush.bf16.msrb.mxu1 %v3373_v15  ;;  %1928 = vmatpush.bf16.msrb.mxu2 %v3501_v16  ;;  %v1685_v2 = vpop.f32.mrf.mxu3  ;;  %v4111_v15 = vld [vmem:[#allocation2 + $0x16c] sm:$0xf]  ;;  %v3470_v39 = vld [vmem:[#allocation2 + $0x5d8] sm:$0xf0] }
  0xd1   :  { %1941 = vmatpush.bf16.msrb.mxu3 %v3629_v19  ;;  %v2910_v19 = vld [vmem:[#allocation2 + $0x178] sm:$0xf0]  ;;  %v4135_v60 = vld [vmem:[#allocation2 + $0x22c] sm:$0xf] }
  0xd2   :  { %1903 = vmatmul.bf16.vlgmr.msrb.gmra.mxu0 %v4534_v37  ;;  %v2913_v26 = vor.u32 %v4111_v15, %v2910_v19  ;;  %v2734_v2 = vld [vmem:[#allocation2 + $0x18] sm:$0xf0]  ;;  %v4223_v14 = vld [vmem:[#allocation2 + $0x4ec] sm:$0xf] }
  0xd3   :  { %1947 = vmatpush.bf16.msra.mxu0 %v2849_v20  ;;  %1929 = vmatmul.bf16.vlgmr.msrb.gmra.mxu2 %v4532_v32  ;;  %v1696_v10 = vpop.f32.mrf.mxu0  ;;  %v4143_v20 = vld [vmem:[#allocation2 + $0x26c] sm:$0xf]  ;;  %v3358_v15 = vld [vmem:[#allocation2 + $0x4f8] sm:$0xf0] }
  0xd4   :  { %1960 = vmatpush.bf16.msra.mxu1 %v2977_v22  ;;  %1973 = vmatpush.bf16.msra.mxu2 %v3105_v23  ;;  %v1697_v16 = vadd.f32 %v1696_v10, %v1684_v45  ;;  %v1709_v17 = vpop.f32.mrf.mxu1  ;;  %v4175_v22 = vld [vmem:[#allocation2 + $0x36c] sm:$0xf]  ;;  %v3166_v23 = vld [vmem:[#allocation2 + $0x378] sm:$0xf0]  ;;  %v3041_v27 = vor.u32 %v4143_v20, %v3038_v21  ;;  %v2865_v21 = vor.u32 %v4099_v5, %v2862_v6 }
  0xd5   :  { %1986 = vmatpush.bf16.msra.mxu3 %v3233_v29  ;;  %1916 = vmatmul.bf16.vlgmr.msrb.gmra.mxu1 %v4538_v40  ;;  %v2766_v29 = vld [vmem:[#allocation2 + $0x58] sm:$0xf0]  ;;  %v3169_v36 = vor.u32 %v4175_v22, %v3166_v23  ;;  %v4287_v19 = vld [vmem:[#allocation2 + $0x6ec] sm:$0xf] }
  0xd6   :  { %1942 = vmatmul.bf16.vlgmr.msrb.gmra.mxu3 %v4536_v38  ;;  %v1710_v24 = vadd.f32 %v1709_v17, %v1697_v16  ;;  %v2769_v49 = vor.u32 %v4075_v28, %v2766_v29  ;;  %v2990_v10 = vld [vmem:[#allocation2 + $0x218] sm:$0xf0]  ;;  %v4255_v16 = vld [vmem:[#allocation2 + $0x5ec] sm:$0xf]  ;;  %v2737_v17 = vor.u32 %v4067_v1, %v2734_v2 }
  0xd7   :  { %1948 = vmatpush.bf16.msra.mxu0 %v2833_v46  ;;  %v3614_v20 = vld [vmem:[#allocation2 + $0x6f8] sm:$0xf0]  ;;  %v2993_v22 = vor.u32 %v4131_v7, %v2990_v10  ;;  %v4319_v23 = vld [vmem:[#allocation2 + $0x7ec] sm:$0xf] }
  0xd8   :  { %1961 = vmatpush.bf16.msra.mxu1 %v2961_v47  ;;  %1974 = vmatpush.bf16.msra.mxu2 %v3089_v48  ;;  %v1722_v31 = vpop.f32.mrf.mxu2  ;;  %v4171_v47 = vld [vmem:[#allocation2 + $0x34c] sm:$0xf]  ;;  %v3150_v48 = vld [vmem:[#allocation2 + $0x358] sm:$0xf0]  ;;  %v3617_v28 = vor.u32 %v4287_v19, %v3614_v20 }
  0xd9   :  { %1987 = vmatpush.bf16.msra.mxu3 %v3217_v53  ;;  %v1723_v45 = vadd.f32 %v1722_v31, %v1710_v24  ;;  %v1735_v46 = vpop.f32.mrf.mxu3  ;;  %v3025_v53 = vor.u32 %v4139_v43, %v3022_v44  ;;  %v3153_v58 = vor.u32 %v4171_v47, %v3150_v48  ;;  %v3742_v24 = vld [vmem:[#allocation2 + $0x7f8] sm:$0xf0]  ;;  %v4219_v29 = vld [vmem:[#allocation2 + $0x4cc] sm:$0xf] }
  0xda   :  { %v4251_v31 = vld [vmem:[#allocation2 + $0x5cc] sm:$0xf]  ;;  %v3598_v44 = vld [vmem:[#allocation2 + $0x6d8] sm:$0xf0]  ;;  %v3345_v47 = vor.u32 %v4219_v29, %v3342_v30 }
  0xdb   :  { %1949 = vmatpush.bf16.msra.mxu0 %v2817_v59  ;;  %v4566_v50 = vadd.f32 %v1735_v46, %v1723_v45  ;;  %v1698_v51 = vpop.f32.mrf.mxu0  ;;  %v2878_v59 = vld [vmem:[#allocation2 + $0x138] sm:$0xf0]  ;;  %v4283_v43 = vld [vmem:[#allocation2 + $0x6cc] sm:$0xf]  ;;  %v3473_v48 = vor.u32 %v4251_v31, %v3470_v39 }
  0xdc   :  { %1962 = vmatpush.bf16.msra.mxu1 %v2945_v61  ;;  %1975 = vmatpush.bf16.msra.mxu2 %v3073_v62  ;;  %v1711_v57 = vpop.f32.mrf.mxu1  ;;  %v3006_v61 = vld [vmem:[#allocation2 + $0x238] sm:$0xf0]  ;;  %v4167_v62 = vld [vmem:[#allocation2 + $0x32c] sm:$0xf] }
  0xdd   :  { %1988 = vmatpush.bf16.msra.mxu3 %v3201_v3  ;;  %v2881_v3 = vor.u32 %v4103_v56, %v2878_v59  ;;  %v3009_v4 = vor.u32 %v4135_v60, %v3006_v61  ;;  %v4315_v45 = vld [vmem:[#allocation2 + $0x7cc] sm:$0xf]  ;;  %v3726_v46 = vld [vmem:[#allocation2 + $0x7d8] sm:$0xf0] }
  0xde   :  { %v4215_v51 = vld [vmem:[#allocation2 + $0x4ac] sm:$0xf]  ;;  %v3729_v54 = vor.u32 %v4315_v45, %v3726_v46  ;;  %v3454_v55 = vld [vmem:[#allocation2 + $0x5b8] sm:$0xf0] }
  0xdf   :  { %1950 = vmatpush.bf16.msra.mxu0 %v2801_v9  ;;  %v3137_v9 = vor.u32 %v4167_v62, %v3134_v63  ;;  %v4279_v56 = vld [vmem:[#allocation2 + $0x6ac] sm:$0xf]  ;;  %v3582_v57 = vld [vmem:[#allocation2 + $0x6b8] sm:$0xf0] }
  0xe0   :  { %1963 = vmatpush.bf16.msra.mxu1 %v2929_v11  ;;  %1976 = vmatpush.bf16.msra.mxu2 %v3057_v12  ;;  %v1724_v8 = vpop.f32.mrf.mxu2  ;;  %v4163_v11 = vld [vmem:[#allocation2 + $0x30c] sm:$0xf]  ;;  %v3118_v12 = vld [vmem:[#allocation2 + $0x318] sm:$0xf0]  ;;  %v3585_v62 = vor.u32 %v4279_v56, %v3582_v57  ;;  %v348_v56 = vperm.slane %v4559_v35, 1 }
  0xe1   :  { %1989 = vmatpush.bf16.msra.mxu3 %v3185_v18  ;;  %v1737_v13 = vpop.f32.mrf.mxu3  ;;  %v3486_v18 = vld [vmem:[#allocation2 + $0x5f8] sm:$0xf0]  ;;  %v4211_v63 = vld [vmem:[#allocation2 + $0x48c] sm:$0xf]  ;;  %v4337_v35 = vld [vmem:[#allocation4 + $0x74] sm:$0xf0] }
  0xe2   :  { %v3710_v59 = vld [vmem:[#allocation2 + $0x7b8] sm:$0xf0]  ;;  %v4307_v5 = vld [vmem:[#allocation2 + $0x78c] sm:$0xf] }
  0xe3   :  { %1951 = vmatpush.bf16.msra.mxu0 %v2785_v25  ;;  %v3121_v25 = vor.u32 %v4163_v11, %v3118_v12  ;;  %v3438_v2 = vld [vmem:[#allocation2 + $0x598] sm:$0xf0]  ;;  %v4207_v8 = vld [vmem:[#allocation2 + $0x46c] sm:$0xf] }
  0xe4   :  { %1964 = vmatpush.bf16.msra.mxu1 %v2913_v26  ;;  %1977 = vmatpush.bf16.msra.mxu2 %v3041_v27  ;;  %v3361_v26 = vor.u32 %v4223_v14, %v3358_v15  ;;  %v3489_v27 = vor.u32 %v4255_v16, %v3486_v18  ;;  %v4239_v10 = vld [vmem:[#allocation2 + $0x56c] sm:$0xf]  ;;  %v3422_v13 = vld [vmem:[#allocation2 + $0x578] sm:$0xf0] }
  0xe5   :  { %1990 = vmatpush.bf16.msra.mxu3 %v3169_v36  ;;  %v3745_v36 = vor.u32 %v4319_v23, %v3742_v24  ;;  %v4271_v14 = vld [vmem:[#allocation2 + $0x66c] sm:$0xf]  ;;  %v3550_v15 = vld [vmem:[#allocation2 + $0x678] sm:$0xf0]  ;;  %v3425_v19 = vor.u32 %v4239_v10, %v3422_v13 }
  0xe6   :  { %v4303_v16 = vld [vmem:[#allocation2 + $0x76c] sm:$0xf]  ;;  %v3553_v20 = vor.u32 %v4271_v14, %v3550_v15  ;;  %v3662_v31 = vld [vmem:[#allocation2 + $0x758] sm:$0xf0] }
  0xe7   :  { %1952 = vmatpush.bf16.msra.mxu0 %v2769_v49  ;;  %v3601_v49 = vor.u32 %v4283_v43, %v3598_v44  ;;  %v4235_v23 = vld [vmem:[#allocation2 + $0x54c] sm:$0xf]  ;;  %v3262_v46 = vld [vmem:[#allocation2 + $0x438] sm:$0xf0] }
  0xe8   :  { %1965 = vmatpush.bf16.msra.mxu1 %v2897_v52  ;;  %1978 = vmatpush.bf16.msra.mxu2 %v3025_v53  ;;  %v3326_v52 = vld [vmem:[#allocation2 + $0x4b8] sm:$0xf0]  ;;  %v4247_v53 = vld [vmem:[#allocation2 + $0x5ac] sm:$0xf] }
  0xe9   :  { %1991 = vmatpush.bf16.msra.mxu3 %v3153_v58  ;;  %v4311_v58 = vld [vmem:[#allocation2 + $0x7ac] sm:$0xf]  ;;  %v3329_v60 = vor.u32 %v4215_v51, %v3326_v52  ;;  %v3457_v61 = vor.u32 %v4247_v53, %v3454_v55  ;;  %v3390_v51 = vld [vmem:[#allocation2 + $0x538] sm:$0xf0] }
  0xea   :  { %v3713_v1 = vor.u32 %v4311_v58, %v3710_v59  ;;  %v4299_v30 = vld [vmem:[#allocation2 + $0x74c] sm:$0xf]  ;;  %v3518_v53 = vld [vmem:[#allocation2 + $0x638] sm:$0xf0] }
  0xeb   :  { %1953 = vmatpush.bf16.msra.mxu0 %v2753_v0  ;;  %v3310_v0 = vld [vmem:[#allocation2 + $0x498] sm:$0xf0]  ;;  %v4199_v45 = vld [vmem:[#allocation2 + $0x42c] sm:$0xf] }
  0xec   :  { %1966 = vmatpush.bf16.msra.mxu1 %v2881_v3  ;;  %1979 = vmatpush.bf16.msra.mxu2 %v3009_v4  ;;  %v4275_v3 = vld [vmem:[#allocation2 + $0x68c] sm:$0xf]  ;;  %v3566_v4 = vld [vmem:[#allocation2 + $0x698] sm:$0xf0]  ;;  %v3265_v57 = vor.u32 %v4199_v45, %v3262_v46  ;;  %v3772_v45 = vld [vmem:[#allocation4 + $0x30] sm:$0xf] }
  0xed   :  { %1992 = vmatpush.bf16.msra.mxu3 %v3137_v9  ;;  %v3569_v7 = vor.u32 %v4275_v3, %v3566_v4  ;;  %v3294_v9 = vld [vmem:[#allocation2 + $0x478] sm:$0xf0]  ;;  %v4263_v52 = vld [vmem:[#allocation2 + $0x62c] sm:$0xf]  ;;  %v3836_v46 = vld [vmem:[#allocation4 + $0xb0] sm:$0xf] }
  0xee   :  { %v3297_v18 = vor.u32 %v4207_v8, %v3294_v9  ;;  %v3646_v55 = vld [vmem:[#allocation2 + $0x738] sm:$0xf0]  ;;  %v4195_v58 = vld [vmem:[#allocation2 + $0x40c] sm:$0xf]  ;;  %v4353_v8 = vld [vmem:[#allocation4 + $0xf4] sm:$0xf0] }
  0xef   :  { %1954 = vmatpush.bf16.msra.mxu0 %v2737_v17  ;;  %v4572_v6 = vpop.f32.mrf.mxu0  ;;  %v3678_v17 = vld [vmem:[#allocation2 + $0x778] sm:$0xf0]  ;;  %v4291_v3 = vld [vmem:[#allocation2 + $0x70c] sm:$0xf] }
  0xf0   :  { %1967 = vmatpush.bf16.msra.mxu1 %v2865_v21  ;;  %1980 = vmatpush.bf16.msra.mxu2 %v2993_v22  ;;  %v4203_v21 = vld [vmem:[#allocation2 + $0x44c] sm:$0xf]  ;;  %v3278_v22 = vld [vmem:[#allocation2 + $0x458] sm:$0xf0] }
  0xf1   :  { %1993 = vmatpush.bf16.msra.mxu3 %v3121_v25  ;;  %v3681_v25 = vor.u32 %v4303_v16, %v3678_v17  ;;  %v3796_v16 = vld [vmem:[#allocation4 + $0x60] sm:$0xf]  ;;  %v4335_v17 = vld [vmem:[#allocation4 + $0x64] sm:$0xf0] }
  0xf2   :  { %1955 = vmatmul.bf16.vlgmr.msra.gmra.mxu0 %v4519_v34  ;;  %v3694_v34 = vld [vmem:[#allocation2 + $0x798] sm:$0xf0]  ;;  %v4574_v11 = vpop.f32.mrf.mxu1 }
  0xf3   :  { %1999 = vmatpush.bf16.msrb.mxu0 %v3361_v26  ;;  %1981 = vmatmul.bf16.vlgmr.msra.gmra.mxu2 %v4517_v33  ;;  %v4243_v33 = vld [vmem:[#allocation2 + $0x58c] sm:$0xf]  ;;  %v3697_v12 = vor.u32 %v4307_v5, %v3694_v34  ;;  %v3406_v26 = vld [vmem:[#allocation2 + $0x558] sm:$0xf0]  ;;  %v3804_v34 = vld [vmem:[#allocation4 + $0x70] sm:$0xf] }
  0xf4   :  { %2012 = vmatpush.bf16.msrb.mxu1 %v3489_v27  ;;  %2025 = vmatpush.bf16.msrb.mxu2 %v3617_v28  ;;  %v4267_v27 = vld [vmem:[#allocation2 + $0x64c] sm:$0xf]  ;;  %v3534_v28 = vld [vmem:[#allocation2 + $0x658] sm:$0xf0]  ;;  %v3409_v43 = vor.u32 %v4235_v23, %v3406_v26  ;;  %v3805_v13 = vor.u32 %v4337_v35, %v3804_v34  ;;  %v4333_v23 = vld [vmem:[#allocation4 + $0x54] sm:$0xf0] }
  0xf5   :  { %2038 = vmatpush.bf16.msrb.mxu3 %v3745_v36  ;;  %1968 = vmatmul.bf16.vlgmr.msra.gmra.mxu1 %v4523_v42  ;;  %v3441_v42 = vor.u32 %v4243_v33, %v3438_v2  ;;  %v3281_v36 = vor.u32 %v4203_v21, %v3278_v22  ;;  %v3537_v44 = vor.u32 %v4267_v27, %v3534_v28  ;;  %v3502_v2 = vld [vmem:[#allocation2 + $0x618] sm:$0xf0]  ;;  %v3788_v22 = vld [vmem:[#allocation4 + $0x50] sm:$0xf] }
  0xf6   :  { %1994 = vmatmul.bf16.vlgmr.msra.gmra.mxu3 %v4521_v41  ;;  %v3313_v41 = vor.u32 %v4211_v63, %v3310_v0  ;;  %v4576_v24 = vpop.f32.mrf.mxu2  ;;  %v3374_v63 = vld [vmem:[#allocation2 + $0x518] sm:$0xf0]  ;;  %v3789_v26 = vor.u32 %v4333_v23, %v3788_v22  ;;  %v3820_v34 = vld [vmem:[#allocation4 + $0x90] sm:$0xf]  ;;  %v4352_v22 = vld [vmem:[#allocation4 + $0xf4] sm:$0xf] }
  0xf7   :  { %2000 = vmatpush.bf16.msrb.mxu0 %v3345_v47  ;;  %v1750_v39 = vpop.f32.mrf.mxu0  ;;  %v4231_v47 = vld [vmem:[#allocation2 + $0x52c] sm:$0xf]  ;;  %v3630_v5 = vld [vmem:[#allocation2 + $0x718] sm:$0xf0] }
  0xf8   :  { %2013 = vmatpush.bf16.msrb.mxu1 %v3473_v48  ;;  %2026 = vmatpush.bf16.msrb.mxu2 %v3601_v49  ;;  %v3665_v49 = vor.u32 %v4299_v30, %v3662_v31  ;;  %v3393_v59 = vor.u32 %v4231_v47, %v3390_v51  ;;  %v4331_v30 = vld [vmem:[#allocation4 + $0x44] sm:$0xf0]  ;;  %v3844_v31 = vld [vmem:[#allocation4 + $0xc0] sm:$0xf]  ;;  %v4369_v39 = vld [vmem:[#allocation4 + $0x174] sm:$0xf0] }
  0xf9   :  { %2039 = vmatpush.bf16.msrb.mxu3 %v3729_v54  ;;  %v4578_v29 = vpop.f32.mrf.mxu3  ;;  %v4295_v54 = vld [vmem:[#allocation2 + $0x72c] sm:$0xf]  ;;  %v4367_v51 = vld [vmem:[#allocation4 + $0x164] sm:$0xf0]  ;;  %v3870_v23 = vld [vmem:[#allocation4 + $0xf8] sm:$0xf0] }
  0xfa   :  { %v1763_v48 = vpop.f32.mrf.mxu1  ;;  %v3649_v33 = vor.u32 %v4295_v54, %v3646_v55 }
  0xfb   :  { %2001 = vmatpush.bf16.msrb.mxu0 %v3329_v60  ;;  %v3521_v60 = vor.u32 %v4263_v52, %v3518_v53 }
  0xfc   :  { %2014 = vmatpush.bf16.msrb.mxu1 %v3457_v61  ;;  %2027 = vmatpush.bf16.msrb.mxu2 %v3585_v62  ;;  %v3246_v61 = vld [vmem:[#allocation2 + $0x418] sm:$0xf0]  ;;  %v4227_v62 = vld [vmem:[#allocation2 + $0x50c] sm:$0xf] }
  0xfd   :  { %2040 = vmatpush.bf16.msrb.mxu3 %v3713_v1  ;;  %v4259_v1 = vld [vmem:[#allocation2 + $0x60c] sm:$0xf]  ;;  %v3377_v9 = vor.u32 %v4227_v62, %v3374_v63  ;;  %v3916_v62 = vld [vmem:[#allocation4 + $0x150] sm:$0xf]  ;;  %v4365_v63 = vld [vmem:[#allocation4 + $0x154] sm:$0xf0] }
  0xfe   :  { %v1776_v0 = vpop.f32.mrf.mxu2  ;;  %v3505_v10 = vor.u32 %v4259_v1, %v3502_v2 }
  0xff   :  { %2002 = vmatpush.bf16.msrb.mxu0 %v3313_v41  ;;  %v1749_v41 = vadd.f32 %v4572_v6, %v348_v56  ;;  %v3797_v6 = vor.u32 %v4335_v17, %v3796_v16  ;;  %v3764_v56 = vld [vmem:[#allocation4 + $0x20] sm:$0xf]  ;;  %v3917_v0 = vor.u32 %v4365_v63, %v3916_v62  ;;  %v4339_v16 = vld [vmem:[#allocation4 + $0x84] sm:$0xf0]  ;;  %v4336_v17 = vld [vmem:[#allocation4 + $0x74] sm:$0xf] }
 0x100   :  { %2015 = vmatpush.bf16.msrb.mxu1 %v3441_v42  ;;  %2028 = vmatpush.bf16.msrb.mxu2 %v3569_v7  ;;  %v3249_v42 = vor.u32 %v4195_v58, %v3246_v61  ;;  %v3868_v7 = vld [vmem:[#allocation4 + $0xf0] sm:$0xf]  ;;  %v3828_v58 = vld [vmem:[#allocation4 + $0xa0] sm:$0xf]  ;;  %v4346_v62 = vld [vmem:[#allocation4 + $0xc4] sm:$0xf] }
 0x101   :  { %2041 = vmatpush.bf16.msrb.mxu3 %v3697_v12  ;;  %v1789_v4 = vpop.f32.mrf.mxu3  ;;  %v3633_v12 = vor.u32 %v4291_v3, %v3630_v5  ;;  %v3869_v14 = vor.u32 %v4353_v8, %v3868_v7  ;;  %v1762_v15 = vadd.f32 %v4574_v11, %v1749_v41  ;;  %v3852_v11 = vld [vmem:[#allocation4 + $0xd0] sm:$0xf]  ;;  %v4325_v5 = vld [vmem:[#allocation4 + $0x14] sm:$0xf0]  ;;  %v4363_v7 = vld [vmem:[#allocation4 + $0x144] sm:$0xf0] }
 0x102   :  { %v3756_v4 = vld [vmem:[#allocation4 + $0x10] sm:$0xf]  ;;  %v4341_v41 = vld [vmem:[#allocation4 + $0x94] sm:$0xf0]  ;;  %v3846_v63 = vld [vmem:[#allocation4 + $0xc8] sm:$0xf0] }
 0x103   :  { %2003 = vmatpush.bf16.msrb.mxu0 %v3297_v18  ;;  %v3860_v18 = vld [vmem:[#allocation4 + $0xe0] sm:$0xf]  ;;  %v1775_v21 = vadd.f32 %v4576_v24, %v1762_v15  ;;  %v4347_v24 = vld [vmem:[#allocation4 + $0xc4] sm:$0xf0] }
 0x104   :  { %2016 = vmatpush.bf16.msrb.mxu1 %v3425_v19  ;;  %2029 = vmatpush.bf16.msrb.mxu2 %v3553_v20  ;;  %v4351_v19 = vld [vmem:[#allocation4 + $0xe4] sm:$0xf0]  ;;  %v3812_v15 = vld [vmem:[#allocation4 + $0x80] sm:$0xf] }
 0x105   :  { %2042 = vmatpush.bf16.msrb.mxu3 %v3681_v25  ;;  %v3861_v20 = vor.u32 %v4351_v19, %v3860_v18  ;;  %v4349_v25 = vld [vmem:[#allocation4 + $0xd4] sm:$0xf0]  ;;  %v1788_v27 = vadd.f32 %v4578_v29, %v1775_v21  ;;  %v3806_v19 = vld [vmem:[#allocation4 + $0x78] sm:$0xf0] }
 0x106   :  { %v3853_v28 = vor.u32 %v4349_v25, %v3852_v11  ;;  %v4345_v29 = vld [vmem:[#allocation4 + $0xb4] sm:$0xf0] }
 0x107   :  { %2004 = vmatpush.bf16.msrb.mxu0 %v3281_v36  ;;  %v3932_v36 = vld [vmem:[#allocation4 + $0x170] sm:$0xf]  ;;  %v3837_v55 = vor.u32 %v4345_v29, %v3836_v46  ;;  %v4361_v21 = vld [vmem:[#allocation4 + $0x134] sm:$0xf0]  ;;  %v3790_v29 = vld [vmem:[#allocation4 + $0x58] sm:$0xf0] }
 0x108   :  { %2017 = vmatpush.bf16.msrb.mxu1 %v3409_v43  ;;  %2030 = vmatpush.bf16.msrb.mxu2 %v3537_v44  ;;  %v3933_v43 = vor.u32 %v4369_v39, %v3932_v36  ;;  %v3845_v44 = vor.u32 %v4347_v24, %v3844_v31  ;;  %v3873_v31 = vor.u32 %v4352_v22, %v3870_v23  ;;  %v3798_v24 = vld [vmem:[#allocation4 + $0x68] sm:$0xf0]  ;;  %v3892_v36 = vld [vmem:[#allocation4 + $0x120] sm:$0xf]  ;;  %v4359_v39 = vld [vmem:[#allocation4 + $0x124] sm:$0xf0] }
 0x109   :  { %2043 = vmatpush.bf16.msrb.mxu3 %v3665_v49  ;;  %v3924_v49 = vld [vmem:[#allocation4 + $0x160] sm:$0xf]  ;;  %v4357_v46 = vld [vmem:[#allocation4 + $0x114] sm:$0xf0]  ;;  %v3758_v22 = vld [vmem:[#allocation4 + $0x18] sm:$0xf0] }
 0x10a   :  { %v3925_v52 = vor.u32 %v4367_v51, %v3924_v49  ;;  %v4348_v49 = vld [vmem:[#allocation4 + $0xd4] sm:$0xf] }
 0x10b   :  { %2005 = vmatpush.bf16.msrb.mxu0 %v3265_v57  ;;  %v4327_v57 = vld [vmem:[#allocation4 + $0x24] sm:$0xf0]  ;;  %v4340_v23 = vld [vmem:[#allocation4 + $0x94] sm:$0xf] }
 0x10c   :  { %2018 = vmatpush.bf16.msrb.mxu1 %v3393_v59  ;;  %2031 = vmatpush.bf16.msrb.mxu2 %v3521_v60  ;;  %v4343_v60 = vld [vmem:[#allocation4 + $0xa4] sm:$0xf0] }
 0x10d   :  { %2044 = vmatpush.bf16.msrb.mxu3 %v3649_v33  ;;  %v3765_v33 = vor.u32 %v4327_v57, %v3764_v56  ;;  %v3829_v3 = vor.u32 %v4343_v60, %v3828_v58  ;;  %v3934_v56 = vld [vmem:[#allocation4 + $0x178] sm:$0xf0]  ;;  %v3782_v60 = vld [vmem:[#allocation4 + $0x48] sm:$0xf0] }
 0x10f   :  { %2006 = vmatpush.bf16.msrb.mxu0 %v3249_v42  ;;  %v3908_v42 = vld [vmem:[#allocation4 + $0x140] sm:$0xf] }
 0x110   :  { %2019 = vmatpush.bf16.msrb.mxu1 %v3377_v9  ;;  %2032 = vmatpush.bf16.msrb.mxu2 %v3505_v10  ;;  %v3909_v8 = vor.u32 %v4363_v7, %v3908_v42  ;;  %v3757_v10 = vor.u32 %v4325_v5, %v3756_v4  ;;  %v4344_v4 = vld [vmem:[#allocation4 + $0xb4] sm:$0xf]  ;;  %v3926_v42 = vld [vmem:[#allocation4 + $0x168] sm:$0xf0] }
 0x111   :  { %2045 = vmatpush.bf16.msrb.mxu3 %v3633_v12  ;;  %v3748_v12 = vld [vmem:[#allocation4] sm:$0xf] }
 0x112   :  { %2007 = vmatmul.bf16.vlgmr.msrb.gmra.mxu0 %v4534_v37  ;;  %v3780_v37 = vld [vmem:[#allocation4 + $0x40] sm:$0xf]  ;;  %v1813_v48 = vpop.f32.mrf.mxu1 }
 0x113   :  { %2449 = vmatpush.bf16.msra.mxu0 %v3805_v13  ;;  %2020 = vmatmul.bf16.vlgmr.msrb.gmra.mxu1 %v4538_v40  ;;  %v3781_v40 = vor.u32 %v4331_v30, %v3780_v37  ;;  %v4323_v13 = vld [vmem:[#allocation4 + $0x4] sm:$0xf0]  ;;  %v3809_v37 = vor.u32 %v4336_v17, %v3806_v19  ;;  %v4334_v30 = vld [vmem:[#allocation4 + $0x64] sm:$0xf]  ;;  %v3918_v17 = vld [vmem:[#allocation4 + $0x158] sm:$0xf0] }
 0x114   :  { %2462 = vmatpush.bf16.msra.mxu1 %v3869_v14  ;;  %2033 = vmatmul.bf16.vlgmr.msrb.gmra.mxu2 %v4532_v32  ;;  %v1800_v32 = vpop.f32.mrf.mxu0  ;;  %v3821_v14 = vor.u32 %v4341_v41, %v3820_v34  ;;  %v3838_v34 = vld [vmem:[#allocation4 + $0xb8] sm:$0xf0]  ;;  %v4366_v41 = vld [vmem:[#allocation4 + $0x164] sm:$0xf] }
 0x115   :  { %2046 = vmatmul.bf16.vlgmr.msrb.gmra.mxu3 %v4536_v38  ;;  %v4329_v38 = vld [vmem:[#allocation4 + $0x34] sm:$0xf0]  ;;  %v1801_v47 = vadd.f32 %v1800_v32, %v1788_v27  ;;  %2475 = vmatpush.bf16.msra.mxu2 %v3933_v43  ;;  %v2051_v27 = vmax.f32 %v4566_v50, 0.0  ;;  %v4350_v43 = vld [vmem:[#allocation4 + $0xe4] sm:$0xf]  ;;  %v3893_v32 = vor.u32 %v4359_v39, %v3892_v36  ;;  %v3801_v50 = vor.u32 %v4334_v30, %v3798_v24 }
 0x116   :  { %v3773_v53 = vor.u32 %v4329_v38, %v3772_v45  ;;  %v1826_v59 = vpop.f32.mrf.mxu2  ;;  %v3884_v38 = vld [vmem:[#allocation4 + $0x110] sm:$0xf]  ;;  %v3929_v7 = vor.u32 %v4366_v41, %v3926_v42  ;;  %v4322_v36 = vld [vmem:[#allocation4 + $0x4] sm:$0xf] }
 0x117   :  { %2450 = vmatpush.bf16.msra.mxu0 %v3797_v6  ;;  %v1814_v54 = vadd.f32 %v1813_v48, %v1801_v47  ;;  %v4592_v45 = vpack.c.bf16 %v2051_v27, %v2051_v27  ;;  %v4332_v48 = vld [vmem:[#allocation4 + $0x54] sm:$0xf]  ;;  %v3885_v51 = vor.u32 %v4357_v46, %v3884_v38  ;;  %v4362_v27 = vld [vmem:[#allocation4 + $0x144] sm:$0xf]  ;;  %v3814_v38 = vld [vmem:[#allocation4 + $0x88] sm:$0xf0] }
 0x118   :  { %2463 = vmatpush.bf16.msra.mxu1 %v3861_v20  ;;  %v3900_v20 = vld [vmem:[#allocation4 + $0x130] sm:$0xf]  ;;  %v3793_v57 = vor.u32 %v4332_v48, %v3790_v29  ;;  %v4358_v29 = vld [vmem:[#allocation4 + $0x124] sm:$0xf] }
 0x119   :  { %2476 = vmatpush.bf16.msra.mxu2 %v3925_v52  ;;  %v1839_v61 = vpop.f32.mrf.mxu3  ;;  %v1827_v1 = vadd.f32 %v1826_v59, %v1814_v54  ;;  %v3901_v11 = vor.u32 %v4361_v21, %v3900_v20  ;;  %v3854_v52 = vld [vmem:[#allocation4 + $0xd8] sm:$0xf0]  ;;  %v4355_v54 = vld [vmem:[#allocation4 + $0x104] sm:$0xf0]  ;;  %v4330_v59 = vld [vmem:[#allocation4 + $0x44] sm:$0xf] }
 0x11a   :  { %v1815_v35 = vpop.f32.mrf.mxu1  ;;  %v3857_v58 = vor.u32 %v4348_v49, %v3854_v52  ;;  %v4324_v21 = vld [vmem:[#allocation4 + $0x14] sm:$0xf]  ;;  %v3894_v49 = vld [vmem:[#allocation4 + $0x128] sm:$0xf0] }
 0x11b   :  { %2451 = vmatpush.bf16.msra.mxu0 %v3789_v26  ;;  %v1840_v9 = vadd.f32 %v1839_v61, %v1827_v1  ;;  %v3749_v26 = vor.u32 %v4323_v13, %v3748_v12  ;;  %v3849_v1 = vor.u32 %v4346_v62, %v3846_v63  ;;  %v3766_v12 = vld [vmem:[#allocation4 + $0x28] sm:$0xf0]  ;;  %v4342_v13 = vld [vmem:[#allocation4 + $0xa4] sm:$0xf]  ;;  %v3761_v30 = vor.u32 %v4324_v21, %v3758_v22  ;;  %v4375_v21 = vld [vmem:[#allocation4 + $0x1a4] sm:$0xf0] }
 0x11c   :  { %2464 = vmatpush.bf16.msra.mxu1 %v3853_v28  ;;  %v1802_v2 = vpop.f32.mrf.mxu0  ;;  %v3813_v28 = vor.u32 %v4339_v16, %v3812_v15  ;;  %v4364_v16 = vld [vmem:[#allocation4 + $0x154] sm:$0xf]  ;;  %v4354_v62 = vld [vmem:[#allocation4 + $0x104] sm:$0xf]  ;;  %v3878_v63 = vld [vmem:[#allocation4 + $0x108] sm:$0xf0] }
 0x11d   :  { %2477 = vmatpush.bf16.msra.mxu2 %v3917_v0  ;;  %v2052_v25 = vmax.f32 %v1840_v9, 0.0  ;;  %v4328_v2 = vld [vmem:[#allocation4 + $0x34] sm:$0xf]  ;;  %v3841_v9 = vor.u32 %v4344_v4, %v3838_v34  ;;  %v3921_v19 = vor.u32 %v4364_v16, %v3918_v17  ;;  %v4381_v34 = vld [vmem:[#allocation4 + $0x1d4] sm:$0xf0] }
 0x11e   :  { %v1828_v18 = vpop.f32.mrf.mxu2 }
 0x11f   :  { %2452 = vmatpush.bf16.msra.mxu0 %v3781_v40  ;;  %v3862_v40 = vld [vmem:[#allocation4 + $0xe8] sm:$0xf0] }
 0x120   :  { %2465 = vmatpush.bf16.msra.mxu1 %v3845_v44  ;;  %v4590_v44 = vpack.c.bf16 %v2052_v25, %v2052_v25  ;;  %v3865_v47 = vor.u32 %v4350_v43, %v3862_v40  ;;  %v3822_v25 = vld [vmem:[#allocation4 + $0x98] sm:$0xf0]  ;;  %v3750_v43 = vld [vmem:[#allocation4 + $0x8] sm:$0xf0]  ;;  %v4360_v40 = vld [vmem:[#allocation4 + $0x134] sm:$0xf] }
 0x121   :  { %2478 = vmatpush.bf16.msra.mxu2 %v3909_v8  ;;  %v1841_v6 = vpop.f32.mrf.mxu3  ;;  %v3825_v39 = vor.u32 %v4340_v23, %v3822_v25 }
 0x123   :  { %2453 = vmatpush.bf16.msra.mxu0 %v3773_v53  ;;  %v3876_v53 = vld [vmem:[#allocation4 + $0x100] sm:$0xf] }
 0x124   :  { %2466 = vmatpush.bf16.msra.mxu1 %v3837_v55  ;;  %v4368_v55 = vld [vmem:[#allocation4 + $0x174] sm:$0xf]  ;;  %v3877_v61 = vor.u32 %v4355_v54, %v3876_v53  ;;  %v3753_v53 = vor.u32 %v4322_v36, %v3750_v43  ;;  %v4385_v54 = vld [vmem:[#allocation4 + $0x1f4] sm:$0xf0] }
 0x125   :  { %2479 = vmatpush.bf16.msra.mxu2 %v3901_v11  ;;  %v3937_v0 = vor.u32 %v4368_v55, %v3934_v56  ;;  %v4384_v36 = vld [vmem:[#allocation4 + $0x1f4] sm:$0xf] }
 0x127   :  { %2454 = vmatpush.bf16.msra.mxu0 %v3765_v33  ;;  %v3785_v33 = vor.u32 %v4330_v59, %v3782_v60  ;;  %v3886_v59 = vld [vmem:[#allocation4 + $0x118] sm:$0xf0] }
 0x128   :  { %2467 = vmatpush.bf16.msra.mxu1 %v3829_v3  ;;  %v3774_v3 = vld [vmem:[#allocation4 + $0x38] sm:$0xf0] }
 0x129   :  { %2480 = vmatpush.bf16.msra.mxu2 %v3893_v32  ;;  %v3777_v8 = vor.u32 %v4328_v2, %v3774_v3  ;;  %v3902_v32 = vld [vmem:[#allocation4 + $0x138] sm:$0xf0]  ;;  %v3988_v2 = vld [vmem:[#allocation4 + $0x1e0] sm:$0xf]  ;;  %v4383_v3 = vld [vmem:[#allocation4 + $0x1e4] sm:$0xf0] }
 0x12a   :  { %v3989_v4 = vor.u32 %v4383_v3, %v3988_v2  ;;  %v3950_v2 = vld [vmem:[#allocation4 + $0x198] sm:$0xf0] }
 0x12b   :  { %2455 = vmatpush.bf16.msra.mxu0 %v3757_v10  ;;  %v4326_v10 = vld [vmem:[#allocation4 + $0x24] sm:$0xf] }
 0x12c   :  { %2468 = vmatpush.bf16.msra.mxu1 %v3821_v14  ;;  %v3830_v14 = vld [vmem:[#allocation4 + $0xa8] sm:$0xf0]  ;;  %v3769_v6 = vor.u32 %v4326_v10, %v3766_v12 }
 0x12d   :  { %2481 = vmatpush.bf16.msra.mxu2 %v3885_v51  ;;  %v3833_v20 = vor.u32 %v4342_v13, %v3830_v14  ;;  %v3996_v51 = vld [vmem:[#allocation4 + $0x1f0] sm:$0xf] }
 0x12e   :  { %v3997_v56 = vor.u32 %v4385_v54, %v3996_v51  ;;  %v3964_v14 = vld [vmem:[#allocation4 + $0x1b0] sm:$0xf] }
 0x12f   :  { %2456 = vmatpush.bf16.msra.mxu0 %v3749_v26  ;;  %v1852_v5 = vpop.f32.mrf.mxu0 }
 0x130   :  { %2469 = vmatpush.bf16.msra.mxu1 %v3813_v28  ;;  %v3910_v28 = vld [vmem:[#allocation4 + $0x148] sm:$0xf0]  ;;  %2488 = vmatpush.bf16.msra.mxu3 %v3997_v56 }
 0x131   :  { %2482 = vmatpush.bf16.msra.mxu2 %v3877_v61 }
 0x132   :  { %2457 = vmatmul.bf16.vlgmr.msra.gmra.mxu0 %v4592_v45  ;;  %v4596_v35 = vpop.f32.mrf.mxu1 }
 0x133   :  { %2501 = vmatpush.bf16.msrb.mxu0 %v3809_v37  ;;  %2470 = vmatmul.bf16.vlgmr.msra.gmra.mxu1 %v4590_v44  ;;  %v3913_v37 = vor.u32 %v4362_v27, %v3910_v28  ;;  %v4373_v27 = vld [vmem:[#allocation4 + $0x194] sm:$0xf0] }
 0x134   :  { %2514 = vmatpush.bf16.msrb.mxu1 %v3873_v31  ;;  %v4601_v31 = vld [vmem:[%s4667_s2] sm:$0xf]  ;;  %2489 = vmatpush.bf16.msra.mxu3 %v3989_v4 }
 0x135   :  { %2527 = vmatpush.bf16.msrb.mxu2 %v3937_v0  ;;  %v349_v24 = vperm.slane %v4601_v31, 2 }
 0x136   :  { %v1878_v15 = vpop.f32.mrf.mxu2 }
 0x137   :  { %2502 = vmatpush.bf16.msrb.mxu0 %v3801_v50  ;;  %v1854_v11 = vpop.f32.mrf.mxu0  ;;  %v4338_v50 = vld [vmem:[#allocation4 + $0x84] sm:$0xf]  ;;  %v1853_v52 = vadd.f32 %v1852_v5, %v349_v24  ;;  %v3980_v5 = vld [vmem:[#allocation4 + $0x1d0] sm:$0xf] }
 0x138   :  { %2515 = vmatpush.bf16.msrb.mxu1 %v3865_v47  ;;  %v3905_v47 = vor.u32 %v4360_v40, %v3902_v32  ;;  %v3817_v55 = vor.u32 %v4338_v50, %v3814_v38  ;;  %v4382_v40 = vld [vmem:[#allocation4 + $0x1e4] sm:$0xf]  ;;  %v3990_v32 = vld [vmem:[#allocation4 + $0x1e8] sm:$0xf0] }
 0x139   :  { %2528 = vmatpush.bf16.msrb.mxu2 %v3929_v7  ;;  %v1891_v18 = vpop.f32.mrf.mxu3  ;;  %v1866_v60 = vadd.f32 %v4596_v35, %v1853_v52  ;;  %v3981_v7 = vor.u32 %v4381_v34, %v3980_v5  ;;  %v3993_v38 = vor.u32 %v4382_v40, %v3990_v32  ;;  %v4378_v52 = vld [vmem:[#allocation4 + $0x1c4] sm:$0xf]  ;;  %v3942_v34 = vld [vmem:[#allocation4 + $0x188] sm:$0xf0]  ;;  %v4401_v40 = vld [vmem:[%s4670_s5 + $0x78] sm:$0xff] }
 0x13a   :  { %v1867_v26 = vpop.f32.mrf.mxu1  ;;  %v4370_v5 = vld [vmem:[#allocation4 + $0x184] sm:$0xf]  ;;  %v4392_v32 = vld [vmem:[%s4670_s5 + $0x30] sm:$0xff] }
 0x13b   :  { %2503 = vmatpush.bf16.msrb.mxu0 %v3793_v57  ;;  %v3897_v57 = vor.u32 %v4358_v29, %v3894_v49  ;;  %v1879_v0 = vadd.f32 %v1878_v15, %v1866_v60  ;;  %2490 = vmatpush.bf16.msra.mxu3 %v3981_v7  ;;  %v4377_v15 = vld [vmem:[#allocation4 + $0x1b4] sm:$0xf0]  ;;  %v3948_v26 = vld [vmem:[#allocation4 + $0x190] sm:$0xf] }
 0x13c   :  { %2516 = vmatpush.bf16.msrb.mxu1 %v3857_v58  ;;  %v4356_v58 = vld [vmem:[#allocation4 + $0x114] sm:$0xf]  ;;  %v3949_v28 = vor.u32 %v4373_v27, %v3948_v26 }
 0x13d   :  { %2529 = vmatpush.bf16.msrb.mxu2 %v3921_v19  ;;  %v3889_v61 = vor.u32 %v4356_v58, %v3886_v59  ;;  %v3965_v19 = vor.u32 %v4377_v15, %v3964_v14  ;;  %v3966_v58 = vld [vmem:[#allocation4 + $0x1b8] sm:$0xf0]  ;;  %v350_v59 = vperm.slane %v4601_v31, 3 }
 0x13e   :  { %v1880_v46 = vpop.f32.mrf.mxu2 }
 0x13f   :  { %2504 = vmatpush.bf16.msrb.mxu0 %v3785_v33  ;;  %v3881_v33 = vor.u32 %v4354_v62, %v3878_v63  ;;  %v3958_v62 = vld [vmem:[#allocation4 + $0x1a8] sm:$0xf0] }
 0x140   :  { %2517 = vmatpush.bf16.msrb.mxu1 %v3849_v1  ;;  %v1892_v1 = vadd.f32 %v1891_v18, %v1879_v0 }
 0x141   :  { %2530 = vmatpush.bf16.msrb.mxu2 %v3913_v37  ;;  %v1893_v48 = vpop.f32.mrf.mxu3  ;;  %v3940_v37 = vld [vmem:[#allocation4 + $0x180] sm:$0xf] }
 0x142   :  { %v3982_v48 = vld [vmem:[#allocation4 + $0x1d8] sm:$0xf0] }
 0x143   :  { %2505 = vmatpush.bf16.msrb.mxu0 %v3777_v8  ;;  %v3972_v8 = vld [vmem:[#allocation4 + $0x1c0] sm:$0xf] }
 0x144   :  { %2518 = vmatpush.bf16.msrb.mxu1 %v3841_v9  ;;  %v4379_v9 = vld [vmem:[#allocation4 + $0x1c4] sm:$0xf0] }
 0x145   :  { %2531 = vmatpush.bf16.msrb.mxu2 %v3905_v47  ;;  %v4380_v47 = vld [vmem:[#allocation4 + $0x1d4] sm:$0xf] }
 0x146   :  { %v3985_v29 = vor.u32 %v4380_v47, %v3982_v48  ;;  %v4390_v47 = vld [vmem:[%s4670_s5 + $0x20] sm:$0xff]  ;;  %v4389_v48 = vld [vmem:[%s4670_s5 + $0x18] sm:$0xff] }
 0x147   :  { %2506 = vmatpush.bf16.msrb.mxu0 %v3769_v6 }
 0x148   :  { %2519 = vmatpush.bf16.msrb.mxu1 %v3833_v20  ;;  %v3956_v20 = vld [vmem:[#allocation4 + $0x1a0] sm:$0xf] }
 0x149   :  { %2532 = vmatpush.bf16.msrb.mxu2 %v3897_v57  ;;  %v3957_v11 = vor.u32 %v4375_v21, %v3956_v20  ;;  %v4376_v57 = vld [vmem:[#allocation4 + $0x1b4] sm:$0xf] }
 0x14a   :  { %v3969_v60 = vor.u32 %v4376_v57, %v3966_v58  ;;  %v4397_v57 = vld [vmem:[%s4670_s5 + $0x58] sm:$0xff]  ;;  %v4396_v58 = vld [vmem:[%s4670_s5 + $0x50] sm:$0xff] }
 0x14b   :  { %2507 = vmatpush.bf16.msrb.mxu0 %v3761_v30  ;;  %v4371_v30 = vld [vmem:[#allocation4 + $0x184] sm:$0xf0] }
 0x14c   :  { %2520 = vmatpush.bf16.msrb.mxu1 %v3825_v39  ;;  %v3941_v24 = vor.u32 %v4371_v30, %v3940_v37  ;;  %v3998_v39 = vld [vmem:[#allocation4 + $0x1f8] sm:$0xf0] }
 0x14d   :  { %2533 = vmatpush.bf16.msrb.mxu2 %v3889_v61  ;;  %v4001_v43 = vor.u32 %v4384_v36, %v3998_v39  ;;  %v4374_v61 = vld [vmem:[#allocation4 + $0x1a4] sm:$0xf] }
 0x14f   :  { %2508 = vmatpush.bf16.msrb.mxu0 %v3753_v53  ;;  %v1904_v35 = vpop.f32.mrf.mxu0  ;;  %v3974_v53 = vld [vmem:[#allocation4 + $0x1c8] sm:$0xf0] }
 0x150   :  { %2521 = vmatpush.bf16.msrb.mxu1 %v3817_v55  ;;  %v1905_v41 = vadd.f32 %v1904_v35, %v1892_v1  ;;  %v3977_v55 = vor.u32 %v4378_v52, %v3974_v53  ;;  %v4372_v1 = vld [vmem:[#allocation4 + $0x194] sm:$0xf]  ;;  %v4387_v53 = vld [vmem:[%s4670_s5 + $0x8] sm:$0xff] }
 0x151   :  { %2534 = vmatpush.bf16.msrb.mxu2 %v3881_v33  ;;  %v3961_v33 = vor.u32 %v4374_v61, %v3958_v62  ;;  %v3953_v4 = vor.u32 %v4372_v1, %v3950_v2 }
 0x152   :  { %2509 = vmatmul.bf16.vlgmr.msrb.gmra.mxu0 %v4592_v45  ;;  %v1917_v42 = vpop.f32.mrf.mxu1 }
 0x153   :  { %2522 = vmatmul.bf16.vlgmr.msrb.gmra.mxu1 %v4590_v44  ;;  %v1918_v45 = vadd.f32 %v1917_v42, %v1905_v41  ;;  %v3973_v44 = vor.u32 %v4379_v9, %v3972_v8  ;;  %v3945_v41 = vor.u32 %v4370_v5, %v3942_v34 }
 0x154   :  { %2702 = vmatpush.bf16.msra.mxu1 %v4401_v40 }
 0x155   :  { %2491 = vmatpush.bf16.msra.mxu3 %v3973_v44 }
 0x156   :  { %v1930_v10 = vpop.f32.mrf.mxu2 }
 0x157   :  { %v1931_v12 = vadd.f32 %v1930_v10, %v1918_v45  ;;  %v1906_v17 = vpop.f32.mrf.mxu0 }
 0x159   :  { %v1943_v13 = vpop.f32.mrf.mxu3  ;;  %2492 = vmatpush.bf16.msra.mxu3 %v3965_v19 }
 0x15a   :  { %v1944_v16 = vadd.f32 %v1943_v13, %v1931_v12  ;;  %v1919_v18 = vpop.f32.mrf.mxu1 }
 0x15c   :  { %v2053_v6 = vmax.f32 %v1944_v16, 0.0 }
 0x15d   :  { %2493 = vmatpush.bf16.msra.mxu3 %v3957_v11 }
 0x15e   :  { %v2057_v22 = vpack.c.bf16 %v2053_v6, %v2053_v6  ;;  %v1932_v23 = vpop.f32.mrf.mxu2  ;;  %v2123_v6 = vld [vmem:[%s4669_s4] sm:$0x3] }
 0x15f   :  { %v2125_v20 = vperm.slane %v2123_v6, 0  ;;  %v2126_v27 = vperm.slane %v2123_v6, 1 }
 0x160   :  { %2483 = vmatmul.bf16.vlgmr.msra.gmra.mxu2 %v2057_v22 }
 0x161   :  { %v1945_v25 = vpop.f32.mrf.mxu3  ;;  %2494 = vmatpush.bf16.msra.mxu3 %v3949_v28 }
 0x165   :  { %2495 = vmatpush.bf16.msra.mxu3 %v3941_v24 }
 0x169   :  { %2540 = vmatpush.bf16.msrb.mxu3 %v4001_v43  ;;  %v4393_v43 = vld [vmem:[%s4670_s5 + $0x38] sm:$0xff] }
 0x16a   :  { %2689 = vmatpush.bf16.msra.mxu0 %v4393_v43 }
 0x16d   :  { %2541 = vmatpush.bf16.msrb.mxu3 %v3993_v38  ;;  %v4391_v38 = vld [vmem:[%s4670_s5 + $0x28] sm:$0xff] }
 0x16e   :  { %2690 = vmatpush.bf16.msra.mxu0 %v4392_v32 }
 0x16f   :  { %v1956_v50 = vpop.f32.mrf.mxu0 }
 0x170   :  { %2535 = vmatmul.bf16.vlgmr.msrb.gmra.mxu2 %v2057_v22  ;;  %v1957_v3 = vadd.f32 %v1956_v50, %v350_v59  ;;  %v4400_v50 = vld [vmem:[%s4670_s5 + $0x70] sm:$0xff]  ;;  %v4395_v59 = vld [vmem:[%s4670_s5 + $0x48] sm:$0xff] }
 0x171   :  { %2542 = vmatpush.bf16.msrb.mxu3 %v3985_v29  ;;  %2703 = vmatpush.bf16.msra.mxu1 %v4400_v50 }
 0x172   :  { %v1969_v46 = vpop.f32.mrf.mxu1  ;;  %2691 = vmatpush.bf16.msra.mxu0 %v4391_v38 }
 0x173   :  { %v1970_v35 = vadd.f32 %v1969_v46, %v1957_v3 }
 0x175   :  { %2543 = vmatpush.bf16.msrb.mxu3 %v3977_v55  ;;  %v4386_v55 = vld [vmem:[%s4670_s5] sm:$0xff] }
 0x176   :  { %v1982_v49 = vpop.f32.mrf.mxu2  ;;  %2692 = vmatpush.bf16.msra.mxu0 %v4390_v47 }
 0x177   :  { %v1958_v54 = vpop.f32.mrf.mxu0  ;;  %v1983_v42 = vadd.f32 %v1982_v49, %v1970_v35  ;;  %v4388_v49 = vld [vmem:[%s4670_s5 + $0x10] sm:$0xff] }
 0x178   :  { %v4399_v54 = vld [vmem:[%s4670_s5 + $0x68] sm:$0xff] }
 0x179   :  { %v1995_v51 = vpop.f32.mrf.mxu3  ;;  %2544 = vmatpush.bf16.msrb.mxu3 %v3969_v60  ;;  %2704 = vmatpush.bf16.msra.mxu1 %v4399_v54  ;;  %v4394_v60 = vld [vmem:[%s4670_s5 + $0x40] sm:$0xff] }
 0x17a   :  { %v1971_v56 = vpop.f32.mrf.mxu1  ;;  %v1996_v31 = vadd.f32 %v1995_v51, %v1983_v42  ;;  %2693 = vmatpush.bf16.msra.mxu0 %v4389_v48 }
 0x17b   :  { %v4398_v56 = vld [vmem:[%s4670_s5 + $0x60] sm:$0xff] }
 0x17d   :  { %2545 = vmatpush.bf16.msrb.mxu3 %v3961_v33  ;;  %2705 = vmatpush.bf16.msra.mxu1 %v4398_v56 }
 0x17e   :  { %v1984_v63 = vpop.f32.mrf.mxu2  ;;  %2694 = vmatpush.bf16.msra.mxu0 %v4388_v49 }
 0x181   :  { %v1997_v0 = vpop.f32.mrf.mxu3  ;;  %2546 = vmatpush.bf16.msrb.mxu3 %v3953_v4  ;;  %2706 = vmatpush.bf16.msra.mxu1 %v4397_v57 }
 0x182   :  { %2695 = vmatpush.bf16.msra.mxu0 %v4387_v53 }
 0x185   :  { %2547 = vmatpush.bf16.msrb.mxu3 %v3945_v41  ;;  %2707 = vmatpush.bf16.msra.mxu1 %v4396_v58 }
 0x186   :  { %2696 = vmatpush.bf16.msra.mxu0 %v4386_v55 }
 0x189   :  { %2708 = vmatpush.bf16.msra.mxu1 %v4395_v59 }
 0x18d   :  { %2709 = vmatpush.bf16.msra.mxu1 %v4394_v60 }
 0x18f   :  { %v2008_v7 = vpop.f32.mrf.mxu0 }
 0x190   :  { %v2021_v45 = vpop.f32.mrf.mxu1  ;;  %v2009_v8 = vadd.f32 %v2008_v7, %v1996_v31  ;;  %v4408_v31 = vld [vmem:[%s4671_s6] ss:$0 sm:$0xff] }
 0x192   :  { %v2022_v9 = vadd.f32 %v2021_v45, %v2009_v8 }
 0x197   :  { %v2034_v10 = vpop.f32.mrf.mxu2  ;;  %v2010_v13 = vpop.f32.mrf.mxu0 }
 0x198   :  { %v2035_v44 = vadd.f32 %v2034_v10, %v2022_v9  ;;  %v2047_v12 = vpop.f32.mrf.mxu3  ;;  %v2023_v14 = vpop.f32.mrf.mxu1 }
 0x19a   :  { %v2048_v15 = vadd.f32 %v2047_v12, %v2035_v44 }
 0x19c   :  { %v2054_v16 = vmax.f32 %v2048_v15, 0.0 }
 0x19e   :  { %v2058_v17 = vpack.c.bf16 %v2054_v16, %v2054_v16 }
 0x19f   :  { %v2036_v18 = vpop.f32.mrf.mxu2 }
 0x1a0   :  { %v2049_v19 = vpop.f32.mrf.mxu3  ;;  %2496 = vmatmul.bf16.vlgmr.msra.gmra.mxu3 %v2058_v17 }
 0x1af   :  { %v2458_v21 = vpop.f32.mrf.mxu0 }
 0x1b0   :  { %v2459_v22 = vadd.f32 %v2458_v21, %v2125_v20  ;;  %v2471_v23 = vpop.f32.mrf.mxu1  ;;  %2548 = vmatmul.bf16.vlgmr.msrb.gmra.mxu3 %v2058_v17 }
 0x1b2   :  { %v2472_v11 = vadd.f32 %v2471_v23, %v2459_v22 }
 0x1b7   :  { %v2460_v25 = vpop.f32.mrf.mxu0 }
 0x1b8   :  { %v2473_v26 = vpop.f32.mrf.mxu1 }
 0x1cf   :  { %v2510_v28 = vpop.f32.mrf.mxu0 }
 0x1d0   :  { %v2511_v37 = vadd.f32 %v2510_v28, %v2126_v27  ;;  %v2523_v30 = vpop.f32.mrf.mxu1 }
 0x1d2   :  { %v2524_v24 = vadd.f32 %v2523_v30, %v2511_v37 }
 0x1d7   :  { %v2512_v36 = vpop.f32.mrf.mxu0 }
 0x1d8   :  { %v2525_v39 = vpop.f32.mrf.mxu1 }
 0x1e3   :  { %v2484_v46 = vpop.f32.mrf.mxu2 }
 0x1e4   :  { %v2485_v61 = vadd.f32 %v2484_v46, %v2472_v11 }
 0x1eb   :  { %v2486_v29 = vpop.f32.mrf.mxu2 }
 0x1f3   :  { %v2536_v51 = vpop.f32.mrf.mxu2 }
 0x1f4   :  { %v2537_v2 = vadd.f32 %v2536_v51, %v2524_v24 }
 0x1fb   :  { %v2538_v52 = vpop.f32.mrf.mxu2 }
 0x223   :  { %v2497_v62 = vpop.f32.mrf.mxu3 }
 0x224   :  { %v2498_v63 = vadd.f32 %v2497_v62, %v2485_v61 }
 0x226   :  { %v2553_v0 = vmax.f32 %v2498_v63, 0.0 }
 0x228   :  { %v2555_v33 = vpack.c.bf16 %v2553_v0, %v2553_v0 }
 0x22a   :  { %2697 = vmatmul.bf16.vlgmr.msra.gmra.mxu0 %v2555_v33 }
 0x22b   :  { %v2499_v1 = vpop.f32.mrf.mxu3 }
 0x233   :  { %v2549_v3 = vpop.f32.mrf.mxu3 }
 0x234   :  { %v2550_v4 = vadd.f32 %v2549_v3, %v2537_v2 }
 0x236   :  { %v2554_v5 = vmax.f32 %v2550_v4, 0.0 }
 0x238   :  { %v2556_v34 = vpack.c.bf16 %v2554_v5, %v2554_v5 }
 0x23a   :  { %2710 = vmatmul.bf16.vlgmr.msra.gmra.mxu1 %v2556_v34 }
 0x23b   :  { %v2551_v35 = vpop.f32.mrf.mxu3 }
 0x2a7   :  { %v2698_v41 = vpop.f32.mrf.mxu0 }
 0x2a8   :  { %v2699_v7 = vadd.f32 %v4408_v31, %v2698_v41 }
 0x2af   :  { %v2700_v42 = vpop.f32.mrf.mxu0 }
 0x2b7   :  { %v2711_v45 = vpop.f32.mrf.mxu1 }
 0x2b8   :  { %v2712_v8 = vadd.f32 %v2711_v45, %v2699_v7 }
 0x2ba   :  { %2715 = vst [vmem:[%s4672_s7] sm:$0x3] %v2712_v8 }
 0x2bf   :  { %v2713_v9 = vpop.f32.mrf.mxu1 }
 0x2c0   :  { %2720 = vsyncpa [#allocation3], 1 }
 0x2c1   :  { %2721 = vsyncpa [#allocation5], 1 }

// kernel: pointnet_tnet_forward.19
= control target key start
LH: loop header
LB: loop body
LE: loop exit
PB: predicated region body
PF: predicated region fallthrough
CT: control target
= control target key end

     0   :  { %12 = vsyncpa [#allocation3], 0  ;;  %s4706_s0 = inlined_call_operand.vmem [shape: f32[2,1024], index: 0, kind: input, shape index: {}]   ;;  %s4707_s1 = inlined_call_operand.hbm [shape: bf16[1024,512], index: 1, kind: input, shape index: {}]   ;;  %s4708_s2 = inlined_call_operand.vmem [shape: f32[1,512], index: 2, kind: input, shape index: {}]   ;;  %s4709_s3 = inlined_call_operand.hbm [shape: bf16[512,256], index: 3, kind: input, shape index: {}]   ;;  %s4710_s4 = inlined_call_operand.vmem [shape: f32[1,256], index: 4, kind: input, shape index: {}]   ;;  %s4711_s5 = inlined_call_operand.vmem [shape: bf16[256,128], index: 5, kind: input, shape index: {}]   ;;  %s4712_s6 = inlined_call_operand.vmem [shape: f32[1,128], index: 6, kind: input, shape index: {}]   ;;  %s4713_s7 = inlined_call_operand.hbm [shape: f32[2,128], index: 7, kind: output, shape index: {}]  }
   0x1   :  { %13 = vsyncpa [#allocation6], 0 }
   0x2   :  { %14 = vsyncpa [#allocation4], 0  ;;  %s21_s26 = sshll.u32 %s4707_s1, 4  ;;  %s4502_s27 = smov [#allocation2]   ;;  %s22_s26 = int_to_ptr.hbm [resolvable:$true] %s21_s26 }
   0x3   :  { %s23_s28 = sshll.u32 %s4502_s27, 4  ;;  %s36_s8 = sshll.u32 %s4709_s3, 4  ;;  %s24_s28 = int_to_ptr.vmem [resolvable:$true] %s23_s28  ;;  %s37_s8 = int_to_ptr.hbm [resolvable:$true] %s36_s8 }
   0x4   :  { %s4503_s9 = smov 256   ;;  %s4504_s10 = smov 16  }
   0x5   :  { %29 = dma.hbm_to_vmem [thread:$0]  %s22_s26, 32768, %s24_s28, [#allocation3], %s4503_s9, %s4503_s9, %s4504_s10  }
   0x6   :  { %s4505_s11 = smov [#allocation5]   ;;  %s4506_s13 = smov 128  }
   0x7   :  { %s38_s12 = sshll.u32 %s4505_s11, 4  ;;  %s4507_s14 = smov 8   ;;  %s39_s12 = int_to_ptr.vmem [resolvable:$true] %s38_s12 }
   0x8   :  { %44 = dma.hbm_to_vmem [thread:$0]  %s37_s8, 8192, %s39_s12, [#allocation6], %s4506_s13, %s4506_s13, %s4507_s14  }
   0x9   :  { %4496 = dma.done.wait [#allocation3], 32768  }
   0xa   :  { %4497 = vsyncadd [#allocation3], 4294934528 }
   0xb   :  { %4498 = dma.done.wait [#allocation6], 8192  }
   0xc   :  { %4499 = vsyncadd [#allocation6], 4294959104  ;;  %v2849_v0 = vld [vmem:[#allocation2 + $0xe0] sm:$0xf]  ;;  %v4109_v1 = vld [vmem:[#allocation2 + $0xec] sm:$0xf0] }
   0xd   :  { %v2977_v2 = vld [vmem:[#allocation2 + $0x1e0] sm:$0xf]  ;;  %v2850_v3 = vor.u32 %v4109_v1, %v2849_v0  ;;  %v4141_v4 = vld [vmem:[#allocation2 + $0x1ec] sm:$0xf0]  ;;  %s2724_s29 = sshll.u32 %s4713_s7, 4  ;;  %s2725_s29 = int_to_ptr.hbm [resolvable:$true] %s2724_s29 }
   0xe   :  { %v3105_v5 = vld [vmem:[#allocation2 + $0x2e0] sm:$0xf]  ;;  %v4173_v6 = vld [vmem:[#allocation2 + $0x2ec] sm:$0xf0]  ;;  %v2978_v7 = vor.u32 %v4141_v4, %v2977_v2 }
   0xf   :  { %v3106_v8 = vor.u32 %v4173_v6, %v3105_v5  ;;  %v3233_v9 = vld [vmem:[#allocation2 + $0x3e0] sm:$0xf]  ;;  %v4205_v10 = vld [vmem:[#allocation2 + $0x3ec] sm:$0xf0]  ;;  %1636 = vmatpush.bf16.msra.mxu0 %v2850_v3 }
  0x10   :  { %v2833_v11 = vld [vmem:[#allocation2 + $0xc0] sm:$0xf]  ;;  %v3234_v12 = vor.u32 %v4205_v10, %v3233_v9  ;;  %v4105_v13 = vld [vmem:[#allocation2 + $0xcc] sm:$0xf0]  ;;  %1649 = vmatpush.bf16.msra.mxu1 %v2978_v7 }
  0x11   :  { %v2961_v14 = vld [vmem:[#allocation2 + $0x1c0] sm:$0xf]  ;;  %v4137_v15 = vld [vmem:[#allocation2 + $0x1cc] sm:$0xf0]  ;;  %1662 = vmatpush.bf16.msra.mxu2 %v3106_v8  ;;  %v2834_v16 = vor.u32 %v4105_v13, %v2833_v11 }
  0x12   :  { %v2962_v17 = vor.u32 %v4137_v15, %v2961_v14  ;;  %v3089_v18 = vld [vmem:[#allocation2 + $0x2c0] sm:$0xf]  ;;  %v4169_v19 = vld [vmem:[#allocation2 + $0x2cc] sm:$0xf0]  ;;  %1675 = vmatpush.bf16.msra.mxu3 %v3234_v12 }
  0x13   :  { %v3217_v20 = vld [vmem:[#allocation2 + $0x3c0] sm:$0xf]  ;;  %v3090_v21 = vor.u32 %v4169_v19, %v3089_v18  ;;  %v4201_v22 = vld [vmem:[#allocation2 + $0x3cc] sm:$0xf0]  ;;  %1637 = vmatpush.bf16.msra.mxu0 %v2834_v16 }
  0x14   :  { %v2817_v23 = vld [vmem:[#allocation2 + $0xa0] sm:$0xf]  ;;  %v4101_v24 = vld [vmem:[#allocation2 + $0xac] sm:$0xf0]  ;;  %v3218_v25 = vor.u32 %v4201_v22, %v3217_v20  ;;  %1650 = vmatpush.bf16.msra.mxu1 %v2962_v17 }
  0x15   :  { %v2945_v26 = vld [vmem:[#allocation2 + $0x1a0] sm:$0xf]  ;;  %v4133_v27 = vld [vmem:[#allocation2 + $0x1ac] sm:$0xf0]  ;;  %v2818_v29 = vor.u32 %v4101_v24, %v2817_v23  ;;  %1663 = vmatpush.bf16.msra.mxu2 %v3090_v21 }
  0x16   :  { %v3073_v28 = vld [vmem:[#allocation2 + $0x2a0] sm:$0xf]  ;;  %v4165_v30 = vld [vmem:[#allocation2 + $0x2ac] sm:$0xf0]  ;;  %v2946_v33 = vor.u32 %v4133_v27, %v2945_v26  ;;  %1676 = vmatpush.bf16.msra.mxu3 %v3218_v25 }
  0x17   :  { %v3201_v31 = vld [vmem:[#allocation2 + $0x3a0] sm:$0xf]  ;;  %v4197_v32 = vld [vmem:[#allocation2 + $0x3ac] sm:$0xf0]  ;;  %v3074_v34 = vor.u32 %v4165_v30, %v3073_v28  ;;  %1638 = vmatpush.bf16.msra.mxu0 %v2818_v29 }
  0x18   :  { %v2801_v35 = vld [vmem:[#allocation2 + $0x80] sm:$0xf]  ;;  %v4097_v36 = vld [vmem:[#allocation2 + $0x8c] sm:$0xf0]  ;;  %v3202_v38 = vor.u32 %v4197_v32, %v3201_v31  ;;  %1651 = vmatpush.bf16.msra.mxu1 %v2946_v33 }
  0x19   :  { %v2929_v37 = vld [vmem:[#allocation2 + $0x180] sm:$0xf]  ;;  %v4129_v39 = vld [vmem:[#allocation2 + $0x18c] sm:$0xf0]  ;;  %v2802_v44 = vor.u32 %v4097_v36, %v2801_v35  ;;  %1664 = vmatpush.bf16.msra.mxu2 %v3074_v34 }
  0x1a   :  { %v3057_v40 = vld [vmem:[#allocation2 + $0x280] sm:$0xf]  ;;  %v4161_v41 = vld [vmem:[#allocation2 + $0x28c] sm:$0xf0]  ;;  %v2930_v45 = vor.u32 %v4129_v39, %v2929_v37  ;;  %1677 = vmatpush.bf16.msra.mxu3 %v3202_v38 }
  0x1b   :  { %v3185_v42 = vld [vmem:[#allocation2 + $0x380] sm:$0xf]  ;;  %v4193_v43 = vld [vmem:[#allocation2 + $0x38c] sm:$0xf0]  ;;  %v3058_v46 = vor.u32 %v4161_v41, %v3057_v40  ;;  %1639 = vmatpush.bf16.msra.mxu0 %v2802_v44 }
  0x1c   :  { %v2785_v47 = vld [vmem:[#allocation2 + $0x60] sm:$0xf]  ;;  %v4093_v48 = vld [vmem:[#allocation2 + $0x6c] sm:$0xf0]  ;;  %v3186_v50 = vor.u32 %v4193_v43, %v3185_v42  ;;  %1652 = vmatpush.bf16.msra.mxu1 %v2930_v45 }
  0x1d   :  { %v2913_v49 = vld [vmem:[#allocation2 + $0x160] sm:$0xf]  ;;  %v4125_v51 = vld [vmem:[#allocation2 + $0x16c] sm:$0xf0]  ;;  %v2786_v56 = vor.u32 %v4093_v48, %v2785_v47  ;;  %1665 = vmatpush.bf16.msra.mxu2 %v3058_v46 }
  0x1e   :  { %v3041_v52 = vld [vmem:[#allocation2 + $0x260] sm:$0xf]  ;;  %v4157_v53 = vld [vmem:[#allocation2 + $0x26c] sm:$0xf0]  ;;  %v2914_v57 = vor.u32 %v4125_v51, %v2913_v49  ;;  %1678 = vmatpush.bf16.msra.mxu3 %v3186_v50 }
  0x1f   :  { %v3169_v54 = vld [vmem:[#allocation2 + $0x360] sm:$0xf]  ;;  %v4189_v55 = vld [vmem:[#allocation2 + $0x36c] sm:$0xf0]  ;;  %v3042_v58 = vor.u32 %v4157_v53, %v3041_v52  ;;  %1640 = vmatpush.bf16.msra.mxu0 %v2786_v56 }
  0x20   :  { %v2769_v59 = vld [vmem:[#allocation2 + $0x40] sm:$0xf]  ;;  %v4089_v60 = vld [vmem:[#allocation2 + $0x4c] sm:$0xf0]  ;;  %v3170_v62 = vor.u32 %v4189_v55, %v3169_v54  ;;  %1653 = vmatpush.bf16.msra.mxu1 %v2914_v57 }
  0x21   :  { %v2897_v61 = vld [vmem:[#allocation2 + $0x140] sm:$0xf]  ;;  %v4121_v63 = vld [vmem:[#allocation2 + $0x14c] sm:$0xf0]  ;;  %v2770_v4 = vor.u32 %v4089_v60, %v2769_v59  ;;  %1666 = vmatpush.bf16.msra.mxu2 %v3042_v58 }
  0x22   :  { %v3025_v0 = vld [vmem:[#allocation2 + $0x240] sm:$0xf]  ;;  %v4153_v1 = vld [vmem:[#allocation2 + $0x24c] sm:$0xf0]  ;;  %v2898_v5 = vor.u32 %v4121_v63, %v2897_v61  ;;  %1679 = vmatpush.bf16.msra.mxu3 %v3170_v62 }
  0x23   :  { %v3153_v2 = vld [vmem:[#allocation2 + $0x340] sm:$0xf]  ;;  %v4185_v3 = vld [vmem:[#allocation2 + $0x34c] sm:$0xf0]  ;;  %v3026_v6 = vor.u32 %v4153_v1, %v3025_v0  ;;  %1641 = vmatpush.bf16.msra.mxu0 %v2770_v4 }
  0x24   :  { %v2753_v7 = vld [vmem:[#allocation2 + $0x20] sm:$0xf]  ;;  %v4085_v8 = vld [vmem:[#allocation2 + $0x2c] sm:$0xf0]  ;;  %v3154_v10 = vor.u32 %v4185_v3, %v3153_v2  ;;  %1654 = vmatpush.bf16.msra.mxu1 %v2898_v5  ;;  %v59_v2 = vld [vmem:[%s4706_s0] sm:$0xff] }
  0x25   :  { %v2881_v9 = vld [vmem:[#allocation2 + $0x120] sm:$0xf]  ;;  %v4117_v11 = vld [vmem:[#allocation2 + $0x12c] sm:$0xf0]  ;;  %v2754_v16 = vor.u32 %v4085_v8, %v2753_v7  ;;  %1667 = vmatpush.bf16.msra.mxu2 %v3026_v6  ;;  %63 = vst [vmem:[#allocation1] ss:$4 sm:$0xff] %v59_v2 }
  0x26   :  { %v3009_v12 = vld [vmem:[#allocation2 + $0x220] sm:$0xf]  ;;  %v4149_v13 = vld [vmem:[#allocation2 + $0x22c] sm:$0xf0]  ;;  %v2882_v19 = vor.u32 %v4117_v11, %v2881_v9  ;;  %1680 = vmatpush.bf16.msra.mxu3 %v3154_v10 }
  0x27   :  { %v3137_v14 = vld [vmem:[#allocation2 + $0x320] sm:$0xf]  ;;  %v4181_v15 = vld [vmem:[#allocation2 + $0x32c] sm:$0xf0]  ;;  %v3010_v20 = vor.u32 %v4149_v13, %v3009_v12  ;;  %1642 = vmatpush.bf16.msra.mxu0 %v2754_v16 }
  0x28   :  { %v2737_v17 = vld [vmem:[#allocation2] sm:$0xf]  ;;  %v4081_v18 = vld [vmem:[#allocation2 + $0xc] sm:$0xf0]  ;;  %v3138_v24 = vor.u32 %v4181_v15, %v3137_v14  ;;  %1655 = vmatpush.bf16.msra.mxu1 %v2882_v19 }
  0x29   :  { %v2865_v21 = vld [vmem:[#allocation2 + $0x100] sm:$0xf]  ;;  %v4113_v22 = vld [vmem:[#allocation2 + $0x10c] sm:$0xf0]  ;;  %v2738_v31 = vor.u32 %v4081_v18, %v2737_v17  ;;  %1668 = vmatpush.bf16.msra.mxu2 %v3010_v20 }
  0x2a   :  { %v2993_v23 = vld [vmem:[#allocation2 + $0x200] sm:$0xf]  ;;  %v4145_v25 = vld [vmem:[#allocation2 + $0x20c] sm:$0xf0]  ;;  %v2866_v35 = vor.u32 %v4113_v22, %v2865_v21  ;;  %1681 = vmatpush.bf16.msra.mxu3 %v3138_v24 }
  0x2b   :  { %v3121_v26 = vld [vmem:[#allocation2 + $0x300] sm:$0xf]  ;;  %v4177_v27 = vld [vmem:[#allocation2 + $0x30c] sm:$0xf0]  ;;  %v2994_v36 = vor.u32 %v4145_v25, %v2993_v23  ;;  %1643 = vmatpush.bf16.msra.mxu0 %v2738_v31 }
  0x2c   :  { %v3361_v28 = vld [vmem:[#allocation2 + $0x4e0] sm:$0xf]  ;;  %v4237_v29 = vld [vmem:[#allocation2 + $0x4ec] sm:$0xf0]  ;;  %v3122_v39 = vor.u32 %v4177_v27, %v3121_v26  ;;  %1656 = vmatpush.bf16.msra.mxu1 %v2866_v35 }
  0x2d   :  { %v3489_v30 = vld [vmem:[#allocation2 + $0x5e0] sm:$0xf]  ;;  %v4269_v32 = vld [vmem:[#allocation2 + $0x5ec] sm:$0xf0]  ;;  %v3362_v40 = vor.u32 %v4237_v29, %v3361_v28  ;;  %1669 = vmatpush.bf16.msra.mxu2 %v2994_v36 }
  0x2e   :  { %v3617_v33 = vld [vmem:[#allocation2 + $0x6e0] sm:$0xf]  ;;  %v4301_v34 = vld [vmem:[#allocation2 + $0x6ec] sm:$0xf0]  ;;  %v3490_v41 = vor.u32 %v4269_v32, %v3489_v30  ;;  %1682 = vmatpush.bf16.msra.mxu3 %v3122_v39 }
  0x2f   :  { %v3745_v37 = vld [vmem:[#allocation2 + $0x7e0] sm:$0xf]  ;;  %v4333_v38 = vld [vmem:[#allocation2 + $0x7ec] sm:$0xf0]  ;;  %v3618_v42 = vor.u32 %v4301_v34, %v3617_v33  ;;  %1688 = vmatpush.bf16.msrb.mxu0 %v3362_v40 }
  0x30   :  { %v3345_v43 = vld [vmem:[#allocation2 + $0x4c0] sm:$0xf]  ;;  %v4233_v44 = vld [vmem:[#allocation2 + $0x4cc] sm:$0xf0]  ;;  %v3746_v46 = vor.u32 %v4333_v38, %v3745_v37  ;;  %1701 = vmatpush.bf16.msrb.mxu1 %v3490_v41 }
  0x31   :  { %v3473_v45 = vld [vmem:[#allocation2 + $0x5c0] sm:$0xf]  ;;  %v4265_v47 = vld [vmem:[#allocation2 + $0x5cc] sm:$0xf0]  ;;  %v3346_v52 = vor.u32 %v4233_v44, %v3345_v43  ;;  %1714 = vmatpush.bf16.msrb.mxu2 %v3618_v42 }
  0x32   :  { %v3601_v48 = vld [vmem:[#allocation2 + $0x6c0] sm:$0xf]  ;;  %v4297_v49 = vld [vmem:[#allocation2 + $0x6cc] sm:$0xf0]  ;;  %v3474_v53 = vor.u32 %v4265_v47, %v3473_v45  ;;  %1727 = vmatpush.bf16.msrb.mxu3 %v3746_v46 }
  0x33   :  { %v3729_v50 = vld [vmem:[#allocation2 + $0x7c0] sm:$0xf]  ;;  %v4329_v51 = vld [vmem:[#allocation2 + $0x7cc] sm:$0xf0]  ;;  %v3602_v54 = vor.u32 %v4297_v49, %v3601_v48  ;;  %1689 = vmatpush.bf16.msrb.mxu0 %v3346_v52 }
  0x34   :  { %v3329_v55 = vld [vmem:[#allocation2 + $0x4a0] sm:$0xf]  ;;  %v4229_v56 = vld [vmem:[#allocation2 + $0x4ac] sm:$0xf0]  ;;  %v3730_v58 = vor.u32 %v4329_v51, %v3729_v50  ;;  %1702 = vmatpush.bf16.msrb.mxu1 %v3474_v53 }
  0x35   :  { %v3457_v57 = vld [vmem:[#allocation2 + $0x5a0] sm:$0xf]  ;;  %v4261_v59 = vld [vmem:[#allocation2 + $0x5ac] sm:$0xf0]  ;;  %v3330_v0 = vor.u32 %v4229_v56, %v3329_v55  ;;  %1715 = vmatpush.bf16.msrb.mxu2 %v3602_v54 }
  0x36   :  { %v3585_v60 = vld [vmem:[#allocation2 + $0x6a0] sm:$0xf]  ;;  %v4293_v61 = vld [vmem:[#allocation2 + $0x6ac] sm:$0xf0]  ;;  %v3458_v3 = vor.u32 %v4261_v59, %v3457_v57  ;;  %1728 = vmatpush.bf16.msrb.mxu3 %v3730_v58 }
  0x37   :  { %v3713_v62 = vld [vmem:[#allocation2 + $0x7a0] sm:$0xf]  ;;  %v4325_v63 = vld [vmem:[#allocation2 + $0x7ac] sm:$0xf0]  ;;  %v3586_v4 = vor.u32 %v4293_v61, %v3585_v60  ;;  %1690 = vmatpush.bf16.msrb.mxu0 %v3330_v0 }
  0x38   :  { %v3313_v1 = vld [vmem:[#allocation2 + $0x480] sm:$0xf]  ;;  %v4225_v5 = vld [vmem:[#allocation2 + $0x48c] sm:$0xf0]  ;;  %v3714_v7 = vor.u32 %v4325_v63, %v3713_v62  ;;  %1703 = vmatpush.bf16.msrb.mxu1 %v3458_v3 }
  0x39   :  { %v3441_v6 = vld [vmem:[#allocation2 + $0x580] sm:$0xf]  ;;  %v4257_v8 = vld [vmem:[#allocation2 + $0x58c] sm:$0xf0]  ;;  %v3314_v13 = vor.u32 %v4225_v5, %v3313_v1  ;;  %1716 = vmatpush.bf16.msrb.mxu2 %v3586_v4 }
  0x3a   :  { %v3569_v9 = vld [vmem:[#allocation2 + $0x680] sm:$0xf]  ;;  %v4289_v10 = vld [vmem:[#allocation2 + $0x68c] sm:$0xf0]  ;;  %v3442_v15 = vor.u32 %v4257_v8, %v3441_v6  ;;  %1729 = vmatpush.bf16.msrb.mxu3 %v3714_v7  ;;  %v4107_v6 = vld [vmem:[#allocation2 + $0xe4] sm:$0xf] }
  0x3b   :  { %v3697_v11 = vld [vmem:[#allocation2 + $0x780] sm:$0xf]  ;;  %v4321_v12 = vld [vmem:[#allocation2 + $0x78c] sm:$0xf0]  ;;  %v3570_v16 = vor.u32 %v4289_v10, %v3569_v9  ;;  %1691 = vmatpush.bf16.msrb.mxu0 %v3314_v13  ;;  %v2851_v7 = vld [vmem:[#allocation2 + $0xf0] sm:$0xf0] }
  0x3c   :  { %v3297_v14 = vld [vmem:[#allocation2 + $0x460] sm:$0xf]  ;;  %v4221_v17 = vld [vmem:[#allocation2 + $0x46c] sm:$0xf0]  ;;  %v3698_v20 = vor.u32 %v4321_v12, %v3697_v11  ;;  %1704 = vmatpush.bf16.msrb.mxu1 %v3442_v15  ;;  %v4139_v8 = vld [vmem:[#allocation2 + $0x1e4] sm:$0xf] }
  0x3d   :  { %v3425_v18 = vld [vmem:[#allocation2 + $0x560] sm:$0xf]  ;;  %v4253_v19 = vld [vmem:[#allocation2 + $0x56c] sm:$0xf0]  ;;  %v3298_v27 = vor.u32 %v4221_v17, %v3297_v14  ;;  %1717 = vmatpush.bf16.msrb.mxu2 %v3570_v16  ;;  %v2979_v9 = vld [vmem:[#allocation2 + $0x1f0] sm:$0xf0] }
  0x3e   :  { %v3553_v21 = vld [vmem:[#allocation2 + $0x660] sm:$0xf]  ;;  %v4285_v22 = vld [vmem:[#allocation2 + $0x66c] sm:$0xf0]  ;;  %v3426_v28 = vor.u32 %v4253_v19, %v3425_v18  ;;  %1730 = vmatpush.bf16.msrb.mxu3 %v3698_v20  ;;  %v4171_v10 = vld [vmem:[#allocation2 + $0x2e4] sm:$0xf] }
  0x3f   :  { %v3681_v23 = vld [vmem:[#allocation2 + $0x760] sm:$0xf]  ;;  %v4317_v24 = vld [vmem:[#allocation2 + $0x76c] sm:$0xf0]  ;;  %v3554_v32 = vor.u32 %v4285_v22, %v3553_v21  ;;  %1692 = vmatpush.bf16.msrb.mxu0 %v3298_v27  ;;  %v3107_v12 = vld [vmem:[#allocation2 + $0x2f0] sm:$0xf0]  ;;  %v2854_v21 = vor.u32 %v4107_v6, %v2851_v7 }
  0x40   :  { %v3281_v25 = vld [vmem:[#allocation2 + $0x440] sm:$0xf]  ;;  %v4217_v26 = vld [vmem:[#allocation2 + $0x44c] sm:$0xf0]  ;;  %v3682_v37 = vor.u32 %v4317_v24, %v3681_v23  ;;  %1705 = vmatpush.bf16.msrb.mxu1 %v3426_v28  ;;  %v4203_v13 = vld [vmem:[#allocation2 + $0x3e4] sm:$0xf]  ;;  %v2982_v24 = vor.u32 %v4139_v8, %v2979_v9 }
  0x41   :  { %v3409_v29 = vld [vmem:[#allocation2 + $0x540] sm:$0xf]  ;;  %v68_v30 = vld.sshfl [vmem:[#allocation1 + $0x10] sm:$0xff pattern:$0x73625140]  ;;  %v3282_v45 = vor.u32 %v4217_v26, %v3281_v25  ;;  %1718 = vmatpush.bf16.msrb.mxu2 %v3554_v32  ;;  %v3110_v25 = vor.u32 %v4171_v10, %v3107_v12 }
  0x42   :  { %v66_v31 = vld.sshfl [vmem:[#allocation1] sm:$0xff pattern:$0x73625140]  ;;  %v4558_v33 = vpack.c.bf16 %v68_v30, %v68_v30  ;;  %v69_v35 = vld.sshfl [vmem:[#allocation1 + $0x18] sm:$0xff pattern:$0x73625140]  ;;  %1731 = vmatpush.bf16.msrb.mxu3 %v3682_v37 }
  0x43   :  { %v4560_v34 = vpack.c.bf16 %v66_v31, %v66_v31  ;;  %v67_v36 = vld.sshfl [vmem:[#allocation1 + $0x8] sm:$0xff pattern:$0x73625140]  ;;  %v4249_v38 = vld [vmem:[#allocation2 + $0x54c] sm:$0xf0]  ;;  %v4562_v41 = vpack.c.bf16 %v69_v35, %v69_v35  ;;  %1693 = vmatpush.bf16.msrb.mxu0 %v3282_v45 }
  0x44   :  { %v3537_v39 = vld [vmem:[#allocation2 + $0x640] sm:$0xf]  ;;  %v4281_v40 = vld [vmem:[#allocation2 + $0x64c] sm:$0xf0]  ;;  %v4564_v42 = vpack.c.bf16 %v67_v36, %v67_v36  ;;  %1670 = vmatmul.bf16.vlgmr.msra.gmra.mxu2 %v4558_v33  ;;  %v3410_v48 = vor.u32 %v4249_v38, %v3409_v29  ;;  %v3235_v14 = vld [vmem:[#allocation2 + $0x3f0] sm:$0xf0] }
  0x45   :  { %v3665_v43 = vld [vmem:[#allocation2 + $0x740] sm:$0xf]  ;;  %v4313_v44 = vld [vmem:[#allocation2 + $0x74c] sm:$0xf0]  ;;  %1644 = vmatmul.bf16.vlgmr.msra.gmra.mxu0 %v4560_v34  ;;  %1683 = vmatmul.bf16.vlgmr.msra.gmra.mxu3 %v4562_v41  ;;  %v3538_v49 = vor.u32 %v4281_v40, %v3537_v39  ;;  %v4103_v17 = vld [vmem:[#allocation2 + $0xc4] sm:$0xf]  ;;  %v3238_v28 = vor.u32 %v4203_v13, %v3235_v14 }
  0x46   :  { %v3265_v46 = vld [vmem:[#allocation2 + $0x420] sm:$0xf]  ;;  %v4213_v47 = vld [vmem:[#allocation2 + $0x42c] sm:$0xf0]  ;;  %v3666_v53 = vor.u32 %v4313_v44, %v3665_v43  ;;  %1657 = vmatmul.bf16.vlgmr.msra.gmra.mxu1 %v4564_v42  ;;  %v2835_v18 = vld [vmem:[#allocation2 + $0xd0] sm:$0xf0] }
  0x47   :  { %v3393_v50 = vld [vmem:[#allocation2 + $0x520] sm:$0xf]  ;;  %v4245_v51 = vld [vmem:[#allocation2 + $0x52c] sm:$0xf0]  ;;  %v3266_v59 = vor.u32 %v4213_v47, %v3265_v46  ;;  %1706 = vmatpush.bf16.msrb.mxu1 %v3410_v48  ;;  %1719 = vmatpush.bf16.msrb.mxu2 %v3538_v49  ;;  %v4135_v26 = vld [vmem:[#allocation2 + $0x1c4] sm:$0xf]  ;;  %v2838_v39 = vor.u32 %v4103_v17, %v2835_v18 }
  0x48   :  { %v60_v52 = vld [vmem:[%s4706_s0 + $0x8] sm:$0xff]  ;;  %v4277_v55 = vld [vmem:[#allocation2 + $0x62c] sm:$0xf0]  ;;  %v3394_v63 = vor.u32 %v4245_v51, %v3393_v50  ;;  %1732 = vmatpush.bf16.msrb.mxu3 %v3666_v53  ;;  %v2963_v29 = vld [vmem:[#allocation2 + $0x1d0] sm:$0xf0] }
  0x49   :  { %v3521_v54 = vld [vmem:[#allocation2 + $0x620] sm:$0xf]  ;;  %65 = vst [vmem:[#allocation1 + $0x20] ss:$4 sm:$0xff] %v60_v52  ;;  %v4309_v57 = vld [vmem:[#allocation2 + $0x72c] sm:$0xf0]  ;;  %1694 = vmatpush.bf16.msrb.mxu0 %v3266_v59  ;;  %v2966_v43 = vor.u32 %v4135_v26, %v2963_v29 }
  0x4a   :  { %v3649_v56 = vld [vmem:[#allocation2 + $0x720] sm:$0xf]  ;;  %v4209_v60 = vld [vmem:[#allocation2 + $0x40c] sm:$0xf0]  ;;  %v3522_v0 = vor.u32 %v4277_v55, %v3521_v54  ;;  %v4167_v30 = vld [vmem:[#allocation2 + $0x2c4] sm:$0xf] }
  0x4b   :  { %v3249_v58 = vld [vmem:[#allocation2 + $0x400] sm:$0xf]  ;;  %v4241_v62 = vld [vmem:[#allocation2 + $0x50c] sm:$0xf0]  ;;  %v3650_v4 = vor.u32 %v4309_v57, %v3649_v56  ;;  %1707 = vmatpush.bf16.msrb.mxu1 %v3394_v63  ;;  %v3091_v31 = vld [vmem:[#allocation2 + $0x2d0] sm:$0xf0] }
  0x4c   :  { %v3377_v61 = vld [vmem:[#allocation2 + $0x500] sm:$0xf]  ;;  %v4273_v2 = vld [vmem:[#allocation2 + $0x60c] sm:$0xf0]  ;;  %v3250_v11 = vor.u32 %v4209_v60, %v3249_v58  ;;  %1720 = vmatpush.bf16.msrb.mxu2 %v3522_v0  ;;  %v4199_v35 = vld [vmem:[#allocation2 + $0x3c4] sm:$0xf]  ;;  %v3094_v44 = vor.u32 %v4167_v30, %v3091_v31 }
  0x4d   :  { %v3505_v1 = vld [vmem:[#allocation2 + $0x600] sm:$0xf]  ;;  %v4305_v5 = vld [vmem:[#allocation2 + $0x70c] sm:$0xf0]  ;;  %v3378_v15 = vor.u32 %v4241_v62, %v3377_v61  ;;  %1733 = vmatpush.bf16.msrb.mxu3 %v3650_v4  ;;  %v3219_v36 = vld [vmem:[#allocation2 + $0x3d0] sm:$0xf0] }
  0x4e   :  { %v3633_v3 = vld [vmem:[#allocation2 + $0x700] sm:$0xf]  ;;  %v3506_v16 = vor.u32 %v4273_v2, %v3505_v1  ;;  %1695 = vmatpush.bf16.msrb.mxu0 %v3250_v11  ;;  %v4099_v45 = vld [vmem:[#allocation2 + $0xa4] sm:$0xf]  ;;  %v2819_v46 = vld [vmem:[#allocation2 + $0xb0] sm:$0xf0]  ;;  %v3222_v48 = vor.u32 %v4199_v35, %v3219_v36 }
  0x4f   :  { %v3634_v20 = vor.u32 %v4305_v5, %v3633_v3  ;;  %1708 = vmatpush.bf16.msrb.mxu1 %v3378_v15  ;;  %v4131_v47 = vld [vmem:[#allocation2 + $0x1a4] sm:$0xf]  ;;  %v2947_v49 = vld [vmem:[#allocation2 + $0x1b0] sm:$0xf0]  ;;  %v2822_v54 = vor.u32 %v4099_v45, %v2819_v46 }
  0x50   :  { %v72_v19 = vld.sshfl [vmem:[#allocation1 + $0x30] sm:$0xff pattern:$0x73625140]  ;;  %v70_v22 = vld.sshfl [vmem:[#allocation1 + $0x20] sm:$0xff pattern:$0x73625140]  ;;  %1721 = vmatpush.bf16.msrb.mxu2 %v3506_v16  ;;  %v2950_v55 = vor.u32 %v4131_v47, %v2947_v49 }
  0x51   :  { %v73_v23 = vld.sshfl [vmem:[#allocation1 + $0x38] sm:$0xff pattern:$0x73625140]  ;;  %v71_v27 = vld.sshfl [vmem:[#allocation1 + $0x28] sm:$0xff pattern:$0x73625140]  ;;  %v4573_v32 = vpack.c.bf16 %v72_v19, %v72_v19  ;;  %v4575_v37 = vpack.c.bf16 %v70_v22, %v70_v22  ;;  %1734 = vmatpush.bf16.msrb.mxu3 %v3634_v20 }
  0x52   :  { %v4577_v38 = vpack.c.bf16 %v73_v23, %v73_v23  ;;  %1740 = vmatpush.bf16.msra.mxu0 %v2854_v21  ;;  %v4579_v40 = vpack.c.bf16 %v71_v27, %v71_v27  ;;  %v4163_v50 = vld [vmem:[#allocation2 + $0x2a4] sm:$0xf]  ;;  %v3075_v51 = vld [vmem:[#allocation2 + $0x2b0] sm:$0xf0] }
  0x53   :  { %1753 = vmatpush.bf16.msra.mxu1 %v2982_v24  ;;  %v4195_v52 = vld [vmem:[#allocation2 + $0x3a4] sm:$0xf]  ;;  %v3203_v53 = vld [vmem:[#allocation2 + $0x3b0] sm:$0xf0]  ;;  %v3078_v56 = vor.u32 %v4163_v50, %v3075_v51 }
  0x54   :  { %1766 = vmatpush.bf16.msra.mxu2 %v3110_v25  ;;  %v4095_v57 = vld [vmem:[#allocation2 + $0x84] sm:$0xf]  ;;  %v2803_v58 = vld [vmem:[#allocation2 + $0x90] sm:$0xf0]  ;;  %v3206_v60 = vor.u32 %v4195_v52, %v3203_v53 }
  0x55   :  { %1779 = vmatpush.bf16.msra.mxu3 %v3238_v28  ;;  %1722 = vmatmul.bf16.vlgmr.msrb.gmra.mxu2 %v4573_v32  ;;  %v4127_v59 = vld [vmem:[#allocation2 + $0x184] sm:$0xf]  ;;  %v2931_v61 = vld [vmem:[#allocation2 + $0x190] sm:$0xf0]  ;;  %v2806_v2 = vor.u32 %v4095_v57, %v2803_v58 }
  0x56   :  { %1696 = vmatmul.bf16.vlgmr.msrb.gmra.mxu0 %v4575_v37  ;;  %1735 = vmatmul.bf16.vlgmr.msrb.gmra.mxu3 %v4577_v38  ;;  %v4159_v62 = vld [vmem:[#allocation2 + $0x284] sm:$0xf]  ;;  %v3059_v63 = vld [vmem:[#allocation2 + $0x290] sm:$0xf0]  ;;  %v2934_v3 = vor.u32 %v4127_v59, %v2931_v61 }
  0x57   :  { %1741 = vmatpush.bf16.msra.mxu0 %v2838_v39  ;;  %1709 = vmatmul.bf16.vlgmr.msrb.gmra.mxu1 %v4579_v40  ;;  %v4191_v0 = vld [vmem:[#allocation2 + $0x384] sm:$0xf]  ;;  %v3187_v1 = vld [vmem:[#allocation2 + $0x390] sm:$0xf0]  ;;  %v3062_v4 = vor.u32 %v4159_v62, %v3059_v63 }
  0x58   :  { %1754 = vmatpush.bf16.msra.mxu1 %v2966_v43  ;;  %1767 = vmatpush.bf16.msra.mxu2 %v3094_v44  ;;  %v4091_v5 = vld [vmem:[#allocation2 + $0x64] sm:$0xf]  ;;  %v2787_v6 = vld [vmem:[#allocation2 + $0x70] sm:$0xf0]  ;;  %v3190_v8 = vor.u32 %v4191_v0, %v3187_v1 }
  0x59   :  { %1780 = vmatpush.bf16.msra.mxu3 %v3222_v48  ;;  %v4123_v7 = vld [vmem:[#allocation2 + $0x164] sm:$0xf]  ;;  %v2915_v9 = vld [vmem:[#allocation2 + $0x170] sm:$0xf0]  ;;  %v2790_v14 = vor.u32 %v4091_v5, %v2787_v6 }
  0x5a   :  { %v4155_v10 = vld [vmem:[#allocation2 + $0x264] sm:$0xf]  ;;  %v3043_v11 = vld [vmem:[#allocation2 + $0x270] sm:$0xf0]  ;;  %v2918_v15 = vor.u32 %v4123_v7, %v2915_v9 }
  0x5b   :  { %1742 = vmatpush.bf16.msra.mxu0 %v2822_v54  ;;  %v4187_v12 = vld [vmem:[#allocation2 + $0x364] sm:$0xf]  ;;  %v3171_v13 = vld [vmem:[#allocation2 + $0x370] sm:$0xf0]  ;;  %v3046_v16 = vor.u32 %v4155_v10, %v3043_v11 }
  0x5c   :  { %1755 = vmatpush.bf16.msra.mxu1 %v2950_v55  ;;  %1768 = vmatpush.bf16.msra.mxu2 %v3078_v56  ;;  %v4087_v17 = vld [vmem:[#allocation2 + $0x44] sm:$0xf]  ;;  %v2771_v18 = vld [vmem:[#allocation2 + $0x50] sm:$0xf0]  ;;  %v3174_v20 = vor.u32 %v4187_v12, %v3171_v13 }
  0x5d   :  { %1781 = vmatpush.bf16.msra.mxu3 %v3206_v60  ;;  %v4119_v19 = vld [vmem:[#allocation2 + $0x144] sm:$0xf]  ;;  %v2899_v21 = vld [vmem:[#allocation2 + $0x150] sm:$0xf0]  ;;  %v2774_v26 = vor.u32 %v4087_v17, %v2771_v18 }
  0x5e   :  { %v4151_v22 = vld [vmem:[#allocation2 + $0x244] sm:$0xf]  ;;  %v3027_v23 = vld [vmem:[#allocation2 + $0x250] sm:$0xf0]  ;;  %v2902_v27 = vor.u32 %v4119_v19, %v2899_v21 }
  0x5f   :  { %1743 = vmatpush.bf16.msra.mxu0 %v2806_v2  ;;  %v4183_v24 = vld [vmem:[#allocation2 + $0x344] sm:$0xf]  ;;  %v3155_v25 = vld [vmem:[#allocation2 + $0x350] sm:$0xf0]  ;;  %v3030_v28 = vor.u32 %v4151_v22, %v3027_v23 }
  0x60   :  { %1756 = vmatpush.bf16.msra.mxu1 %v2934_v3  ;;  %1769 = vmatpush.bf16.msra.mxu2 %v3062_v4  ;;  %v4083_v29 = vld [vmem:[#allocation2 + $0x24] sm:$0xf]  ;;  %v2755_v30 = vld [vmem:[#allocation2 + $0x30] sm:$0xf0]  ;;  %v3158_v35 = vor.u32 %v4183_v24, %v3155_v25 }
  0x61   :  { %1782 = vmatpush.bf16.msra.mxu3 %v3190_v8  ;;  %v4115_v31 = vld [vmem:[#allocation2 + $0x124] sm:$0xf]  ;;  %v2883_v36 = vld [vmem:[#allocation2 + $0x130] sm:$0xf0]  ;;  %v2758_v46 = vor.u32 %v4083_v29, %v2755_v30 }
  0x62   :  { %v4147_v39 = vld [vmem:[#allocation2 + $0x224] sm:$0xf]  ;;  %v3011_v43 = vld [vmem:[#allocation2 + $0x230] sm:$0xf0]  ;;  %v2886_v49 = vor.u32 %v4115_v31, %v2883_v36 }
  0x63   :  { %1744 = vmatpush.bf16.msra.mxu0 %v2790_v14  ;;  %v4179_v44 = vld [vmem:[#allocation2 + $0x324] sm:$0xf]  ;;  %v3139_v45 = vld [vmem:[#allocation2 + $0x330] sm:$0xf0]  ;;  %v3014_v50 = vor.u32 %v4147_v39, %v3011_v43 }
  0x64   :  { %1757 = vmatpush.bf16.msra.mxu1 %v2918_v15  ;;  %1770 = vmatpush.bf16.msra.mxu2 %v3046_v16  ;;  %v4079_v47 = vld [vmem:[#allocation2 + $0x4] sm:$0xf]  ;;  %v2739_v48 = vld [vmem:[#allocation2 + $0x10] sm:$0xf0]  ;;  %v3142_v54 = vor.u32 %v4179_v44, %v3139_v45 }
  0x65   :  { %1783 = vmatpush.bf16.msra.mxu3 %v3174_v20  ;;  %v4111_v51 = vld [vmem:[#allocation2 + $0x104] sm:$0xf]  ;;  %v2867_v52 = vld [vmem:[#allocation2 + $0x110] sm:$0xf0]  ;;  %v2742_v61 = vor.u32 %v4079_v47, %v2739_v48 }
  0x66   :  { %v4143_v53 = vld [vmem:[#allocation2 + $0x204] sm:$0xf]  ;;  %v2995_v55 = vld [vmem:[#allocation2 + $0x210] sm:$0xf0]  ;;  %v2870_v1 = vor.u32 %v4111_v51, %v2867_v52 }
  0x67   :  { %1745 = vmatpush.bf16.msra.mxu0 %v2774_v26  ;;  %v4175_v56 = vld [vmem:[#allocation2 + $0x304] sm:$0xf]  ;;  %v3123_v57 = vld [vmem:[#allocation2 + $0x310] sm:$0xf0]  ;;  %v2998_v2 = vor.u32 %v4143_v53, %v2995_v55 }
  0x68   :  { %1758 = vmatpush.bf16.msra.mxu1 %v2902_v27  ;;  %1771 = vmatpush.bf16.msra.mxu2 %v3030_v28  ;;  %v4235_v58 = vld [vmem:[#allocation2 + $0x4e4] sm:$0xf]  ;;  %v3363_v59 = vld [vmem:[#allocation2 + $0x4f0] sm:$0xf0]  ;;  %v3126_v5 = vor.u32 %v4175_v56, %v3123_v57 }
  0x69   :  { %1784 = vmatpush.bf16.msra.mxu3 %v3158_v35  ;;  %v4267_v60 = vld [vmem:[#allocation2 + $0x5e4] sm:$0xf]  ;;  %v3491_v62 = vld [vmem:[#allocation2 + $0x5f0] sm:$0xf0]  ;;  %v3366_v6 = vor.u32 %v4235_v58, %v3363_v59 }
  0x6a   :  { %v4299_v63 = vld [vmem:[#allocation2 + $0x6e4] sm:$0xf]  ;;  %v3619_v0 = vld [vmem:[#allocation2 + $0x6f0] sm:$0xf0]  ;;  %v3494_v7 = vor.u32 %v4267_v60, %v3491_v62 }
  0x6b   :  { %1746 = vmatpush.bf16.msra.mxu0 %v2758_v46  ;;  %v4331_v3 = vld [vmem:[#allocation2 + $0x7e4] sm:$0xf]  ;;  %v3747_v4 = vld [vmem:[#allocation2 + $0x7f0] sm:$0xf0]  ;;  %v3622_v8 = vor.u32 %v4299_v63, %v3619_v0 }
  0x6c   :  { %1759 = vmatpush.bf16.msra.mxu1 %v2886_v49  ;;  %1772 = vmatpush.bf16.msra.mxu2 %v3014_v50  ;;  %v4231_v9 = vld [vmem:[#allocation2 + $0x4c4] sm:$0xf]  ;;  %v3347_v10 = vld [vmem:[#allocation2 + $0x4d0] sm:$0xf0]  ;;  %v3750_v12 = vor.u32 %v4331_v3, %v3747_v4 }
  0x6d   :  { %1785 = vmatpush.bf16.msra.mxu3 %v3142_v54  ;;  %v4263_v11 = vld [vmem:[#allocation2 + $0x5c4] sm:$0xf]  ;;  %v3475_v13 = vld [vmem:[#allocation2 + $0x5d0] sm:$0xf0]  ;;  %v3350_v18 = vor.u32 %v4231_v9, %v3347_v10 }
  0x6e   :  { %v4295_v14 = vld [vmem:[#allocation2 + $0x6c4] sm:$0xf]  ;;  %v3603_v15 = vld [vmem:[#allocation2 + $0x6d0] sm:$0xf0]  ;;  %v3478_v19 = vor.u32 %v4263_v11, %v3475_v13 }
  0x6f   :  { %1747 = vmatpush.bf16.msra.mxu0 %v2742_v61  ;;  %v4327_v16 = vld [vmem:[#allocation2 + $0x7c4] sm:$0xf]  ;;  %v3731_v17 = vld [vmem:[#allocation2 + $0x7d0] sm:$0xf0]  ;;  %v3606_v20 = vor.u32 %v4295_v14, %v3603_v15 }
  0x70   :  { %1760 = vmatpush.bf16.msra.mxu1 %v2870_v1  ;;  %1773 = vmatpush.bf16.msra.mxu2 %v2998_v2  ;;  %v4227_v21 = vld [vmem:[#allocation2 + $0x4a4] sm:$0xf]  ;;  %v3331_v22 = vld [vmem:[#allocation2 + $0x4b0] sm:$0xf0]  ;;  %v3734_v24 = vor.u32 %v4327_v16, %v3731_v17 }
  0x71   :  { %1786 = vmatpush.bf16.msra.mxu3 %v3126_v5  ;;  %v4259_v23 = vld [vmem:[#allocation2 + $0x5a4] sm:$0xf]  ;;  %v3459_v25 = vld [vmem:[#allocation2 + $0x5b0] sm:$0xf0]  ;;  %v3334_v30 = vor.u32 %v4227_v21, %v3331_v22 }
  0x72   :  { %v4291_v26 = vld [vmem:[#allocation2 + $0x6a4] sm:$0xf]  ;;  %v3587_v27 = vld [vmem:[#allocation2 + $0x6b0] sm:$0xf0]  ;;  %1748 = vmatmul.bf16.vlgmr.msra.gmra.mxu0 %v4560_v34  ;;  %v3462_v31 = vor.u32 %v4259_v23, %v3459_v25 }
  0x73   :  { %1792 = vmatpush.bf16.msrb.mxu0 %v3366_v6  ;;  %1774 = vmatmul.bf16.vlgmr.msra.gmra.mxu2 %v4558_v33  ;;  %v4323_v28 = vld [vmem:[#allocation2 + $0x7a4] sm:$0xf]  ;;  %v3715_v29 = vld [vmem:[#allocation2 + $0x7b0] sm:$0xf0]  ;;  %v3590_v35 = vor.u32 %v4291_v26, %v3587_v27 }
  0x74   :  { %1805 = vmatpush.bf16.msrb.mxu1 %v3494_v7  ;;  %1818 = vmatpush.bf16.msrb.mxu2 %v3622_v8  ;;  %v4223_v36 = vld [vmem:[#allocation2 + $0x484] sm:$0xf]  ;;  %v3315_v39 = vld [vmem:[#allocation2 + $0x490] sm:$0xf0]  ;;  %v3718_v44 = vor.u32 %v4323_v28, %v3715_v29 }
  0x75   :  { %1831 = vmatpush.bf16.msrb.mxu3 %v3750_v12  ;;  %1761 = vmatmul.bf16.vlgmr.msra.gmra.mxu1 %v4564_v42  ;;  %v4255_v43 = vld [vmem:[#allocation2 + $0x584] sm:$0xf]  ;;  %v3443_v45 = vld [vmem:[#allocation2 + $0x590] sm:$0xf0]  ;;  %v3318_v50 = vor.u32 %v4223_v36, %v3315_v39  ;;  %v2857_v39 = vld [vmem:[#allocation2 + $0xe8] sm:$0xf] }
  0x76   :  { %1787 = vmatmul.bf16.vlgmr.msra.gmra.mxu3 %v4562_v41  ;;  %v4287_v46 = vld [vmem:[#allocation2 + $0x684] sm:$0xf]  ;;  %v3571_v47 = vld [vmem:[#allocation2 + $0x690] sm:$0xf0]  ;;  %v3446_v51 = vor.u32 %v4255_v43, %v3443_v45  ;;  %v4110_v43 = vld [vmem:[#allocation2 + $0xf4] sm:$0xf0] }
  0x77   :  { %1793 = vmatpush.bf16.msrb.mxu0 %v3350_v18  ;;  %v4319_v48 = vld [vmem:[#allocation2 + $0x784] sm:$0xf]  ;;  %v3699_v49 = vld [vmem:[#allocation2 + $0x790] sm:$0xf0]  ;;  %v3574_v52 = vor.u32 %v4287_v46, %v3571_v47  ;;  %v4142_v46 = vld [vmem:[#allocation2 + $0x1f4] sm:$0xf0] }
  0x78   :  { %1806 = vmatpush.bf16.msrb.mxu1 %v3478_v19  ;;  %1819 = vmatpush.bf16.msrb.mxu2 %v3606_v20  ;;  %v4219_v53 = vld [vmem:[#allocation2 + $0x464] sm:$0xf]  ;;  %v3299_v54 = vld [vmem:[#allocation2 + $0x470] sm:$0xf0]  ;;  %v3702_v56 = vor.u32 %v4319_v48, %v3699_v49  ;;  %v3113_v47 = vld [vmem:[#allocation2 + $0x2e8] sm:$0xf] }
  0x79   :  { %1832 = vmatpush.bf16.msrb.mxu3 %v3734_v24  ;;  %v4251_v55 = vld [vmem:[#allocation2 + $0x564] sm:$0xf]  ;;  %v3427_v57 = vld [vmem:[#allocation2 + $0x570] sm:$0xf0]  ;;  %v3302_v62 = vor.u32 %v4219_v53, %v3299_v54  ;;  %v4174_v48 = vld [vmem:[#allocation2 + $0x2f4] sm:$0xf0]  ;;  %v2858_v54 = vor.u32 %v4110_v43, %v2857_v39 }
  0x7a   :  { %v4283_v58 = vld [vmem:[#allocation2 + $0x664] sm:$0xf]  ;;  %v3555_v59 = vld [vmem:[#allocation2 + $0x670] sm:$0xf0]  ;;  %v3430_v63 = vor.u32 %v4251_v55, %v3427_v57  ;;  %v2841_v57 = vld [vmem:[#allocation2 + $0xc8] sm:$0xf] }
  0x7b   :  { %1794 = vmatpush.bf16.msrb.mxu0 %v3334_v30  ;;  %v4315_v60 = vld [vmem:[#allocation2 + $0x764] sm:$0xf]  ;;  %v3683_v61 = vld [vmem:[#allocation2 + $0x770] sm:$0xf0]  ;;  %v3558_v0 = vor.u32 %v4283_v58, %v3555_v59  ;;  %v4106_v58 = vld [vmem:[#allocation2 + $0xd4] sm:$0xf0] }
  0x7c   :  { %1807 = vmatpush.bf16.msrb.mxu1 %v3462_v31  ;;  %1820 = vmatpush.bf16.msrb.mxu2 %v3590_v35  ;;  %v4215_v1 = vld [vmem:[#allocation2 + $0x444] sm:$0xf]  ;;  %v3283_v2 = vld [vmem:[#allocation2 + $0x450] sm:$0xf0]  ;;  %v3686_v4 = vor.u32 %v4315_v60, %v3683_v61  ;;  %v2969_v59 = vld [vmem:[#allocation2 + $0x1c8] sm:$0xf] }
  0x7d   :  { %1833 = vmatpush.bf16.msrb.mxu3 %v3718_v44  ;;  %v4247_v3 = vld [vmem:[#allocation2 + $0x544] sm:$0xf]  ;;  %v3411_v5 = vld [vmem:[#allocation2 + $0x550] sm:$0xf0]  ;;  %v3286_v10 = vor.u32 %v4215_v1, %v3283_v2  ;;  %v2985_v44 = vld [vmem:[#allocation2 + $0x1e8] sm:$0xf]  ;;  %v2842_v2 = vor.u32 %v4106_v58, %v2841_v57 }
  0x7e   :  { %v4279_v6 = vld [vmem:[#allocation2 + $0x644] sm:$0xf]  ;;  %v3539_v7 = vld [vmem:[#allocation2 + $0x650] sm:$0xf0]  ;;  %v3414_v11 = vor.u32 %v4247_v3, %v3411_v5  ;;  %v2986_v55 = vor.u32 %v4142_v46, %v2985_v44  ;;  %v4138_v61 = vld [vmem:[#allocation2 + $0x1d4] sm:$0xf0] }
  0x7f   :  { %1795 = vmatpush.bf16.msrb.mxu0 %v3318_v50  ;;  %v4311_v8 = vld [vmem:[#allocation2 + $0x744] sm:$0xf]  ;;  %v3667_v9 = vld [vmem:[#allocation2 + $0x750] sm:$0xf0]  ;;  %v3542_v12 = vor.u32 %v4279_v6, %v3539_v7  ;;  %v4202_v1 = vld [vmem:[#allocation2 + $0x3d4] sm:$0xf0]  ;;  %v2970_v3 = vor.u32 %v4138_v61, %v2969_v59 }
  0x80   :  { %1808 = vmatpush.bf16.msrb.mxu1 %v3446_v51  ;;  %1821 = vmatpush.bf16.msrb.mxu2 %v3574_v52  ;;  %v4211_v13 = vld [vmem:[#allocation2 + $0x424] sm:$0xf]  ;;  %v3267_v14 = vld [vmem:[#allocation2 + $0x430] sm:$0xf0]  ;;  %v3670_v16 = vor.u32 %v4311_v8, %v3667_v9  ;;  %v3241_v51 = vld [vmem:[#allocation2 + $0x3e8] sm:$0xf] }
  0x81   :  { %1834 = vmatpush.bf16.msrb.mxu3 %v3702_v56  ;;  %v4243_v15 = vld [vmem:[#allocation2 + $0x524] sm:$0xf]  ;;  %v3395_v17 = vld [vmem:[#allocation2 + $0x530] sm:$0xf0]  ;;  %v3270_v22 = vor.u32 %v4211_v13, %v3267_v14  ;;  %v4206_v52 = vld [vmem:[#allocation2 + $0x3f4] sm:$0xf0]  ;;  %v3114_v56 = vor.u32 %v4174_v48, %v3113_v47 }
  0x82   :  { %v4275_v18 = vld [vmem:[#allocation2 + $0x624] sm:$0xf]  ;;  %v3523_v19 = vld [vmem:[#allocation2 + $0x630] sm:$0xf0]  ;;  %v3398_v25 = vor.u32 %v4243_v15, %v3395_v17  ;;  %v3242_v60 = vor.u32 %v4206_v52, %v3241_v51  ;;  %v2825_v5 = vld [vmem:[#allocation2 + $0xa8] sm:$0xf] }
  0x83   :  { %1796 = vmatpush.bf16.msrb.mxu0 %v3302_v62  ;;  %v4307_v20 = vld [vmem:[#allocation2 + $0x724] sm:$0xf]  ;;  %v3651_v21 = vld [vmem:[#allocation2 + $0x730] sm:$0xf0]  ;;  %v3526_v26 = vor.u32 %v4275_v18, %v3523_v19  ;;  %v3097_v62 = vld [vmem:[#allocation2 + $0x2c8] sm:$0xf] }
  0x84   :  { %1809 = vmatpush.bf16.msrb.mxu1 %v3430_v63  ;;  %1822 = vmatpush.bf16.msrb.mxu2 %v3558_v0  ;;  %v4207_v23 = vld [vmem:[#allocation2 + $0x404] sm:$0xf]  ;;  %v3251_v24 = vld [vmem:[#allocation2 + $0x410] sm:$0xf0]  ;;  %v3654_v30 = vor.u32 %v4307_v20, %v3651_v21  ;;  %v4170_v63 = vld [vmem:[#allocation2 + $0x2d4] sm:$0xf0] }
  0x85   :  { %1835 = vmatpush.bf16.msrb.mxu3 %v3686_v4  ;;  %v4239_v27 = vld [vmem:[#allocation2 + $0x504] sm:$0xf]  ;;  %v3379_v28 = vld [vmem:[#allocation2 + $0x510] sm:$0xf0]  ;;  %v3254_v45 = vor.u32 %v4207_v23, %v3251_v24  ;;  %v3225_v0 = vld [vmem:[#allocation2 + $0x3c8] sm:$0xf]  ;;  %v3098_v4 = vor.u32 %v4170_v63, %v3097_v62 }
  0x86   :  { %v4271_v29 = vld [vmem:[#allocation2 + $0x604] sm:$0xf]  ;;  %v3507_v31 = vld [vmem:[#allocation2 + $0x610] sm:$0xf0]  ;;  %v3382_v49 = vor.u32 %v4239_v27, %v3379_v28  ;;  %v4102_v6 = vld [vmem:[#allocation2 + $0xb4] sm:$0xf0]  ;;  %v3226_v8 = vor.u32 %v4202_v1, %v3225_v0 }
  0x87   :  { %1797 = vmatpush.bf16.msrb.mxu0 %v3286_v10  ;;  %v4303_v35 = vld [vmem:[#allocation2 + $0x704] sm:$0xf]  ;;  %v3635_v36 = vld [vmem:[#allocation2 + $0x710] sm:$0xf0]  ;;  %v3510_v50 = vor.u32 %v4271_v29, %v3507_v31  ;;  %v2953_v7 = vld [vmem:[#allocation2 + $0x1a8] sm:$0xf]  ;;  %v2826_v14 = vor.u32 %v4102_v6, %v2825_v5 }
  0x88   :  { %1810 = vmatpush.bf16.msrb.mxu1 %v3414_v11  ;;  %1823 = vmatpush.bf16.msrb.mxu2 %v3542_v12  ;;  %v3638_v53 = vor.u32 %v4303_v35, %v3635_v36  ;;  %v4134_v9 = vld [vmem:[#allocation2 + $0x1b4] sm:$0xf0]  ;;  %v3081_v10 = vld [vmem:[#allocation2 + $0x2a8] sm:$0xf] }
  0x89   :  { %1836 = vmatpush.bf16.msrb.mxu3 %v3670_v16  ;;  %v4166_v11 = vld [vmem:[#allocation2 + $0x2b4] sm:$0xf0]  ;;  %v3209_v12 = vld [vmem:[#allocation2 + $0x3a8] sm:$0xf]  ;;  %v2954_v15 = vor.u32 %v4134_v9, %v2953_v7 }
  0x8a   :  { %v4198_v13 = vld [vmem:[#allocation2 + $0x3b4] sm:$0xf0]  ;;  %v3082_v16 = vor.u32 %v4166_v11, %v3081_v10  ;;  %v2809_v17 = vld [vmem:[#allocation2 + $0x88] sm:$0xf] }
  0x8b   :  { %1798 = vmatpush.bf16.msrb.mxu0 %v3270_v22  ;;  %v4098_v18 = vld [vmem:[#allocation2 + $0x94] sm:$0xf0]  ;;  %v2937_v19 = vld [vmem:[#allocation2 + $0x188] sm:$0xf]  ;;  %v3210_v20 = vor.u32 %v4198_v13, %v3209_v12 }
  0x8c   :  { %1811 = vmatpush.bf16.msrb.mxu1 %v3398_v25  ;;  %1824 = vmatpush.bf16.msrb.mxu2 %v3526_v26  ;;  %v4130_v21 = vld [vmem:[#allocation2 + $0x194] sm:$0xf0]  ;;  %v3065_v22 = vld [vmem:[#allocation2 + $0x288] sm:$0xf]  ;;  %v2810_v26 = vor.u32 %v4098_v18, %v2809_v17 }
  0x8d   :  { %1837 = vmatpush.bf16.msrb.mxu3 %v3654_v30  ;;  %v4162_v23 = vld [vmem:[#allocation2 + $0x294] sm:$0xf0]  ;;  %v3193_v24 = vld [vmem:[#allocation2 + $0x388] sm:$0xf]  ;;  %v2938_v27 = vor.u32 %v4130_v21, %v2937_v19 }
  0x8e   :  { %v4194_v25 = vld [vmem:[#allocation2 + $0x394] sm:$0xf0]  ;;  %v3066_v28 = vor.u32 %v4162_v23, %v3065_v22  ;;  %v2793_v29 = vld [vmem:[#allocation2 + $0x68] sm:$0xf] }
  0x8f   :  { %1799 = vmatpush.bf16.msrb.mxu0 %v3254_v45  ;;  %v4094_v30 = vld [vmem:[#allocation2 + $0x74] sm:$0xf0]  ;;  %v2921_v31 = vld [vmem:[#allocation2 + $0x168] sm:$0xf]  ;;  %v3194_v35 = vor.u32 %v4194_v25, %v3193_v24 }
  0x90   :  { %1812 = vmatpush.bf16.msrb.mxu1 %v3382_v49  ;;  %1825 = vmatpush.bf16.msrb.mxu2 %v3510_v50  ;;  %v4126_v36 = vld [vmem:[#allocation2 + $0x174] sm:$0xf0]  ;;  %v3049_v39 = vld [vmem:[#allocation2 + $0x268] sm:$0xf]  ;;  %v2794_v46 = vor.u32 %v4094_v30, %v2793_v29 }
  0x91   :  { %1838 = vmatpush.bf16.msrb.mxu3 %v3638_v53  ;;  %v4158_v43 = vld [vmem:[#allocation2 + $0x274] sm:$0xf0]  ;;  %v3177_v44 = vld [vmem:[#allocation2 + $0x368] sm:$0xf]  ;;  %v2922_v47 = vor.u32 %v4126_v36, %v2921_v31 }
  0x92   :  { %1800 = vmatmul.bf16.vlgmr.msrb.gmra.mxu0 %v4575_v37  ;;  %v4190_v45 = vld [vmem:[#allocation2 + $0x374] sm:$0xf0]  ;;  %v3050_v48 = vor.u32 %v4158_v43, %v3049_v39  ;;  %v2777_v49 = vld [vmem:[#allocation2 + $0x48] sm:$0xf] }
  0x93   :  { %1844 = vmatpush.bf16.msra.mxu0 %v2858_v54  ;;  %1826 = vmatmul.bf16.vlgmr.msrb.gmra.mxu2 %v4573_v32  ;;  %v4090_v50 = vld [vmem:[#allocation2 + $0x54] sm:$0xf0]  ;;  %v2905_v51 = vld [vmem:[#allocation2 + $0x148] sm:$0xf]  ;;  %v3178_v52 = vor.u32 %v4190_v45, %v3177_v44 }
  0x94   :  { %1857 = vmatpush.bf16.msra.mxu1 %v2986_v55  ;;  %1870 = vmatpush.bf16.msra.mxu2 %v3114_v56  ;;  %v4122_v53 = vld [vmem:[#allocation2 + $0x154] sm:$0xf0]  ;;  %v3033_v54 = vld [vmem:[#allocation2 + $0x248] sm:$0xf]  ;;  %v2778_v58 = vor.u32 %v4090_v50, %v2777_v49 }
  0x95   :  { %1883 = vmatpush.bf16.msra.mxu3 %v3242_v60  ;;  %1813 = vmatmul.bf16.vlgmr.msrb.gmra.mxu1 %v4579_v40  ;;  %v4154_v55 = vld [vmem:[#allocation2 + $0x254] sm:$0xf0]  ;;  %v3161_v56 = vld [vmem:[#allocation2 + $0x348] sm:$0xf]  ;;  %v2906_v59 = vor.u32 %v4122_v53, %v2905_v51 }
  0x96   :  { %1839 = vmatmul.bf16.vlgmr.msrb.gmra.mxu3 %v4577_v38  ;;  %v4186_v57 = vld [vmem:[#allocation2 + $0x354] sm:$0xf0]  ;;  %v3034_v60 = vor.u32 %v4154_v55, %v3033_v54  ;;  %v2761_v61 = vld [vmem:[#allocation2 + $0x28] sm:$0xf] }
  0x97   :  { %1845 = vmatpush.bf16.msra.mxu0 %v2842_v2  ;;  %v4086_v62 = vld [vmem:[#allocation2 + $0x34] sm:$0xf0]  ;;  %v2889_v63 = vld [vmem:[#allocation2 + $0x128] sm:$0xf]  ;;  %v3162_v0 = vor.u32 %v4186_v57, %v3161_v56 }
  0x98   :  { %1858 = vmatpush.bf16.msra.mxu1 %v2970_v3  ;;  %1871 = vmatpush.bf16.msra.mxu2 %v3098_v4  ;;  %v4118_v1 = vld [vmem:[#allocation2 + $0x134] sm:$0xf0]  ;;  %v3017_v2 = vld [vmem:[#allocation2 + $0x228] sm:$0xf]  ;;  %v2762_v6 = vor.u32 %v4086_v62, %v2761_v61 }
  0x99   :  { %1884 = vmatpush.bf16.msra.mxu3 %v3226_v8  ;;  %v4150_v3 = vld [vmem:[#allocation2 + $0x234] sm:$0xf0]  ;;  %v3145_v4 = vld [vmem:[#allocation2 + $0x328] sm:$0xf]  ;;  %v2890_v9 = vor.u32 %v4118_v1, %v2889_v63 }
  0x9a   :  { %v4182_v5 = vld [vmem:[#allocation2 + $0x334] sm:$0xf0]  ;;  %v2745_v7 = vld [vmem:[#allocation2 + $0x8] sm:$0xf]  ;;  %v3018_v10 = vor.u32 %v4150_v3, %v3017_v2 }
  0x9b   :  { %1846 = vmatpush.bf16.msra.mxu0 %v2826_v14  ;;  %v4082_v8 = vld [vmem:[#allocation2 + $0x14] sm:$0xf0]  ;;  %v2873_v11 = vld [vmem:[#allocation2 + $0x108] sm:$0xf]  ;;  %v3146_v14 = vor.u32 %v4182_v5, %v3145_v4 }
  0x9c   :  { %1859 = vmatpush.bf16.msra.mxu1 %v2954_v15  ;;  %1872 = vmatpush.bf16.msra.mxu2 %v3082_v16  ;;  %v4114_v12 = vld [vmem:[#allocation2 + $0x114] sm:$0xf0]  ;;  %v3001_v13 = vld [vmem:[#allocation2 + $0x208] sm:$0xf]  ;;  %v2746_v21 = vor.u32 %v4082_v8, %v2745_v7 }
  0x9d   :  { %1885 = vmatpush.bf16.msra.mxu3 %v3210_v20  ;;  %v4146_v15 = vld [vmem:[#allocation2 + $0x214] sm:$0xf0]  ;;  %v3129_v16 = vld [vmem:[#allocation2 + $0x308] sm:$0xf]  ;;  %v2874_v25 = vor.u32 %v4114_v12, %v2873_v11 }
  0x9e   :  { %v4178_v17 = vld [vmem:[#allocation2 + $0x314] sm:$0xf0]  ;;  %v3369_v18 = vld [vmem:[#allocation2 + $0x4e8] sm:$0xf] }
  0x9f   :  { %1847 = vmatpush.bf16.msra.mxu0 %v2810_v26  ;;  %v4238_v19 = vld [vmem:[#allocation2 + $0x4f4] sm:$0xf0]  ;;  %v3497_v20 = vld [vmem:[#allocation2 + $0x5e8] sm:$0xf]  ;;  %v3002_v26 = vor.u32 %v4146_v15, %v3001_v13  ;;  %v3130_v29 = vor.u32 %v4178_v17, %v3129_v16 }
  0xa0   :  { %1860 = vmatpush.bf16.msra.mxu1 %v2938_v27  ;;  %1873 = vmatpush.bf16.msra.mxu2 %v3066_v28  ;;  %v4270_v22 = vld [vmem:[#allocation2 + $0x5f4] sm:$0xf0]  ;;  %v3625_v23 = vld [vmem:[#allocation2 + $0x6e8] sm:$0xf]  ;;  %v3370_v30 = vor.u32 %v4238_v19, %v3369_v18 }
  0xa1   :  { %1886 = vmatpush.bf16.msra.mxu3 %v3194_v35  ;;  %v4302_v24 = vld [vmem:[#allocation2 + $0x6f4] sm:$0xf0]  ;;  %v3753_v27 = vld [vmem:[#allocation2 + $0x7e8] sm:$0xf]  ;;  %v3498_v31 = vor.u32 %v4270_v22, %v3497_v20 }
  0xa2   :  { %v4334_v28 = vld [vmem:[#allocation2 + $0x7f4] sm:$0xf0]  ;;  %v3626_v35 = vor.u32 %v4302_v24, %v3625_v23  ;;  %v3353_v36 = vld [vmem:[#allocation2 + $0x4c8] sm:$0xf] }
  0xa3   :  { %1848 = vmatpush.bf16.msra.mxu0 %v2794_v46  ;;  %v4234_v39 = vld [vmem:[#allocation2 + $0x4d4] sm:$0xf0]  ;;  %v3481_v43 = vld [vmem:[#allocation2 + $0x5c8] sm:$0xf]  ;;  %v3754_v44 = vor.u32 %v4334_v28, %v3753_v27 }
  0xa4   :  { %1861 = vmatpush.bf16.msra.mxu1 %v2922_v47  ;;  %1874 = vmatpush.bf16.msra.mxu2 %v3050_v48  ;;  %v4266_v45 = vld [vmem:[#allocation2 + $0x5d4] sm:$0xf0]  ;;  %v3609_v46 = vld [vmem:[#allocation2 + $0x6c8] sm:$0xf]  ;;  %v3354_v50 = vor.u32 %v4234_v39, %v3353_v36 }
  0xa5   :  { %1887 = vmatpush.bf16.msra.mxu3 %v3178_v52  ;;  %v4298_v47 = vld [vmem:[#allocation2 + $0x6d4] sm:$0xf0]  ;;  %v3737_v48 = vld [vmem:[#allocation2 + $0x7c8] sm:$0xf]  ;;  %v3482_v51 = vor.u32 %v4266_v45, %v3481_v43 }
  0xa6   :  { %v4330_v49 = vld [vmem:[#allocation2 + $0x7d4] sm:$0xf0]  ;;  %v3610_v52 = vor.u32 %v4298_v47, %v3609_v46  ;;  %v3337_v53 = vld [vmem:[#allocation2 + $0x4a8] sm:$0xf] }
  0xa7   :  { %1849 = vmatpush.bf16.msra.mxu0 %v2778_v58  ;;  %v4230_v54 = vld [vmem:[#allocation2 + $0x4b4] sm:$0xf0]  ;;  %v3465_v55 = vld [vmem:[#allocation2 + $0x5a8] sm:$0xf]  ;;  %v3738_v56 = vor.u32 %v4330_v49, %v3737_v48 }
  0xa8   :  { %1862 = vmatpush.bf16.msra.mxu1 %v2906_v59  ;;  %1875 = vmatpush.bf16.msra.mxu2 %v3034_v60  ;;  %v4262_v57 = vld [vmem:[#allocation2 + $0x5b4] sm:$0xf0]  ;;  %v3593_v58 = vld [vmem:[#allocation2 + $0x6a8] sm:$0xf]  ;;  %v3338_v62 = vor.u32 %v4230_v54, %v3337_v53 }
  0xa9   :  { %1888 = vmatpush.bf16.msra.mxu3 %v3162_v0  ;;  %v4294_v59 = vld [vmem:[#allocation2 + $0x6b4] sm:$0xf0]  ;;  %v3721_v60 = vld [vmem:[#allocation2 + $0x7a8] sm:$0xf]  ;;  %v3466_v63 = vor.u32 %v4262_v57, %v3465_v55 }
  0xaa   :  { %v4326_v61 = vld [vmem:[#allocation2 + $0x7b4] sm:$0xf0]  ;;  %v3594_v0 = vor.u32 %v4294_v59, %v3593_v58  ;;  %v3321_v1 = vld [vmem:[#allocation2 + $0x488] sm:$0xf] }
  0xab   :  { %1850 = vmatpush.bf16.msra.mxu0 %v2762_v6  ;;  %v4226_v2 = vld [vmem:[#allocation2 + $0x494] sm:$0xf0]  ;;  %v3449_v3 = vld [vmem:[#allocation2 + $0x588] sm:$0xf]  ;;  %v3722_v4 = vor.u32 %v4326_v61, %v3721_v60 }
  0xac   :  { %1863 = vmatpush.bf16.msra.mxu1 %v2890_v9  ;;  %1876 = vmatpush.bf16.msra.mxu2 %v3018_v10  ;;  %v4258_v5 = vld [vmem:[#allocation2 + $0x594] sm:$0xf0]  ;;  %v3577_v6 = vld [vmem:[#allocation2 + $0x688] sm:$0xf]  ;;  %v3322_v10 = vor.u32 %v4226_v2, %v3321_v1 }
  0xad   :  { %1889 = vmatpush.bf16.msra.mxu3 %v3146_v14  ;;  %v4290_v7 = vld [vmem:[#allocation2 + $0x694] sm:$0xf0]  ;;  %v3705_v8 = vld [vmem:[#allocation2 + $0x788] sm:$0xf]  ;;  %v3450_v11 = vor.u32 %v4258_v5, %v3449_v3 }
  0xae   :  { %v4322_v9 = vld [vmem:[#allocation2 + $0x794] sm:$0xf0]  ;;  %v3578_v12 = vor.u32 %v4290_v7, %v3577_v6  ;;  %v3305_v13 = vld [vmem:[#allocation2 + $0x468] sm:$0xf]  ;;  %v4108_v6 = vld [vmem:[#allocation2 + $0xec] sm:$0xf] }
  0xaf   :  { %1851 = vmatpush.bf16.msra.mxu0 %v2746_v21  ;;  %v4222_v14 = vld [vmem:[#allocation2 + $0x474] sm:$0xf0]  ;;  %v3433_v15 = vld [vmem:[#allocation2 + $0x568] sm:$0xf]  ;;  %v3706_v16 = vor.u32 %v4322_v9, %v3705_v8  ;;  %v2859_v7 = vld [vmem:[#allocation2 + $0xf8] sm:$0xf0] }
  0xb0   :  { %1864 = vmatpush.bf16.msra.mxu1 %v2874_v25  ;;  %1877 = vmatpush.bf16.msra.mxu2 %v3002_v26  ;;  %v4254_v17 = vld [vmem:[#allocation2 + $0x574] sm:$0xf0]  ;;  %v3561_v18 = vld [vmem:[#allocation2 + $0x668] sm:$0xf]  ;;  %v3306_v22 = vor.u32 %v4222_v14, %v3305_v13  ;;  %v4140_v8 = vld [vmem:[#allocation2 + $0x1ec] sm:$0xf] }
  0xb1   :  { %1890 = vmatpush.bf16.msra.mxu3 %v3130_v29  ;;  %v4286_v19 = vld [vmem:[#allocation2 + $0x674] sm:$0xf0]  ;;  %v3689_v20 = vld [vmem:[#allocation2 + $0x768] sm:$0xf]  ;;  %v3434_v24 = vor.u32 %v4254_v17, %v3433_v15  ;;  %v3115_v13 = vld [vmem:[#allocation2 + $0x2f8] sm:$0xf0] }
  0xb2   :  { %1852 = vmatmul.bf16.vlgmr.msra.gmra.mxu0 %v4560_v34  ;;  %v4318_v21 = vld [vmem:[#allocation2 + $0x774] sm:$0xf0]  ;;  %v3289_v23 = vld [vmem:[#allocation2 + $0x448] sm:$0xf]  ;;  %v3562_v25 = vor.u32 %v4286_v19, %v3561_v18  ;;  %v4204_v17 = vld [vmem:[#allocation2 + $0x3ec] sm:$0xf] }
  0xb3   :  { %1896 = vmatpush.bf16.msrb.mxu0 %v3370_v30  ;;  %1878 = vmatmul.bf16.vlgmr.msra.gmra.mxu2 %v4558_v33  ;;  %v4218_v26 = vld [vmem:[#allocation2 + $0x454] sm:$0xf0]  ;;  %v3417_v27 = vld [vmem:[#allocation2 + $0x548] sm:$0xf]  ;;  %v3690_v29 = vor.u32 %v4318_v21, %v3689_v20  ;;  %v3243_v18 = vld [vmem:[#allocation2 + $0x3f8] sm:$0xf0]  ;;  %v2862_v20 = vor.u32 %v4108_v6, %v2859_v7 }
  0xb4   :  { %1909 = vmatpush.bf16.msrb.mxu1 %v3498_v31  ;;  %1922 = vmatpush.bf16.msrb.mxu2 %v3626_v35  ;;  %v4250_v28 = vld [vmem:[#allocation2 + $0x554] sm:$0xf0]  ;;  %v3545_v30 = vld [vmem:[#allocation2 + $0x648] sm:$0xf]  ;;  %v3290_v43 = vor.u32 %v4218_v26, %v3289_v23  ;;  %v4136_v26 = vld [vmem:[#allocation2 + $0x1cc] sm:$0xf] }
  0xb5   :  { %1935 = vmatpush.bf16.msrb.mxu3 %v3754_v44  ;;  %1865 = vmatmul.bf16.vlgmr.msra.gmra.mxu1 %v4564_v42  ;;  %v4282_v31 = vld [vmem:[#allocation2 + $0x654] sm:$0xf0]  ;;  %v3673_v36 = vld [vmem:[#allocation2 + $0x748] sm:$0xf]  ;;  %v3418_v45 = vor.u32 %v4250_v28, %v3417_v27  ;;  %v3067_v6 = vld [vmem:[#allocation2 + $0x298] sm:$0xf0] }
  0xb6   :  { %1891 = vmatmul.bf16.vlgmr.msra.gmra.mxu3 %v4562_v41  ;;  %v4600_v35 = vld [vmem:[%s4708_s2] sm:$0xf]  ;;  %v3273_v44 = vld [vmem:[#allocation2 + $0x428] sm:$0xf]  ;;  %v3546_v46 = vor.u32 %v4282_v31, %v3545_v30  ;;  %v2971_v30 = vld [vmem:[#allocation2 + $0x1d8] sm:$0xf0] }
  0xb7   :  { %1897 = vmatpush.bf16.msrb.mxu0 %v3354_v50  ;;  %v4314_v39 = vld [vmem:[#allocation2 + $0x754] sm:$0xf0]  ;;  %v3401_v48 = vld [vmem:[#allocation2 + $0x528] sm:$0xf]  ;;  %v348_v49 = vperm.slane %v4600_v35, 0 }
  0xb8   :  { %1910 = vmatpush.bf16.msrb.mxu1 %v3482_v51  ;;  %1923 = vmatpush.bf16.msrb.mxu2 %v3610_v52  ;;  %v4214_v47 = vld [vmem:[#allocation2 + $0x434] sm:$0xf0]  ;;  %v3674_v50 = vor.u32 %v4314_v39, %v3673_v36  ;;  %v3529_v52 = vld [vmem:[#allocation2 + $0x628] sm:$0xf]  ;;  %v4168_v31 = vld [vmem:[#allocation2 + $0x2cc] sm:$0xf] }
  0xb9   :  { %1936 = vmatpush.bf16.msrb.mxu3 %v3738_v56  ;;  %v4246_v51 = vld [vmem:[#allocation2 + $0x534] sm:$0xf0]  ;;  %v3657_v54 = vld [vmem:[#allocation2 + $0x728] sm:$0xf]  ;;  %v3274_v56 = vor.u32 %v4214_v47, %v3273_v44  ;;  %v3099_v36 = vld [vmem:[#allocation2 + $0x2d8] sm:$0xf0]  ;;  %v2974_v47 = vor.u32 %v4136_v26, %v2971_v30 }
  0xba   :  { %v4278_v53 = vld [vmem:[#allocation2 + $0x634] sm:$0xf0]  ;;  %v3257_v57 = vld [vmem:[#allocation2 + $0x408] sm:$0xf]  ;;  %v3402_v60 = vor.u32 %v4246_v51, %v3401_v48  ;;  %v3227_v44 = vld [vmem:[#allocation2 + $0x3d8] sm:$0xf0]  ;;  %v3102_v48 = vor.u32 %v4168_v31, %v3099_v36 }
  0xbb   :  { %1898 = vmatpush.bf16.msrb.mxu0 %v3338_v62  ;;  %v4310_v55 = vld [vmem:[#allocation2 + $0x734] sm:$0xf0]  ;;  %v3530_v61 = vor.u32 %v4278_v53, %v3529_v52  ;;  %v3385_v62 = vld [vmem:[#allocation2 + $0x508] sm:$0xf]  ;;  %v4132_v51 = vld [vmem:[#allocation2 + $0x1ac] sm:$0xf] }
  0xbc   :  { %1911 = vmatpush.bf16.msrb.mxu1 %v3466_v63  ;;  %1924 = vmatpush.bf16.msrb.mxu2 %v3594_v0  ;;  %v4210_v58 = vld [vmem:[#allocation2 + $0x414] sm:$0xf0]  ;;  %v3513_v0 = vld [vmem:[#allocation2 + $0x608] sm:$0xf]  ;;  %v3658_v2 = vor.u32 %v4310_v55, %v3657_v54  ;;  %v2955_v54 = vld [vmem:[#allocation2 + $0x1b8] sm:$0xf0] }
  0xbd   :  { %1937 = vmatpush.bf16.msrb.mxu3 %v3722_v4  ;;  %v4242_v63 = vld [vmem:[#allocation2 + $0x514] sm:$0xf0]  ;;  %v3641_v4 = vld [vmem:[#allocation2 + $0x708] sm:$0xf]  ;;  %v4164_v55 = vld [vmem:[#allocation2 + $0x2ac] sm:$0xf] }
  0xbe   :  { %v4274_v3 = vld [vmem:[#allocation2 + $0x614] sm:$0xf0]  ;;  %v3386_v15 = vor.u32 %v4242_v63, %v3385_v62  ;;  %v4096_v63 = vld [vmem:[#allocation2 + $0x8c] sm:$0xf] }
  0xbf   :  { %1899 = vmatpush.bf16.msrb.mxu0 %v3322_v10  ;;  %v4306_v5 = vld [vmem:[#allocation2 + $0x714] sm:$0xf0]  ;;  %v3258_v10 = vor.u32 %v4210_v58, %v3257_v57  ;;  %v4196_v57 = vld [vmem:[#allocation2 + $0x3ac] sm:$0xf]  ;;  %v3211_v58 = vld [vmem:[#allocation2 + $0x3b8] sm:$0xf0] }
  0xc0   :  { %1912 = vmatpush.bf16.msrb.mxu1 %v3450_v11  ;;  %1925 = vmatpush.bf16.msrb.mxu2 %v3578_v12  ;;  %v2987_v11 = vld [vmem:[#allocation2 + $0x1f8] sm:$0xf0]  ;;  %v4172_v12 = vld [vmem:[#allocation2 + $0x2ec] sm:$0xf]  ;;  %v3642_v19 = vor.u32 %v4306_v5, %v3641_v4 }
  0xc1   :  { %1938 = vmatpush.bf16.msrb.mxu3 %v3706_v16  ;;  %v3514_v16 = vor.u32 %v4274_v3, %v3513_v0  ;;  %v3118_v23 = vor.u32 %v4172_v12, %v3115_v13  ;;  %v2811_v0 = vld [vmem:[#allocation2 + $0x98] sm:$0xf0]  ;;  %v3214_v3 = vor.u32 %v4196_v57, %v3211_v58  ;;  %v4160_v5 = vld [vmem:[#allocation2 + $0x28c] sm:$0xf] }
  0xc2   :  { %v1645_v59 = vpop.f32.mrf.mxu0  ;;  %v2939_v4 = vld [vmem:[#allocation2 + $0x198] sm:$0xf0]  ;;  %v4192_v7 = vld [vmem:[#allocation2 + $0x38c] sm:$0xf]  ;;  %v3070_v12 = vor.u32 %v4160_v5, %v3067_v6 }
  0xc3   :  { %1900 = vmatpush.bf16.msrb.mxu0 %v3306_v22  ;;  %v1646_v1 = vadd.f32 %v1645_v59, %v348_v49  ;;  %v1658_v9 = vpop.f32.mrf.mxu1  ;;  %v2990_v22 = vor.u32 %v4140_v8, %v2987_v11  ;;  %v4100_v49 = vld [vmem:[#allocation2 + $0xac] sm:$0xf]  ;;  %v3195_v8 = vld [vmem:[#allocation2 + $0x398] sm:$0xf0] }
  0xc4   :  { %1913 = vmatpush.bf16.msrb.mxu1 %v3434_v24  ;;  %1926 = vmatpush.bf16.msrb.mxu2 %v3562_v25  ;;  %v4104_v24 = vld [vmem:[#allocation2 + $0xcc] sm:$0xf]  ;;  %v2843_v25 = vld [vmem:[#allocation2 + $0xd8] sm:$0xf0] }
  0xc5   :  { %1939 = vmatpush.bf16.msrb.mxu3 %v3690_v29  ;;  %v1659_v14 = vadd.f32 %v1658_v9, %v1646_v1  ;;  %v3246_v29 = vor.u32 %v4204_v17, %v3243_v18  ;;  %v4128_v1 = vld [vmem:[#allocation2 + $0x18c] sm:$0xf]  ;;  %v2814_v9 = vor.u32 %v4096_v63, %v2811_v0  ;;  %v3198_v18 = vor.u32 %v4192_v7, %v3195_v8  ;;  %v3147_v63 = vld [vmem:[#allocation2 + $0x338] sm:$0xf0] }
  0xc6   :  { %v2942_v11 = vor.u32 %v4128_v1, %v2939_v4  ;;  %v4092_v13 = vld [vmem:[#allocation2 + $0x6c] sm:$0xf]  ;;  %v2875_v6 = vld [vmem:[#allocation2 + $0x118] sm:$0xf0] }
  0xc7   :  { %1901 = vmatpush.bf16.msrb.mxu0 %v3290_v43  ;;  %v1671_v21 = vpop.f32.mrf.mxu2  ;;  %v4200_v43 = vld [vmem:[#allocation2 + $0x3cc] sm:$0xf] }
  0xc8   :  { %1914 = vmatpush.bf16.msrb.mxu1 %v3418_v45  ;;  %1927 = vmatpush.bf16.msrb.mxu2 %v3546_v46  ;;  %v1672_v27 = vadd.f32 %v1671_v21, %v1659_v14  ;;  %v1684_v28 = vpop.f32.mrf.mxu3  ;;  %v2846_v46 = vor.u32 %v4104_v24, %v2843_v25  ;;  %v3230_v53 = vor.u32 %v4200_v43, %v3227_v44  ;;  %v2795_v14 = vld [vmem:[#allocation2 + $0x78] sm:$0xf0]  ;;  %v4120_v30 = vld [vmem:[#allocation2 + $0x14c] sm:$0xf] }
  0xc9   :  { %1940 = vmatpush.bf16.msrb.mxu3 %v3674_v50  ;;  %v2827_v50 = vld [vmem:[#allocation2 + $0xb8] sm:$0xf0]  ;;  %v2798_v25 = vor.u32 %v4092_v13, %v2795_v14  ;;  %v4152_v43 = vld [vmem:[#allocation2 + $0x24c] sm:$0xf] }
  0xca   :  { %v1647_v39 = vpop.f32.mrf.mxu0  ;;  %v1685_v45 = vadd.f32 %v1684_v28, %v1672_v27  ;;  %v2830_v59 = vor.u32 %v4100_v49, %v2827_v50  ;;  %v3051_v21 = vld [vmem:[#allocation2 + $0x278] sm:$0xf0]  ;;  %v4088_v28 = vld [vmem:[#allocation2 + $0x4c] sm:$0xf] }
  0xcb   :  { %1902 = vmatpush.bf16.msrb.mxu0 %v3274_v56  ;;  %v1660_v52 = vpop.f32.mrf.mxu1  ;;  %v3083_v56 = vld [vmem:[#allocation2 + $0x2b8] sm:$0xf0]  ;;  %v4080_v1 = vld [vmem:[#allocation2 + $0xc] sm:$0xf] }
  0xcc   :  { %1915 = vmatpush.bf16.msrb.mxu1 %v3402_v60  ;;  %1928 = vmatpush.bf16.msrb.mxu2 %v3530_v61  ;;  %v2958_v61 = vor.u32 %v4132_v51, %v2955_v54  ;;  %v3086_v62 = vor.u32 %v4164_v55, %v3083_v56  ;;  %v2907_v39 = vld [vmem:[#allocation2 + $0x158] sm:$0xf0]  ;;  %v4084_v54 = vld [vmem:[#allocation2 + $0x2c] sm:$0xf] }
  0xcd   :  { %1941 = vmatpush.bf16.msrb.mxu3 %v3658_v2  ;;  %v3035_v44 = vld [vmem:[#allocation2 + $0x258] sm:$0xf0]  ;;  %v2910_v52 = vor.u32 %v4120_v30, %v2907_v39  ;;  %v4116_v56 = vld [vmem:[#allocation2 + $0x12c] sm:$0xf] }
  0xce   :  { %v2763_v55 = vld [vmem:[#allocation2 + $0x38] sm:$0xf0]  ;;  %v4112_v5 = vld [vmem:[#allocation2 + $0x10c] sm:$0xf] }
  0xcf   :  { %1903 = vmatpush.bf16.msrb.mxu0 %v3258_v10  ;;  %v1673_v60 = vpop.f32.mrf.mxu2  ;;  %v2766_v0 = vor.u32 %v4084_v54, %v2763_v55  ;;  %v4144_v7 = vld [vmem:[#allocation2 + $0x20c] sm:$0xf]  ;;  %v3355_v30 = vld [vmem:[#allocation2 + $0x4d8] sm:$0xf0] }
  0xd0   :  { %1916 = vmatpush.bf16.msrb.mxu1 %v3386_v15  ;;  %1929 = vmatpush.bf16.msrb.mxu2 %v3514_v16  ;;  %v1686_v2 = vpop.f32.mrf.mxu3  ;;  %v4124_v15 = vld [vmem:[#allocation2 + $0x16c] sm:$0xf]  ;;  %v3483_v39 = vld [vmem:[#allocation2 + $0x5d8] sm:$0xf0] }
  0xd1   :  { %1942 = vmatpush.bf16.msrb.mxu3 %v3642_v19  ;;  %v2923_v19 = vld [vmem:[#allocation2 + $0x178] sm:$0xf0]  ;;  %v4148_v60 = vld [vmem:[#allocation2 + $0x22c] sm:$0xf] }
  0xd2   :  { %1904 = vmatmul.bf16.vlgmr.msrb.gmra.mxu0 %v4575_v37  ;;  %v2926_v26 = vor.u32 %v4124_v15, %v2923_v19  ;;  %v2747_v2 = vld [vmem:[#allocation2 + $0x18] sm:$0xf0]  ;;  %v4236_v14 = vld [vmem:[#allocation2 + $0x4ec] sm:$0xf] }
  0xd3   :  { %1948 = vmatpush.bf16.msra.mxu0 %v2862_v20  ;;  %1930 = vmatmul.bf16.vlgmr.msrb.gmra.mxu2 %v4573_v32  ;;  %v1697_v10 = vpop.f32.mrf.mxu0  ;;  %v4156_v20 = vld [vmem:[#allocation2 + $0x26c] sm:$0xf]  ;;  %v3371_v15 = vld [vmem:[#allocation2 + $0x4f8] sm:$0xf0] }
  0xd4   :  { %1961 = vmatpush.bf16.msra.mxu1 %v2990_v22  ;;  %1974 = vmatpush.bf16.msra.mxu2 %v3118_v23  ;;  %v1698_v16 = vadd.f32 %v1697_v10, %v1685_v45  ;;  %v1710_v17 = vpop.f32.mrf.mxu1  ;;  %v4188_v22 = vld [vmem:[#allocation2 + $0x36c] sm:$0xf]  ;;  %v3179_v23 = vld [vmem:[#allocation2 + $0x378] sm:$0xf0]  ;;  %v3054_v27 = vor.u32 %v4156_v20, %v3051_v21  ;;  %v2878_v21 = vor.u32 %v4112_v5, %v2875_v6 }
  0xd5   :  { %1987 = vmatpush.bf16.msra.mxu3 %v3246_v29  ;;  %1917 = vmatmul.bf16.vlgmr.msrb.gmra.mxu1 %v4579_v40  ;;  %v2779_v29 = vld [vmem:[#allocation2 + $0x58] sm:$0xf0]  ;;  %v3182_v36 = vor.u32 %v4188_v22, %v3179_v23  ;;  %v4300_v19 = vld [vmem:[#allocation2 + $0x6ec] sm:$0xf] }
  0xd6   :  { %1943 = vmatmul.bf16.vlgmr.msrb.gmra.mxu3 %v4577_v38  ;;  %v1711_v24 = vadd.f32 %v1710_v17, %v1698_v16  ;;  %v2782_v49 = vor.u32 %v4088_v28, %v2779_v29  ;;  %v3003_v10 = vld [vmem:[#allocation2 + $0x218] sm:$0xf0]  ;;  %v4268_v16 = vld [vmem:[#allocation2 + $0x5ec] sm:$0xf]  ;;  %v2750_v17 = vor.u32 %v4080_v1, %v2747_v2 }
  0xd7   :  { %1949 = vmatpush.bf16.msra.mxu0 %v2846_v46  ;;  %v3627_v20 = vld [vmem:[#allocation2 + $0x6f8] sm:$0xf0]  ;;  %v3006_v22 = vor.u32 %v4144_v7, %v3003_v10  ;;  %v4332_v23 = vld [vmem:[#allocation2 + $0x7ec] sm:$0xf] }
  0xd8   :  { %1962 = vmatpush.bf16.msra.mxu1 %v2974_v47  ;;  %1975 = vmatpush.bf16.msra.mxu2 %v3102_v48  ;;  %v1723_v31 = vpop.f32.mrf.mxu2  ;;  %v4184_v47 = vld [vmem:[#allocation2 + $0x34c] sm:$0xf]  ;;  %v3163_v48 = vld [vmem:[#allocation2 + $0x358] sm:$0xf0]  ;;  %v3630_v28 = vor.u32 %v4300_v19, %v3627_v20 }
  0xd9   :  { %1988 = vmatpush.bf16.msra.mxu3 %v3230_v53  ;;  %v1724_v45 = vadd.f32 %v1723_v31, %v1711_v24  ;;  %v1736_v46 = vpop.f32.mrf.mxu3  ;;  %v3038_v53 = vor.u32 %v4152_v43, %v3035_v44  ;;  %v3166_v58 = vor.u32 %v4184_v47, %v3163_v48  ;;  %v3755_v24 = vld [vmem:[#allocation2 + $0x7f8] sm:$0xf0]  ;;  %v4232_v29 = vld [vmem:[#allocation2 + $0x4cc] sm:$0xf] }
  0xda   :  { %v4264_v31 = vld [vmem:[#allocation2 + $0x5cc] sm:$0xf]  ;;  %v3611_v44 = vld [vmem:[#allocation2 + $0x6d8] sm:$0xf0]  ;;  %v3358_v47 = vor.u32 %v4232_v29, %v3355_v30 }
  0xdb   :  { %1950 = vmatpush.bf16.msra.mxu0 %v2830_v59  ;;  %v4607_v50 = vadd.f32 %v1736_v46, %v1724_v45  ;;  %v1699_v51 = vpop.f32.mrf.mxu0  ;;  %v2891_v59 = vld [vmem:[#allocation2 + $0x138] sm:$0xf0]  ;;  %v4296_v43 = vld [vmem:[#allocation2 + $0x6cc] sm:$0xf]  ;;  %v3486_v48 = vor.u32 %v4264_v31, %v3483_v39 }
  0xdc   :  { %1963 = vmatpush.bf16.msra.mxu1 %v2958_v61  ;;  %1976 = vmatpush.bf16.msra.mxu2 %v3086_v62  ;;  %v1712_v57 = vpop.f32.mrf.mxu1  ;;  %v3019_v61 = vld [vmem:[#allocation2 + $0x238] sm:$0xf0]  ;;  %v4180_v62 = vld [vmem:[#allocation2 + $0x32c] sm:$0xf] }
  0xdd   :  { %1989 = vmatpush.bf16.msra.mxu3 %v3214_v3  ;;  %v2894_v3 = vor.u32 %v4116_v56, %v2891_v59  ;;  %v3022_v4 = vor.u32 %v4148_v60, %v3019_v61  ;;  %v4328_v45 = vld [vmem:[#allocation2 + $0x7cc] sm:$0xf]  ;;  %v3739_v46 = vld [vmem:[#allocation2 + $0x7d8] sm:$0xf0] }
  0xde   :  { %v4228_v51 = vld [vmem:[#allocation2 + $0x4ac] sm:$0xf]  ;;  %v3742_v54 = vor.u32 %v4328_v45, %v3739_v46  ;;  %v3467_v55 = vld [vmem:[#allocation2 + $0x5b8] sm:$0xf0] }
  0xdf   :  { %1951 = vmatpush.bf16.msra.mxu0 %v2814_v9  ;;  %v3150_v9 = vor.u32 %v4180_v62, %v3147_v63  ;;  %v4292_v56 = vld [vmem:[#allocation2 + $0x6ac] sm:$0xf]  ;;  %v3595_v57 = vld [vmem:[#allocation2 + $0x6b8] sm:$0xf0] }
  0xe0   :  { %1964 = vmatpush.bf16.msra.mxu1 %v2942_v11  ;;  %1977 = vmatpush.bf16.msra.mxu2 %v3070_v12  ;;  %v1725_v8 = vpop.f32.mrf.mxu2  ;;  %v4176_v11 = vld [vmem:[#allocation2 + $0x30c] sm:$0xf]  ;;  %v3131_v12 = vld [vmem:[#allocation2 + $0x318] sm:$0xf0]  ;;  %v3598_v62 = vor.u32 %v4292_v56, %v3595_v57  ;;  %v349_v56 = vperm.slane %v4600_v35, 1 }
  0xe1   :  { %1990 = vmatpush.bf16.msra.mxu3 %v3198_v18  ;;  %v1738_v13 = vpop.f32.mrf.mxu3  ;;  %v3499_v18 = vld [vmem:[#allocation2 + $0x5f8] sm:$0xf0]  ;;  %v4224_v63 = vld [vmem:[#allocation2 + $0x48c] sm:$0xf]  ;;  %v4350_v35 = vld [vmem:[#allocation5 + $0x74] sm:$0xf0] }
  0xe2   :  { %v3723_v59 = vld [vmem:[#allocation2 + $0x7b8] sm:$0xf0]  ;;  %v4320_v5 = vld [vmem:[#allocation2 + $0x78c] sm:$0xf] }
  0xe3   :  { %1952 = vmatpush.bf16.msra.mxu0 %v2798_v25  ;;  %v3134_v25 = vor.u32 %v4176_v11, %v3131_v12  ;;  %v3451_v2 = vld [vmem:[#allocation2 + $0x598] sm:$0xf0]  ;;  %v4220_v8 = vld [vmem:[#allocation2 + $0x46c] sm:$0xf] }
  0xe4   :  { %1965 = vmatpush.bf16.msra.mxu1 %v2926_v26  ;;  %1978 = vmatpush.bf16.msra.mxu2 %v3054_v27  ;;  %v3374_v26 = vor.u32 %v4236_v14, %v3371_v15  ;;  %v3502_v27 = vor.u32 %v4268_v16, %v3499_v18  ;;  %v4252_v10 = vld [vmem:[#allocation2 + $0x56c] sm:$0xf]  ;;  %v3435_v13 = vld [vmem:[#allocation2 + $0x578] sm:$0xf0] }
  0xe5   :  { %1991 = vmatpush.bf16.msra.mxu3 %v3182_v36  ;;  %v3758_v36 = vor.u32 %v4332_v23, %v3755_v24  ;;  %v4284_v14 = vld [vmem:[#allocation2 + $0x66c] sm:$0xf]  ;;  %v3563_v15 = vld [vmem:[#allocation2 + $0x678] sm:$0xf0]  ;;  %v3438_v19 = vor.u32 %v4252_v10, %v3435_v13 }
  0xe6   :  { %v4316_v16 = vld [vmem:[#allocation2 + $0x76c] sm:$0xf]  ;;  %v3566_v20 = vor.u32 %v4284_v14, %v3563_v15  ;;  %v3675_v31 = vld [vmem:[#allocation2 + $0x758] sm:$0xf0] }
  0xe7   :  { %1953 = vmatpush.bf16.msra.mxu0 %v2782_v49  ;;  %v3614_v49 = vor.u32 %v4296_v43, %v3611_v44  ;;  %v4248_v23 = vld [vmem:[#allocation2 + $0x54c] sm:$0xf]  ;;  %v3275_v46 = vld [vmem:[#allocation2 + $0x438] sm:$0xf0] }
  0xe8   :  { %1966 = vmatpush.bf16.msra.mxu1 %v2910_v52  ;;  %1979 = vmatpush.bf16.msra.mxu2 %v3038_v53  ;;  %v3339_v52 = vld [vmem:[#allocation2 + $0x4b8] sm:$0xf0]  ;;  %v4260_v53 = vld [vmem:[#allocation2 + $0x5ac] sm:$0xf] }
  0xe9   :  { %1992 = vmatpush.bf16.msra.mxu3 %v3166_v58  ;;  %v4324_v58 = vld [vmem:[#allocation2 + $0x7ac] sm:$0xf]  ;;  %v3342_v60 = vor.u32 %v4228_v51, %v3339_v52  ;;  %v3470_v61 = vor.u32 %v4260_v53, %v3467_v55  ;;  %v3403_v51 = vld [vmem:[#allocation2 + $0x538] sm:$0xf0] }
  0xea   :  { %v3726_v1 = vor.u32 %v4324_v58, %v3723_v59  ;;  %v4312_v30 = vld [vmem:[#allocation2 + $0x74c] sm:$0xf]  ;;  %v3531_v53 = vld [vmem:[#allocation2 + $0x638] sm:$0xf0] }
  0xeb   :  { %1954 = vmatpush.bf16.msra.mxu0 %v2766_v0  ;;  %v3323_v0 = vld [vmem:[#allocation2 + $0x498] sm:$0xf0]  ;;  %v4212_v45 = vld [vmem:[#allocation2 + $0x42c] sm:$0xf] }
  0xec   :  { %1967 = vmatpush.bf16.msra.mxu1 %v2894_v3  ;;  %1980 = vmatpush.bf16.msra.mxu2 %v3022_v4  ;;  %v4288_v3 = vld [vmem:[#allocation2 + $0x68c] sm:$0xf]  ;;  %v3579_v4 = vld [vmem:[#allocation2 + $0x698] sm:$0xf0]  ;;  %v3278_v57 = vor.u32 %v4212_v45, %v3275_v46  ;;  %v3785_v45 = vld [vmem:[#allocation5 + $0x30] sm:$0xf] }
  0xed   :  { %1993 = vmatpush.bf16.msra.mxu3 %v3150_v9  ;;  %v3582_v7 = vor.u32 %v4288_v3, %v3579_v4  ;;  %v3307_v9 = vld [vmem:[#allocation2 + $0x478] sm:$0xf0]  ;;  %v4276_v52 = vld [vmem:[#allocation2 + $0x62c] sm:$0xf]  ;;  %v3849_v46 = vld [vmem:[#allocation5 + $0xb0] sm:$0xf] }
  0xee   :  { %v3310_v18 = vor.u32 %v4220_v8, %v3307_v9  ;;  %v3659_v55 = vld [vmem:[#allocation2 + $0x738] sm:$0xf0]  ;;  %v4208_v58 = vld [vmem:[#allocation2 + $0x40c] sm:$0xf]  ;;  %v4366_v8 = vld [vmem:[#allocation5 + $0xf4] sm:$0xf0] }
  0xef   :  { %1955 = vmatpush.bf16.msra.mxu0 %v2750_v17  ;;  %v4613_v6 = vpop.f32.mrf.mxu0  ;;  %v3691_v17 = vld [vmem:[#allocation2 + $0x778] sm:$0xf0]  ;;  %v4304_v3 = vld [vmem:[#allocation2 + $0x70c] sm:$0xf] }
  0xf0   :  { %1968 = vmatpush.bf16.msra.mxu1 %v2878_v21  ;;  %1981 = vmatpush.bf16.msra.mxu2 %v3006_v22  ;;  %v4216_v21 = vld [vmem:[#allocation2 + $0x44c] sm:$0xf]  ;;  %v3291_v22 = vld [vmem:[#allocation2 + $0x458] sm:$0xf0] }
  0xf1   :  { %1994 = vmatpush.bf16.msra.mxu3 %v3134_v25  ;;  %v3694_v25 = vor.u32 %v4316_v16, %v3691_v17  ;;  %v3809_v16 = vld [vmem:[#allocation5 + $0x60] sm:$0xf]  ;;  %v4348_v17 = vld [vmem:[#allocation5 + $0x64] sm:$0xf0] }
  0xf2   :  { %1956 = vmatmul.bf16.vlgmr.msra.gmra.mxu0 %v4560_v34  ;;  %v3707_v34 = vld [vmem:[#allocation2 + $0x798] sm:$0xf0]  ;;  %v4615_v11 = vpop.f32.mrf.mxu1 }
  0xf3   :  { %2000 = vmatpush.bf16.msrb.mxu0 %v3374_v26  ;;  %1982 = vmatmul.bf16.vlgmr.msra.gmra.mxu2 %v4558_v33  ;;  %v4256_v33 = vld [vmem:[#allocation2 + $0x58c] sm:$0xf]  ;;  %v3710_v12 = vor.u32 %v4320_v5, %v3707_v34  ;;  %v3419_v26 = vld [vmem:[#allocation2 + $0x558] sm:$0xf0]  ;;  %v3817_v34 = vld [vmem:[#allocation5 + $0x70] sm:$0xf] }
  0xf4   :  { %2013 = vmatpush.bf16.msrb.mxu1 %v3502_v27  ;;  %2026 = vmatpush.bf16.msrb.mxu2 %v3630_v28  ;;  %v4280_v27 = vld [vmem:[#allocation2 + $0x64c] sm:$0xf]  ;;  %v3547_v28 = vld [vmem:[#allocation2 + $0x658] sm:$0xf0]  ;;  %v3422_v43 = vor.u32 %v4248_v23, %v3419_v26  ;;  %v3818_v13 = vor.u32 %v4350_v35, %v3817_v34  ;;  %v4346_v23 = vld [vmem:[#allocation5 + $0x54] sm:$0xf0] }
  0xf5   :  { %2039 = vmatpush.bf16.msrb.mxu3 %v3758_v36  ;;  %1969 = vmatmul.bf16.vlgmr.msra.gmra.mxu1 %v4564_v42  ;;  %v3454_v42 = vor.u32 %v4256_v33, %v3451_v2  ;;  %v3294_v36 = vor.u32 %v4216_v21, %v3291_v22  ;;  %v3550_v44 = vor.u32 %v4280_v27, %v3547_v28  ;;  %v3515_v2 = vld [vmem:[#allocation2 + $0x618] sm:$0xf0]  ;;  %v3801_v22 = vld [vmem:[#allocation5 + $0x50] sm:$0xf] }
  0xf6   :  { %1995 = vmatmul.bf16.vlgmr.msra.gmra.mxu3 %v4562_v41  ;;  %v3326_v41 = vor.u32 %v4224_v63, %v3323_v0  ;;  %v4617_v24 = vpop.f32.mrf.mxu2  ;;  %v3387_v63 = vld [vmem:[#allocation2 + $0x518] sm:$0xf0]  ;;  %v3802_v26 = vor.u32 %v4346_v23, %v3801_v22  ;;  %v3833_v34 = vld [vmem:[#allocation5 + $0x90] sm:$0xf]  ;;  %v4365_v22 = vld [vmem:[#allocation5 + $0xf4] sm:$0xf] }
  0xf7   :  { %2001 = vmatpush.bf16.msrb.mxu0 %v3358_v47  ;;  %v1751_v39 = vpop.f32.mrf.mxu0  ;;  %v4244_v47 = vld [vmem:[#allocation2 + $0x52c] sm:$0xf]  ;;  %v3643_v5 = vld [vmem:[#allocation2 + $0x718] sm:$0xf0] }
  0xf8   :  { %2014 = vmatpush.bf16.msrb.mxu1 %v3486_v48  ;;  %2027 = vmatpush.bf16.msrb.mxu2 %v3614_v49  ;;  %v3678_v49 = vor.u32 %v4312_v30, %v3675_v31  ;;  %v3406_v59 = vor.u32 %v4244_v47, %v3403_v51  ;;  %v4344_v30 = vld [vmem:[#allocation5 + $0x44] sm:$0xf0]  ;;  %v3857_v31 = vld [vmem:[#allocation5 + $0xc0] sm:$0xf]  ;;  %v4382_v39 = vld [vmem:[#allocation5 + $0x174] sm:$0xf0] }
  0xf9   :  { %2040 = vmatpush.bf16.msrb.mxu3 %v3742_v54  ;;  %v4619_v29 = vpop.f32.mrf.mxu3  ;;  %v4308_v54 = vld [vmem:[#allocation2 + $0x72c] sm:$0xf]  ;;  %v4380_v51 = vld [vmem:[#allocation5 + $0x164] sm:$0xf0]  ;;  %v3883_v23 = vld [vmem:[#allocation5 + $0xf8] sm:$0xf0] }
  0xfa   :  { %v1764_v48 = vpop.f32.mrf.mxu1  ;;  %v3662_v33 = vor.u32 %v4308_v54, %v3659_v55 }
  0xfb   :  { %2002 = vmatpush.bf16.msrb.mxu0 %v3342_v60  ;;  %v3534_v60 = vor.u32 %v4276_v52, %v3531_v53 }
  0xfc   :  { %2015 = vmatpush.bf16.msrb.mxu1 %v3470_v61  ;;  %2028 = vmatpush.bf16.msrb.mxu2 %v3598_v62  ;;  %v3259_v61 = vld [vmem:[#allocation2 + $0x418] sm:$0xf0]  ;;  %v4240_v62 = vld [vmem:[#allocation2 + $0x50c] sm:$0xf] }
  0xfd   :  { %2041 = vmatpush.bf16.msrb.mxu3 %v3726_v1  ;;  %v4272_v1 = vld [vmem:[#allocation2 + $0x60c] sm:$0xf]  ;;  %v3390_v9 = vor.u32 %v4240_v62, %v3387_v63  ;;  %v3929_v62 = vld [vmem:[#allocation5 + $0x150] sm:$0xf]  ;;  %v4378_v63 = vld [vmem:[#allocation5 + $0x154] sm:$0xf0] }
  0xfe   :  { %v1777_v0 = vpop.f32.mrf.mxu2  ;;  %v3518_v10 = vor.u32 %v4272_v1, %v3515_v2 }
  0xff   :  { %2003 = vmatpush.bf16.msrb.mxu0 %v3326_v41  ;;  %v1750_v41 = vadd.f32 %v4613_v6, %v349_v56  ;;  %v3810_v6 = vor.u32 %v4348_v17, %v3809_v16  ;;  %v3777_v56 = vld [vmem:[#allocation5 + $0x20] sm:$0xf]  ;;  %v3930_v0 = vor.u32 %v4378_v63, %v3929_v62  ;;  %v4352_v16 = vld [vmem:[#allocation5 + $0x84] sm:$0xf0]  ;;  %v4349_v17 = vld [vmem:[#allocation5 + $0x74] sm:$0xf] }
 0x100   :  { %2016 = vmatpush.bf16.msrb.mxu1 %v3454_v42  ;;  %2029 = vmatpush.bf16.msrb.mxu2 %v3582_v7  ;;  %v3262_v42 = vor.u32 %v4208_v58, %v3259_v61  ;;  %v3881_v7 = vld [vmem:[#allocation5 + $0xf0] sm:$0xf]  ;;  %v3841_v58 = vld [vmem:[#allocation5 + $0xa0] sm:$0xf]  ;;  %v4359_v62 = vld [vmem:[#allocation5 + $0xc4] sm:$0xf] }
 0x101   :  { %2042 = vmatpush.bf16.msrb.mxu3 %v3710_v12  ;;  %v1790_v4 = vpop.f32.mrf.mxu3  ;;  %v3646_v12 = vor.u32 %v4304_v3, %v3643_v5  ;;  %v3882_v14 = vor.u32 %v4366_v8, %v3881_v7  ;;  %v1763_v15 = vadd.f32 %v4615_v11, %v1750_v41  ;;  %v3865_v11 = vld [vmem:[#allocation5 + $0xd0] sm:$0xf]  ;;  %v4338_v5 = vld [vmem:[#allocation5 + $0x14] sm:$0xf0]  ;;  %v4376_v7 = vld [vmem:[#allocation5 + $0x144] sm:$0xf0] }
 0x102   :  { %v3769_v4 = vld [vmem:[#allocation5 + $0x10] sm:$0xf]  ;;  %v4354_v41 = vld [vmem:[#allocation5 + $0x94] sm:$0xf0]  ;;  %v3859_v63 = vld [vmem:[#allocation5 + $0xc8] sm:$0xf0] }
 0x103   :  { %2004 = vmatpush.bf16.msrb.mxu0 %v3310_v18  ;;  %v3873_v18 = vld [vmem:[#allocation5 + $0xe0] sm:$0xf]  ;;  %v1776_v21 = vadd.f32 %v4617_v24, %v1763_v15  ;;  %v4360_v24 = vld [vmem:[#allocation5 + $0xc4] sm:$0xf0] }
 0x104   :  { %2017 = vmatpush.bf16.msrb.mxu1 %v3438_v19  ;;  %2030 = vmatpush.bf16.msrb.mxu2 %v3566_v20  ;;  %v4364_v19 = vld [vmem:[#allocation5 + $0xe4] sm:$0xf0]  ;;  %v3825_v15 = vld [vmem:[#allocation5 + $0x80] sm:$0xf] }
 0x105   :  { %2043 = vmatpush.bf16.msrb.mxu3 %v3694_v25  ;;  %v3874_v20 = vor.u32 %v4364_v19, %v3873_v18  ;;  %v4362_v25 = vld [vmem:[#allocation5 + $0xd4] sm:$0xf0]  ;;  %v1789_v27 = vadd.f32 %v4619_v29, %v1776_v21  ;;  %v3819_v19 = vld [vmem:[#allocation5 + $0x78] sm:$0xf0] }
 0x106   :  { %v3866_v28 = vor.u32 %v4362_v25, %v3865_v11  ;;  %v4358_v29 = vld [vmem:[#allocation5 + $0xb4] sm:$0xf0] }
 0x107   :  { %2005 = vmatpush.bf16.msrb.mxu0 %v3294_v36  ;;  %v3945_v36 = vld [vmem:[#allocation5 + $0x170] sm:$0xf]  ;;  %v3850_v55 = vor.u32 %v4358_v29, %v3849_v46  ;;  %v4374_v21 = vld [vmem:[#allocation5 + $0x134] sm:$0xf0]  ;;  %v3803_v29 = vld [vmem:[#allocation5 + $0x58] sm:$0xf0] }
 0x108   :  { %2018 = vmatpush.bf16.msrb.mxu1 %v3422_v43  ;;  %2031 = vmatpush.bf16.msrb.mxu2 %v3550_v44  ;;  %v3946_v43 = vor.u32 %v4382_v39, %v3945_v36  ;;  %v3858_v44 = vor.u32 %v4360_v24, %v3857_v31  ;;  %v3886_v31 = vor.u32 %v4365_v22, %v3883_v23  ;;  %v3811_v24 = vld [vmem:[#allocation5 + $0x68] sm:$0xf0]  ;;  %v3905_v36 = vld [vmem:[#allocation5 + $0x120] sm:$0xf]  ;;  %v4372_v39 = vld [vmem:[#allocation5 + $0x124] sm:$0xf0] }
 0x109   :  { %2044 = vmatpush.bf16.msrb.mxu3 %v3678_v49  ;;  %v3937_v49 = vld [vmem:[#allocation5 + $0x160] sm:$0xf]  ;;  %v4370_v46 = vld [vmem:[#allocation5 + $0x114] sm:$0xf0]  ;;  %v3771_v22 = vld [vmem:[#allocation5 + $0x18] sm:$0xf0] }
 0x10a   :  { %v3938_v52 = vor.u32 %v4380_v51, %v3937_v49  ;;  %v4361_v49 = vld [vmem:[#allocation5 + $0xd4] sm:$0xf] }
 0x10b   :  { %2006 = vmatpush.bf16.msrb.mxu0 %v3278_v57  ;;  %v4340_v57 = vld [vmem:[#allocation5 + $0x24] sm:$0xf0]  ;;  %v4353_v23 = vld [vmem:[#allocation5 + $0x94] sm:$0xf] }
 0x10c   :  { %2019 = vmatpush.bf16.msrb.mxu1 %v3406_v59  ;;  %2032 = vmatpush.bf16.msrb.mxu2 %v3534_v60  ;;  %v4356_v60 = vld [vmem:[#allocation5 + $0xa4] sm:$0xf0] }
 0x10d   :  { %2045 = vmatpush.bf16.msrb.mxu3 %v3662_v33  ;;  %v3778_v33 = vor.u32 %v4340_v57, %v3777_v56  ;;  %v3842_v3 = vor.u32 %v4356_v60, %v3841_v58  ;;  %v3947_v56 = vld [vmem:[#allocation5 + $0x178] sm:$0xf0]  ;;  %v3795_v60 = vld [vmem:[#allocation5 + $0x48] sm:$0xf0] }
 0x10f   :  { %2007 = vmatpush.bf16.msrb.mxu0 %v3262_v42  ;;  %v3921_v42 = vld [vmem:[#allocation5 + $0x140] sm:$0xf] }
 0x110   :  { %2020 = vmatpush.bf16.msrb.mxu1 %v3390_v9  ;;  %2033 = vmatpush.bf16.msrb.mxu2 %v3518_v10  ;;  %v3922_v8 = vor.u32 %v4376_v7, %v3921_v42  ;;  %v3770_v10 = vor.u32 %v4338_v5, %v3769_v4  ;;  %v4357_v4 = vld [vmem:[#allocation5 + $0xb4] sm:$0xf]  ;;  %v3939_v42 = vld [vmem:[#allocation5 + $0x168] sm:$0xf0] }
 0x111   :  { %2046 = vmatpush.bf16.msrb.mxu3 %v3646_v12  ;;  %v3761_v12 = vld [vmem:[#allocation5] sm:$0xf] }
 0x112   :  { %2008 = vmatmul.bf16.vlgmr.msrb.gmra.mxu0 %v4575_v37  ;;  %v3793_v37 = vld [vmem:[#allocation5 + $0x40] sm:$0xf]  ;;  %v1814_v48 = vpop.f32.mrf.mxu1 }
 0x113   :  { %2450 = vmatpush.bf16.msra.mxu0 %v3818_v13  ;;  %2021 = vmatmul.bf16.vlgmr.msrb.gmra.mxu1 %v4579_v40  ;;  %v3794_v40 = vor.u32 %v4344_v30, %v3793_v37  ;;  %v4336_v13 = vld [vmem:[#allocation5 + $0x4] sm:$0xf0]  ;;  %v3822_v37 = vor.u32 %v4349_v17, %v3819_v19  ;;  %v4347_v30 = vld [vmem:[#allocation5 + $0x64] sm:$0xf]  ;;  %v3931_v17 = vld [vmem:[#allocation5 + $0x158] sm:$0xf0] }
 0x114   :  { %2463 = vmatpush.bf16.msra.mxu1 %v3882_v14  ;;  %2034 = vmatmul.bf16.vlgmr.msrb.gmra.mxu2 %v4573_v32  ;;  %v1801_v32 = vpop.f32.mrf.mxu0  ;;  %v3834_v14 = vor.u32 %v4354_v41, %v3833_v34  ;;  %v3851_v34 = vld [vmem:[#allocation5 + $0xb8] sm:$0xf0]  ;;  %v4379_v41 = vld [vmem:[#allocation5 + $0x164] sm:$0xf] }
 0x115   :  { %2047 = vmatmul.bf16.vlgmr.msrb.gmra.mxu3 %v4577_v38  ;;  %v4342_v38 = vld [vmem:[#allocation5 + $0x34] sm:$0xf0]  ;;  %v1802_v47 = vadd.f32 %v1801_v32, %v1789_v27  ;;  %2476 = vmatpush.bf16.msra.mxu2 %v3946_v43  ;;  %v2052_v27 = vmax.f32 %v4607_v50, 0.0  ;;  %v4363_v43 = vld [vmem:[#allocation5 + $0xe4] sm:$0xf]  ;;  %v3906_v32 = vor.u32 %v4372_v39, %v3905_v36  ;;  %v3814_v50 = vor.u32 %v4347_v30, %v3811_v24 }
 0x116   :  { %v3786_v53 = vor.u32 %v4342_v38, %v3785_v45  ;;  %v1827_v59 = vpop.f32.mrf.mxu2  ;;  %v3897_v38 = vld [vmem:[#allocation5 + $0x110] sm:$0xf]  ;;  %v3942_v7 = vor.u32 %v4379_v41, %v3939_v42  ;;  %v4335_v36 = vld [vmem:[#allocation5 + $0x4] sm:$0xf] }
 0x117   :  { %2451 = vmatpush.bf16.msra.mxu0 %v3810_v6  ;;  %v1815_v54 = vadd.f32 %v1814_v48, %v1802_v47  ;;  %v4633_v45 = vpack.c.bf16 %v2052_v27, %v2052_v27  ;;  %v4345_v48 = vld [vmem:[#allocation5 + $0x54] sm:$0xf]  ;;  %v3898_v51 = vor.u32 %v4370_v46, %v3897_v38  ;;  %v4375_v27 = vld [vmem:[#allocation5 + $0x144] sm:$0xf]  ;;  %v3827_v38 = vld [vmem:[#allocation5 + $0x88] sm:$0xf0] }
 0x118   :  { %2464 = vmatpush.bf16.msra.mxu1 %v3874_v20  ;;  %v3913_v20 = vld [vmem:[#allocation5 + $0x130] sm:$0xf]  ;;  %v3806_v57 = vor.u32 %v4345_v48, %v3803_v29  ;;  %v4371_v29 = vld [vmem:[#allocation5 + $0x124] sm:$0xf] }
 0x119   :  { %2477 = vmatpush.bf16.msra.mxu2 %v3938_v52  ;;  %v1840_v61 = vpop.f32.mrf.mxu3  ;;  %v1828_v1 = vadd.f32 %v1827_v59, %v1815_v54  ;;  %v3914_v11 = vor.u32 %v4374_v21, %v3913_v20  ;;  %v3867_v52 = vld [vmem:[#allocation5 + $0xd8] sm:$0xf0]  ;;  %v4368_v54 = vld [vmem:[#allocation5 + $0x104] sm:$0xf0]  ;;  %v4343_v59 = vld [vmem:[#allocation5 + $0x44] sm:$0xf] }
 0x11a   :  { %v1816_v35 = vpop.f32.mrf.mxu1  ;;  %v3870_v58 = vor.u32 %v4361_v49, %v3867_v52  ;;  %v4337_v21 = vld [vmem:[#allocation5 + $0x14] sm:$0xf]  ;;  %v3907_v49 = vld [vmem:[#allocation5 + $0x128] sm:$0xf0] }
 0x11b   :  { %2452 = vmatpush.bf16.msra.mxu0 %v3802_v26  ;;  %v1841_v9 = vadd.f32 %v1840_v61, %v1828_v1  ;;  %v3762_v26 = vor.u32 %v4336_v13, %v3761_v12  ;;  %v3862_v1 = vor.u32 %v4359_v62, %v3859_v63  ;;  %v3779_v12 = vld [vmem:[#allocation5 + $0x28] sm:$0xf0]  ;;  %v4355_v13 = vld [vmem:[#allocation5 + $0xa4] sm:$0xf]  ;;  %v3774_v30 = vor.u32 %v4337_v21, %v3771_v22  ;;  %v4388_v21 = vld [vmem:[#allocation5 + $0x1a4] sm:$0xf0] }
 0x11c   :  { %2465 = vmatpush.bf16.msra.mxu1 %v3866_v28  ;;  %v1803_v2 = vpop.f32.mrf.mxu0  ;;  %v3826_v28 = vor.u32 %v4352_v16, %v3825_v15  ;;  %v4377_v16 = vld [vmem:[#allocation5 + $0x154] sm:$0xf]  ;;  %v4367_v62 = vld [vmem:[#allocation5 + $0x104] sm:$0xf]  ;;  %v3891_v63 = vld [vmem:[#allocation5 + $0x108] sm:$0xf0] }
 0x11d   :  { %2478 = vmatpush.bf16.msra.mxu2 %v3930_v0  ;;  %v2053_v25 = vmax.f32 %v1841_v9, 0.0  ;;  %v4341_v2 = vld [vmem:[#allocation5 + $0x34] sm:$0xf]  ;;  %v3854_v9 = vor.u32 %v4357_v4, %v3851_v34  ;;  %v3934_v19 = vor.u32 %v4377_v16, %v3931_v17  ;;  %v4394_v34 = vld [vmem:[#allocation5 + $0x1d4] sm:$0xf0] }
 0x11e   :  { %v1829_v18 = vpop.f32.mrf.mxu2 }
 0x11f   :  { %2453 = vmatpush.bf16.msra.mxu0 %v3794_v40  ;;  %v3875_v40 = vld [vmem:[#allocation5 + $0xe8] sm:$0xf0] }
 0x120   :  { %2466 = vmatpush.bf16.msra.mxu1 %v3858_v44  ;;  %v4631_v44 = vpack.c.bf16 %v2053_v25, %v2053_v25  ;;  %v3878_v47 = vor.u32 %v4363_v43, %v3875_v40  ;;  %v3835_v25 = vld [vmem:[#allocation5 + $0x98] sm:$0xf0]  ;;  %v3763_v43 = vld [vmem:[#allocation5 + $0x8] sm:$0xf0]  ;;  %v4373_v40 = vld [vmem:[#allocation5 + $0x134] sm:$0xf] }
 0x121   :  { %2479 = vmatpush.bf16.msra.mxu2 %v3922_v8  ;;  %v1842_v6 = vpop.f32.mrf.mxu3  ;;  %v3838_v39 = vor.u32 %v4353_v23, %v3835_v25 }
 0x123   :  { %2454 = vmatpush.bf16.msra.mxu0 %v3786_v53  ;;  %v3889_v53 = vld [vmem:[#allocation5 + $0x100] sm:$0xf] }
 0x124   :  { %2467 = vmatpush.bf16.msra.mxu1 %v3850_v55  ;;  %v4381_v55 = vld [vmem:[#allocation5 + $0x174] sm:$0xf]  ;;  %v3890_v61 = vor.u32 %v4368_v54, %v3889_v53  ;;  %v3766_v53 = vor.u32 %v4335_v36, %v3763_v43  ;;  %v4398_v54 = vld [vmem:[#allocation5 + $0x1f4] sm:$0xf0] }
 0x125   :  { %2480 = vmatpush.bf16.msra.mxu2 %v3914_v11  ;;  %v3950_v0 = vor.u32 %v4381_v55, %v3947_v56  ;;  %v4397_v36 = vld [vmem:[#allocation5 + $0x1f4] sm:$0xf] }
 0x127   :  { %2455 = vmatpush.bf16.msra.mxu0 %v3778_v33  ;;  %v3798_v33 = vor.u32 %v4343_v59, %v3795_v60  ;;  %v3899_v59 = vld [vmem:[#allocation5 + $0x118] sm:$0xf0] }
 0x128   :  { %2468 = vmatpush.bf16.msra.mxu1 %v3842_v3  ;;  %v3787_v3 = vld [vmem:[#allocation5 + $0x38] sm:$0xf0] }
 0x129   :  { %2481 = vmatpush.bf16.msra.mxu2 %v3906_v32  ;;  %v3790_v8 = vor.u32 %v4341_v2, %v3787_v3  ;;  %v3915_v32 = vld [vmem:[#allocation5 + $0x138] sm:$0xf0]  ;;  %v4001_v2 = vld [vmem:[#allocation5 + $0x1e0] sm:$0xf]  ;;  %v4396_v3 = vld [vmem:[#allocation5 + $0x1e4] sm:$0xf0] }
 0x12a   :  { %v4002_v4 = vor.u32 %v4396_v3, %v4001_v2  ;;  %v3963_v2 = vld [vmem:[#allocation5 + $0x198] sm:$0xf0] }
 0x12b   :  { %2456 = vmatpush.bf16.msra.mxu0 %v3770_v10  ;;  %v4339_v10 = vld [vmem:[#allocation5 + $0x24] sm:$0xf] }
 0x12c   :  { %2469 = vmatpush.bf16.msra.mxu1 %v3834_v14  ;;  %v3843_v14 = vld [vmem:[#allocation5 + $0xa8] sm:$0xf0]  ;;  %v3782_v6 = vor.u32 %v4339_v10, %v3779_v12 }
 0x12d   :  { %2482 = vmatpush.bf16.msra.mxu2 %v3898_v51  ;;  %v3846_v20 = vor.u32 %v4355_v13, %v3843_v14  ;;  %v4009_v51 = vld [vmem:[#allocation5 + $0x1f0] sm:$0xf] }
 0x12e   :  { %v4010_v56 = vor.u32 %v4398_v54, %v4009_v51  ;;  %v3977_v14 = vld [vmem:[#allocation5 + $0x1b0] sm:$0xf] }
 0x12f   :  { %2457 = vmatpush.bf16.msra.mxu0 %v3762_v26  ;;  %v1853_v5 = vpop.f32.mrf.mxu0 }
 0x130   :  { %2470 = vmatpush.bf16.msra.mxu1 %v3826_v28  ;;  %v3923_v28 = vld [vmem:[#allocation5 + $0x148] sm:$0xf0]  ;;  %2489 = vmatpush.bf16.msra.mxu3 %v4010_v56 }
 0x131   :  { %2483 = vmatpush.bf16.msra.mxu2 %v3890_v61 }
 0x132   :  { %2458 = vmatmul.bf16.vlgmr.msra.gmra.mxu0 %v4633_v45  ;;  %v4637_v35 = vpop.f32.mrf.mxu1 }
 0x133   :  { %2502 = vmatpush.bf16.msrb.mxu0 %v3822_v37  ;;  %2471 = vmatmul.bf16.vlgmr.msra.gmra.mxu1 %v4631_v44  ;;  %v3926_v37 = vor.u32 %v4375_v27, %v3923_v28  ;;  %v4386_v27 = vld [vmem:[#allocation5 + $0x194] sm:$0xf0] }
 0x134   :  { %2515 = vmatpush.bf16.msrb.mxu1 %v3886_v31  ;;  %v4642_v31 = vld [vmem:[%s4708_s2] sm:$0xf]  ;;  %2490 = vmatpush.bf16.msra.mxu3 %v4002_v4 }
 0x135   :  { %2528 = vmatpush.bf16.msrb.mxu2 %v3950_v0  ;;  %v350_v24 = vperm.slane %v4642_v31, 2 }
 0x136   :  { %v1879_v15 = vpop.f32.mrf.mxu2 }
 0x137   :  { %2503 = vmatpush.bf16.msrb.mxu0 %v3814_v50  ;;  %v1855_v11 = vpop.f32.mrf.mxu0  ;;  %v4351_v50 = vld [vmem:[#allocation5 + $0x84] sm:$0xf]  ;;  %v1854_v52 = vadd.f32 %v1853_v5, %v350_v24  ;;  %v3993_v5 = vld [vmem:[#allocation5 + $0x1d0] sm:$0xf] }
 0x138   :  { %2516 = vmatpush.bf16.msrb.mxu1 %v3878_v47  ;;  %v3918_v47 = vor.u32 %v4373_v40, %v3915_v32  ;;  %v3830_v55 = vor.u32 %v4351_v50, %v3827_v38  ;;  %v4395_v40 = vld [vmem:[#allocation5 + $0x1e4] sm:$0xf]  ;;  %v4003_v32 = vld [vmem:[#allocation5 + $0x1e8] sm:$0xf0] }
 0x139   :  { %2529 = vmatpush.bf16.msrb.mxu2 %v3942_v7  ;;  %v1892_v18 = vpop.f32.mrf.mxu3  ;;  %v1867_v60 = vadd.f32 %v4637_v35, %v1854_v52  ;;  %v3994_v7 = vor.u32 %v4394_v34, %v3993_v5  ;;  %v4006_v38 = vor.u32 %v4395_v40, %v4003_v32  ;;  %v4391_v52 = vld [vmem:[#allocation5 + $0x1c4] sm:$0xf]  ;;  %v3955_v34 = vld [vmem:[#allocation5 + $0x188] sm:$0xf0]  ;;  %v4414_v40 = vld [vmem:[%s4711_s5 + $0x78] sm:$0xff] }
 0x13a   :  { %v1868_v26 = vpop.f32.mrf.mxu1  ;;  %v4383_v5 = vld [vmem:[#allocation5 + $0x184] sm:$0xf]  ;;  %v4405_v32 = vld [vmem:[%s4711_s5 + $0x30] sm:$0xff] }
 0x13b   :  { %2504 = vmatpush.bf16.msrb.mxu0 %v3806_v57  ;;  %v3910_v57 = vor.u32 %v4371_v29, %v3907_v49  ;;  %v1880_v0 = vadd.f32 %v1879_v15, %v1867_v60  ;;  %2491 = vmatpush.bf16.msra.mxu3 %v3994_v7  ;;  %v4390_v15 = vld [vmem:[#allocation5 + $0x1b4] sm:$0xf0]  ;;  %v3961_v26 = vld [vmem:[#allocation5 + $0x190] sm:$0xf] }
 0x13c   :  { %2517 = vmatpush.bf16.msrb.mxu1 %v3870_v58  ;;  %v4369_v58 = vld [vmem:[#allocation5 + $0x114] sm:$0xf]  ;;  %v3962_v28 = vor.u32 %v4386_v27, %v3961_v26 }
 0x13d   :  { %2530 = vmatpush.bf16.msrb.mxu2 %v3934_v19  ;;  %v3902_v61 = vor.u32 %v4369_v58, %v3899_v59  ;;  %v3978_v19 = vor.u32 %v4390_v15, %v3977_v14  ;;  %v3979_v58 = vld [vmem:[#allocation5 + $0x1b8] sm:$0xf0]  ;;  %v351_v59 = vperm.slane %v4642_v31, 3 }
 0x13e   :  { %v1881_v46 = vpop.f32.mrf.mxu2 }
 0x13f   :  { %2505 = vmatpush.bf16.msrb.mxu0 %v3798_v33  ;;  %v3894_v33 = vor.u32 %v4367_v62, %v3891_v63  ;;  %v3971_v62 = vld [vmem:[#allocation5 + $0x1a8] sm:$0xf0] }
 0x140   :  { %2518 = vmatpush.bf16.msrb.mxu1 %v3862_v1  ;;  %v1893_v1 = vadd.f32 %v1892_v18, %v1880_v0 }
 0x141   :  { %2531 = vmatpush.bf16.msrb.mxu2 %v3926_v37  ;;  %v1894_v48 = vpop.f32.mrf.mxu3  ;;  %v3953_v37 = vld [vmem:[#allocation5 + $0x180] sm:$0xf] }
 0x142   :  { %v3995_v48 = vld [vmem:[#allocation5 + $0x1d8] sm:$0xf0] }
 0x143   :  { %2506 = vmatpush.bf16.msrb.mxu0 %v3790_v8  ;;  %v3985_v8 = vld [vmem:[#allocation5 + $0x1c0] sm:$0xf] }
 0x144   :  { %2519 = vmatpush.bf16.msrb.mxu1 %v3854_v9  ;;  %v4392_v9 = vld [vmem:[#allocation5 + $0x1c4] sm:$0xf0] }
 0x145   :  { %2532 = vmatpush.bf16.msrb.mxu2 %v3918_v47  ;;  %v4393_v47 = vld [vmem:[#allocation5 + $0x1d4] sm:$0xf] }
 0x146   :  { %v3998_v29 = vor.u32 %v4393_v47, %v3995_v48  ;;  %v4403_v47 = vld [vmem:[%s4711_s5 + $0x20] sm:$0xff]  ;;  %v4402_v48 = vld [vmem:[%s4711_s5 + $0x18] sm:$0xff] }
 0x147   :  { %2507 = vmatpush.bf16.msrb.mxu0 %v3782_v6 }
 0x148   :  { %2520 = vmatpush.bf16.msrb.mxu1 %v3846_v20  ;;  %v3969_v20 = vld [vmem:[#allocation5 + $0x1a0] sm:$0xf] }
 0x149   :  { %2533 = vmatpush.bf16.msrb.mxu2 %v3910_v57  ;;  %v3970_v11 = vor.u32 %v4388_v21, %v3969_v20  ;;  %v4389_v57 = vld [vmem:[#allocation5 + $0x1b4] sm:$0xf] }
 0x14a   :  { %v3982_v60 = vor.u32 %v4389_v57, %v3979_v58  ;;  %v4410_v57 = vld [vmem:[%s4711_s5 + $0x58] sm:$0xff]  ;;  %v4409_v58 = vld [vmem:[%s4711_s5 + $0x50] sm:$0xff] }
 0x14b   :  { %2508 = vmatpush.bf16.msrb.mxu0 %v3774_v30  ;;  %v4384_v30 = vld [vmem:[#allocation5 + $0x184] sm:$0xf0] }
 0x14c   :  { %2521 = vmatpush.bf16.msrb.mxu1 %v3838_v39  ;;  %v3954_v24 = vor.u32 %v4384_v30, %v3953_v37  ;;  %v4011_v39 = vld [vmem:[#allocation5 + $0x1f8] sm:$0xf0] }
 0x14d   :  { %2534 = vmatpush.bf16.msrb.mxu2 %v3902_v61  ;;  %v4014_v43 = vor.u32 %v4397_v36, %v4011_v39  ;;  %v4387_v61 = vld [vmem:[#allocation5 + $0x1a4] sm:$0xf] }
 0x14f   :  { %2509 = vmatpush.bf16.msrb.mxu0 %v3766_v53  ;;  %v1905_v35 = vpop.f32.mrf.mxu0  ;;  %v3987_v53 = vld [vmem:[#allocation5 + $0x1c8] sm:$0xf0] }
 0x150   :  { %2522 = vmatpush.bf16.msrb.mxu1 %v3830_v55  ;;  %v1906_v41 = vadd.f32 %v1905_v35, %v1893_v1  ;;  %v3990_v55 = vor.u32 %v4391_v52, %v3987_v53  ;;  %v4385_v1 = vld [vmem:[#allocation5 + $0x194] sm:$0xf]  ;;  %v4400_v53 = vld [vmem:[%s4711_s5 + $0x8] sm:$0xff] }
 0x151   :  { %2535 = vmatpush.bf16.msrb.mxu2 %v3894_v33  ;;  %v3974_v33 = vor.u32 %v4387_v61, %v3971_v62  ;;  %v3966_v4 = vor.u32 %v4385_v1, %v3963_v2 }
 0x152   :  { %2510 = vmatmul.bf16.vlgmr.msrb.gmra.mxu0 %v4633_v45  ;;  %v1918_v42 = vpop.f32.mrf.mxu1 }
 0x153   :  { %2523 = vmatmul.bf16.vlgmr.msrb.gmra.mxu1 %v4631_v44  ;;  %v1919_v45 = vadd.f32 %v1918_v42, %v1906_v41  ;;  %v3986_v44 = vor.u32 %v4392_v9, %v3985_v8  ;;  %v3958_v41 = vor.u32 %v4383_v5, %v3955_v34 }
 0x154   :  { %2703 = vmatpush.bf16.msra.mxu1 %v4414_v40 }
 0x155   :  { %2492 = vmatpush.bf16.msra.mxu3 %v3986_v44 }
 0x156   :  { %v1931_v10 = vpop.f32.mrf.mxu2 }
 0x157   :  { %v1932_v12 = vadd.f32 %v1931_v10, %v1919_v45  ;;  %v1907_v17 = vpop.f32.mrf.mxu0 }
 0x159   :  { %v1944_v13 = vpop.f32.mrf.mxu3  ;;  %2493 = vmatpush.bf16.msra.mxu3 %v3978_v19 }
 0x15a   :  { %v1945_v16 = vadd.f32 %v1944_v13, %v1932_v12  ;;  %v1920_v18 = vpop.f32.mrf.mxu1 }
 0x15c   :  { %v2054_v6 = vmax.f32 %v1945_v16, 0.0 }
 0x15d   :  { %2494 = vmatpush.bf16.msra.mxu3 %v3970_v11 }
 0x15e   :  { %v2058_v22 = vpack.c.bf16 %v2054_v6, %v2054_v6  ;;  %v1933_v23 = vpop.f32.mrf.mxu2  ;;  %v2124_v6 = vld [vmem:[%s4710_s4] sm:$0x3] }
 0x15f   :  { %v2126_v20 = vperm.slane %v2124_v6, 0  ;;  %v2127_v27 = vperm.slane %v2124_v6, 1 }
 0x160   :  { %2484 = vmatmul.bf16.vlgmr.msra.gmra.mxu2 %v2058_v22 }
 0x161   :  { %v1946_v25 = vpop.f32.mrf.mxu3  ;;  %2495 = vmatpush.bf16.msra.mxu3 %v3962_v28 }
 0x165   :  { %2496 = vmatpush.bf16.msra.mxu3 %v3954_v24 }
 0x169   :  { %2541 = vmatpush.bf16.msrb.mxu3 %v4014_v43  ;;  %v4406_v43 = vld [vmem:[%s4711_s5 + $0x38] sm:$0xff] }
 0x16a   :  { %2690 = vmatpush.bf16.msra.mxu0 %v4406_v43 }
 0x16d   :  { %2542 = vmatpush.bf16.msrb.mxu3 %v4006_v38  ;;  %v4404_v38 = vld [vmem:[%s4711_s5 + $0x28] sm:$0xff] }
 0x16e   :  { %2691 = vmatpush.bf16.msra.mxu0 %v4405_v32 }
 0x16f   :  { %v1957_v50 = vpop.f32.mrf.mxu0 }
 0x170   :  { %2536 = vmatmul.bf16.vlgmr.msrb.gmra.mxu2 %v2058_v22  ;;  %v1958_v3 = vadd.f32 %v1957_v50, %v351_v59  ;;  %v4413_v50 = vld [vmem:[%s4711_s5 + $0x70] sm:$0xff]  ;;  %v4408_v59 = vld [vmem:[%s4711_s5 + $0x48] sm:$0xff] }
 0x171   :  { %2543 = vmatpush.bf16.msrb.mxu3 %v3998_v29  ;;  %2704 = vmatpush.bf16.msra.mxu1 %v4413_v50 }
 0x172   :  { %v1970_v46 = vpop.f32.mrf.mxu1  ;;  %2692 = vmatpush.bf16.msra.mxu0 %v4404_v38 }
 0x173   :  { %v1971_v35 = vadd.f32 %v1970_v46, %v1958_v3 }
 0x175   :  { %2544 = vmatpush.bf16.msrb.mxu3 %v3990_v55  ;;  %v4399_v55 = vld [vmem:[%s4711_s5] sm:$0xff] }
 0x176   :  { %v1983_v49 = vpop.f32.mrf.mxu2  ;;  %2693 = vmatpush.bf16.msra.mxu0 %v4403_v47 }
 0x177   :  { %v1959_v54 = vpop.f32.mrf.mxu0  ;;  %v1984_v42 = vadd.f32 %v1983_v49, %v1971_v35  ;;  %v4401_v49 = vld [vmem:[%s4711_s5 + $0x10] sm:$0xff] }
 0x178   :  { %v4412_v54 = vld [vmem:[%s4711_s5 + $0x68] sm:$0xff] }
 0x179   :  { %v1996_v51 = vpop.f32.mrf.mxu3  ;;  %2545 = vmatpush.bf16.msrb.mxu3 %v3982_v60  ;;  %2705 = vmatpush.bf16.msra.mxu1 %v4412_v54  ;;  %v4407_v60 = vld [vmem:[%s4711_s5 + $0x40] sm:$0xff] }
 0x17a   :  { %v1972_v56 = vpop.f32.mrf.mxu1  ;;  %v1997_v31 = vadd.f32 %v1996_v51, %v1984_v42  ;;  %2694 = vmatpush.bf16.msra.mxu0 %v4402_v48 }
 0x17b   :  { %v4411_v56 = vld [vmem:[%s4711_s5 + $0x60] sm:$0xff]  ;;  %s4508_s5 = smov [#allocation7]  }
 0x17c   :  { %s2722_s26 = sshll.u32 %s4508_s5, 4  ;;  %s2723_s26 = int_to_ptr.vmem [resolvable:$true] %s2722_s26 }
 0x17d   :  { %2546 = vmatpush.bf16.msrb.mxu3 %v3974_v33  ;;  %2706 = vmatpush.bf16.msra.mxu1 %v4411_v56 }
 0x17e   :  { %v1985_v63 = vpop.f32.mrf.mxu2  ;;  %2695 = vmatpush.bf16.msra.mxu0 %v4401_v49 }
 0x181   :  { %v1998_v0 = vpop.f32.mrf.mxu3  ;;  %2547 = vmatpush.bf16.msrb.mxu3 %v3966_v4  ;;  %2707 = vmatpush.bf16.msra.mxu1 %v4410_v57 }
 0x182   :  { %2696 = vmatpush.bf16.msra.mxu0 %v4400_v53 }
 0x185   :  { %2548 = vmatpush.bf16.msrb.mxu3 %v3958_v41  ;;  %2708 = vmatpush.bf16.msra.mxu1 %v4409_v58 }
 0x186   :  { %2697 = vmatpush.bf16.msra.mxu0 %v4399_v55 }
 0x189   :  { %2709 = vmatpush.bf16.msra.mxu1 %v4408_v59 }
 0x18d   :  { %2710 = vmatpush.bf16.msra.mxu1 %v4407_v60 }
 0x18f   :  { %v2009_v7 = vpop.f32.mrf.mxu0 }
 0x190   :  { %v2022_v45 = vpop.f32.mrf.mxu1  ;;  %v2010_v8 = vadd.f32 %v2009_v7, %v1997_v31  ;;  %v4422_v31 = vld [vmem:[%s4712_s6] ss:$0 sm:$0xff] }
 0x192   :  { %v2023_v9 = vadd.f32 %v2022_v45, %v2010_v8 }
 0x197   :  { %v2035_v10 = vpop.f32.mrf.mxu2  ;;  %v2011_v13 = vpop.f32.mrf.mxu0 }
 0x198   :  { %v2036_v44 = vadd.f32 %v2035_v10, %v2023_v9  ;;  %v2048_v12 = vpop.f32.mrf.mxu3  ;;  %v2024_v14 = vpop.f32.mrf.mxu1 }
 0x19a   :  { %v2049_v15 = vadd.f32 %v2048_v12, %v2036_v44 }
 0x19c   :  { %v2055_v16 = vmax.f32 %v2049_v15, 0.0 }
 0x19e   :  { %v2059_v17 = vpack.c.bf16 %v2055_v16, %v2055_v16 }
 0x19f   :  { %v2037_v18 = vpop.f32.mrf.mxu2 }
 0x1a0   :  { %v2050_v19 = vpop.f32.mrf.mxu3  ;;  %2497 = vmatmul.bf16.vlgmr.msra.gmra.mxu3 %v2059_v17 }
 0x1af   :  { %v2459_v21 = vpop.f32.mrf.mxu0 }
 0x1b0   :  { %v2460_v22 = vadd.f32 %v2459_v21, %v2126_v20  ;;  %v2472_v23 = vpop.f32.mrf.mxu1  ;;  %2549 = vmatmul.bf16.vlgmr.msrb.gmra.mxu3 %v2059_v17 }
 0x1b2   :  { %v2473_v11 = vadd.f32 %v2472_v23, %v2460_v22 }
 0x1b7   :  { %v2461_v25 = vpop.f32.mrf.mxu0 }
 0x1b8   :  { %v2474_v26 = vpop.f32.mrf.mxu1 }
 0x1cf   :  { %v2511_v28 = vpop.f32.mrf.mxu0 }
 0x1d0   :  { %v2512_v37 = vadd.f32 %v2511_v28, %v2127_v27  ;;  %v2524_v30 = vpop.f32.mrf.mxu1 }
 0x1d2   :  { %v2525_v24 = vadd.f32 %v2524_v30, %v2512_v37 }
 0x1d7   :  { %v2513_v36 = vpop.f32.mrf.mxu0 }
 0x1d8   :  { %v2526_v39 = vpop.f32.mrf.mxu1 }
 0x1e3   :  { %v2485_v46 = vpop.f32.mrf.mxu2 }
 0x1e4   :  { %v2486_v61 = vadd.f32 %v2485_v46, %v2473_v11 }
 0x1eb   :  { %v2487_v29 = vpop.f32.mrf.mxu2 }
 0x1f3   :  { %v2537_v51 = vpop.f32.mrf.mxu2 }
 0x1f4   :  { %v2538_v2 = vadd.f32 %v2537_v51, %v2525_v24 }
 0x1fb   :  { %v2539_v52 = vpop.f32.mrf.mxu2 }
 0x223   :  { %v2498_v62 = vpop.f32.mrf.mxu3 }
 0x224   :  { %v2499_v63 = vadd.f32 %v2498_v62, %v2486_v61 }
 0x226   :  { %v2554_v0 = vmax.f32 %v2499_v63, 0.0 }
 0x228   :  { %v2556_v33 = vpack.c.bf16 %v2554_v0, %v2554_v0 }
 0x22a   :  { %2698 = vmatmul.bf16.vlgmr.msra.gmra.mxu0 %v2556_v33 }
 0x22b   :  { %v2500_v1 = vpop.f32.mrf.mxu3 }
 0x233   :  { %v2550_v3 = vpop.f32.mrf.mxu3 }
 0x234   :  { %v2551_v4 = vadd.f32 %v2550_v3, %v2538_v2 }
 0x236   :  { %v2555_v5 = vmax.f32 %v2551_v4, 0.0 }
 0x238   :  { %v2557_v34 = vpack.c.bf16 %v2555_v5, %v2555_v5 }
 0x23a   :  { %2711 = vmatmul.bf16.vlgmr.msra.gmra.mxu1 %v2557_v34 }
 0x23b   :  { %v2552_v35 = vpop.f32.mrf.mxu3 }
 0x2a7   :  { %v2699_v41 = vpop.f32.mrf.mxu0 }
 0x2a8   :  { %v2700_v7 = vadd.f32 %v4422_v31, %v2699_v41 }
 0x2af   :  { %v2701_v42 = vpop.f32.mrf.mxu0 }
 0x2b7   :  { %v2712_v45 = vpop.f32.mrf.mxu1 }
 0x2b8   :  { %v2713_v8 = vadd.f32 %v2712_v45, %v2700_v7 }
 0x2ba   :  { %2716 = vst [vmem:[#allocation7] sm:$0x3] %v2713_v8 }
 0x2bb   :  { %2727 = dma.vmem_to_hbm [thread:$0]  %s2723_s26, 32, %s2725_s29, [#allocation4]  }
 0x2bf   :  { %v2714_v9 = vpop.f32.mrf.mxu1 }
 0x2c0   :  { %4500 = dma.done.wait [#allocation4], 32  }
 0x2c1   :  { %4501 = vsyncadd [#allocation4], 4294967264 }
 0x2c2   :  { %2732 = vsyncpa [#allocation3], 1 }
 0x2c3   :  { %2733 = vsyncpa [#allocation6], 1 }
 0x2c4   :  { %2734 = vsyncpa [#allocation4], 1 }

</bundles_post_ra>
